<compile_context>
chip_gen: v7x
topology: tpu7x:2x2x1
jax: 0.10.0
libtpu: 0.0.40
codegen_flags: <defaults>
</compile_context>

<pallas_src>
import functools

import jax
import jax.numpy as jnp
import numpy as np
from jax import lax
from jax.experimental import pallas as pl
from jax.experimental.pallas import tpu as pltpu

_EPS = 1e-5  # torch.nn.LayerNorm default eps


def _layernorm(x, gamma, beta):
    mu = jnp.mean(x, axis=-1, keepdims=True)
    d = x - mu
    var = jnp.mean(d * d, axis=-1, keepdims=True)
    return d * lax.rsqrt(var + _EPS) * gamma + beta


def _qsablock_kernel(x_ref, wdw_ref, bdw_ref, g1_ref, b1_ref, qm_ref, hm3_ref,
                     wk_ref, wv_ref, wp_ref, bp_ref, g2_ref, b2_ref, o_ref,
                     *, num_heads):
    Bt, H, W, C = x_ref.shape
    N = H * W

    # ---- pos_embed1: depthwise 3x3 conv + bias, zero padding done in-kernel ----
    x32 = x_ref[...].astype(jnp.float32)               # single f32 copy (also the residual)
    taps = wdw_ref[...]                                 # (9, C) f32
    w_pos = lax.broadcasted_iota(jnp.int32, (W, 1), 0)  # (W, 1)
    zrow = jnp.zeros((Bt, 1, W, C), jnp.float32)

    conv = None
    for dw in range(3):
        if dw == 0:      # needs x[.., w-1, ..]; wrapped column 0 masked to zero
            xw = pltpu.roll(x32, 1, 2)
            wmask = (w_pos >= 1).astype(jnp.float32)
        elif dw == 1:
            xw, wmask = x32, None
        else:            # needs x[.., w+1, ..]; wrapped column W-1 masked to zero
            xw = pltpu.roll(x32, W - 1, 2)
            wmask = (w_pos <= W - 2).astype(jnp.float32)
        for dh in range(3):
            if dh == 0:      # x[.., h-1, ..] with zero top row (major-dim concat)
                xs = jnp.concatenate([zrow, xw[:, :H - 1]], axis=1)
            elif dh == 1:
                xs = xw
            else:            # x[.., h+1, ..] with zero bottom row
                xs = jnp.concatenate([xw[:, 1:], zrow], axis=1)
            tap = taps[3 * dh + dw][None, :]                  # (1, C)
            fac = tap if wmask is None else wmask * tap       # (1|W, C), mask folded in
            term = xs * fac
            conv = term if conv is None else conv + term
    x1 = x32 + conv + bdw_ref[...]                            # x + conv(x) + bias

    # ---- tokens + norm1 --------------------------------------------------------
    t = _layernorm(x1.reshape(Bt * N, C), g1_ref[...], b1_ref[...])
    t_bf = t.astype(jnp.bfloat16)

    # ---- K / V projections, batched over all Bt images (big MXU M dim) ---------
    k_all = jnp.dot(t_bf, wk_ref[...],
                    preferred_element_type=jnp.float32).astype(jnp.bfloat16)
    v_all = jnp.dot(t_bf, wv_ref[...],
                    preferred_element_type=jnp.float32).astype(jnp.bfloat16)

    # ---- attention: tiny per-image part ----------------------------------------
    qm = qm_ref[...]      # (3*nh, C) bf16, softmax scale + head mask pre-folded
    hm3 = hm3_ref[...]    # (3*nh, C) f32 head mask
    o_rows = []
    for b in range(Bt):
        k_b = k_all[b * N:(b + 1) * N, :]                     # aligned sublane slice
        v_b = v_all[b * N:(b + 1) * N, :]
        s = lax.dot_general(qm, k_b, (((1,), (1,)), ((), ())),
                            preferred_element_type=jnp.float32)   # (3*nh, N)
        s = s - jnp.max(s, axis=-1, keepdims=True)
        p = jnp.exp(s)
        p = p / jnp.sum(p, axis=-1, keepdims=True)            # exact softmax
        pv = jnp.dot(p.astype(jnp.bfloat16), v_b,
                     preferred_element_type=jnp.float32)       # (3*nh, C)
        pvm = pv * hm3
        for qi in range(3):   # keep each row's own head block and fold heads
            o_rows.append(jnp.sum(pvm[qi * num_heads:(qi + 1) * num_heads, :],
                                  axis=0, keepdims=True))
    o_all = jnp.concatenate(o_rows, axis=0)                    # (3*Bt, C)

    # ---- output projection + bias, then x1 + norm2(x1), batched over Bt --------
    y = jnp.dot(o_all.astype(jnp.bfloat16), wp_ref[...],
                preferred_element_type=jnp.float32) + bp_ref[...]   # (3*Bt, C)
    y = y + _layernorm(y, g2_ref[...], b2_ref[...])
    for b in range(Bt):
        o_ref[b, :, :] = y[3 * b:3 * (b + 1), :].astype(o_ref.dtype)


def _param_spec(shape, *, single_buffer):
    """BlockSpec for a parameter whose block index never changes."""
    index_map = lambda *_: (0,) * len(shape)
    if single_buffer:
        # Constant block -> a single VMEM buffer suffices; double-buffering it
        # would only waste VMEM (matters most on v7x's 64 MiB).
        return pl.BlockSpec(shape, index_map, pipeline_mode=pl.Buffered(1))
    return pl.BlockSpec(shape, index_map)


def _pick_block_b(B, max_bt=8):
    """Largest divisor of B that is <= max_bt while keeping >= 2 grid steps
    (feeds both TensorCores on v7x); falls back to B if impossible."""
    best = None
    for bt in range(1, min(B, max_bt) + 1):
        if B % bt == 0 and B // bt >= 2:
            best = bt
    return best if best is not None else B


def query_sablock(x_nchw, wdw, bdw, g1, b1, q_param, wk_t, wv_t, wp_t, bp,
                  g2, b2, *, num_heads, block_b=None):
    """query_SABlock.forward.

    x_nchw: (B, C, H, W).  Linear weights are passed pre-transposed as
    (C_in, C_out).  wdw: (3, 3, C) depthwise conv taps (torch pos_embed1.weight
    (C, 1, 3, 3) permuted to (kh, kw, C))."""
    B, C, H, W = x_nchw.shape
    assert C % num_heads == 0
    hd = C // num_heads
    scale = hd ** (-0.5)
    if block_b is None:
        block_b = _pick_block_b(B)
    assert B % block_b == 0

    # NHWC (channels -> lanes), bf16, UNPADDED: padding is realized in-kernel, so
    # no padded copy of x goes through HBM.
    x_nhwc = jnp.transpose(x_nchw, (0, 2, 3, 1)).astype(jnp.bfloat16)

    # Hoisted attention constants (computed once in the wrapper, resident in VMEM):
    head_of_col = jnp.arange(C, dtype=jnp.int32) // hd
    hmask = (head_of_col[None, :] ==
             jnp.arange(num_heads, dtype=jnp.int32)[:, None]).astype(jnp.float32)
    hm3 = jnp.tile(hmask, (3, 1))                                    # (3*nh, C)
    qm = ((q_param.astype(jnp.float32) * scale)[:, None, :] * hmask[None]
          ).reshape(3 * num_heads, C).astype(jnp.bfloat16)           # (3*nh, C)

    wk_bf = wk_t.astype(jnp.bfloat16)
    wv_bf = wv_t.astype(jnp.bfloat16)
    wp_bf = wp_t.astype(jnp.bfloat16)
    wdw9 = wdw.reshape(9, C).astype(jnp.float32)
    row = lambda a: a.reshape(1, C).astype(jnp.float32)
    bdw_r, g1_r, b1_r, bp_r, g2_r, b2_r = (row(a) for a in (bdw, g1, b1, bp, g2, b2))

    kernel = functools.partial(_qsablock_kernel, num_heads=num_heads)
    operands = (x_nhwc, wdw9, bdw_r, g1_r, b1_r, qm, hm3,
                wk_bf, wv_bf, wp_bf, bp_r, g2_r, b2_r)

    # TODO(synk): for large H*W (or the 64 MiB VMEM of v7x) add an N-tile grid axis
    # with online-softmax accumulation; for production C < 128 consider packing
    # tokens so the lane dim is >= 128; on v7x the bf16 weights could be stored as
    # fp8 (with a scale) to halve their VMEM footprint.
    def build_and_run(single_buffer_params):
        pspec = functools.partial(_param_spec, single_buffer=single_buffer_params)
        grid_spec = pltpu.PrefetchScalarGridSpec(
            num_scalar_prefetch=0,
            grid=(B // block_b,),
            in_specs=[
                pl.BlockSpec((block_b, H, W, C), lambda b: (b, 0, 0, 0)),  # x (bf16)
                pspec((9, C)),                 # depthwise conv taps
                pspec((1, C)),                 # conv bias
                pspec((1, C)),                 # norm1 gamma
                pspec((1, C)),                 # norm1 beta
                pspec((3 * num_heads, C)),     # pre-masked/pre-scaled queries (bf16)
                pspec((3 * num_heads, C)),     # head mask (f32)
                pspec((C, C)),                 # Wk^T (bf16)
                pspec((C, C)),                 # Wv^T (bf16)
                pspec((C, C)),                 # Wproj^T (bf16)
                pspec((1, C)),                 # proj bias
                pspec((1, C)),                 # norm2 gamma
                pspec((1, C)),                 # norm2 beta
            ],
            out_specs=pl.BlockSpec((block_b, 3, C), lambda b: (b, 0, 0)),
        )
        return pl.pallas_call(
            kernel,
            out_shape=jax.ShapeDtypeStruct((B, 3, C), x_nchw.dtype),
            grid_spec=grid_spec,
            # vmem_limit_bytes deliberately left at the default: the per-step
            # footprint is tiny here, and forcing 64 MiB would leave no headroom
            # on v7x (64 MiB physical per TensorCore).
            compiler_params=pltpu.CompilerParams(
                dimension_semantics=("parallel",)),
        )(*operands)

    try:
        # Constant parameter blocks single-buffered (pl.Buffered(1)).
        return build_and_run(True)
    except Exception:
        # Older jax without BlockSpec.pipeline_mode support: plain (double-buffered)
        # parameter blocks.  A genuine kernel error re-raises from this call.
        return build_and_run(False)


def _reference(x_nchw, wdw, bdw, g1, b1, q_param, wk_t, wv_t, wp_t, bp, g2, b2,
               *, num_heads):
    B, C, H, W = x_nchw.shape
    N = H * W
    hd = C // num_heads
    scale = hd ** (-0.5)
    x_nhwc = jnp.transpose(x_nchw, (0, 2, 3, 1))
    xpad = jnp.pad(x_nhwc, ((0, 0), (1, 1), (1, 1), (0, 0)))
    conv = jnp.zeros_like(x_nhwc)
    for dh in range(3):
        for dw in range(3):
            conv = conv + xpad[:, dh:dh + H, dw:dw + W, :] * wdw[dh, dw]
    x1 = x_nhwc + conv + bdw
    t = x1.reshape(B, N, C)
    mu = t.mean(-1, keepdims=True)
    var = ((t - mu) ** 2).mean(-1, keepdims=True)
    t = (t - mu) / jnp.sqrt(var + _EPS) * g1 + b1
    k = t @ wk_t
    v = t @ wv_t
    kh = k.reshape(B, N, num_heads, hd).transpose(0, 2, 1, 3)
    vh = v.reshape(B, N, num_heads, hd).transpose(0, 2, 1, 3)
    qh = jnp.broadcast_to(q_param[None], (B, 3, C)).reshape(
        B, 3, num_heads, hd).transpose(0, 2, 1, 3)
    attn = jnp.einsum("bhqd,bhkd->bhqk", qh, kh) * scale
    attn = jax.nn.softmax(attn, axis=-1)
    o = jnp.einsum("bhqk,bhkd->bhqd", attn, vh).transpose(0, 2, 1, 3).reshape(B, 3, C)
    y = o @ wp_t + bp
    mu2 = y.mean(-1, keepdims=True)
    var2 = ((y - mu2) ** 2).mean(-1, keepdims=True)
    y2 = (y - mu2) / jnp.sqrt(var2 + _EPS) * g2 + b2
    return y + y2


if __name__ == "__main__":
    B, C, H, W = 8, 32, 8, 8
    num_heads = 4

    key = jax.random.PRNGKey(0)
    kx, kdw, kbdw, kk, kv, kp, kb, kg1, kb1, kg2, kb2 = jax.random.split(key, 11)

    x = jax.random.normal(kx, (B, C, H, W), dtype=jnp.float32)

    # Parameter shapes follow the nn.Module __init__:
    wdw = jax.random.normal(kdw, (3, 3, C), jnp.float32) * 0.2    # pos_embed1.weight (C,1,3,3)->(3,3,C)
    bdw = jax.random.normal(kbdw, (C,), jnp.float32) * 0.1        # pos_embed1.bias
    g1 = 1.0 + 0.1 * jax.random.normal(kg1, (C,), jnp.float32)    # norm1.weight
    b1 = 0.1 * jax.random.normal(kb1, (C,), jnp.float32)          # norm1.bias
    q_param = jnp.ones((3, C), jnp.float32)                       # attn.q = ones((1,3,dim))
    wk_t = jax.random.normal(kk, (C, C), jnp.float32) * 0.05      # attn.k.weight.T (qkv_bias=False)
    wv_t = jax.random.normal(kv, (C, C), jnp.float32) * 0.05      # attn.v.weight.T
    wp_t = jax.random.normal(kp, (C, C), jnp.float32) * 0.2       # attn.proj.weight.T
    bp = jax.random.normal(kb, (C,), jnp.float32) * 0.5           # attn.proj.bias
    g2 = 1.0 + 0.1 * jax.random.normal(kg2, (C,), jnp.float32)    # norm2.weight
    b2 = 0.1 * jax.random.normal(kb2, (C,), jnp.float32)          # norm2.bias

    out = query_sablock(x, wdw, bdw, g1, b1, q_param, wk_t, wv_t, wp_t, bp,
                        g2, b2, num_heads=num_heads)
    out = jax.block_until_ready(out)

    ref = _reference(x, wdw, bdw, g1, b1, q_param, wk_t, wv_t, wp_t, bp,
                     g2, b2, num_heads=num_heads)
    # bf16 MXU operands / bf16-stored input vs f32 reference -> loose-ish tolerance.
    np.testing.assert_allclose(np.asarray(out), np.asarray(ref), rtol=2e-2, atol=2e-2)

    print("KERNEL_OK")
</pallas_src>

<mosaic_0001>
module attributes {stable_mosaic.version = 11 : i64} {
  func.func @_qsablock_kernel(%arg0: i32, %arg1: memref<4x8x8x32xbf16, #tpu.memory_space<vmem>>, %arg2: memref<9x32xf32, #tpu.memory_space<vmem>>, %arg3: memref<1x32xf32, #tpu.memory_space<vmem>>, %arg4: memref<1x32xf32, #tpu.memory_space<vmem>>, %arg5: memref<1x32xf32, #tpu.memory_space<vmem>>, %arg6: memref<12x32xbf16, #tpu.memory_space<vmem>>, %arg7: memref<12x32xf32, #tpu.memory_space<vmem>>, %arg8: memref<32x32xbf16, #tpu.memory_space<vmem>>, %arg9: memref<32x32xbf16, #tpu.memory_space<vmem>>, %arg10: memref<32x32xbf16, #tpu.memory_space<vmem>>, %arg11: memref<1x32xf32, #tpu.memory_space<vmem>>, %arg12: memref<1x32xf32, #tpu.memory_space<vmem>>, %arg13: memref<1x32xf32, #tpu.memory_space<vmem>>, %arg14: memref<4x3x32xf32, #tpu.memory_space<vmem>>) attributes {dimension_semantics = [#tpu.dimension_semantics<parallel>], iteration_bounds = array<i64: 2>, scalar_prefetch = 0 : i64, scratch_operands = 0 : i64, tpu.core_type = #tpu.core_type<tc>, window_params = [{transform_indices = @transform_0, window_bounds = array<i64: 4, 8, 8, 32>}, {pipeline_mode = #tpu.pipeline_mode<synchronous>, transform_indices = @transform_1, window_bounds = array<i64: 9, 32>}, {pipeline_mode = #tpu.pipeline_mode<synchronous>, transform_indices = @transform_2, window_bounds = array<i64: 1, 32>}, {pipeline_mode = #tpu.pipeline_mode<synchronous>, transform_indices = @transform_3, window_bounds = array<i64: 1, 32>}, {pipeline_mode = #tpu.pipeline_mode<synchronous>, transform_indices = @transform_4, window_bounds = array<i64: 1, 32>}, {pipeline_mode = #tpu.pipeline_mode<synchronous>, transform_indices = @transform_5, window_bounds = array<i64: 12, 32>}, {pipeline_mode = #tpu.pipeline_mode<synchronous>, transform_indices = @transform_6, window_bounds = array<i64: 12, 32>}, {pipeline_mode = #tpu.pipeline_mode<synchronous>, transform_indices = @transform_7, window_bounds = array<i64: 32, 32>}, {pipeline_mode = #tpu.pipeline_mode<synchronous>, transform_indices = @transform_8, window_bounds = array<i64: 32, 32>}, {pipeline_mode = #tpu.pipeline_mode<synchronous>, transform_indices = @transform_9, window_bounds = array<i64: 32, 32>}, {pipeline_mode = #tpu.pipeline_mode<synchronous>, transform_indices = @transform_10, window_bounds = array<i64: 1, 32>}, {pipeline_mode = #tpu.pipeline_mode<synchronous>, transform_indices = @transform_11, window_bounds = array<i64: 1, 32>}, {pipeline_mode = #tpu.pipeline_mode<synchronous>, transform_indices = @transform_12, window_bounds = array<i64: 1, 32>}, {transform_indices = @transform_13, window_bounds = array<i64: 4, 3, 32>}]} {
    %c0 = arith.constant 0 : index
    %c0_0 = arith.constant 0 : index
    %c0_1 = arith.constant 0 : index
    %c0_2 = arith.constant 0 : index
    %0 = vector.load %arg1[%c0, %c0_0, %c0_1, %c0_2] : memref<4x8x8x32xbf16, #tpu.memory_space<vmem>>, vector<4x8x8x32xbf16>
    %1 = arith.extf %0 : vector<4x8x8x32xbf16> to vector<4x8x8x32xf32>
    %c0_3 = arith.constant 0 : index
    %c0_4 = arith.constant 0 : index
    %2 = vector.load %arg2[%c0_3, %c0_4] : memref<9x32xf32, #tpu.memory_space<vmem>>, vector<9x32xf32>
    %3 = tpu.iota {dimensions = array<i32: 0>} : vector<8x1xi32>
    %cst = arith.constant 0.000000e+00 : f32
    %4 = vector.broadcast %cst : f32 to vector<4x1x8x32xf32>
    %c1_i32 = arith.constant 1 : i32
    %5 = tpu.dynamic_rotate %1 by %c1_i32 dim 2 : vector<4x8x8x32xf32>, i32 -> vector<4x8x8x32xf32>
    %c1_i32_5 = arith.constant 1 : i32
    %6 = vector.broadcast %c1_i32_5 : i32 to vector<8x1xi32>
    %7 = arith.cmpi sge, %3, %6 : vector<8x1xi32>
    %8 = arith.extui %7 : vector<8x1xi1> to vector<8x1xi32>
    %9 = arith.sitofp %8 : vector<8x1xi32> to vector<8x1xf32>
    %10 = vector.extract_strided_slice %5 {offsets = [0, 0, 0, 0], sizes = [4, 7, 8, 32], strides = [1, 1, 1, 1]} : vector<4x8x8x32xf32> to vector<4x7x8x32xf32>
    %11 = tpu.concatenate %4, %10 in 1 : vector<4x1x8x32xf32>, vector<4x7x8x32xf32> -> vector<4x8x8x32xf32>
    %12 = vector.extract_strided_slice %2 {offsets = [0, 0], sizes = [1, 32], strides = [1, 1]} : vector<9x32xf32> to vector<1x32xf32>
    %13 = vector.shape_cast %12 : vector<1x32xf32> to vector<32xf32>
    %14 = vector.shape_cast %13 : vector<32xf32> to vector<1x32xf32>
    %15 = vector.broadcast %9 : vector<8x1xf32> to vector<8x32xf32>
    %16 = vector.broadcast %14 : vector<1x32xf32> to vector<8x32xf32>
    %17 = arith.mulf %15, %16 : vector<8x32xf32>
    %18 = vector.shape_cast %17 : vector<8x32xf32> to vector<1x1x8x32xf32>
    %19 = vector.broadcast %18 : vector<1x1x8x32xf32> to vector<4x8x8x32xf32>
    %20 = arith.mulf %11, %19 : vector<4x8x8x32xf32>
    %21 = vector.extract_strided_slice %2 {offsets = [3, 0], sizes = [1, 32], strides = [1, 1]} : vector<9x32xf32> to vector<1x32xf32>
    %22 = vector.shape_cast %21 : vector<1x32xf32> to vector<32xf32>
    %23 = vector.shape_cast %22 : vector<32xf32> to vector<1x32xf32>
    %24 = vector.broadcast %9 : vector<8x1xf32> to vector<8x32xf32>
    %25 = vector.broadcast %23 : vector<1x32xf32> to vector<8x32xf32>
    %26 = arith.mulf %24, %25 : vector<8x32xf32>
    %27 = vector.shape_cast %26 : vector<8x32xf32> to vector<1x1x8x32xf32>
    %28 = vector.broadcast %27 : vector<1x1x8x32xf32> to vector<4x8x8x32xf32>
    %29 = arith.mulf %5, %28 : vector<4x8x8x32xf32>
    %30 = arith.addf %20, %29 : vector<4x8x8x32xf32>
    %31 = vector.extract_strided_slice %5 {offsets = [0, 1, 0, 0], sizes = [4, 7, 8, 32], strides = [1, 1, 1, 1]} : vector<4x8x8x32xf32> to vector<4x7x8x32xf32>
    %32 = tpu.concatenate %31, %4 in 1 : vector<4x7x8x32xf32>, vector<4x1x8x32xf32> -> vector<4x8x8x32xf32>
    %33 = vector.extract_strided_slice %2 {offsets = [6, 0], sizes = [1, 32], strides = [1, 1]} : vector<9x32xf32> to vector<1x32xf32>
    %34 = vector.shape_cast %33 : vector<1x32xf32> to vector<32xf32>
    %35 = vector.shape_cast %34 : vector<32xf32> to vector<1x32xf32>
    %36 = vector.broadcast %9 : vector<8x1xf32> to vector<8x32xf32>
    %37 = vector.broadcast %35 : vector<1x32xf32> to vector<8x32xf32>
    %38 = arith.mulf %36, %37 : vector<8x32xf32>
    %39 = vector.shape_cast %38 : vector<8x32xf32> to vector<1x1x8x32xf32>
    %40 = vector.broadcast %39 : vector<1x1x8x32xf32> to vector<4x8x8x32xf32>
    %41 = arith.mulf %32, %40 : vector<4x8x8x32xf32>
    %42 = arith.addf %30, %41 : vector<4x8x8x32xf32>
    %43 = vector.extract_strided_slice %1 {offsets = [0, 0, 0, 0], sizes = [4, 7, 8, 32], strides = [1, 1, 1, 1]} : vector<4x8x8x32xf32> to vector<4x7x8x32xf32>
    %44 = tpu.concatenate %4, %43 in 1 : vector<4x1x8x32xf32>, vector<4x7x8x32xf32> -> vector<4x8x8x32xf32>
    %45 = vector.extract_strided_slice %2 {offsets = [1, 0], sizes = [1, 32], strides = [1, 1]} : vector<9x32xf32> to vector<1x32xf32>
    %46 = vector.shape_cast %45 : vector<1x32xf32> to vector<32xf32>
    %47 = vector.shape_cast %46 : vector<32xf32> to vector<1x32xf32>
    %48 = vector.shape_cast %47 : vector<1x32xf32> to vector<1x1x1x32xf32>
    %49 = vector.broadcast %48 : vector<1x1x1x32xf32> to vector<4x8x8x32xf32>
    %50 = arith.mulf %44, %49 : vector<4x8x8x32xf32>
    %51 = arith.addf %42, %50 : vector<4x8x8x32xf32>
    %52 = vector.extract_strided_slice %2 {offsets = [4, 0], sizes = [1, 32], strides = [1, 1]} : vector<9x32xf32> to vector<1x32xf32>
    %53 = vector.shape_cast %52 : vector<1x32xf32> to vector<32xf32>
    %54 = vector.shape_cast %53 : vector<32xf32> to vector<1x32xf32>
    %55 = vector.shape_cast %54 : vector<1x32xf32> to vector<1x1x1x32xf32>
    %56 = vector.broadcast %55 : vector<1x1x1x32xf32> to vector<4x8x8x32xf32>
    %57 = arith.mulf %1, %56 : vector<4x8x8x32xf32>
    %58 = arith.addf %51, %57 : vector<4x8x8x32xf32>
    %59 = vector.extract_strided_slice %1 {offsets = [0, 1, 0, 0], sizes = [4, 7, 8, 32], strides = [1, 1, 1, 1]} : vector<4x8x8x32xf32> to vector<4x7x8x32xf32>
    %60 = tpu.concatenate %59, %4 in 1 : vector<4x7x8x32xf32>, vector<4x1x8x32xf32> -> vector<4x8x8x32xf32>
    %61 = vector.extract_strided_slice %2 {offsets = [7, 0], sizes = [1, 32], strides = [1, 1]} : vector<9x32xf32> to vector<1x32xf32>
    %62 = vector.shape_cast %61 : vector<1x32xf32> to vector<32xf32>
    %63 = vector.shape_cast %62 : vector<32xf32> to vector<1x32xf32>
    %64 = vector.shape_cast %63 : vector<1x32xf32> to vector<1x1x1x32xf32>
    %65 = vector.broadcast %64 : vector<1x1x1x32xf32> to vector<4x8x8x32xf32>
    %66 = arith.mulf %60, %65 : vector<4x8x8x32xf32>
    %67 = arith.addf %58, %66 : vector<4x8x8x32xf32>
    %c7_i32 = arith.constant 7 : i32
    %68 = tpu.dynamic_rotate %1 by %c7_i32 dim 2 : vector<4x8x8x32xf32>, i32 -> vector<4x8x8x32xf32>
    %c6_i32 = arith.constant 6 : i32
    %69 = vector.broadcast %c6_i32 : i32 to vector<8x1xi32>
    %70 = arith.cmpi sle, %3, %69 : vector<8x1xi32>
    %71 = arith.extui %70 : vector<8x1xi1> to vector<8x1xi32>
    %72 = arith.sitofp %71 : vector<8x1xi32> to vector<8x1xf32>
    %73 = vector.extract_strided_slice %68 {offsets = [0, 0, 0, 0], sizes = [4, 7, 8, 32], strides = [1, 1, 1, 1]} : vector<4x8x8x32xf32> to vector<4x7x8x32xf32>
    %74 = tpu.concatenate %4, %73 in 1 : vector<4x1x8x32xf32>, vector<4x7x8x32xf32> -> vector<4x8x8x32xf32>
    %75 = vector.extract_strided_slice %2 {offsets = [2, 0], sizes = [1, 32], strides = [1, 1]} : vector<9x32xf32> to vector<1x32xf32>
    %76 = vector.shape_cast %75 : vector<1x32xf32> to vector<32xf32>
    %77 = vector.shape_cast %76 : vector<32xf32> to vector<1x32xf32>
    %78 = vector.broadcast %72 : vector<8x1xf32> to vector<8x32xf32>
    %79 = vector.broadcast %77 : vector<1x32xf32> to vector<8x32xf32>
    %80 = arith.mulf %78, %79 : vector<8x32xf32>
    %81 = vector.shape_cast %80 : vector<8x32xf32> to vector<1x1x8x32xf32>
    %82 = vector.broadcast %81 : vector<1x1x8x32xf32> to vector<4x8x8x32xf32>
    %83 = arith.mulf %74, %82 : vector<4x8x8x32xf32>
    %84 = arith.addf %67, %83 : vector<4x8x8x32xf32>
    %85 = vector.extract_strided_slice %2 {offsets = [5, 0], sizes = [1, 32], strides = [1, 1]} : vector<9x32xf32> to vector<1x32xf32>
    %86 = vector.shape_cast %85 : vector<1x32xf32> to vector<32xf32>
    %87 = vector.shape_cast %86 : vector<32xf32> to vector<1x32xf32>
    %88 = vector.broadcast %72 : vector<8x1xf32> to vector<8x32xf32>
    %89 = vector.broadcast %87 : vector<1x32xf32> to vector<8x32xf32>
    %90 = arith.mulf %88, %89 : vector<8x32xf32>
    %91 = vector.shape_cast %90 : vector<8x32xf32> to vector<1x1x8x32xf32>
    %92 = vector.broadcast %91 : vector<1x1x8x32xf32> to vector<4x8x8x32xf32>
    %93 = arith.mulf %68, %92 : vector<4x8x8x32xf32>
    %94 = arith.addf %84, %93 : vector<4x8x8x32xf32>
    %95 = vector.extract_strided_slice %68 {offsets = [0, 1, 0, 0], sizes = [4, 7, 8, 32], strides = [1, 1, 1, 1]} : vector<4x8x8x32xf32> to vector<4x7x8x32xf32>
    %96 = tpu.concatenate %95, %4 in 1 : vector<4x7x8x32xf32>, vector<4x1x8x32xf32> -> vector<4x8x8x32xf32>
    %97 = vector.extract_strided_slice %2 {offsets = [8, 0], sizes = [1, 32], strides = [1, 1]} : vector<9x32xf32> to vector<1x32xf32>
    %98 = vector.shape_cast %97 : vector<1x32xf32> to vector<32xf32>
    %99 = vector.shape_cast %98 : vector<32xf32> to vector<1x32xf32>
    %100 = vector.broadcast %72 : vector<8x1xf32> to vector<8x32xf32>
    %101 = vector.broadcast %99 : vector<1x32xf32> to vector<8x32xf32>
    %102 = arith.mulf %100, %101 : vector<8x32xf32>
    %103 = vector.shape_cast %102 : vector<8x32xf32> to vector<1x1x8x32xf32>
    %104 = vector.broadcast %103 : vector<1x1x8x32xf32> to vector<4x8x8x32xf32>
    %105 = arith.mulf %96, %104 : vector<4x8x8x32xf32>
    %106 = arith.addf %94, %105 : vector<4x8x8x32xf32>
    %107 = arith.addf %1, %106 : vector<4x8x8x32xf32>
    %c0_6 = arith.constant 0 : index
    %c0_7 = arith.constant 0 : index
    %108 = vector.load %arg3[%c0_6, %c0_7] : memref<1x32xf32, #tpu.memory_space<vmem>>, vector<1x32xf32>
    %109 = vector.shape_cast %108 : vector<1x32xf32> to vector<1x1x1x32xf32>
    %110 = vector.broadcast %109 : vector<1x1x1x32xf32> to vector<4x8x8x32xf32>
    %111 = arith.addf %107, %110 : vector<4x8x8x32xf32>
    %112 = vector.shape_cast %111 : vector<4x8x8x32xf32> to vector<256x32xf32>
    %c0_8 = arith.constant 0 : index
    %c0_9 = arith.constant 0 : index
    %113 = vector.load %arg4[%c0_8, %c0_9] : memref<1x32xf32, #tpu.memory_space<vmem>>, vector<1x32xf32>
    %c0_10 = arith.constant 0 : index
    %c0_11 = arith.constant 0 : index
    %114 = vector.load %arg5[%c0_10, %c0_11] : memref<1x32xf32, #tpu.memory_space<vmem>>, vector<1x32xf32>
    %cst_12 = arith.constant dense<0.000000e+00> : vector<256xf32>
    %115 = vector.multi_reduction <add>, %112, %cst_12 [1] : vector<256x32xf32> to vector<256xf32>
    %116 = vector.shape_cast %115 : vector<256xf32> to vector<256x1xf32>
    %cst_13 = arith.constant 3.200000e+01 : f32
    %117 = vector.broadcast %cst_13 : f32 to vector<256x1xf32>
    %118 = arith.divf %116, %117 : vector<256x1xf32>
    %119 = vector.broadcast %118 : vector<256x1xf32> to vector<256x32xf32>
    %120 = arith.subf %112, %119 : vector<256x32xf32>
    %121 = arith.mulf %120, %120 : vector<256x32xf32>
    %cst_14 = arith.constant dense<0.000000e+00> : vector<256xf32>
    %122 = vector.multi_reduction <add>, %121, %cst_14 [1] : vector<256x32xf32> to vector<256xf32>
    %123 = vector.shape_cast %122 : vector<256xf32> to vector<256x1xf32>
    %cst_15 = arith.constant 3.200000e+01 : f32
    %124 = vector.broadcast %cst_15 : f32 to vector<256x1xf32>
    %125 = arith.divf %123, %124 : vector<256x1xf32>
    %cst_16 = arith.constant 9.99999974E-6 : f32
    %126 = vector.broadcast %cst_16 : f32 to vector<256x1xf32>
    %127 = arith.addf %125, %126 : vector<256x1xf32>
    %128 = math.rsqrt %127 : vector<256x1xf32>
    %129 = vector.broadcast %128 : vector<256x1xf32> to vector<256x32xf32>
    %130 = arith.mulf %120, %129 : vector<256x32xf32>
    %131 = vector.broadcast %113 : vector<1x32xf32> to vector<256x32xf32>
    %132 = arith.mulf %130, %131 : vector<256x32xf32>
    %133 = vector.broadcast %114 : vector<1x32xf32> to vector<256x32xf32>
    %134 = arith.addf %132, %133 : vector<256x32xf32>
    %135 = arith.truncf %134 : vector<256x32xf32> to vector<256x32xbf16>
    %c0_17 = arith.constant 0 : index
    %c0_18 = arith.constant 0 : index
    %136 = vector.load %arg8[%c0_17, %c0_18] : memref<32x32xbf16, #tpu.memory_space<vmem>>, vector<32x32xbf16>
    %cst_19 = arith.constant dense<0.000000e+00> : vector<256x32xf32>
    %137 = tpu.matmul %135, %136, %cst_19 {dimension_numbers = #tpu.dot_dimension_numbers<[1], [0], [0], [1], [0, 0, 1, 1], [], []>} : vector<256x32xbf16>, vector<32x32xbf16>, vector<256x32xf32> -> vector<256x32xf32>
    %138 = arith.truncf %137 : vector<256x32xf32> to vector<256x32xbf16>
    %c0_20 = arith.constant 0 : index
    %c0_21 = arith.constant 0 : index
    %139 = vector.load %arg9[%c0_20, %c0_21] : memref<32x32xbf16, #tpu.memory_space<vmem>>, vector<32x32xbf16>
    %cst_22 = arith.constant dense<0.000000e+00> : vector<256x32xf32>
    %140 = tpu.matmul %135, %139, %cst_22 {dimension_numbers = #tpu.dot_dimension_numbers<[1], [0], [0], [1], [0, 0, 1, 1], [], []>} : vector<256x32xbf16>, vector<32x32xbf16>, vector<256x32xf32> -> vector<256x32xf32>
    %141 = arith.truncf %140 : vector<256x32xf32> to vector<256x32xbf16>
    %c0_23 = arith.constant 0 : index
    %c0_24 = arith.constant 0 : index
    %142 = vector.load %arg6[%c0_23, %c0_24] : memref<12x32xbf16, #tpu.memory_space<vmem>>, vector<12x32xbf16>
    %c0_25 = arith.constant 0 : index
    %c0_26 = arith.constant 0 : index
    %143 = vector.load %arg7[%c0_25, %c0_26] : memref<12x32xf32, #tpu.memory_space<vmem>>, vector<12x32xf32>
    %144 = vector.extract_strided_slice %138 {offsets = [0, 0], sizes = [64, 32], strides = [1, 1]} : vector<256x32xbf16> to vector<64x32xbf16>
    %145 = vector.extract_strided_slice %141 {offsets = [0, 0], sizes = [64, 32], strides = [1, 1]} : vector<256x32xbf16> to vector<64x32xbf16>
    %cst_27 = arith.constant dense<0.000000e+00> : vector<12x64xf32>
    %146 = tpu.matmul %142, %144, %cst_27 {dimension_numbers = #tpu.dot_dimension_numbers<[1], [1], [0], [0], [0, 0, 1, 0], [], []>} : vector<12x32xbf16>, vector<64x32xbf16>, vector<12x64xf32> -> vector<12x64xf32>
    %cst_28 = arith.constant dense<0xFF800000> : vector<12xf32>
    %147 = vector.multi_reduction <maximumf>, %146, %cst_28 [1] : vector<12x64xf32> to vector<12xf32>
    %148 = vector.shape_cast %147 : vector<12xf32> to vector<12x1xf32>
    %149 = vector.broadcast %148 : vector<12x1xf32> to vector<12x64xf32>
    %150 = arith.subf %146, %149 : vector<12x64xf32>
    %151 = math.exp %150 : vector<12x64xf32>
    %cst_29 = arith.constant dense<0.000000e+00> : vector<12xf32>
    %152 = vector.multi_reduction <add>, %151, %cst_29 [1] : vector<12x64xf32> to vector<12xf32>
    %153 = vector.shape_cast %152 : vector<12xf32> to vector<12x1xf32>
    %154 = vector.broadcast %153 : vector<12x1xf32> to vector<12x64xf32>
    %155 = arith.divf %151, %154 : vector<12x64xf32>
    %156 = arith.truncf %155 : vector<12x64xf32> to vector<12x64xbf16>
    %cst_30 = arith.constant dense<0.000000e+00> : vector<12x32xf32>
    %157 = tpu.matmul %156, %145, %cst_30 {dimension_numbers = #tpu.dot_dimension_numbers<[1], [0], [0], [1], [0, 0, 1, 1], [], []>} : vector<12x64xbf16>, vector<64x32xbf16>, vector<12x32xf32> -> vector<12x32xf32>
    %158 = arith.mulf %157, %143 : vector<12x32xf32>
    %159 = vector.extract_strided_slice %158 {offsets = [0, 0], sizes = [4, 32], strides = [1, 1]} : vector<12x32xf32> to vector<4x32xf32>
    %cst_31 = arith.constant dense<0.000000e+00> : vector<32xf32>
    %160 = vector.multi_reduction <add>, %159, %cst_31 [0] : vector<4x32xf32> to vector<32xf32>
    %161 = vector.shape_cast %160 : vector<32xf32> to vector<1x32xf32>
    %162 = vector.extract_strided_slice %158 {offsets = [4, 0], sizes = [4, 32], strides = [1, 1]} : vector<12x32xf32> to vector<4x32xf32>
    %cst_32 = arith.constant dense<0.000000e+00> : vector<32xf32>
    %163 = vector.multi_reduction <add>, %162, %cst_32 [0] : vector<4x32xf32> to vector<32xf32>
    %164 = vector.shape_cast %163 : vector<32xf32> to vector<1x32xf32>
    %165 = vector.extract_strided_slice %158 {offsets = [8, 0], sizes = [4, 32], strides = [1, 1]} : vector<12x32xf32> to vector<4x32xf32>
    %cst_33 = arith.constant dense<0.000000e+00> : vector<32xf32>
    %166 = vector.multi_reduction <add>, %165, %cst_33 [0] : vector<4x32xf32> to vector<32xf32>
    %167 = vector.shape_cast %166 : vector<32xf32> to vector<1x32xf32>
    %168 = vector.extract_strided_slice %138 {offsets = [64, 0], sizes = [64, 32], strides = [1, 1]} : vector<256x32xbf16> to vector<64x32xbf16>
    %169 = vector.extract_strided_slice %141 {offsets = [64, 0], sizes = [64, 32], strides = [1, 1]} : vector<256x32xbf16> to vector<64x32xbf16>
    %cst_34 = arith.constant dense<0.000000e+00> : vector<12x64xf32>
    %170 = tpu.matmul %142, %168, %cst_34 {dimension_numbers = #tpu.dot_dimension_numbers<[1], [1], [0], [0], [0, 0, 1, 0], [], []>} : vector<12x32xbf16>, vector<64x32xbf16>, vector<12x64xf32> -> vector<12x64xf32>
    %cst_35 = arith.constant dense<0xFF800000> : vector<12xf32>
    %171 = vector.multi_reduction <maximumf>, %170, %cst_35 [1] : vector<12x64xf32> to vector<12xf32>
    %172 = vector.shape_cast %171 : vector<12xf32> to vector<12x1xf32>
    %173 = vector.broadcast %172 : vector<12x1xf32> to vector<12x64xf32>
    %174 = arith.subf %170, %173 : vector<12x64xf32>
    %175 = math.exp %174 : vector<12x64xf32>
    %cst_36 = arith.constant dense<0.000000e+00> : vector<12xf32>
    %176 = vector.multi_reduction <add>, %175, %cst_36 [1] : vector<12x64xf32> to vector<12xf32>
    %177 = vector.shape_cast %176 : vector<12xf32> to vector<12x1xf32>
    %178 = vector.broadcast %177 : vector<12x1xf32> to vector<12x64xf32>
    %179 = arith.divf %175, %178 : vector<12x64xf32>
    %180 = arith.truncf %179 : vector<12x64xf32> to vector<12x64xbf16>
    %cst_37 = arith.constant dense<0.000000e+00> : vector<12x32xf32>
    %181 = tpu.matmul %180, %169, %cst_37 {dimension_numbers = #tpu.dot_dimension_numbers<[1], [0], [0], [1], [0, 0, 1, 1], [], []>} : vector<12x64xbf16>, vector<64x32xbf16>, vector<12x32xf32> -> vector<12x32xf32>
    %182 = arith.mulf %181, %143 : vector<12x32xf32>
    %183 = vector.extract_strided_slice %182 {offsets = [0, 0], sizes = [4, 32], strides = [1, 1]} : vector<12x32xf32> to vector<4x32xf32>
    %cst_38 = arith.constant dense<0.000000e+00> : vector<32xf32>
    %184 = vector.multi_reduction <add>, %183, %cst_38 [0] : vector<4x32xf32> to vector<32xf32>
    %185 = vector.shape_cast %184 : vector<32xf32> to vector<1x32xf32>
    %186 = vector.extract_strided_slice %182 {offsets = [4, 0], sizes = [4, 32], strides = [1, 1]} : vector<12x32xf32> to vector<4x32xf32>
    %cst_39 = arith.constant dense<0.000000e+00> : vector<32xf32>
    %187 = vector.multi_reduction <add>, %186, %cst_39 [0] : vector<4x32xf32> to vector<32xf32>
    %188 = vector.shape_cast %187 : vector<32xf32> to vector<1x32xf32>
    %189 = vector.extract_strided_slice %182 {offsets = [8, 0], sizes = [4, 32], strides = [1, 1]} : vector<12x32xf32> to vector<4x32xf32>
    %cst_40 = arith.constant dense<0.000000e+00> : vector<32xf32>
    %190 = vector.multi_reduction <add>, %189, %cst_40 [0] : vector<4x32xf32> to vector<32xf32>
    %191 = vector.shape_cast %190 : vector<32xf32> to vector<1x32xf32>
    %192 = vector.extract_strided_slice %138 {offsets = [128, 0], sizes = [64, 32], strides = [1, 1]} : vector<256x32xbf16> to vector<64x32xbf16>
    %193 = vector.extract_strided_slice %141 {offsets = [128, 0], sizes = [64, 32], strides = [1, 1]} : vector<256x32xbf16> to vector<64x32xbf16>
    %cst_41 = arith.constant dense<0.000000e+00> : vector<12x64xf32>
    %194 = tpu.matmul %142, %192, %cst_41 {dimension_numbers = #tpu.dot_dimension_numbers<[1], [1], [0], [0], [0, 0, 1, 0], [], []>} : vector<12x32xbf16>, vector<64x32xbf16>, vector<12x64xf32> -> vector<12x64xf32>
    %cst_42 = arith.constant dense<0xFF800000> : vector<12xf32>
    %195 = vector.multi_reduction <maximumf>, %194, %cst_42 [1] : vector<12x64xf32> to vector<12xf32>
    %196 = vector.shape_cast %195 : vector<12xf32> to vector<12x1xf32>
    %197 = vector.broadcast %196 : vector<12x1xf32> to vector<12x64xf32>
    %198 = arith.subf %194, %197 : vector<12x64xf32>
    %199 = math.exp %198 : vector<12x64xf32>
    %cst_43 = arith.constant dense<0.000000e+00> : vector<12xf32>
    %200 = vector.multi_reduction <add>, %199, %cst_43 [1] : vector<12x64xf32> to vector<12xf32>
    %201 = vector.shape_cast %200 : vector<12xf32> to vector<12x1xf32>
    %202 = vector.broadcast %201 : vector<12x1xf32> to vector<12x64xf32>
    %203 = arith.divf %199, %202 : vector<12x64xf32>
    %204 = arith.truncf %203 : vector<12x64xf32> to vector<12x64xbf16>
    %cst_44 = arith.constant dense<0.000000e+00> : vector<12x32xf32>
    %205 = tpu.matmul %204, %193, %cst_44 {dimension_numbers = #tpu.dot_dimension_numbers<[1], [0], [0], [1], [0, 0, 1, 1], [], []>} : vector<12x64xbf16>, vector<64x32xbf16>, vector<12x32xf32> -> vector<12x32xf32>
    %206 = arith.mulf %205, %143 : vector<12x32xf32>
    %207 = vector.extract_strided_slice %206 {offsets = [0, 0], sizes = [4, 32], strides = [1, 1]} : vector<12x32xf32> to vector<4x32xf32>
    %cst_45 = arith.constant dense<0.000000e+00> : vector<32xf32>
    %208 = vector.multi_reduction <add>, %207, %cst_45 [0] : vector<4x32xf32> to vector<32xf32>
    %209 = vector.shape_cast %208 : vector<32xf32> to vector<1x32xf32>
    %210 = vector.extract_strided_slice %206 {offsets = [4, 0], sizes = [4, 32], strides = [1, 1]} : vector<12x32xf32> to vector<4x32xf32>
    %cst_46 = arith.constant dense<0.000000e+00> : vector<32xf32>
    %211 = vector.multi_reduction <add>, %210, %cst_46 [0] : vector<4x32xf32> to vector<32xf32>
    %212 = vector.shape_cast %211 : vector<32xf32> to vector<1x32xf32>
    %213 = vector.extract_strided_slice %206 {offsets = [8, 0], sizes = [4, 32], strides = [1, 1]} : vector<12x32xf32> to vector<4x32xf32>
    %cst_47 = arith.constant dense<0.000000e+00> : vector<32xf32>
    %214 = vector.multi_reduction <add>, %213, %cst_47 [0] : vector<4x32xf32> to vector<32xf32>
    %215 = vector.shape_cast %214 : vector<32xf32> to vector<1x32xf32>
    %216 = vector.extract_strided_slice %138 {offsets = [192, 0], sizes = [64, 32], strides = [1, 1]} : vector<256x32xbf16> to vector<64x32xbf16>
    %217 = vector.extract_strided_slice %141 {offsets = [192, 0], sizes = [64, 32], strides = [1, 1]} : vector<256x32xbf16> to vector<64x32xbf16>
    %cst_48 = arith.constant dense<0.000000e+00> : vector<12x64xf32>
    %218 = tpu.matmul %142, %216, %cst_48 {dimension_numbers = #tpu.dot_dimension_numbers<[1], [1], [0], [0], [0, 0, 1, 0], [], []>} : vector<12x32xbf16>, vector<64x32xbf16>, vector<12x64xf32> -> vector<12x64xf32>
    %cst_49 = arith.constant dense<0xFF800000> : vector<12xf32>
    %219 = vector.multi_reduction <maximumf>, %218, %cst_49 [1] : vector<12x64xf32> to vector<12xf32>
    %220 = vector.shape_cast %219 : vector<12xf32> to vector<12x1xf32>
    %221 = vector.broadcast %220 : vector<12x1xf32> to vector<12x64xf32>
    %222 = arith.subf %218, %221 : vector<12x64xf32>
    %223 = math.exp %222 : vector<12x64xf32>
    %cst_50 = arith.constant dense<0.000000e+00> : vector<12xf32>
    %224 = vector.multi_reduction <add>, %223, %cst_50 [1] : vector<12x64xf32> to vector<12xf32>
    %225 = vector.shape_cast %224 : vector<12xf32> to vector<12x1xf32>
    %226 = vector.broadcast %225 : vector<12x1xf32> to vector<12x64xf32>
    %227 = arith.divf %223, %226 : vector<12x64xf32>
    %228 = arith.truncf %227 : vector<12x64xf32> to vector<12x64xbf16>
    %cst_51 = arith.constant dense<0.000000e+00> : vector<12x32xf32>
    %229 = tpu.matmul %228, %217, %cst_51 {dimension_numbers = #tpu.dot_dimension_numbers<[1], [0], [0], [1], [0, 0, 1, 1], [], []>} : vector<12x64xbf16>, vector<64x32xbf16>, vector<12x32xf32> -> vector<12x32xf32>
    %230 = arith.mulf %229, %143 : vector<12x32xf32>
    %231 = vector.extract_strided_slice %230 {offsets = [0, 0], sizes = [4, 32], strides = [1, 1]} : vector<12x32xf32> to vector<4x32xf32>
    %cst_52 = arith.constant dense<0.000000e+00> : vector<32xf32>
    %232 = vector.multi_reduction <add>, %231, %cst_52 [0] : vector<4x32xf32> to vector<32xf32>
    %233 = vector.shape_cast %232 : vector<32xf32> to vector<1x32xf32>
    %234 = vector.extract_strided_slice %230 {offsets = [4, 0], sizes = [4, 32], strides = [1, 1]} : vector<12x32xf32> to vector<4x32xf32>
    %cst_53 = arith.constant dense<0.000000e+00> : vector<32xf32>
    %235 = vector.multi_reduction <add>, %234, %cst_53 [0] : vector<4x32xf32> to vector<32xf32>
    %236 = vector.shape_cast %235 : vector<32xf32> to vector<1x32xf32>
    %237 = vector.extract_strided_slice %230 {offsets = [8, 0], sizes = [4, 32], strides = [1, 1]} : vector<12x32xf32> to vector<4x32xf32>
    %cst_54 = arith.constant dense<0.000000e+00> : vector<32xf32>
    %238 = vector.multi_reduction <add>, %237, %cst_54 [0] : vector<4x32xf32> to vector<32xf32>
    %239 = vector.shape_cast %238 : vector<32xf32> to vector<1x32xf32>
    %240 = tpu.concatenate %161, %164, %167, %185, %188, %191, %209, %212, %215, %233, %236, %239 in 0 : vector<1x32xf32>, vector<1x32xf32>, vector<1x32xf32>, vector<1x32xf32>, vector<1x32xf32>, vector<1x32xf32>, vector<1x32xf32>, vector<1x32xf32>, vector<1x32xf32>, vector<1x32xf32>, vector<1x32xf32>, vector<1x32xf32> -> vector<12x32xf32>
    %241 = arith.truncf %240 : vector<12x32xf32> to vector<12x32xbf16>
    %c0_55 = arith.constant 0 : index
    %c0_56 = arith.constant 0 : index
    %242 = vector.load %arg10[%c0_55, %c0_56] : memref<32x32xbf16, #tpu.memory_space<vmem>>, vector<32x32xbf16>
    %cst_57 = arith.constant dense<0.000000e+00> : vector<12x32xf32>
    %243 = tpu.matmul %241, %242, %cst_57 {dimension_numbers = #tpu.dot_dimension_numbers<[1], [0], [0], [1], [0, 0, 1, 1], [], []>} : vector<12x32xbf16>, vector<32x32xbf16>, vector<12x32xf32> -> vector<12x32xf32>
    %c0_58 = arith.constant 0 : index
    %c0_59 = arith.constant 0 : index
    %244 = vector.load %arg11[%c0_58, %c0_59] : memref<1x32xf32, #tpu.memory_space<vmem>>, vector<1x32xf32>
    %245 = vector.broadcast %244 : vector<1x32xf32> to vector<12x32xf32>
    %246 = arith.addf %243, %245 : vector<12x32xf32>
    %c0_60 = arith.constant 0 : index
    %c0_61 = arith.constant 0 : index
    %247 = vector.load %arg12[%c0_60, %c0_61] : memref<1x32xf32, #tpu.memory_space<vmem>>, vector<1x32xf32>
    %c0_62 = arith.constant 0 : index
    %c0_63 = arith.constant 0 : index
    %248 = vector.load %arg13[%c0_62, %c0_63] : memref<1x32xf32, #tpu.memory_space<vmem>>, vector<1x32xf32>
    %cst_64 = arith.constant dense<0.000000e+00> : vector<12xf32>
    %249 = vector.multi_reduction <add>, %246, %cst_64 [1] : vector<12x32xf32> to vector<12xf32>
    %250 = vector.shape_cast %249 : vector<12xf32> to vector<12x1xf32>
    %cst_65 = arith.constant 3.200000e+01 : f32
    %251 = vector.broadcast %cst_65 : f32 to vector<12x1xf32>
    %252 = arith.divf %250, %251 : vector<12x1xf32>
    %253 = vector.broadcast %252 : vector<12x1xf32> to vector<12x32xf32>
    %254 = arith.subf %246, %253 : vector<12x32xf32>
    %255 = arith.mulf %254, %254 : vector<12x32xf32>
    %cst_66 = arith.constant dense<0.000000e+00> : vector<12xf32>
    %256 = vector.multi_reduction <add>, %255, %cst_66 [1] : vector<12x32xf32> to vector<12xf32>
    %257 = vector.shape_cast %256 : vector<12xf32> to vector<12x1xf32>
    %cst_67 = arith.constant 3.200000e+01 : f32
    %258 = vector.broadcast %cst_67 : f32 to vector<12x1xf32>
    %259 = arith.divf %257, %258 : vector<12x1xf32>
    %cst_68 = arith.constant 9.99999974E-6 : f32
    %260 = vector.broadcast %cst_68 : f32 to vector<12x1xf32>
    %261 = arith.addf %259, %260 : vector<12x1xf32>
    %262 = math.rsqrt %261 : vector<12x1xf32>
    %263 = vector.broadcast %262 : vector<12x1xf32> to vector<12x32xf32>
    %264 = arith.mulf %254, %263 : vector<12x32xf32>
    %265 = vector.broadcast %247 : vector<1x32xf32> to vector<12x32xf32>
    %266 = arith.mulf %264, %265 : vector<12x32xf32>
    %267 = vector.broadcast %248 : vector<1x32xf32> to vector<12x32xf32>
    %268 = arith.addf %266, %267 : vector<12x32xf32>
    %269 = arith.addf %246, %268 : vector<12x32xf32>
    %270 = vector.extract_strided_slice %269 {offsets = [0, 0], sizes = [3, 32], strides = [1, 1]} : vector<12x32xf32> to vector<3x32xf32>
    %c0_69 = arith.constant 0 : index
    %c0_70 = arith.constant 0 : index
    %c0_71 = arith.constant 0 : index
    %271 = vector.load %arg14[%c0_69, %c0_70, %c0_71] : memref<4x3x32xf32, #tpu.memory_space<vmem>>, vector<1x3x32xf32>
    %272 = vector.shape_cast %271 : vector<1x3x32xf32> to vector<3x32xf32>
    %273 = vector.shape_cast %270 : vector<3x32xf32> to vector<1x3x32xf32>
    tpu.vector_store %arg14[%c0_69, %c0_70, %c0_71], %273 {strides = array<i32>} : memref<4x3x32xf32, #tpu.memory_space<vmem>>, vector<1x3x32xf32>,
    %274 = vector.extract_strided_slice %269 {offsets = [3, 0], sizes = [3, 32], strides = [1, 1]} : vector<12x32xf32> to vector<3x32xf32>
    %c1 = arith.constant 1 : index
    %c0_72 = arith.constant 0 : index
    %c0_73 = arith.constant 0 : index
    %275 = vector.load %arg14[%c1, %c0_72, %c0_73] : memref<4x3x32xf32, #tpu.memory_space<vmem>>, vector<1x3x32xf32>
    %276 = vector.shape_cast %275 : vector<1x3x32xf32> to vector<3x32xf32>
    %277 = vector.shape_cast %274 : vector<3x32xf32> to vector<1x3x32xf32>
    tpu.vector_store %arg14[%c1, %c0_72, %c0_73], %277 {strides = array<i32>} : memref<4x3x32xf32, #tpu.memory_space<vmem>>, vector<1x3x32xf32>,
    %278 = vector.extract_strided_slice %269 {offsets = [6, 0], sizes = [3, 32], strides = [1, 1]} : vector<12x32xf32> to vector<3x32xf32>
    %c2 = arith.constant 2 : index
    %c0_74 = arith.constant 0 : index
    %c0_75 = arith.constant 0 : index
    %279 = vector.load %arg14[%c2, %c0_74, %c0_75] : memref<4x3x32xf32, #tpu.memory_space<vmem>>, vector<1x3x32xf32>
    %280 = vector.shape_cast %279 : vector<1x3x32xf32> to vector<3x32xf32>
    %281 = vector.shape_cast %278 : vector<3x32xf32> to vector<1x3x32xf32>
    tpu.vector_store %arg14[%c2, %c0_74, %c0_75], %281 {strides = array<i32>} : memref<4x3x32xf32, #tpu.memory_space<vmem>>, vector<1x3x32xf32>,
    %282 = vector.extract_strided_slice %269 {offsets = [9, 0], sizes = [3, 32], strides = [1, 1]} : vector<12x32xf32> to vector<3x32xf32>
    %c3 = arith.constant 3 : index
    %c0_76 = arith.constant 0 : index
    %c0_77 = arith.constant 0 : index
    %283 = vector.load %arg14[%c3, %c0_76, %c0_77] : memref<4x3x32xf32, #tpu.memory_space<vmem>>, vector<1x3x32xf32>
    %284 = vector.shape_cast %283 : vector<1x3x32xf32> to vector<3x32xf32>
    %285 = vector.shape_cast %282 : vector<3x32xf32> to vector<1x3x32xf32>
    tpu.vector_store %arg14[%c3, %c0_76, %c0_77], %285 {strides = array<i32>} : memref<4x3x32xf32, #tpu.memory_space<vmem>>, vector<1x3x32xf32>,
    return
  }
  func.func @transform_0(%arg0: i32) -> (i32, i32, i32, i32) {
    %c0_i32 = arith.constant 0 : i32
    %c0_i32_0 = arith.constant 0 : i32
    %c0_i32_1 = arith.constant 0 : i32
    %c0_i32_2 = arith.constant 0 : i32
    return %arg0, %c0_i32, %c0_i32_0, %c0_i32_1 : i32, i32, i32, i32
  }
  func.func @transform_1(%arg0: i32) -> (i32, i32) {
    %c0_i32 = arith.constant 0 : i32
    %c0_i32_0 = arith.constant 0 : i32
    %c0_i32_1 = arith.constant 0 : i32
    return %c0_i32, %c0_i32_0 : i32, i32
  }
  func.func @transform_2(%arg0: i32) -> (i32, i32) {
    %c0_i32 = arith.constant 0 : i32
    %c0_i32_0 = arith.constant 0 : i32
    %c0_i32_1 = arith.constant 0 : i32
    return %c0_i32, %c0_i32_0 : i32, i32
  }
  func.func @transform_3(%arg0: i32) -> (i32, i32) {
    %c0_i32 = arith.constant 0 : i32
    %c0_i32_0 = arith.constant 0 : i32
    %c0_i32_1 = arith.constant 0 : i32
    return %c0_i32, %c0_i32_0 : i32, i32
  }
  func.func @transform_4(%arg0: i32) -> (i32, i32) {
    %c0_i32 = arith.constant 0 : i32
    %c0_i32_0 = arith.constant 0 : i32
    %c0_i32_1 = arith.constant 0 : i32
    return %c0_i32, %c0_i32_0 : i32, i32
  }
  func.func @transform_5(%arg0: i32) -> (i32, i32) {
    %c0_i32 = arith.constant 0 : i32
    %c0_i32_0 = arith.constant 0 : i32
    %c0_i32_1 = arith.constant 0 : i32
    return %c0_i32, %c0_i32_0 : i32, i32
  }
  func.func @transform_6(%arg0: i32) -> (i32, i32) {
    %c0_i32 = arith.constant 0 : i32
    %c0_i32_0 = arith.constant 0 : i32
    %c0_i32_1 = arith.constant 0 : i32
    return %c0_i32, %c0_i32_0 : i32, i32
  }
  func.func @transform_7(%arg0: i32) -> (i32, i32) {
    %c0_i32 = arith.constant 0 : i32
    %c0_i32_0 = arith.constant 0 : i32
    %c0_i32_1 = arith.constant 0 : i32
    return %c0_i32, %c0_i32_0 : i32, i32
  }
  func.func @transform_8(%arg0: i32) -> (i32, i32) {
    %c0_i32 = arith.constant 0 : i32
    %c0_i32_0 = arith.constant 0 : i32
    %c0_i32_1 = arith.constant 0 : i32
    return %c0_i32, %c0_i32_0 : i32, i32
  }
  func.func @transform_9(%arg0: i32) -> (i32, i32) {
    %c0_i32 = arith.constant 0 : i32
    %c0_i32_0 = arith.constant 0 : i32
    %c0_i32_1 = arith.constant 0 : i32
    return %c0_i32, %c0_i32_0 : i32, i32
  }
  func.func @transform_10(%arg0: i32) -> (i32, i32) {
    %c0_i32 = arith.constant 0 : i32
    %c0_i32_0 = arith.constant 0 : i32
    %c0_i32_1 = arith.constant 0 : i32
    return %c0_i32, %c0_i32_0 : i32, i32
  }
  func.func @transform_11(%arg0: i32) -> (i32, i32) {
    %c0_i32 = arith.constant 0 : i32
    %c0_i32_0 = arith.constant 0 : i32
    %c0_i32_1 = arith.constant 0 : i32
    return %c0_i32, %c0_i32_0 : i32, i32
  }
  func.func @transform_12(%arg0: i32) -> (i32, i32) {
    %c0_i32 = arith.constant 0 : i32
    %c0_i32_0 = arith.constant 0 : i32
    %c0_i32_1 = arith.constant 0 : i32
    return %c0_i32, %c0_i32_0 : i32, i32
  }
  func.func @transform_13(%arg0: i32) -> (i32, i32, i32) {
    %c0_i32 = arith.constant 0 : i32
    %c0_i32_0 = arith.constant 0 : i32
    %c0_i32_1 = arith.constant 0 : i32
    return %arg0, %c0_i32, %c0_i32_0 : i32, i32, i32
  }
}

module attributes {stable_mosaic.version = 11 : i64} {
  func.func @_qsablock_kernel(%arg0: i32, %arg1: memref<4x8x8x32xbf16, #tpu.memory_space<vmem>>, %arg2: memref<9x32xf32, #tpu.memory_space<vmem>>, %arg3: memref<1x32xf32, #tpu.memory_space<vmem>>, %arg4: memref<1x32xf32, #tpu.memory_space<vmem>>, %arg5: memref<1x32xf32, #tpu.memory_space<vmem>>, %arg6: memref<12x32xbf16, #tpu.memory_space<vmem>>, %arg7: memref<12x32xf32, #tpu.memory_space<vmem>>, %arg8: memref<32x32xbf16, #tpu.memory_space<vmem>>, %arg9: memref<32x32xbf16, #tpu.memory_space<vmem>>, %arg10: memref<32x32xbf16, #tpu.memory_space<vmem>>, %arg11: memref<1x32xf32, #tpu.memory_space<vmem>>, %arg12: memref<1x32xf32, #tpu.memory_space<vmem>>, %arg13: memref<1x32xf32, #tpu.memory_space<vmem>>, %arg14: memref<4x3x32xf32, #tpu.memory_space<vmem>>) attributes {dimension_semantics = [#tpu.dimension_semantics<parallel>], iteration_bounds = array<i64: 2>, scalar_prefetch = 0 : i64, scratch_operands = 0 : i64, tpu.core_type = #tpu.core_type<tc>, window_params = [{transform_indices = @transform_0, window_bounds = array<i64: 4, 8, 8, 32>}, {pipeline_mode = #tpu.pipeline_mode<synchronous>, transform_indices = @transform_1, window_bounds = array<i64: 9, 32>}, {pipeline_mode = #tpu.pipeline_mode<synchronous>, transform_indices = @transform_2, window_bounds = array<i64: 1, 32>}, {pipeline_mode = #tpu.pipeline_mode<synchronous>, transform_indices = @transform_3, window_bounds = array<i64: 1, 32>}, {pipeline_mode = #tpu.pipeline_mode<synchronous>, transform_indices = @transform_4, window_bounds = array<i64: 1, 32>}, {pipeline_mode = #tpu.pipeline_mode<synchronous>, transform_indices = @transform_5, window_bounds = array<i64: 12, 32>}, {pipeline_mode = #tpu.pipeline_mode<synchronous>, transform_indices = @transform_6, window_bounds = array<i64: 12, 32>}, {pipeline_mode = #tpu.pipeline_mode<synchronous>, transform_indices = @transform_7, window_bounds = array<i64: 32, 32>}, {pipeline_mode = #tpu.pipeline_mode<synchronous>, transform_indices = @transform_8, window_bounds = array<i64: 32, 32>}, {pipeline_mode = #tpu.pipeline_mode<synchronous>, transform_indices = @transform_9, window_bounds = array<i64: 32, 32>}, {pipeline_mode = #tpu.pipeline_mode<synchronous>, transform_indices = @transform_10, window_bounds = array<i64: 1, 32>}, {pipeline_mode = #tpu.pipeline_mode<synchronous>, transform_indices = @transform_11, window_bounds = array<i64: 1, 32>}, {pipeline_mode = #tpu.pipeline_mode<synchronous>, transform_indices = @transform_12, window_bounds = array<i64: 1, 32>}, {transform_indices = @transform_13, window_bounds = array<i64: 4, 3, 32>}]} {
    %c0 = arith.constant 0 : index
    %c0_0 = arith.constant 0 : index
    %c0_1 = arith.constant 0 : index
    %c0_2 = arith.constant 0 : index
    %0 = vector.load %arg1[%c0, %c0_0, %c0_1, %c0_2] : memref<4x8x8x32xbf16, #tpu.memory_space<vmem>>, vector<4x8x8x32xbf16>
    %1 = arith.extf %0 : vector<4x8x8x32xbf16> to vector<4x8x8x32xf32>
    %c0_3 = arith.constant 0 : index
    %c0_4 = arith.constant 0 : index
    %2 = vector.load %arg2[%c0_3, %c0_4] : memref<9x32xf32, #tpu.memory_space<vmem>>, vector<9x32xf32>
    %3 = tpu.iota {dimensions = array<i32: 0>} : vector<8x1xi32>
    %cst = arith.constant 0.000000e+00 : f32
    %4 = vector.broadcast %cst : f32 to vector<4x1x8x32xf32>
    %c1_i32 = arith.constant 1 : i32
    %5 = tpu.dynamic_rotate %1 by %c1_i32 dim 2 : vector<4x8x8x32xf32>, i32 -> vector<4x8x8x32xf32>
    %c1_i32_5 = arith.constant 1 : i32
    %6 = vector.broadcast %c1_i32_5 : i32 to vector<8x1xi32>
    %7 = arith.cmpi sge, %3, %6 : vector<8x1xi32>
    %8 = arith.extui %7 : vector<8x1xi1> to vector<8x1xi32>
    %9 = arith.sitofp %8 : vector<8x1xi32> to vector<8x1xf32>
    %10 = vector.extract_strided_slice %5 {offsets = [0, 0, 0, 0], sizes = [4, 7, 8, 32], strides = [1, 1, 1, 1]} : vector<4x8x8x32xf32> to vector<4x7x8x32xf32>
    %11 = tpu.concatenate %4, %10 in 1 : vector<4x1x8x32xf32>, vector<4x7x8x32xf32> -> vector<4x8x8x32xf32>
    %12 = vector.extract_strided_slice %2 {offsets = [0, 0], sizes = [1, 32], strides = [1, 1]} : vector<9x32xf32> to vector<1x32xf32>
    %13 = vector.shape_cast %12 : vector<1x32xf32> to vector<32xf32>
    %14 = vector.shape_cast %13 : vector<32xf32> to vector<1x32xf32>
    %15 = vector.broadcast %9 : vector<8x1xf32> to vector<8x32xf32>
    %16 = vector.broadcast %14 : vector<1x32xf32> to vector<8x32xf32>
    %17 = arith.mulf %15, %16 : vector<8x32xf32>
    %18 = vector.shape_cast %17 : vector<8x32xf32> to vector<1x1x8x32xf32>
    %19 = vector.broadcast %18 : vector<1x1x8x32xf32> to vector<4x8x8x32xf32>
    %20 = arith.mulf %11, %19 : vector<4x8x8x32xf32>
    %21 = vector.extract_strided_slice %2 {offsets = [3, 0], sizes = [1, 32], strides = [1, 1]} : vector<9x32xf32> to vector<1x32xf32>
    %22 = vector.shape_cast %21 : vector<1x32xf32> to vector<32xf32>
    %23 = vector.shape_cast %22 : vector<32xf32> to vector<1x32xf32>
    %24 = vector.broadcast %9 : vector<8x1xf32> to vector<8x32xf32>
    %25 = vector.broadcast %23 : vector<1x32xf32> to vector<8x32xf32>
    %26 = arith.mulf %24, %25 : vector<8x32xf32>
    %27 = vector.shape_cast %26 : vector<8x32xf32> to vector<1x1x8x32xf32>
    %28 = vector.broadcast %27 : vector<1x1x8x32xf32> to vector<4x8x8x32xf32>
    %29 = arith.mulf %5, %28 : vector<4x8x8x32xf32>
    %30 = arith.addf %20, %29 : vector<4x8x8x32xf32>
    %31 = vector.extract_strided_slice %5 {offsets = [0, 1, 0, 0], sizes = [4, 7, 8, 32], strides = [1, 1, 1, 1]} : vector<4x8x8x32xf32> to vector<4x7x8x32xf32>
    %32 = tpu.concatenate %31, %4 in 1 : vector<4x7x8x32xf32>, vector<4x1x8x32xf32> -> vector<4x8x8x32xf32>
    %33 = vector.extract_strided_slice %2 {offsets = [6, 0], sizes = [1, 32], strides = [1, 1]} : vector<9x32xf32> to vector<1x32xf32>
    %34 = vector.shape_cast %33 : vector<1x32xf32> to vector<32xf32>
    %35 = vector.shape_cast %34 : vector<32xf32> to vector<1x32xf32>
    %36 = vector.broadcast %9 : vector<8x1xf32> to vector<8x32xf32>
    %37 = vector.broadcast %35 : vector<1x32xf32> to vector<8x32xf32>
    %38 = arith.mulf %36, %37 : vector<8x32xf32>
    %39 = vector.shape_cast %38 : vector<8x32xf32> to vector<1x1x8x32xf32>
    %40 = vector.broadcast %39 : vector<1x1x8x32xf32> to vector<4x8x8x32xf32>
    %41 = arith.mulf %32, %40 : vector<4x8x8x32xf32>
    %42 = arith.addf %30, %41 : vector<4x8x8x32xf32>
    %43 = vector.extract_strided_slice %1 {offsets = [0, 0, 0, 0], sizes = [4, 7, 8, 32], strides = [1, 1, 1, 1]} : vector<4x8x8x32xf32> to vector<4x7x8x32xf32>
    %44 = tpu.concatenate %4, %43 in 1 : vector<4x1x8x32xf32>, vector<4x7x8x32xf32> -> vector<4x8x8x32xf32>
    %45 = vector.extract_strided_slice %2 {offsets = [1, 0], sizes = [1, 32], strides = [1, 1]} : vector<9x32xf32> to vector<1x32xf32>
    %46 = vector.shape_cast %45 : vector<1x32xf32> to vector<32xf32>
    %47 = vector.shape_cast %46 : vector<32xf32> to vector<1x32xf32>
    %48 = vector.shape_cast %47 : vector<1x32xf32> to vector<1x1x1x32xf32>
    %49 = vector.broadcast %48 : vector<1x1x1x32xf32> to vector<4x8x8x32xf32>
    %50 = arith.mulf %44, %49 : vector<4x8x8x32xf32>
    %51 = arith.addf %42, %50 : vector<4x8x8x32xf32>
    %52 = vector.extract_strided_slice %2 {offsets = [4, 0], sizes = [1, 32], strides = [1, 1]} : vector<9x32xf32> to vector<1x32xf32>
    %53 = vector.shape_cast %52 : vector<1x32xf32> to vector<32xf32>
    %54 = vector.shape_cast %53 : vector<32xf32> to vector<1x32xf32>
    %55 = vector.shape_cast %54 : vector<1x32xf32> to vector<1x1x1x32xf32>
    %56 = vector.broadcast %55 : vector<1x1x1x32xf32> to vector<4x8x8x32xf32>
    %57 = arith.mulf %1, %56 : vector<4x8x8x32xf32>
    %58 = arith.addf %51, %57 : vector<4x8x8x32xf32>
    %59 = vector.extract_strided_slice %1 {offsets = [0, 1, 0, 0], sizes = [4, 7, 8, 32], strides = [1, 1, 1, 1]} : vector<4x8x8x32xf32> to vector<4x7x8x32xf32>
    %60 = tpu.concatenate %59, %4 in 1 : vector<4x7x8x32xf32>, vector<4x1x8x32xf32> -> vector<4x8x8x32xf32>
    %61 = vector.extract_strided_slice %2 {offsets = [7, 0], sizes = [1, 32], strides = [1, 1]} : vector<9x32xf32> to vector<1x32xf32>
    %62 = vector.shape_cast %61 : vector<1x32xf32> to vector<32xf32>
    %63 = vector.shape_cast %62 : vector<32xf32> to vector<1x32xf32>
    %64 = vector.shape_cast %63 : vector<1x32xf32> to vector<1x1x1x32xf32>
    %65 = vector.broadcast %64 : vector<1x1x1x32xf32> to vector<4x8x8x32xf32>
    %66 = arith.mulf %60, %65 : vector<4x8x8x32xf32>
    %67 = arith.addf %58, %66 : vector<4x8x8x32xf32>
    %c7_i32 = arith.constant 7 : i32
    %68 = tpu.dynamic_rotate %1 by %c7_i32 dim 2 : vector<4x8x8x32xf32>, i32 -> vector<4x8x8x32xf32>
    %c6_i32 = arith.constant 6 : i32
    %69 = vector.broadcast %c6_i32 : i32 to vector<8x1xi32>
    %70 = arith.cmpi sle, %3, %69 : vector<8x1xi32>
    %71 = arith.extui %70 : vector<8x1xi1> to vector<8x1xi32>
    %72 = arith.sitofp %71 : vector<8x1xi32> to vector<8x1xf32>
    %73 = vector.extract_strided_slice %68 {offsets = [0, 0, 0, 0], sizes = [4, 7, 8, 32], strides = [1, 1, 1, 1]} : vector<4x8x8x32xf32> to vector<4x7x8x32xf32>
    %74 = tpu.concatenate %4, %73 in 1 : vector<4x1x8x32xf32>, vector<4x7x8x32xf32> -> vector<4x8x8x32xf32>
    %75 = vector.extract_strided_slice %2 {offsets = [2, 0], sizes = [1, 32], strides = [1, 1]} : vector<9x32xf32> to vector<1x32xf32>
    %76 = vector.shape_cast %75 : vector<1x32xf32> to vector<32xf32>
    %77 = vector.shape_cast %76 : vector<32xf32> to vector<1x32xf32>
    %78 = vector.broadcast %72 : vector<8x1xf32> to vector<8x32xf32>
    %79 = vector.broadcast %77 : vector<1x32xf32> to vector<8x32xf32>
    %80 = arith.mulf %78, %79 : vector<8x32xf32>
    %81 = vector.shape_cast %80 : vector<8x32xf32> to vector<1x1x8x32xf32>
    %82 = vector.broadcast %81 : vector<1x1x8x32xf32> to vector<4x8x8x32xf32>
    %83 = arith.mulf %74, %82 : vector<4x8x8x32xf32>
    %84 = arith.addf %67, %83 : vector<4x8x8x32xf32>
    %85 = vector.extract_strided_slice %2 {offsets = [5, 0], sizes = [1, 32], strides = [1, 1]} : vector<9x32xf32> to vector<1x32xf32>
    %86 = vector.shape_cast %85 : vector<1x32xf32> to vector<32xf32>
    %87 = vector.shape_cast %86 : vector<32xf32> to vector<1x32xf32>
    %88 = vector.broadcast %72 : vector<8x1xf32> to vector<8x32xf32>
    %89 = vector.broadcast %87 : vector<1x32xf32> to vector<8x32xf32>
    %90 = arith.mulf %88, %89 : vector<8x32xf32>
    %91 = vector.shape_cast %90 : vector<8x32xf32> to vector<1x1x8x32xf32>
    %92 = vector.broadcast %91 : vector<1x1x8x32xf32> to vector<4x8x8x32xf32>
    %93 = arith.mulf %68, %92 : vector<4x8x8x32xf32>
    %94 = arith.addf %84, %93 : vector<4x8x8x32xf32>
    %95 = vector.extract_strided_slice %68 {offsets = [0, 1, 0, 0], sizes = [4, 7, 8, 32], strides = [1, 1, 1, 1]} : vector<4x8x8x32xf32> to vector<4x7x8x32xf32>
    %96 = tpu.concatenate %95, %4 in 1 : vector<4x7x8x32xf32>, vector<4x1x8x32xf32> -> vector<4x8x8x32xf32>
    %97 = vector.extract_strided_slice %2 {offsets = [8, 0], sizes = [1, 32], strides = [1, 1]} : vector<9x32xf32> to vector<1x32xf32>
    %98 = vector.shape_cast %97 : vector<1x32xf32> to vector<32xf32>
    %99 = vector.shape_cast %98 : vector<32xf32> to vector<1x32xf32>
    %100 = vector.broadcast %72 : vector<8x1xf32> to vector<8x32xf32>
    %101 = vector.broadcast %99 : vector<1x32xf32> to vector<8x32xf32>
    %102 = arith.mulf %100, %101 : vector<8x32xf32>
    %103 = vector.shape_cast %102 : vector<8x32xf32> to vector<1x1x8x32xf32>
    %104 = vector.broadcast %103 : vector<1x1x8x32xf32> to vector<4x8x8x32xf32>
    %105 = arith.mulf %96, %104 : vector<4x8x8x32xf32>
    %106 = arith.addf %94, %105 : vector<4x8x8x32xf32>
    %107 = arith.addf %1, %106 : vector<4x8x8x32xf32>
    %c0_6 = arith.constant 0 : index
    %c0_7 = arith.constant 0 : index
    %108 = vector.load %arg3[%c0_6, %c0_7] : memref<1x32xf32, #tpu.memory_space<vmem>>, vector<1x32xf32>
    %109 = vector.shape_cast %108 : vector<1x32xf32> to vector<1x1x1x32xf32>
    %110 = vector.broadcast %109 : vector<1x1x1x32xf32> to vector<4x8x8x32xf32>
    %111 = arith.addf %107, %110 : vector<4x8x8x32xf32>
    %112 = vector.shape_cast %111 : vector<4x8x8x32xf32> to vector<256x32xf32>
    %c0_8 = arith.constant 0 : index
    %c0_9 = arith.constant 0 : index
    %113 = vector.load %arg4[%c0_8, %c0_9] : memref<1x32xf32, #tpu.memory_space<vmem>>, vector<1x32xf32>
    %c0_10 = arith.constant 0 : index
    %c0_11 = arith.constant 0 : index
    %114 = vector.load %arg5[%c0_10, %c0_11] : memref<1x32xf32, #tpu.memory_space<vmem>>, vector<1x32xf32>
    %cst_12 = arith.constant dense<0.000000e+00> : vector<256xf32>
    %115 = vector.multi_reduction <add>, %112, %cst_12 [1] : vector<256x32xf32> to vector<256xf32>
    %116 = vector.shape_cast %115 : vector<256xf32> to vector<256x1xf32>
    %cst_13 = arith.constant 3.200000e+01 : f32
    %117 = vector.broadcast %cst_13 : f32 to vector<256x1xf32>
    %118 = arith.divf %116, %117 : vector<256x1xf32>
    %119 = vector.broadcast %118 : vector<256x1xf32> to vector<256x32xf32>
    %120 = arith.subf %112, %119 : vector<256x32xf32>
    %121 = arith.mulf %120, %120 : vector<256x32xf32>
    %cst_14 = arith.constant dense<0.000000e+00> : vector<256xf32>
    %122 = vector.multi_reduction <add>, %121, %cst_14 [1] : vector<256x32xf32> to vector<256xf32>
    %123 = vector.shape_cast %122 : vector<256xf32> to vector<256x1xf32>
    %cst_15 = arith.constant 3.200000e+01 : f32
    %124 = vector.broadcast %cst_15 : f32 to vector<256x1xf32>
    %125 = arith.divf %123, %124 : vector<256x1xf32>
    %cst_16 = arith.constant 9.99999974E-6 : f32
    %126 = vector.broadcast %cst_16 : f32 to vector<256x1xf32>
    %127 = arith.addf %125, %126 : vector<256x1xf32>
    %128 = math.rsqrt %127 : vector<256x1xf32>
    %129 = vector.broadcast %128 : vector<256x1xf32> to vector<256x32xf32>
    %130 = arith.mulf %120, %129 : vector<256x32xf32>
    %131 = vector.broadcast %113 : vector<1x32xf32> to vector<256x32xf32>
    %132 = arith.mulf %130, %131 : vector<256x32xf32>
    %133 = vector.broadcast %114 : vector<1x32xf32> to vector<256x32xf32>
    %134 = arith.addf %132, %133 : vector<256x32xf32>
    %135 = arith.truncf %134 : vector<256x32xf32> to vector<256x32xbf16>
    %c0_17 = arith.constant 0 : index
    %c0_18 = arith.constant 0 : index
    %136 = vector.load %arg8[%c0_17, %c0_18] : memref<32x32xbf16, #tpu.memory_space<vmem>>, vector<32x32xbf16>
    %cst_19 = arith.constant dense<0.000000e+00> : vector<256x32xf32>
    %137 = tpu.matmul %135, %136, %cst_19 {dimension_numbers = #tpu.dot_dimension_numbers<[1], [0], [0], [1], [0, 0, 1, 1], [], []>} : vector<256x32xbf16>, vector<32x32xbf16>, vector<256x32xf32> -> vector<256x32xf32>
    %138 = arith.truncf %137 : vector<256x32xf32> to vector<256x32xbf16>
    %c0_20 = arith.constant 0 : index
    %c0_21 = arith.constant 0 : index
    %139 = vector.load %arg9[%c0_20, %c0_21] : memref<32x32xbf16, #tpu.memory_space<vmem>>, vector<32x32xbf16>
    %cst_22 = arith.constant dense<0.000000e+00> : vector<256x32xf32>
    %140 = tpu.matmul %135, %139, %cst_22 {dimension_numbers = #tpu.dot_dimension_numbers<[1], [0], [0], [1], [0, 0, 1, 1], [], []>} : vector<256x32xbf16>, vector<32x32xbf16>, vector<256x32xf32> -> vector<256x32xf32>
    %141 = arith.truncf %140 : vector<256x32xf32> to vector<256x32xbf16>
    %c0_23 = arith.constant 0 : index
    %c0_24 = arith.constant 0 : index
    %142 = vector.load %arg6[%c0_23, %c0_24] : memref<12x32xbf16, #tpu.memory_space<vmem>>, vector<12x32xbf16>
    %c0_25 = arith.constant 0 : index
    %c0_26 = arith.constant 0 : index
    %143 = vector.load %arg7[%c0_25, %c0_26] : memref<12x32xf32, #tpu.memory_space<vmem>>, vector<12x32xf32>
    %144 = vector.extract_strided_slice %138 {offsets = [0, 0], sizes = [64, 32], strides = [1, 1]} : vector<256x32xbf16> to vector<64x32xbf16>
    %145 = vector.extract_strided_slice %141 {offsets = [0, 0], sizes = [64, 32], strides = [1, 1]} : vector<256x32xbf16> to vector<64x32xbf16>
    %cst_27 = arith.constant dense<0.000000e+00> : vector<12x64xf32>
    %146 = tpu.matmul %142, %144, %cst_27 {dimension_numbers = #tpu.dot_dimension_numbers<[1], [1], [0], [0], [0, 0, 1, 0], [], []>} : vector<12x32xbf16>, vector<64x32xbf16>, vector<12x64xf32> -> vector<12x64xf32>
    %cst_28 = arith.constant dense<0xFF800000> : vector<12xf32>
    %147 = vector.multi_reduction <maximumf>, %146, %cst_28 [1] : vector<12x64xf32> to vector<12xf32>
    %148 = vector.shape_cast %147 : vector<12xf32> to vector<12x1xf32>
    %149 = vector.broadcast %148 : vector<12x1xf32> to vector<12x64xf32>
    %150 = arith.subf %146, %149 : vector<12x64xf32>
    %151 = math.exp %150 : vector<12x64xf32>
    %cst_29 = arith.constant dense<0.000000e+00> : vector<12xf32>
    %152 = vector.multi_reduction <add>, %151, %cst_29 [1] : vector<12x64xf32> to vector<12xf32>
    %153 = vector.shape_cast %152 : vector<12xf32> to vector<12x1xf32>
    %154 = vector.broadcast %153 : vector<12x1xf32> to vector<12x64xf32>
    %155 = arith.divf %151, %154 : vector<12x64xf32>
    %156 = arith.truncf %155 : vector<12x64xf32> to vector<12x64xbf16>
    %cst_30 = arith.constant dense<0.000000e+00> : vector<12x32xf32>
    %157 = tpu.matmul %156, %145, %cst_30 {dimension_numbers = #tpu.dot_dimension_numbers<[1], [0], [0], [1], [0, 0, 1, 1], [], []>} : vector<12x64xbf16>, vector<64x32xbf16>, vector<12x32xf32> -> vector<12x32xf32>
    %158 = arith.mulf %157, %143 : vector<12x32xf32>
    %159 = vector.extract_strided_slice %158 {offsets = [0, 0], sizes = [4, 32], strides = [1, 1]} : vector<12x32xf32> to vector<4x32xf32>
    %cst_31 = arith.constant dense<0.000000e+00> : vector<32xf32>
    %160 = vector.multi_reduction <add>, %159, %cst_31 [0] : vector<4x32xf32> to vector<32xf32>
    %161 = vector.shape_cast %160 : vector<32xf32> to vector<1x32xf32>
    %162 = vector.extract_strided_slice %158 {offsets = [4, 0], sizes = [4, 32], strides = [1, 1]} : vector<12x32xf32> to vector<4x32xf32>
    %cst_32 = arith.constant dense<0.000000e+00> : vector<32xf32>
    %163 = vector.multi_reduction <add>, %162, %cst_32 [0] : vector<4x32xf32> to vector<32xf32>
    %164 = vector.shape_cast %163 : vector<32xf32> to vector<1x32xf32>
    %165 = vector.extract_strided_slice %158 {offsets = [8, 0], sizes = [4, 32], strides = [1, 1]} : vector<12x32xf32> to vector<4x32xf32>
    %cst_33 = arith.constant dense<0.000000e+00> : vector<32xf32>
    %166 = vector.multi_reduction <add>, %165, %cst_33 [0] : vector<4x32xf32> to vector<32xf32>
    %167 = vector.shape_cast %166 : vector<32xf32> to vector<1x32xf32>
    %168 = vector.extract_strided_slice %138 {offsets = [64, 0], sizes = [64, 32], strides = [1, 1]} : vector<256x32xbf16> to vector<64x32xbf16>
    %169 = vector.extract_strided_slice %141 {offsets = [64, 0], sizes = [64, 32], strides = [1, 1]} : vector<256x32xbf16> to vector<64x32xbf16>
    %cst_34 = arith.constant dense<0.000000e+00> : vector<12x64xf32>
    %170 = tpu.matmul %142, %168, %cst_34 {dimension_numbers = #tpu.dot_dimension_numbers<[1], [1], [0], [0], [0, 0, 1, 0], [], []>} : vector<12x32xbf16>, vector<64x32xbf16>, vector<12x64xf32> -> vector<12x64xf32>
    %cst_35 = arith.constant dense<0xFF800000> : vector<12xf32>
    %171 = vector.multi_reduction <maximumf>, %170, %cst_35 [1] : vector<12x64xf32> to vector<12xf32>
    %172 = vector.shape_cast %171 : vector<12xf32> to vector<12x1xf32>
    %173 = vector.broadcast %172 : vector<12x1xf32> to vector<12x64xf32>
    %174 = arith.subf %170, %173 : vector<12x64xf32>
    %175 = math.exp %174 : vector<12x64xf32>
    %cst_36 = arith.constant dense<0.000000e+00> : vector<12xf32>
    %176 = vector.multi_reduction <add>, %175, %cst_36 [1] : vector<12x64xf32> to vector<12xf32>
    %177 = vector.shape_cast %176 : vector<12xf32> to vector<12x1xf32>
    %178 = vector.broadcast %177 : vector<12x1xf32> to vector<12x64xf32>
    %179 = arith.divf %175, %178 : vector<12x64xf32>
    %180 = arith.truncf %179 : vector<12x64xf32> to vector<12x64xbf16>
    %cst_37 = arith.constant dense<0.000000e+00> : vector<12x32xf32>
    %181 = tpu.matmul %180, %169, %cst_37 {dimension_numbers = #tpu.dot_dimension_numbers<[1], [0], [0], [1], [0, 0, 1, 1], [], []>} : vector<12x64xbf16>, vector<64x32xbf16>, vector<12x32xf32> -> vector<12x32xf32>
    %182 = arith.mulf %181, %143 : vector<12x32xf32>
    %183 = vector.extract_strided_slice %182 {offsets = [0, 0], sizes = [4, 32], strides = [1, 1]} : vector<12x32xf32> to vector<4x32xf32>
    %cst_38 = arith.constant dense<0.000000e+00> : vector<32xf32>
    %184 = vector.multi_reduction <add>, %183, %cst_38 [0] : vector<4x32xf32> to vector<32xf32>
    %185 = vector.shape_cast %184 : vector<32xf32> to vector<1x32xf32>
    %186 = vector.extract_strided_slice %182 {offsets = [4, 0], sizes = [4, 32], strides = [1, 1]} : vector<12x32xf32> to vector<4x32xf32>
    %cst_39 = arith.constant dense<0.000000e+00> : vector<32xf32>
    %187 = vector.multi_reduction <add>, %186, %cst_39 [0] : vector<4x32xf32> to vector<32xf32>
    %188 = vector.shape_cast %187 : vector<32xf32> to vector<1x32xf32>
    %189 = vector.extract_strided_slice %182 {offsets = [8, 0], sizes = [4, 32], strides = [1, 1]} : vector<12x32xf32> to vector<4x32xf32>
    %cst_40 = arith.constant dense<0.000000e+00> : vector<32xf32>
    %190 = vector.multi_reduction <add>, %189, %cst_40 [0] : vector<4x32xf32> to vector<32xf32>
    %191 = vector.shape_cast %190 : vector<32xf32> to vector<1x32xf32>
    %192 = vector.extract_strided_slice %138 {offsets = [128, 0], sizes = [64, 32], strides = [1, 1]} : vector<256x32xbf16> to vector<64x32xbf16>
    %193 = vector.extract_strided_slice %141 {offsets = [128, 0], sizes = [64, 32], strides = [1, 1]} : vector<256x32xbf16> to vector<64x32xbf16>
    %cst_41 = arith.constant dense<0.000000e+00> : vector<12x64xf32>
    %194 = tpu.matmul %142, %192, %cst_41 {dimension_numbers = #tpu.dot_dimension_numbers<[1], [1], [0], [0], [0, 0, 1, 0], [], []>} : vector<12x32xbf16>, vector<64x32xbf16>, vector<12x64xf32> -> vector<12x64xf32>
    %cst_42 = arith.constant dense<0xFF800000> : vector<12xf32>
    %195 = vector.multi_reduction <maximumf>, %194, %cst_42 [1] : vector<12x64xf32> to vector<12xf32>
    %196 = vector.shape_cast %195 : vector<12xf32> to vector<12x1xf32>
    %197 = vector.broadcast %196 : vector<12x1xf32> to vector<12x64xf32>
    %198 = arith.subf %194, %197 : vector<12x64xf32>
    %199 = math.exp %198 : vector<12x64xf32>
    %cst_43 = arith.constant dense<0.000000e+00> : vector<12xf32>
    %200 = vector.multi_reduction <add>, %199, %cst_43 [1] : vector<12x64xf32> to vector<12xf32>
    %201 = vector.shape_cast %200 : vector<12xf32> to vector<12x1xf32>
    %202 = vector.broadcast %201 : vector<12x1xf32> to vector<12x64xf32>
    %203 = arith.divf %199, %202 : vector<12x64xf32>
    %204 = arith.truncf %203 : vector<12x64xf32> to vector<12x64xbf16>
    %cst_44 = arith.constant dense<0.000000e+00> : vector<12x32xf32>
    %205 = tpu.matmul %204, %193, %cst_44 {dimension_numbers = #tpu.dot_dimension_numbers<[1], [0], [0], [1], [0, 0, 1, 1], [], []>} : vector<12x64xbf16>, vector<64x32xbf16>, vector<12x32xf32> -> vector<12x32xf32>
    %206 = arith.mulf %205, %143 : vector<12x32xf32>
    %207 = vector.extract_strided_slice %206 {offsets = [0, 0], sizes = [4, 32], strides = [1, 1]} : vector<12x32xf32> to vector<4x32xf32>
    %cst_45 = arith.constant dense<0.000000e+00> : vector<32xf32>
    %208 = vector.multi_reduction <add>, %207, %cst_45 [0] : vector<4x32xf32> to vector<32xf32>
    %209 = vector.shape_cast %208 : vector<32xf32> to vector<1x32xf32>
    %210 = vector.extract_strided_slice %206 {offsets = [4, 0], sizes = [4, 32], strides = [1, 1]} : vector<12x32xf32> to vector<4x32xf32>
    %cst_46 = arith.constant dense<0.000000e+00> : vector<32xf32>
    %211 = vector.multi_reduction <add>, %210, %cst_46 [0] : vector<4x32xf32> to vector<32xf32>
    %212 = vector.shape_cast %211 : vector<32xf32> to vector<1x32xf32>
    %213 = vector.extract_strided_slice %206 {offsets = [8, 0], sizes = [4, 32], strides = [1, 1]} : vector<12x32xf32> to vector<4x32xf32>
    %cst_47 = arith.constant dense<0.000000e+00> : vector<32xf32>
    %214 = vector.multi_reduction <add>, %213, %cst_47 [0] : vector<4x32xf32> to vector<32xf32>
    %215 = vector.shape_cast %214 : vector<32xf32> to vector<1x32xf32>
    %216 = vector.extract_strided_slice %138 {offsets = [192, 0], sizes = [64, 32], strides = [1, 1]} : vector<256x32xbf16> to vector<64x32xbf16>
    %217 = vector.extract_strided_slice %141 {offsets = [192, 0], sizes = [64, 32], strides = [1, 1]} : vector<256x32xbf16> to vector<64x32xbf16>
    %cst_48 = arith.constant dense<0.000000e+00> : vector<12x64xf32>
    %218 = tpu.matmul %142, %216, %cst_48 {dimension_numbers = #tpu.dot_dimension_numbers<[1], [1], [0], [0], [0, 0, 1, 0], [], []>} : vector<12x32xbf16>, vector<64x32xbf16>, vector<12x64xf32> -> vector<12x64xf32>
    %cst_49 = arith.constant dense<0xFF800000> : vector<12xf32>
    %219 = vector.multi_reduction <maximumf>, %218, %cst_49 [1] : vector<12x64xf32> to vector<12xf32>
    %220 = vector.shape_cast %219 : vector<12xf32> to vector<12x1xf32>
    %221 = vector.broadcast %220 : vector<12x1xf32> to vector<12x64xf32>
    %222 = arith.subf %218, %221 : vector<12x64xf32>
    %223 = math.exp %222 : vector<12x64xf32>
    %cst_50 = arith.constant dense<0.000000e+00> : vector<12xf32>
    %224 = vector.multi_reduction <add>, %223, %cst_50 [1] : vector<12x64xf32> to vector<12xf32>
    %225 = vector.shape_cast %224 : vector<12xf32> to vector<12x1xf32>
    %226 = vector.broadcast %225 : vector<12x1xf32> to vector<12x64xf32>
    %227 = arith.divf %223, %226 : vector<12x64xf32>
    %228 = arith.truncf %227 : vector<12x64xf32> to vector<12x64xbf16>
    %cst_51 = arith.constant dense<0.000000e+00> : vector<12x32xf32>
    %229 = tpu.matmul %228, %217, %cst_51 {dimension_numbers = #tpu.dot_dimension_numbers<[1], [0], [0], [1], [0, 0, 1, 1], [], []>} : vector<12x64xbf16>, vector<64x32xbf16>, vector<12x32xf32> -> vector<12x32xf32>
    %230 = arith.mulf %229, %143 : vector<12x32xf32>
    %231 = vector.extract_strided_slice %230 {offsets = [0, 0], sizes = [4, 32], strides = [1, 1]} : vector<12x32xf32> to vector<4x32xf32>
    %cst_52 = arith.constant dense<0.000000e+00> : vector<32xf32>
    %232 = vector.multi_reduction <add>, %231, %cst_52 [0] : vector<4x32xf32> to vector<32xf32>
    %233 = vector.shape_cast %232 : vector<32xf32> to vector<1x32xf32>
    %234 = vector.extract_strided_slice %230 {offsets = [4, 0], sizes = [4, 32], strides = [1, 1]} : vector<12x32xf32> to vector<4x32xf32>
    %cst_53 = arith.constant dense<0.000000e+00> : vector<32xf32>
    %235 = vector.multi_reduction <add>, %234, %cst_53 [0] : vector<4x32xf32> to vector<32xf32>
    %236 = vector.shape_cast %235 : vector<32xf32> to vector<1x32xf32>
    %237 = vector.extract_strided_slice %230 {offsets = [8, 0], sizes = [4, 32], strides = [1, 1]} : vector<12x32xf32> to vector<4x32xf32>
    %cst_54 = arith.constant dense<0.000000e+00> : vector<32xf32>
    %238 = vector.multi_reduction <add>, %237, %cst_54 [0] : vector<4x32xf32> to vector<32xf32>
    %239 = vector.shape_cast %238 : vector<32xf32> to vector<1x32xf32>
    %240 = tpu.concatenate %161, %164, %167, %185, %188, %191, %209, %212, %215, %233, %236, %239 in 0 : vector<1x32xf32>, vector<1x32xf32>, vector<1x32xf32>, vector<1x32xf32>, vector<1x32xf32>, vector<1x32xf32>, vector<1x32xf32>, vector<1x32xf32>, vector<1x32xf32>, vector<1x32xf32>, vector<1x32xf32>, vector<1x32xf32> -> vector<12x32xf32>
    %241 = arith.truncf %240 : vector<12x32xf32> to vector<12x32xbf16>
    %c0_55 = arith.constant 0 : index
    %c0_56 = arith.constant 0 : index
    %242 = vector.load %arg10[%c0_55, %c0_56] : memref<32x32xbf16, #tpu.memory_space<vmem>>, vector<32x32xbf16>
    %cst_57 = arith.constant dense<0.000000e+00> : vector<12x32xf32>
    %243 = tpu.matmul %241, %242, %cst_57 {dimension_numbers = #tpu.dot_dimension_numbers<[1], [0], [0], [1], [0, 0, 1, 1], [], []>} : vector<12x32xbf16>, vector<32x32xbf16>, vector<12x32xf32> -> vector<12x32xf32>
    %c0_58 = arith.constant 0 : index
    %c0_59 = arith.constant 0 : index
    %244 = vector.load %arg11[%c0_58, %c0_59] : memref<1x32xf32, #tpu.memory_space<vmem>>, vector<1x32xf32>
    %245 = vector.broadcast %244 : vector<1x32xf32> to vector<12x32xf32>
    %246 = arith.addf %243, %245 : vector<12x32xf32>
    %c0_60 = arith.constant 0 : index
    %c0_61 = arith.constant 0 : index
    %247 = vector.load %arg12[%c0_60, %c0_61] : memref<1x32xf32, #tpu.memory_space<vmem>>, vector<1x32xf32>
    %c0_62 = arith.constant 0 : index
    %c0_63 = arith.constant 0 : index
    %248 = vector.load %arg13[%c0_62, %c0_63] : memref<1x32xf32, #tpu.memory_space<vmem>>, vector<1x32xf32>
    %cst_64 = arith.constant dense<0.000000e+00> : vector<12xf32>
    %249 = vector.multi_reduction <add>, %246, %cst_64 [1] : vector<12x32xf32> to vector<12xf32>
    %250 = vector.shape_cast %249 : vector<12xf32> to vector<12x1xf32>
    %cst_65 = arith.constant 3.200000e+01 : f32
    %251 = vector.broadcast %cst_65 : f32 to vector<12x1xf32>
    %252 = arith.divf %250, %251 : vector<12x1xf32>
    %253 = vector.broadcast %252 : vector<12x1xf32> to vector<12x32xf32>
    %254 = arith.subf %246, %253 : vector<12x32xf32>
    %255 = arith.mulf %254, %254 : vector<12x32xf32>
    %cst_66 = arith.constant dense<0.000000e+00> : vector<12xf32>
    %256 = vector.multi_reduction <add>, %255, %cst_66 [1] : vector<12x32xf32> to vector<12xf32>
    %257 = vector.shape_cast %256 : vector<12xf32> to vector<12x1xf32>
    %cst_67 = arith.constant 3.200000e+01 : f32
    %258 = vector.broadcast %cst_67 : f32 to vector<12x1xf32>
    %259 = arith.divf %257, %258 : vector<12x1xf32>
    %cst_68 = arith.constant 9.99999974E-6 : f32
    %260 = vector.broadcast %cst_68 : f32 to vector<12x1xf32>
    %261 = arith.addf %259, %260 : vector<12x1xf32>
    %262 = math.rsqrt %261 : vector<12x1xf32>
    %263 = vector.broadcast %262 : vector<12x1xf32> to vector<12x32xf32>
    %264 = arith.mulf %254, %263 : vector<12x32xf32>
    %265 = vector.broadcast %247 : vector<1x32xf32> to vector<12x32xf32>
    %266 = arith.mulf %264, %265 : vector<12x32xf32>
    %267 = vector.broadcast %248 : vector<1x32xf32> to vector<12x32xf32>
    %268 = arith.addf %266, %267 : vector<12x32xf32>
    %269 = arith.addf %246, %268 : vector<12x32xf32>
    %270 = vector.extract_strided_slice %269 {offsets = [0, 0], sizes = [3, 32], strides = [1, 1]} : vector<12x32xf32> to vector<3x32xf32>
    %c0_69 = arith.constant 0 : index
    %c0_70 = arith.constant 0 : index
    %c0_71 = arith.constant 0 : index
    %271 = vector.load %arg14[%c0_69, %c0_70, %c0_71] : memref<4x3x32xf32, #tpu.memory_space<vmem>>, vector<1x3x32xf32>
    %272 = vector.shape_cast %271 : vector<1x3x32xf32> to vector<3x32xf32>
    %273 = vector.shape_cast %270 : vector<3x32xf32> to vector<1x3x32xf32>
    tpu.vector_store %arg14[%c0_69, %c0_70, %c0_71], %273 {strides = array<i32>} : memref<4x3x32xf32, #tpu.memory_space<vmem>>, vector<1x3x32xf32>,
    %274 = vector.extract_strided_slice %269 {offsets = [3, 0], sizes = [3, 32], strides = [1, 1]} : vector<12x32xf32> to vector<3x32xf32>
    %c1 = arith.constant 1 : index
    %c0_72 = arith.constant 0 : index
    %c0_73 = arith.constant 0 : index
    %275 = vector.load %arg14[%c1, %c0_72, %c0_73] : memref<4x3x32xf32, #tpu.memory_space<vmem>>, vector<1x3x32xf32>
    %276 = vector.shape_cast %275 : vector<1x3x32xf32> to vector<3x32xf32>
    %277 = vector.shape_cast %274 : vector<3x32xf32> to vector<1x3x32xf32>
    tpu.vector_store %arg14[%c1, %c0_72, %c0_73], %277 {strides = array<i32>} : memref<4x3x32xf32, #tpu.memory_space<vmem>>, vector<1x3x32xf32>,
    %278 = vector.extract_strided_slice %269 {offsets = [6, 0], sizes = [3, 32], strides = [1, 1]} : vector<12x32xf32> to vector<3x32xf32>
    %c2 = arith.constant 2 : index
    %c0_74 = arith.constant 0 : index
    %c0_75 = arith.constant 0 : index
    %279 = vector.load %arg14[%c2, %c0_74, %c0_75] : memref<4x3x32xf32, #tpu.memory_space<vmem>>, vector<1x3x32xf32>
    %280 = vector.shape_cast %279 : vector<1x3x32xf32> to vector<3x32xf32>
    %281 = vector.shape_cast %278 : vector<3x32xf32> to vector<1x3x32xf32>
    tpu.vector_store %arg14[%c2, %c0_74, %c0_75], %281 {strides = array<i32>} : memref<4x3x32xf32, #tpu.memory_space<vmem>>, vector<1x3x32xf32>,
    %282 = vector.extract_strided_slice %269 {offsets = [9, 0], sizes = [3, 32], strides = [1, 1]} : vector<12x32xf32> to vector<3x32xf32>
    %c3 = arith.constant 3 : index
    %c0_76 = arith.constant 0 : index
    %c0_77 = arith.constant 0 : index
    %283 = vector.load %arg14[%c3, %c0_76, %c0_77] : memref<4x3x32xf32, #tpu.memory_space<vmem>>, vector<1x3x32xf32>
    %284 = vector.shape_cast %283 : vector<1x3x32xf32> to vector<3x32xf32>
    %285 = vector.shape_cast %282 : vector<3x32xf32> to vector<1x3x32xf32>
    tpu.vector_store %arg14[%c3, %c0_76, %c0_77], %285 {strides = array<i32>} : memref<4x3x32xf32, #tpu.memory_space<vmem>>, vector<1x3x32xf32>,
    return
  }
  func.func @transform_0(%arg0: i32) -> (i32, i32, i32, i32) {
    %c0_i32 = arith.constant 0 : i32
    %c0_i32_0 = arith.constant 0 : i32
    %c0_i32_1 = arith.constant 0 : i32
    %c0_i32_2 = arith.constant 0 : i32
    return %arg0, %c0_i32, %c0_i32_0, %c0_i32_1 : i32, i32, i32, i32
  }
  func.func @transform_1(%arg0: i32) -> (i32, i32) {
    %c0_i32 = arith.constant 0 : i32
    %c0_i32_0 = arith.constant 0 : i32
    %c0_i32_1 = arith.constant 0 : i32
    return %c0_i32, %c0_i32_0 : i32, i32
  }
  func.func @transform_2(%arg0: i32) -> (i32, i32) {
    %c0_i32 = arith.constant 0 : i32
    %c0_i32_0 = arith.constant 0 : i32
    %c0_i32_1 = arith.constant 0 : i32
    return %c0_i32, %c0_i32_0 : i32, i32
  }
  func.func @transform_3(%arg0: i32) -> (i32, i32) {
    %c0_i32 = arith.constant 0 : i32
    %c0_i32_0 = arith.constant 0 : i32
    %c0_i32_1 = arith.constant 0 : i32
    return %c0_i32, %c0_i32_0 : i32, i32
  }
  func.func @transform_4(%arg0: i32) -> (i32, i32) {
    %c0_i32 = arith.constant 0 : i32
    %c0_i32_0 = arith.constant 0 : i32
    %c0_i32_1 = arith.constant 0 : i32
    return %c0_i32, %c0_i32_0 : i32, i32
  }
  func.func @transform_5(%arg0: i32) -> (i32, i32) {
    %c0_i32 = arith.constant 0 : i32
    %c0_i32_0 = arith.constant 0 : i32
    %c0_i32_1 = arith.constant 0 : i32
    return %c0_i32, %c0_i32_0 : i32, i32
  }
  func.func @transform_6(%arg0: i32) -> (i32, i32) {
    %c0_i32 = arith.constant 0 : i32
    %c0_i32_0 = arith.constant 0 : i32
    %c0_i32_1 = arith.constant 0 : i32
    return %c0_i32, %c0_i32_0 : i32, i32
  }
  func.func @transform_7(%arg0: i32) -> (i32, i32) {
    %c0_i32 = arith.constant 0 : i32
    %c0_i32_0 = arith.constant 0 : i32
    %c0_i32_1 = arith.constant 0 : i32
    return %c0_i32, %c0_i32_0 : i32, i32
  }
  func.func @transform_8(%arg0: i32) -> (i32, i32) {
    %c0_i32 = arith.constant 0 : i32
    %c0_i32_0 = arith.constant 0 : i32
    %c0_i32_1 = arith.constant 0 : i32
    return %c0_i32, %c0_i32_0 : i32, i32
  }
  func.func @transform_9(%arg0: i32) -> (i32, i32) {
    %c0_i32 = arith.constant 0 : i32
    %c0_i32_0 = arith.constant 0 : i32
    %c0_i32_1 = arith.constant 0 : i32
    return %c0_i32, %c0_i32_0 : i32, i32
  }
  func.func @transform_10(%arg0: i32) -> (i32, i32) {
    %c0_i32 = arith.constant 0 : i32
    %c0_i32_0 = arith.constant 0 : i32
    %c0_i32_1 = arith.constant 0 : i32
    return %c0_i32, %c0_i32_0 : i32, i32
  }
  func.func @transform_11(%arg0: i32) -> (i32, i32) {
    %c0_i32 = arith.constant 0 : i32
    %c0_i32_0 = arith.constant 0 : i32
    %c0_i32_1 = arith.constant 0 : i32
    return %c0_i32, %c0_i32_0 : i32, i32
  }
  func.func @transform_12(%arg0: i32) -> (i32, i32) {
    %c0_i32 = arith.constant 0 : i32
    %c0_i32_0 = arith.constant 0 : i32
    %c0_i32_1 = arith.constant 0 : i32
    return %c0_i32, %c0_i32_0 : i32, i32
  }
  func.func @transform_13(%arg0: i32) -> (i32, i32, i32) {
    %c0_i32 = arith.constant 0 : i32
    %c0_i32_0 = arith.constant 0 : i32
    %c0_i32_1 = arith.constant 0 : i32
    return %arg0, %c0_i32, %c0_i32_0 : i32, i32, i32
  }
}

</mosaic_0001>

<bundles_post_ra>
// kernel: tpu_custom_call.1
= control target key start
LH: loop header
LB: loop body
LE: loop exit
PB: predicated region body
PF: predicated region fallthrough
CT: control target
= control target key end

     0   :  { %s5775_s0 = inlined_call_operand.hbm [shape: bf16[8,8,8,32], index: 0, kind: input, shape index: {}]   ;;  %s5776_s1 = inlined_call_operand.hbm [shape: f32[9,32], index: 1, kind: input, shape index: {}]   ;;  %s5777_s2 = inlined_call_operand.vmem [shape: f32[1,32], index: 2, kind: input, shape index: {}]   ;;  %s5778_s3 = inlined_call_operand.vmem [shape: f32[1,32], index: 3, kind: input, shape index: {}]   ;;  %s5779_s4 = inlined_call_operand.hbm [shape: f32[1,32], index: 4, kind: input, shape index: {}]   ;;  %s5780_s5 = inlined_call_operand.hbm [shape: bf16[12,32], index: 5, kind: input, shape index: {}]   ;;  %s5781_s6 = inlined_call_operand.vmem [shape: f32[12,32], index: 6, kind: input, shape index: {}]   ;;  %s5782_s7 = inlined_call_operand.hbm [shape: bf16[32,32], index: 7, kind: input, shape index: {}]   ;;  %s5783_s8 = inlined_call_operand.hbm [shape: bf16[32,32], index: 8, kind: input, shape index: {}]   ;;  %s5784_s9 = inlined_call_operand.vmem [shape: bf16[32,32], index: 9, kind: input, shape index: {}]   ;;  %s5785_s10 = inlined_call_operand.vmem [shape: f32[1,32], index: 10, kind: input, shape index: {}]   ;;  %s5786_s11 = inlined_call_operand.vmem [shape: f32[1,32], index: 11, kind: input, shape index: {}]   ;;  %s5787_s12 = inlined_call_operand.vmem [shape: f32[1,32], index: 12, kind: input, shape index: {}]   ;;  %s5788_s13 = inlined_call_operand.vmem [shape: f32[8,3,32], index: 13, kind: output, shape index: {}]  }
   0x1   :  { %5819 = sst [smem:[#allocation37_spill]] %s5784_s9 }
   0x2   :  { %5820 = sst [smem:[#allocation38_spill]] %s5785_s10 }
   0x3   :  { %5821 = sst [smem:[#allocation39_spill]] %s5786_s11 }
   0x4   :  { %5822 = sst [smem:[#allocation40_spill]] %s5787_s12 }
   0x5   :  { %5823 = sst [smem:[#allocation41_spill]] %s5788_s13 }
   0x6   :  { %18 = vsyncpa [#allocation3], 0 }
   0x7   :  { %20 = vsyncpa [#allocation3 + $0x1], 0 }
   0x8   :  { %21 = vsyncpa [#allocation5], 0 }
   0x9   :  { %22 = vsyncpa [#allocation8], 0 }
   0xa   :  { %23 = vsyncpa [#allocation11], 0  ;;  %s4042_s25 = smov 0   ;;  %s4044_s26 = smov 0  }
   0xb   :  { %s4046_s27 = smov 0   ;;  %s4048_s28 = smov 0  }
   0xc LB: > { %s3960_s29 = smov [#allocation4]   ;;  %s5789_s14 = sadd.s32 4294967295, %s3958_s28   ;;  %s3958_s28 = sphi %s4048_s28, %s5891_s28   ;;  %s3954_s27 = sphi %s4046_s27, %s5890_s27   ;;  %s3950_s26 = sphi %s4044_s26, %s5889_s26   ;;  %s3946_s25 = sphi %s4042_s25, %s5888_s25  }
   0xd   : > { %s350_s30 = sshll.u32 %s3960_s29, 4  ;;  %p3119_p0 = scmp.ge.s32.totalorder %s3958_s28, 1  ;;  %s4071_s30 = int_to_ptr.vmem [resolvable:$true] %s350_s30 }
   0xe   : > { %p4066_p1 = scmp.eq.s32.totalorder %s5789_s14, 0  ;;  %p338_p2 = scmp.lt.s32.totalorder %s3958_s28, 3 }
   0xf   : > { %s3961_s17 = smov [#allocation7]   ;;  %s3962_s20 = smov [#allocation6]  }
  0x10   : > { %s5824_s15 = scalar_select %p4066_p1, 1, 0 }
  0x11   : > { %p4073_p3 = pnand %p3119_p0, %p338_p2  ;;  %s380_s18 = sshll.u32 %s3961_s17, 4  ;;  %s4085_s18 = int_to_ptr.vmem [resolvable:$true] %s380_s18 }
  0x12   : > { %s4087_s21 = sshll.u32 %s3962_s20, 4  ;;  %s3742_s24 = scalar_lea.hbm %s5776_s1, 256  ;;  %s371_s21 = int_to_ptr.vmem [resolvable:$true] %s4087_s21 }
  0x13   : > { %s5825_s16 = scalar_select %p4073_p3, 1, 0 }
  0x14   : > { %p3560_p4 = pneg %p4073_p3  ;;  %p3743_p6 = scmp.ne.s32.totalorder %s5776_s1, %s3742_s24 }
  0x15   : > { %p3749_p10 = scmp.lt.u32.totalorder %s3742_s24, %s5776_s1 }
  0x16   : > { %p4081_p5 = pnand %p3560_p4, %p4066_p1 }
  0x18   : > { %p4097_p7 = pneg %p4081_p5 }
  0x1a   : > { %p3745_p8 = pnand %p4097_p7, %p3743_p6 }
  0x1c   : > { %p3746_p9 = pneg %p3745_p8 }
  0x1e   : > { %p3751_p11 = pnand %p3749_p10, %p3746_p9 }
  0x20   : > { %3754 = shalt.err (!%p3751_p11)
}
  0x21   : > { %s3755_s14 = scalar_lea.vmem %s4071_s30, 256  ;;  %p3763_p2 = scmp.lt.s32.totalorder %s4071_s30, %s4071_s30 }
  0x22   : > { %p3756_p12 = scmp.ne.s32.totalorder %s4071_s30, %s3755_s14  ;;  %p3764_p4 = scmp.lt.s32.totalorder %s3755_s14, %s3755_s14 }
  0x24   : > { %p3758_p13 = pnand %p3756_p12, %p4097_p7  ;;  %p3765_p6 = por %p3764_p4, %p3763_p2 }
  0x26   : > { %p3759_p0 = pneg %p3758_p13 }
  0x28   : > { %p3766_p8 = pnand %p3765_p6, %p3759_p0 }
  0x2a   : > { %3769 = shalt.err (!%p3766_p8)
}
  0x2b   : > { %s3963_s22 = smov 128   ;;  %s3964_s13 = smov 8  }
  0x2c   : > { %3563 = dma.hbm_to_vmem [thread:$0]  (!%p4081_p5), %s5776_s1, 256, %s4071_s30, [#allocation5], %s3963_s22, %s3963_s22, %s3964_s13  }
  0x2d   : > { %s3770_s12 = scalar_lea.hbm %s5780_s5, 128 }
  0x2e   : > { %p3771_p9 = scmp.ne.s32.totalorder %s5780_s5, %s3770_s12  ;;  %p3777_p12 = scmp.lt.u32.totalorder %s3770_s12, %s5780_s5 }
  0x30   : > { %p3773_p10 = pnand %p3771_p9, %p4097_p7 }
  0x32   : > { %p3774_p11 = pneg %p3773_p10 }
  0x34   : > { %p3779_p13 = pnand %p3777_p12, %p3774_p11 }
  0x36   : > { %3782 = shalt.err (!%p3779_p13)
}
  0x37   : > { %s3783_s30 = scalar_lea.vmem %s4085_s18, 128  ;;  %p3791_p6 = scmp.lt.s32.totalorder %s4085_s18, %s4085_s18 }
  0x38   : > { %p3784_p0 = scmp.ne.s32.totalorder %s4085_s18, %s3783_s30  ;;  %p3792_p8 = scmp.lt.s32.totalorder %s3783_s30, %s3783_s30 }
  0x3a   : > { %p3786_p2 = pnand %p3784_p0, %p4097_p7  ;;  %p3793_p9 = por %p3792_p8, %p3791_p6 }
  0x3c   : > { %p3787_p4 = pneg %p3786_p2 }
  0x3e   : > { %p3794_p10 = pnand %p3793_p9, %p3787_p4 }
  0x40   : > { %3797 = shalt.err (!%p3794_p10)
}
  0x41   : > { %s5794_s10 = smov 64   ;;  %s3966_s9 = smov 4  }
  0x42   : > { %3569 = dma.hbm_to_vmem [thread:$0]  (!%p4081_p5), %s5780_s5, 128, %s4085_s18, [#allocation8], %s5794_s10, %s5794_s10, %s3966_s9  }
  0x43   : > { %s3798_s23 = scalar_lea.hbm %s5779_s4, 16 }
  0x44   : > { %p3799_p11 = scmp.ne.s32.totalorder %s5779_s4, %s3798_s23  ;;  %p3805_p0 = scmp.lt.u32.totalorder %s3798_s23, %s5779_s4 }
  0x46   : > { %p3801_p12 = pnand %p3799_p11, %p4097_p7 }
  0x48   : > { %p3802_p13 = pneg %p3801_p12 }
  0x4a   : > { %p3807_p2 = pnand %p3805_p0, %p3802_p13 }
  0x4c   : > { %3810 = shalt.err (!%p3807_p2)
}
  0x4d   : > { %s3811_s30 = scalar_lea.vmem %s371_s21, 16  ;;  %s3818_s18 = scalar_lea.vmem %s371_s21, 32 }
  0x4e   : > { %p3812_p4 = scmp.ne.s32.totalorder %s371_s21, %s3811_s30  ;;  %p3819_p9 = scmp.lt.s32.totalorder %s371_s21, %s371_s21 }
  0x4f   : > { %p3820_p10 = scmp.lt.s32.totalorder %s3818_s18, %s3811_s30 }
  0x50   : > { %p3814_p6 = pnand %p3812_p4, %p4097_p7 }
  0x51   : > { %p3821_p3 = por %p3820_p10, %p3819_p9 }
  0x52   : > { %p3815_p8 = pneg %p3814_p6 }
  0x54   : > { %p3822_p1 = pnand %p3821_p3, %p3815_p8 }
  0x56   : > { %3825 = shalt.err (!%p3822_p1)
}
  0x57   : > { %3566 = dma.hbm_to_vmem [thread:$0]  (!%p4081_p5), %s5779_s4, 16, %s371_s21, [#allocation5]  }
  0x58   : > { %s3967_s22 = smov [#allocation9]   ;;  %s3968_s23 = smov [#allocation10]  }
  0x59   : > { %s396_s13 = sshll.u32 %s3967_s22, 4  ;;  %s409_s24 = sshll.u32 %s3968_s23, 4  ;;  %s397_s13 = int_to_ptr.vmem [resolvable:$true] %s396_s13  ;;  %s410_s24 = int_to_ptr.vmem [resolvable:$true] %s409_s24 }
  0x5a   : > { %s3826_s14 = scalar_lea.hbm %s5782_s7, 256 }
  0x5b   : > { %p3827_p1 = scmp.ne.s32.totalorder %s5782_s7, %s3826_s14  ;;  %p3833_p12 = scmp.lt.u32.totalorder %s3826_s14, %s5782_s7 }
  0x5d   : > { %p3829_p3 = pnand %p3827_p1, %p4097_p7 }
  0x5f   : > { %p3830_p11 = pneg %p3829_p3 }
  0x61   : > { %p3835_p13 = pnand %p3833_p12, %p3830_p11 }
  0x63   : > { %3838 = shalt.err (!%p3835_p13)
}
  0x64   : > { %s3839_s21 = scalar_lea.vmem %s397_s13, 256  ;;  %p3847_p6 = scmp.lt.s32.totalorder %s397_s13, %s397_s13 }
  0x65   : > { %p3840_p0 = scmp.ne.s32.totalorder %s397_s13, %s3839_s21  ;;  %p3848_p8 = scmp.lt.s32.totalorder %s3839_s21, %s3839_s21 }
  0x67   : > { %p3842_p2 = pnand %p3840_p0, %p4097_p7  ;;  %p3849_p9 = por %p3848_p8, %p3847_p6 }
  0x69   : > { %p3843_p4 = pneg %p3842_p2 }
  0x6b   : > { %p3850_p10 = pnand %p3849_p9, %p3843_p4 }
  0x6d   : > { %3853 = shalt.err (!%p3850_p10)
}
  0x6e   : > { %s5828_s12 = smov 64   ;;  %s3854_s20 = scalar_lea.hbm %s5783_s8, 256 }
  0x6f   : > { %3572 = dma.hbm_to_vmem [thread:$0]  (!%p4081_p5), %s5782_s7, 256, %s397_s13, [#allocation8], %s5828_s12, %s5828_s12, %s3966_s9  }
  0x70   : > { %p3855_p1 = scmp.ne.s32.totalorder %s5783_s8, %s3854_s20  ;;  %p3861_p12 = scmp.lt.u32.totalorder %s3854_s20, %s5783_s8 }
  0x72   : > { %p3857_p3 = pnand %p3855_p1, %p4097_p7 }
  0x74   : > { %p3858_p11 = pneg %p3857_p3 }
  0x76   : > { %p3863_p13 = pnand %p3861_p12, %p3858_p11 }
  0x78   : > { %3866 = shalt.err (!%p3863_p13)
}
  0x79   : > { %s3867_s21 = scalar_lea.vmem %s410_s24, 256  ;;  %p3875_p6 = scmp.lt.s32.totalorder %s410_s24, %s410_s24 }
  0x7a   : > { %p3868_p0 = scmp.ne.s32.totalorder %s410_s24, %s3867_s21  ;;  %p3876_p8 = scmp.lt.s32.totalorder %s3867_s21, %s3867_s21 }
  0x7c   : > { %p3870_p2 = pnand %p3868_p0, %p4097_p7  ;;  %p3877_p9 = por %p3876_p8, %p3875_p6 }
  0x7e   : > { %p3871_p4 = pneg %p3870_p2 }
  0x80   : > { %p3878_p10 = pnand %p3877_p9, %p3871_p4 }
  0x82   : > { %3881 = shalt.err (!%p3878_p10)
}
  0x83   : > { %3575 = dma.hbm_to_vmem [thread:$0]  (!%p4081_p5), %s5783_s8, 256, %s410_s24, [#allocation11], %s5828_s12, %s5828_s12, %s3966_s9  }
  0x84   : > { %s4206_s19 = sadd.s32 1, %s3958_s28   ;;  %s36_s22 = sadd.s32 1, %s3954_s27 }
  0x85   : > { %s33_s17 = ssub.s32 %s3958_s28, %s4206_s19  ;;  %p43_p1 = scmp.ne.s32.totalorder %s3954_s27, %s3950_s26 }
  0x86   : > { %p34_p7 = scmp.eq.s32.totalorder %s33_s17, 0  ;;  %p44_p3 = scmp.eq.s32.totalorder %s3958_s28, 0 }
  0x87   : > { %p49_p11 = scmp.ne.s32.totalorder %s3950_s26, %s3946_s25  ;;  %p5829_p13 = scmp.ne.s32.totalorder %s5824_s15, 0 }
  0x88   : > { %s4217_s23 = scalar_select %p34_p7, %s3954_s27, %s36_s22  }
  0x89   : > { %p45_p12 = por %p44_p3, %p43_p1  ;;  %p4221_p0 = por %p5829_p13, %p49_p11 }
  0x8a   : > { %p3585_p2 = scmp.lt.s32.totalorder %s3958_s28, 2  ;;  %s435_s20 = sand.u32 1, %s3954_s27  }
  0x8b   : > { %s3126_s24 = sshll.u32 %s435_s20, 7  ;;  %s3203_s14 = sshll.u32 %s3958_s28, 11 }
  0x8c   : > { %s4231_s11 = scalar_lea.hbm %s5775_s0, %s3203_s14  ;;  %s439_s25 = scalar_lea.vmem [#allocation2], %s3126_s24 }
  0x8d   : > { %s447_s21 = sshll.u32 %s439_s25, 4  ;;  %p4235_p5 = pnand %p3585_p2, %p45_p12  ;;  %s4233_s21 = int_to_ptr.vmem [resolvable:$true] %s447_s21 }
  0x8e   : > { %s4239_s10 = scalar_lea.sflag [#allocation3], %s435_s20  ;;  %s3882_s17 = scalar_lea.hbm %s4231_s11, 2048 }
  0x8f   : > { %p3883_p4 = scmp.ne.s32.totalorder %s4231_s11, %s3882_s17  ;;  %p3884_p6 = pneg %p4235_p5 }
  0x90   : > { %s3887_s14 = scalar_lea.hbm %s5775_s0, 4096  ;;  %p3888_p10 = scmp.lt.u32.totalorder %s4231_s11, %s5775_s0 }
  0x91   : > { %p3885_p8 = pnand %p3884_p6, %p3883_p4  ;;  %p3889_p7 = scmp.lt.u32.totalorder %s3887_s14, %s3882_s17 }
  0x92   : > { %p3891_p3 = scmp.lt.u32.totalorder %s3882_s17, %s4231_s11 }
  0x93   : > { %p3886_p9 = pneg %p3885_p8  ;;  %p3890_p1 = por %p3889_p7, %p3888_p10 }
  0x95   : > { %p3892_p11 = por %p3891_p3, %p3890_p1 }
  0x97   : > { %p3893_p12 = pnand %p3892_p11, %p3886_p9 }
  0x99   : > { %3896 = shalt.err (!%p3893_p12)
}
  0x9a   : > { %s3897_s20 = scalar_lea.vmem %s4233_s21, 2048  ;;  %s3969_s25 = smov [#allocation2]  }
  0x9b   : > { %p3898_p13 = scmp.ne.s32.totalorder %s4233_s21, %s3897_s20  ;;  %s3902_s22 = sshll.u32 %s3969_s25, 4  ;;  %s3903_s22 = int_to_ptr.vmem [resolvable:$false] %s3902_s22 }
  0x9c   : > { %s3904_s24 = scalar_lea.vmem %s3903_s22, 4096  ;;  %p3905_p8 = scmp.lt.s32.totalorder %s4233_s21, %s3903_s22 }
  0x9d   : > { %p3900_p2 = pnand %p3898_p13, %p3884_p6  ;;  %p3906_p10 = scmp.lt.s32.totalorder %s3904_s24, %s3897_s20 }
  0x9f   : > { %p3901_p4 = pneg %p3900_p2  ;;  %p3907_p7 = por %p3906_p10, %p3905_p8 }
  0xa1   : > { %p3908_p1 = pnand %p3907_p7, %p3901_p4 }
  0xa3   : > { %3911 = shalt.err (!%p3908_p1)
}
  0xa4   : > { %3579 = dma.hbm_to_vmem [thread:$0]  (!%p4235_p5), %s4231_s11, 2048, %s4233_s21, %s4239_s10, %s5828_s12, %s5828_s12, %s3966_s9  }
  0xa5   : > { %p5832_p6 = scmp.ne.s32.totalorder %s5825_s16, 0 }
  0xa7   : > { %459 = sbr.rel (%p5832_p6) target bundleno = 3265 (0xcc1), region = 72 }
  0xae   : > { %s461_s17 = sand.u32 1, %s3950_s26  }
  0xaf   : > { %s3131_s14 = sshll.u32 %s461_s17, 7  ;;  %s462_s30 = scalar_lea.sflag [#allocation3], %s461_s17 }
  0xb0   : > { %s4273_s18 = scalar_lea.vmem [#allocation2], %s3131_s14 }
  0xb1   : > { %3929 = dma.done.wait (%p4221_p0), %s462_s30, 2048  }
  0xb2   : > { %3931 = vsyncadd (%p4221_p0), %s462_s30, 4294965248  ;;  %p5833_p9 = scmp.ne.s32.totalorder %s5824_s15, 0 }
  0xb4   : > { %3933 = dma.done.wait (%p5833_p9), [#allocation5], 272  }
  0xb5   : > { %3935 = vsyncadd (%p5833_p9), [#allocation5], 4294967024 }
  0xb6   : > { %3937 = dma.done.wait (%p5833_p9), [#allocation8], 384  }
  0xb7   : > { %3939 = vsyncadd (%p5833_p9), [#allocation8], 4294966912 }
  0xb8   : > { %3941 = dma.done.wait (%p5833_p9), [#allocation11], 256  }
  0xb9   : > { %3943 = vsyncadd (%p5833_p9), [#allocation11], 4294967040  ;;  %v602_v0 = vlaneseq  ;;  %v3205_v6 = vld [vmem:[%s4273_s18] sm:$0xff]   ;;  %v5796_v8 = vmov 0.0   ;;  %v3141_v21 = vld [vmem:[#allocation4 + $0x8] ss:$0 sm:$0xff] }
  0xba   : > { %v600_v7 = vld [vmem:[#allocation4] sm:$0xff]  ;;  %v4293_v13 = vunpack.c.l.bf16 %v3205_v6  ;;  %v4295_v14 = vunpack.c.h.bf16 %v3205_v6  ;;  %v3268_v30 = vld [vmem:[%s4273_s18 + $0x8] sm:$0xff]   ;;  %vm1315_vm2 = vcmask 261120   ;;  %vm3971_vm3 = vmmov 0   ;;  %s5882_s24 = sld [smem:[#allocation37_spill]]  ;;  %s5883_s15 = sld [smem:[#allocation38_spill]] }
  0xbb   : > { %v603_v1 = vshrl.u32 %v602_v0, 7  ;;  %v4326_v40 = vunpack.c.l.bf16 %v3268_v30  ;;  %v4328_v41 = vunpack.c.h.bf16 %v3268_v30  ;;  %vm2324_vm4 = vcmask 523264   ;;  %s5884_s16 = sadd.s32 4294967295, %s3958_s28   ;;  %s5885_s11 = sld [smem:[#allocation39_spill]] }
  0xbc   : > { %v604_v22 = vrot.slane %v4293_v13, 7  ;;  %v605_v23 = vrot.slane %v4295_v14, 7  ;;  %v1006_v33 = vrot.slane %v4293_v13, 1  ;;  %v1007_v34 = vrot.slane %v4295_v14, 1  ;;  %s3137_s9 = sshll.u32 %s5884_s16, 2  ;;  %s5886_s10 = sld [smem:[#allocation40_spill]] }
  0xbd   : > { %vm636_vm0 = vcmp.ge.s32.totalorder %v603_v1, 1  ;;  %v641_v2 = vsub.s32 0, %v603_v1  ;;  %v675_v3 = vsub.s32 3, %v603_v1  ;;  %v744_v4 = vsub.s32 6, %v603_v1  ;;  %p530_p0 = scmp.lt.s32.totalorder %s3137_s9, 7  ;;  %s5887_s22 = sld [smem:[#allocation41_spill]] }
  0xbe   : > { %v810_v5 = vsub.s32 1, %v603_v1  ;;  %vm1038_vm1 = vcmp.le.s32.totalorder %v603_v1, 6  ;;  %v3139_v9 = vsel %vm636_vm0, 1.0, %v5796_v8  ;;  %v875_v10 = vsub.s32 4, %v603_v1 }
  0xbf   : > { %v943_v11 = vsub.s32 7, %v603_v1  ;;  %v1043_v12 = vsub.s32 2, %v603_v1  ;;  %v642_v15 = vrot.slane %v600_v7, %v641_v2  ;;  %v676_v16 = vrot.slane %v600_v7, %v675_v3  ;;  %s5893_s9 = smov (!%p530_p0, %s3137_s9), 7 }
  0xc0   : > { %v745_v17 = vrot.slane %v600_v7, %v744_v4  ;;  %v4297_v18 = vrot.slane %v600_v7, %v810_v5  ;;  %v3140_v19 = vsel %vm1038_vm1, 1.0, %v5796_v8  ;;  %v1109_v20 = vsub.s32 5, %v603_v1  ;;  %v3269_v1 = vld [vmem:[%s4273_s18 + $0x10] sm:$0xff]   ;;  %s3138_s20 = sshll.u32 %s5893_s9, 2 }
  0xc1   : > { %v4302_v24 = vmul.f32 %v3139_v9, %v642_v15  ;;  %v4304_v25 = vmul.f32 %v3139_v9, %v676_v16  ;;  %v4311_v28 = vrot.slane %v600_v7, %v875_v10  ;;  %v4313_v29 = vrot.slane %v600_v7, %v943_v11 }
  0xc2   : > { %v4306_v26 = vmul.f32 %v3139_v9, %v745_v17  ;;  %v4309_v27 = vmul.f32 0.0, %v4297_v18  ;;  %v1044_v36 = vrot.slane %v600_v7, %v1043_v12  ;;  %v1110_v37 = vrot.slane %v600_v7, %v1109_v20 }
  0xc3   : > { %v4317_v31 = vmul.f32 0.0, %v4302_v24  ;;  %v678_v32 = vmul.f32 %v4304_v25, %v604_v22  ;;  %v4323_v38 = vmul.f32 %v3141_v21, %v3140_v19  ;;  %v877_v42 = vmul.f32 %v4293_v13, %v4311_v28  ;;  %s533_s17 = scalar_lea.vmem %s5887_s22, %s3138_s20 }
  0xc4   : > { %v747_v35 = vmul.f32 %v4306_v26, %v605_v23  ;;  %v4332_v43 = vmul.f32 %v3140_v19, %v1044_v36  ;;  %v646_v44 = vmul.f32 %v4302_v24, %v605_v23  ;;  %v4335_v46 = vmul.f32 %v3140_v19, %v1110_v37 }
  0xc5   : > { %v710_v39 = vadd.f32 %v678_v32, %v4317_v31  ;;  %v606_v47 = vrot.slane %v4326_v40, 7  ;;  %v607_v48 = vrot.slane %v4328_v41, 7  ;;  %v945_v49 = vmul.f32 %v4295_v14, %v4313_v29 }
  0xc6   : > { %v1181_v50 = vmul.f32 %v4323_v38, %v1007_v34  ;;  %v814_v51 = vmul.f32 %v4295_v14, %v4297_v18  ;;  %v1008_v52 = vrot.slane %v4326_v40, 1  ;;  %v4349_v56 = vrot.slane %v4328_v41, 1 }
  0xc7   : > { %v776_v45 = vadd.f32 %v747_v35, %v710_v39  ;;  %v680_v54 = vmul.f32 %v4304_v25, %v606_v47  ;;  %v749_v55 = vmul.f32 %v4306_v26, %v607_v48  ;;  %v4352_v57 = vmul.f32 0.0, %v4332_v43 }
  0xc8   : > { %v879_v58 = vmul.f32 %v4326_v40, %v4311_v28  ;;  %v645_v59 = vmul.f32 %v4302_v24, %v604_v22  ;;  %v679_v60 = vmul.f32 %v4304_v25, %v605_v23  ;;  %v1112_v62 = vmul.f32 %v4335_v46, %v1006_v33 }
  0xc9   : > { %v841_v53 = vadd.f32 %v4309_v27, %v776_v45  ;;  %v712_v63 = vadd.f32 %v680_v54, %v646_v44  ;;  %v748_v0 = vmul.f32 %v4306_v26, %v606_v47  ;;  %v947_v2 = vmul.f32 %v4328_v41, %v4313_v29 }
  0xca   : > { %v1048_v3 = vmul.f32 %v4332_v43, %v1007_v34  ;;  %v711_v4 = vadd.f32 %v679_v60, %v645_v59  ;;  %v813_v5 = vmul.f32 %v4293_v13, %v4297_v18  ;;  %v1114_v9 = vmul.f32 %v4335_v46, %v1008_v52 }
  0xcb   : > { %v909_v61 = vadd.f32 %v877_v42, %v841_v53  ;;  %v778_v7 = vadd.f32 %v749_v55, %v712_v63  ;;  %v1183_v10 = vmul.f32 %v4323_v38, %v4349_v56  ;;  %v878_v12 = vmul.f32 %v4295_v14, %v4311_v28  ;;  %v4394_v53 = vld [vmem:[%s5777_s2] ss:$0 sm:$0xff] }
  0xcc   : > { %v777_v11 = vadd.f32 %v748_v0, %v711_v4  ;;  %v4371_v15 = vunpack.c.l.bf16 %v3269_v1  ;;  %v647_v16 = vmul.f32 %v4302_v24, %v606_v47  ;;  %v946_v20 = vmul.f32 %v4326_v40, %v4313_v29 }
  0xcd   : > { %v974_v6 = vadd.f32 %v945_v49, %v909_v61  ;;  %v843_v19 = vadd.f32 %v814_v51, %v778_v7  ;;  %v681_v21 = vmul.f32 %v4304_v25, %v607_v48  ;;  %v1047_v23 = vmul.f32 %v4332_v43, %v1006_v33 }
  0xce   : > { %v842_v22 = vadd.f32 %v813_v5, %v777_v11  ;;  %v1113_v30 = vmul.f32 %v4335_v46, %v1007_v34  ;;  %v608_v32 = vrot.slane %v4371_v15, 7  ;;  %v1182_v37 = vmul.f32 %v4323_v38, %v1008_v52 }
  0xcf   : > { %v1075_v17 = vadd.f32 %v4352_v57, %v974_v6  ;;  %v911_v36 = vadd.f32 %v879_v58, %v843_v19  ;;  %v713_v39 = vadd.f32 %v681_v21, %v647_v16  ;;  %v815_v45 = vmul.f32 %v4326_v40, %v4297_v18 }
  0xd0   : > { %v910_v42 = vadd.f32 %v878_v12, %v842_v22  ;;  %v750_v44 = vmul.f32 %v4306_v26, %v608_v32  ;;  %v880_v47 = vmul.f32 %v4328_v41, %v4311_v28  ;;  %v948_v34 = vmul.f32 %v4371_v15, %v4313_v29 }
  0xd1   : > { %v1144_v35 = vadd.f32 %v1112_v62, %v1075_v17  ;;  %v976_v33 = vadd.f32 %v947_v2, %v911_v36  ;;  %v4389_v51 = vunpack.c.h.bf16 %v3269_v1  ;;  %v648_v58 = vmul.f32 %v4302_v24, %v607_v48 }
  0xd2   : > { %v975_v54 = vadd.f32 %v946_v20, %v910_v42  ;;  %v779_v55 = vadd.f32 %v750_v44, %v713_v39  ;;  %v682_v59 = vmul.f32 %v4304_v25, %v608_v32  ;;  %v1010_v61 = vrot.slane %v4371_v15, 1 }
  0xd3   : > { %v1210_v49 = vadd.f32 %v1181_v50, %v1144_v35  ;;  %v1077_v60 = vadd.f32 %v1048_v3, %v976_v33  ;;  %v609_v62 = vrot.slane %v4389_v51, 7  ;;  %v1049_v1 = vmul.f32 %v4332_v43, %v1008_v52 }
  0xd4   : > { %v1076_v63 = vadd.f32 %v1047_v23, %v975_v54  ;;  %v844_v0 = vadd.f32 %v815_v45, %v779_v55  ;;  %v714_v2 = vadd.f32 %v682_v59, %v648_v58  ;;  %v816_v6 = vmul.f32 %v4328_v41, %v4297_v18 }
  0xd5   : > { %v1242_v50 = vadd.f32 %v4293_v13, %v1210_v49  ;;  %v1146_v5 = vadd.f32 %v1114_v9, %v1077_v60  ;;  %v751_v48 = vmul.f32 %v4306_v26, %v609_v62  ;;  %v3270_v13 = vld [vmem:[%s4273_s18 + $0x18] sm:$0xff]   ;;  %v1115_v11 = vmul.f32 %v4335_v46, %v4349_v56 }
  0xd6   : > { %v1145_v3 = vadd.f32 %v1113_v30, %v1076_v63  ;;  %v912_v7 = vadd.f32 %v880_v47, %v844_v0  ;;  %v881_v12 = vmul.f32 %v4371_v15, %v4311_v28  ;;  %v949_v9 = vmul.f32 %v4389_v51, %v4313_v29 }
  0xd7   : > { %v4403_v4 = vadd.f32 %v4394_v53, %v1242_v50  ;;  %v1212_v16 = vadd.f32 %v1183_v10, %v1146_v5  ;;  %v780_v17 = vadd.f32 %v751_v48, %v714_v2  ;;  %v1011_v21 = vrot.slane %v4389_v51, 1 }
  0xd8   : > { %v1211_v19 = vadd.f32 %v1182_v37, %v1145_v3  ;;  %v977_v20 = vadd.f32 %v948_v34, %v912_v7  ;;  %v4418_v22 = vunpack.c.l.bf16 %v3270_v13  ;;  %v649_v35 = vmul.f32 %v4302_v24, %v608_v32 }
  0xd9   : > { %v1316_v52 = vsel %vm1315_vm2, %v4403_v4, 0.0  ;;  %v1244_v23 = vadd.f32 %v4326_v40, %v1212_v16  ;;  %v845_v30 = vadd.f32 %v816_v6, %v780_v17  ;;  %v683_v36 = vmul.f32 %v4304_v25, %v609_v62 }
  0xda   : > { %1317 = vadd.xlane.f32.xlu0 %v1316_v52  ;;  %v1243_v10 = vadd.f32 %v4295_v14, %v1211_v19  ;;  %v1078_v39 = vadd.f32 %v1049_v1, %v977_v20  ;;  %v1184_v42 = vmul.f32 %v4323_v38, %v1010_v61  ;;  %v610_v44 = vrot.slane %v4418_v22, 7 }
  0xdb   : > { %v4427_v37 = vadd.f32 %v4394_v53, %v1244_v23  ;;  %v913_v45 = vadd.f32 %v881_v12, %v845_v30  ;;  %v1050_v47 = vmul.f32 %v4332_v43, %v4349_v56  ;;  %v715_v40 = vadd.f32 %v683_v36, %v649_v35 }
  0xdc   : > { %v4432_v49 = vadd.f32 %v4394_v53, %v1243_v10  ;;  %v1147_v32 = vadd.f32 %v1115_v11, %v1078_v39  ;;  %v752_v33 = vmul.f32 %v4306_v26, %v610_v44  ;;  %v817_v14 = vmul.f32 %v4371_v15, %v4297_v18 }
  0xdd   : > { %v1322_v34 = vsel %vm1315_vm2, %v4427_v37, 0.0  ;;  %v978_v54 = vadd.f32 %v949_v9, %v913_v45  ;;  %v1116_v55 = vmul.f32 %v4335_v46, %v1010_v61  ;;  %v1185_v58 = vmul.f32 %v4323_v38, %v1011_v21  ;;  %v3271_v45 = vld [vmem:[%s4273_s18 + $0x20] sm:$0xff]  }
  0xde   : > { %1323 = vadd.xlane.f32.xlu1 %v1322_v34  ;;  %v1319_v56 = vsel %vm1315_vm2, %v4432_v49, 0.0  ;;  %v1213_v59 = vadd.f32 %v1184_v42, %v1147_v32  ;;  %v781_v50 = vadd.f32 %v752_v33, %v715_v40  ;;  %v882_v60 = vmul.f32 %v4389_v51, %v4311_v28 }
  0xdf   : > { %1320 = vadd.xlane.f32.xlu0 %v1319_v56  ;;  %v1079_v63 = vadd.f32 %v1050_v47, %v978_v54  ;;  %v950_v0 = vmul.f32 %v4418_v22, %v4313_v29  ;;  %v4447_v1 = vunpack.c.h.bf16 %v3270_v13  ;;  %v650_v2 = vmul.f32 %v4302_v24, %v609_v62 }
  0xe0   : > { %v1245_v5 = vadd.f32 %v4328_v41, %v1213_v59  ;;  %v846_v48 = vadd.f32 %v817_v14, %v781_v50  ;;  %v1012_v6 = vrot.slane %v4418_v22, 1  ;;  %v684_v3 = vmul.f32 %v4304_v25, %v610_v44 }
  0xe1   : > { %v1148_v7 = vadd.f32 %v1116_v55, %v1079_v63  ;;  %v1051_v11 = vmul.f32 %v4332_v43, %v1010_v61  ;;  %v1117_v12 = vmul.f32 %v4335_v46, %v1011_v21  ;;  %v611_v52 = vrot.slane %v4447_v1, 7 }
  0xe2   : > { %v4457_v16 = vadd.f32 %v4394_v53, %v1245_v5  ;;  %v914_v13 = vadd.f32 %v882_v60, %v846_v48  ;;  %v1186_v62 = vmul.f32 %v4323_v38, %v1012_v6  ;;  %v716_v41 = vadd.f32 %v684_v3, %v650_v2  ;;  %v3272_v48 = vld [vmem:[%s4273_s18 + $0x28] sm:$0xff]  }
  0xe3   : > { %v1214_v17 = vadd.f32 %v1185_v58, %v1148_v7  ;;  %v753_v9 = vmul.f32 %v4306_v26, %v611_v52  ;;  %v818_v19 = vmul.f32 %v4389_v51, %v4297_v18  ;;  %v883_v61 = vmul.f32 %v4418_v22, %v4311_v28 }
  0xe4   : > { %v1325_v20 = vsel %vm1315_vm2, %v4457_v16, 0.0  ;;  %v979_v23 = vadd.f32 %v950_v0, %v914_v13  ;;  %v1013_v30 = vrot.slane %v4447_v1, 1  ;;  %v651_v35 = vmul.f32 %v4302_v24, %v610_v44 }
  0xe5   : > { %1326 = vadd.xlane.f32.xlu1 %v1325_v20  ;;  %v1246_v36 = vadd.f32 %v4371_v15, %v1214_v17  ;;  %v782_v10 = vadd.f32 %v753_v9, %v716_v41  ;;  %v685_v39 = vmul.f32 %v4304_v25, %v611_v52  ;;  %v4472_v42 = vmul.f32 0.0, %v4306_v26 }
  0xe6   : > { %v1080_v47 = vadd.f32 %v1051_v11, %v979_v23  ;;  %v951_v40 = vmul.f32 %v4447_v1, %v4313_v29  ;;  %v1052_v32 = vmul.f32 %v4332_v43, %v1011_v21  ;;  %v1118_v33 = vmul.f32 %v4335_v46, %v1012_v6 }
  0xe7   : > { %v4480_v44 = vadd.f32 %v4394_v53, %v1246_v36  ;;  %v847_v14 = vadd.f32 %v818_v19, %v782_v10  ;;  %v717_v15 = vadd.f32 %v685_v39, %v651_v35  ;;  %v819_v34 = vmul.f32 %v4418_v22, %v4297_v18 }
  0xe8   : > { %v1149_v54 = vadd.f32 %v1117_v12, %v1080_v47  ;;  %v1187_v55 = vmul.f32 %v4323_v38, %v1013_v30  ;;  %v884_v58 = vmul.f32 %v4447_v1, %v4311_v28  ;;  %v4487_v56 = vunpack.c.l.bf16 %v3271_v45 }
  0xe9   : > { %v1328_v21 = vsel %vm1315_vm2, %v4480_v44, 0.0  ;;  %v915_v59 = vadd.f32 %v883_v61, %v847_v14  ;;  %v783_v50 = vadd.f32 %v4472_v42, %v717_v15  ;;  %v4492_v60 = vunpack.c.h.bf16 %v3271_v45 }
  0xea   : > { %1329 = vadd.xlane.f32.xlu0 %v1328_v21  ;;  %v1215_v63 = vadd.f32 %v1186_v62, %v1149_v54  ;;  %v4495_v0 = vmul.f32 0.0, %v4313_v29  ;;  %v1053_v2 = vmul.f32 %v4332_v43, %v1012_v6  ;;  %v612_v5 = vrot.slane %v4487_v56, 7 }
  0xeb   : > { %v980_v3 = vadd.f32 %v951_v40, %v915_v59  ;;  %v848_v7 = vadd.f32 %v819_v34, %v783_v50  ;;  %v1119_v11 = vmul.f32 %v4335_v46, %v1013_v30  ;;  %v613_v12 = vrot.slane %v4492_v60, 7 }
  0xec   : > { %5834 = vst [vmem:[#allocation16_spill] sm:$0xff] %v4495_v0  ;;  %v1247_v52 = vadd.f32 %v4389_v51, %v1215_v63  ;;  %v4504_v13 = vmul.f32 0.0, %v4323_v38  ;;  %v686_v62 = vmul.f32 %v4304_v25, %v612_v5  ;;  %v1014_v41 = vrot.slane %v4487_v56, 1 }
  0xed   : > { %v1081_v17 = vadd.f32 %v1052_v32, %v980_v3  ;;  %v916_v6 = vadd.f32 %v884_v58, %v848_v7  ;;  %v755_v9 = vmul.f32 %v4306_v26, %v613_v12  ;;  %v4509_v19 = vunpack.c.l.bf16 %v3272_v48 }
  0xee   : > { %5835 = vst [vmem:[#allocation17_spill] sm:$0xff] %v4504_v13  ;;  %v4512_v61 = vadd.f32 %v4394_v53, %v1247_v52  ;;  %v718_v20 = vadd.f32 %v686_v62, %v4317_v31  ;;  %v4516_v51 = vrot.slane %v4492_v60, 1  ;;  %v652_v23 = vmul.f32 %v4302_v24, %v612_v5 }
  0xef   : > { %v1150_v30 = vadd.f32 %v1118_v33, %v1081_v17  ;;  %v981_v35 = vadd.f32 %v4495_v0, %v916_v6  ;;  %v614_v36 = vrot.slane %v4509_v19, 7  ;;  %v687_v10 = vmul.f32 %v4304_v25, %v613_v12 }
  0xf0   : > { %v1331_v39 = vsel %vm1315_vm2, %v4512_v61, 0.0  ;;  %v784_v45 = vadd.f32 %v755_v9, %v718_v20  ;;  %v885_v47 = vmul.f32 %v4487_v56, %v4311_v28  ;;  %v820_v40 = vmul.f32 %v4487_v56, %v4297_v18 }
  0xf1   : > { %1332 = vadd.xlane.f32.xlu1 %v1331_v39  ;;  %v1216_v32 = vadd.f32 %v1187_v55, %v1150_v30  ;;  %v1082_v14 = vadd.f32 %v1053_v2, %v981_v35  ;;  %v719_v33 = vadd.f32 %v687_v10, %v652_v23  ;;  %v756_v15 = vmul.f32 %v4306_v26, %v614_v36  ;;  %v3273_v35 = vld [vmem:[%s4273_s18 + $0x30] sm:$0xff]  }
  0xf2   : > { %v849_v34 = vadd.f32 %v4309_v27, %v784_v45  ;;  %v953_v54 = vmul.f32 %v4492_v60, %v4313_v29  ;;  %v1120_v58 = vmul.f32 %v4335_v46, %v1014_v41  ;;  %v1189_v21 = vmul.f32 %v4323_v38, %v4516_v51 }
  0xf3   : > { %v1248_v59 = vadd.f32 %v4418_v22, %v1216_v32  ;;  %v1151_v50 = vadd.f32 %v1119_v11, %v1082_v14  ;;  %v785_v63 = vadd.f32 %v756_v15, %v719_v33  ;;  %v886_v55 = vmul.f32 %v4492_v60, %v4311_v28 }
  0xf4   : > { %v917_v2 = vadd.f32 %v885_v47, %v849_v34  ;;  %v954_v5 = vmul.f32 %v4509_v19, %v4313_v29  ;;  %v4540_v3 = vunpack.c.h.bf16 %v3272_v48  ;;  %v653_v7 = vmul.f32 %v4302_v24, %v613_v12 }
  0xf5   : > { %v4544_v52 = vadd.f32 %v4394_v53, %v1248_v59  ;;  %v1217_v62 = vadd.f32 %v4504_v13, %v1151_v50  ;;  %v850_v22 = vadd.f32 %v820_v40, %v785_v63  ;;  %v688_v11 = vmul.f32 %v4304_v25, %v614_v36 }
  0xf6   : > { %v982_v17 = vadd.f32 %v953_v54, %v917_v2  ;;  %v1016_v6 = vrot.slane %v4509_v19, 1  ;;  %v1054_v9 = vmul.f32 %v4332_v43, %v1014_v41  ;;  %v615_v20 = vrot.slane %v4540_v3, 7 }
  0xf7   : > { %v1334_v48 = vsel %vm1315_vm2, %v4544_v52, 0.0  ;;  %v1249_v12 = vadd.f32 %v4447_v1, %v1217_v62  ;;  %v918_v23 = vadd.f32 %v886_v55, %v850_v22  ;;  %v720_v30 = vadd.f32 %v688_v11, %v653_v7 }
  0xf8   : > { %1335 = vadd.xlane.f32.xlu0 %v1334_v48  ;;  %v1083_v10 = vadd.f32 %v4352_v57, %v982_v17  ;;  %v1121_v39 = vmul.f32 %v4335_v46, %v4516_v51  ;;  %v757_v45 = vmul.f32 %v4306_v26, %v615_v20  ;;  %v821_v41 = vmul.f32 %v4492_v60, %v4297_v18 }
  0xf9   : > { %v4562_v47 = vadd.f32 %v4394_v53, %v1249_v12  ;;  %v983_v40 = vadd.f32 %v954_v5, %v918_v23  ;;  %v1190_v1 = vmul.f32 %v4323_v38, %v1016_v6  ;;  %v887_v32 = vmul.f32 %v4509_v19, %v4311_v28 }
  0xfa   : > { %v1152_v14 = vadd.f32 %v1120_v58, %v1083_v10  ;;  %v786_v33 = vadd.f32 %v757_v45, %v720_v30  ;;  %v1017_v15 = vrot.slane %v4540_v3, 1  ;;  %v4568_v34 = vunpack.c.l.bf16 %v3273_v35 }
  0xfb   : > { %v1337_v54 = vsel %vm1315_vm2, %v4562_v47, 0.0  ;;  %v1084_v59 = vadd.f32 %v1054_v9, %v983_v40  ;;  %v654_v50 = vmul.f32 %v4302_v24, %v614_v36  ;;  %v689_v63 = vmul.f32 %v4304_v25, %v615_v20 }
  0xfc   : > { %1338 = vadd.xlane.f32.xlu1 %v1337_v54  ;;  %v1218_v55 = vadd.f32 %v1189_v21, %v1152_v14  ;;  %v851_v2 = vadd.f32 %v821_v41, %v786_v33  ;;  %v955_v5 = vmul.f32 %v4540_v3, %v4313_v29  ;;  %v616_v58 = vrot.slane %v4568_v34, 7 }
  0xfd   : > { %v1153_v7 = vadd.f32 %v1121_v39, %v1084_v59  ;;  %v1055_v62 = vmul.f32 %v4332_v43, %v4516_v51  ;;  %v721_v22 = vadd.f32 %v689_v63, %v654_v50  ;;  %v822_v9 = vmul.f32 %v4509_v19, %v4297_v18  ;;  %v3274_v59 = vld [vmem:[%s4273_s18 + $0x38] sm:$0xff]  }
  0xfe   : > { %v1250_v11 = vadd.f32 %v4487_v56, %v1218_v55  ;;  %v919_v17 = vadd.f32 %v887_v32, %v851_v2  ;;  %v758_v36 = vmul.f32 %v4306_v26, %v616_v58  ;;  %v1122_v48 = vmul.f32 %v4335_v46, %v1016_v6 }
  0xff   : > { %v1219_v21 = vadd.f32 %v1190_v1, %v1153_v7  ;;  %v1191_v12 = vmul.f32 %v4323_v38, %v1017_v15  ;;  %v4585_v23 = vunpack.c.h.bf16 %v3273_v35  ;;  %v888_v56 = vmul.f32 %v4540_v3, %v4311_v28 }
 0x100   : > { %v4588_v30 = vadd.f32 %v4394_v53, %v1250_v11  ;;  %v984_v51 = vadd.f32 %v955_v5, %v919_v17  ;;  %v787_v10 = vadd.f32 %v758_v36, %v721_v22  ;;  %v655_v41 = vmul.f32 %v4302_v24, %v615_v20 }
 0x101   : > { %v1251_v39 = vadd.f32 %v4492_v60, %v1219_v21  ;;  %v617_v45 = vrot.slane %v4585_v23, 7  ;;  %v690_v40 = vmul.f32 %v4304_v25, %v616_v58  ;;  %v956_v14 = vmul.f32 %v4568_v34, %v4313_v29 }
 0x102   : > { %v1340_v35 = vsel %vm1315_vm2, %v4588_v30, 0.0  ;;  %v1085_v1 = vadd.f32 %v1055_v62, %v984_v51  ;;  %v852_v32 = vadd.f32 %v822_v9, %v787_v10  ;;  %v823_v20 = vmul.f32 %v4540_v3, %v4297_v18 }
 0x103   : > { %1341 = vadd.xlane.f32.xlu0 %v1340_v35  ;;  %v4601_v33 = vadd.f32 %v4394_v53, %v1251_v39  ;;  %v722_v54 = vadd.f32 %v690_v40, %v655_v41  ;;  %v759_v60 = vmul.f32 %v4306_v26, %v617_v45  ;;  %v1056_v55 = vmul.f32 %v4332_v43, %v1016_v6 }
 0x104   : > { %v1154_v50 = vadd.f32 %v1122_v48, %v1085_v1  ;;  %v920_v63 = vadd.f32 %v888_v56, %v852_v32  ;;  %v1018_v5 = vrot.slane %v4568_v34, 1  ;;  %v889_v62 = vmul.f32 %v4568_v34, %v4311_v28 }
 0x105   : > { %v1343_v2 = vsel %vm1315_vm2, %v4601_v33, 0.0  ;;  %v788_v7 = vadd.f32 %v759_v60, %v722_v54  ;;  %v1123_v17 = vmul.f32 %v4335_v46, %v1017_v15  ;;  %v4614_v36 = vunpack.c.l.bf16 %v3274_v59 }
 0x106   : > { %1344 = vadd.xlane.f32.xlu1 %v1343_v2  ;;  %v1220_v22 = vadd.f32 %v1191_v12, %v1154_v50  ;;  %v985_v11 = vadd.f32 %v956_v14, %v920_v63  ;;  %v957_v6 = vmul.f32 %v4585_v23, %v4313_v29  ;;  %v656_v21 = vmul.f32 %v4302_v24, %v616_v58 }
 0x107   : > { %v853_v9 = vadd.f32 %v823_v20, %v788_v7  ;;  %v691_v48 = vmul.f32 %v4304_v25, %v617_v45  ;;  %v1192_v56 = vmul.f32 %v4323_v38, %v1018_v5  ;;  %v618_v12 = vrot.slane %v4614_v36, 7 }
 0x108   : > { %v1252_v51 = vadd.f32 %v4509_v19, %v1220_v22  ;;  %v1086_v10 = vadd.f32 %v1056_v55, %v985_v11  ;;  %v1019_v41 = vrot.slane %v4585_v23, 1  ;;  %v1057_v40 = vmul.f32 %v4332_v43, %v1017_v15 }
 0x109   : > { %v921_v39 = vadd.f32 %v889_v62, %v853_v9  ;;  %v723_v35 = vadd.f32 %v691_v48, %v656_v21  ;;  %v760_v58 = vmul.f32 %v4306_v26, %v618_v12  ;;  %v824_v19 = vmul.f32 %v4568_v34, %v4297_v18 }
 0x10a   : > { %v4626_v1 = vadd.f32 %v4394_v53, %v1252_v51  ;;  %v1155_v32 = vadd.f32 %v1123_v17, %v1086_v10  ;;  %v1124_v54 = vmul.f32 %v4335_v46, %v1018_v5  ;;  %v890_v60 = vmul.f32 %v4585_v23, %v4311_v28 }
 0x10b   : > { %v986_v14 = vadd.f32 %v957_v6, %v921_v39  ;;  %v4634_v20 = vunpack.c.h.bf16 %v3274_v59  ;;  %v789_v63 = vadd.f32 %v760_v58, %v723_v35  ;;  %v657_v55 = vmul.f32 %v4302_v24, %v617_v45 }
 0x10c   : > { %v1346_v15 = vsel %vm1315_vm2, %v4626_v1, 0.0  ;;  %v1221_v50 = vadd.f32 %v1192_v56, %v1155_v32  ;;  %v1193_v7 = vmul.f32 %v4323_v38, %v1019_v41  ;;  %v692_v22 = vmul.f32 %v4304_v25, %v618_v12 }
 0x10d   : > { %1347 = vadd.xlane.f32.xlu0 %v1346_v15  ;;  %v1087_v2 = vadd.f32 %v1057_v40, %v986_v14  ;;  %v619_v62 = vrot.slane %v4634_v20, 7  ;;  %v854_v17 = vadd.f32 %v824_v19, %v789_v63  ;;  %v958_v59 = vmul.f32 %v4614_v36, %v4313_v29 }
 0x10e   : > { %v1253_v11 = vadd.f32 %v4540_v3, %v1221_v50  ;;  %v724_v6 = vadd.f32 %v692_v22, %v657_v55  ;;  %v825_v45 = vmul.f32 %v4585_v23, %v4297_v18  ;;  %v1020_v10 = vrot.slane %v4614_v36, 1 }
 0x10f   : > { %v1156_v9 = vadd.f32 %v1124_v54, %v1087_v2  ;;  %v761_v21 = vmul.f32 %v4306_v26, %v619_v62  ;;  %v922_v51 = vadd.f32 %v890_v60, %v854_v17  ;;  %v1058_v56 = vmul.f32 %v4332_v43, %v1018_v5 }
 0x110   : > { %v4649_v48 = vadd.f32 %v4394_v53, %v1253_v11  ;;  %v891_v40 = vmul.f32 %v4614_v36, %v4311_v28  ;;  %v658_v35 = vmul.f32 %v4302_v24, %v618_v12  ;;  %v1125_v19 = vmul.f32 %v4335_v46, %v1019_v41 }
 0x111   : > { %v1222_v3 = vadd.f32 %v1193_v7, %v1156_v9  ;;  %v790_v39 = vadd.f32 %v761_v21, %v724_v6  ;;  %v987_v58 = vadd.f32 %v958_v59, %v922_v51  ;;  %v693_v14 = vmul.f32 %v4304_v25, %v619_v62 }
 0x112   : > { %v1349_v32 = vsel %vm1315_vm2, %v4649_v48, 0.0  ;;  %v959_v5 = vmul.f32 %v4634_v20, %v4313_v29  ;;  %v1194_v50 = vmul.f32 %v4323_v38, %v1020_v10  ;;  %v826_v12 = vmul.f32 %v4614_v36, %v4297_v18 }
 0x113   : > { %1350 = vadd.xlane.f32.xlu1 %v1349_v32  ;;  %v1254_v54 = vadd.f32 %v4568_v34, %v1222_v3  ;;  %v855_v60 = vadd.f32 %v825_v45, %v790_v39  ;;  %v1088_v15 = vadd.f32 %v1058_v56, %v987_v58  ;;  %v725_v63 = vadd.f32 %v693_v14, %v658_v35 }
 0x114   : > { %v1021_v7 = vrot.slane %v4634_v20, 1  ;;  %v1059_v62 = vmul.f32 %v4332_v43, %v1019_v41  ;;  %v892_v11 = vmul.f32 %v4634_v20, %v4311_v28  ;;  %v1126_v9 = vmul.f32 %v4335_v46, %v1020_v10 }
 0x115   : > { %v4667_v55 = vadd.f32 %v4394_v53, %v1254_v54  ;;  %v923_v2 = vadd.f32 %v891_v40, %v855_v60  ;;  %v1157_v34 = vadd.f32 %v1125_v19, %v1088_v15  ;;  %v791_v22 = vadd.f32 %v4472_v42, %v725_v63 }
 0x116   : > { %v1195_v51 = vmul.f32 %v4323_v38, %v1021_v7  ;;  %v1060_v3 = vmul.f32 %v4332_v43, %v1020_v10  ;;  %v1127_v32 = vmul.f32 %v4335_v46, %v1021_v7  ;;  %vm2328_vm5 = vcmask 519168  }
 0x117   : > { %v1352_v17 = vsel %vm1315_vm2, %v4667_v55, 0.0  ;;  %v988_v59 = vadd.f32 %v959_v5, %v923_v2  ;;  %v1223_v6 = vadd.f32 %v1194_v50, %v1157_v34  ;;  %v856_v21 = vadd.f32 %v826_v12, %v791_v22 }
 0x118   : > { %1353 = vadd.xlane.f32.xlu0 %v1352_v17  ;;  %vm2395_vm6 = vcmask 257024   ;;  %vm2858_vm7 = vcmask 1040384   ;;  %vm2860_vm8 = vcmask 1041408   ;;  %vm2862_vm9 = vcmask 1042432  }
 0x119   : > { %v1089_v45 = vadd.f32 %v1059_v62, %v988_v59  ;;  %v1255_v41 = vadd.f32 %v4585_v23, %v1223_v6  ;;  %v924_v56 = vadd.f32 %v892_v11, %v856_v21  ;;  %v3276_v62 = vld [vmem:[%s4273_s18 + $0x48] sm:$0xff]   ;;  %vm2864_vm10 = vcmask 1043456  }
 0x11a   : > { %vm2866_vm11 = vcmask 1044480   ;;  %vm2868_vm12 = vcmask 1045504   ;;  %vm2870_vm13 = vcmask 1046528   ;;  %vm2989_vm14 = vcmask 256000  }
 0x11b   : > { %v1158_v39 = vadd.f32 %v1126_v9, %v1089_v45  ;;  %v4681_v40 = vadd.f32 %v4394_v53, %v1255_v41  ;;  %v989_v35 = vadd.f32 %v4495_v0, %v924_v56  ;;  %v4714_v9 = vunpack.c.h.bf16 %v3276_v62 }
 0x11c   : > { %vm2992_vm15 = vcmask 259075   ;;  %vm2995_vm0 = vcmask 261126   ;;  %vm2997_vm1 = vcmask 253952  }
 0x11d   : > { %v1224_v58 = vadd.f32 %v1195_v51, %v1158_v39  ;;  %v1355_v19 = vsel %vm1315_vm2, %v4681_v40, 0.0  ;;  %v1090_v14 = vadd.f32 %v1060_v3, %v989_v35  ;;  %v623_v51 = vrot.slane %v4714_v9, 7 }
 0x11e   : > { %1356 = vadd.xlane.f32.xlu1 %v1355_v19 }
 0x11f   : > { %v1256_v23 = vadd.f32 %v4614_v36, %v1224_v58  ;;  %v1159_v54 = vadd.f32 %v1127_v32, %v1090_v14  ;;  %v3275_v36 = vld [vmem:[%s4273_s18 + $0x40] sm:$0xff]   ;;  %v3277_v14 = vld [vmem:[%s4273_s18 + $0x50] sm:$0xff]  }
 0x120   : > { %v4701_v12 = vunpack.c.l.bf16 %v3275_v36  ;;  %v4703_v2 = vunpack.c.h.bf16 %v3275_v36 }
 0x121   : > { %v4689_v10 = vadd.f32 %v4394_v53, %v1256_v23  ;;  %v1225_v60 = vadd.f32 %v4504_v13, %v1159_v54  ;;  %v764_v54 = vmul.f32 %v4306_v26, %v623_v51 }
 0x122   : > { %v620_v7 = vrot.slane %v4701_v12, 7  ;;  %v621_v34 = vrot.slane %v4703_v2, 7  ;;  %v893_v35 = vmul.f32 %v4701_v12, %v4311_v28 }
 0x123   : > { %5836 = vst [vmem:[#allocation18_spill] sm:$0xff] %v4689_v10  ;;  %v1358_v5 = vsel %vm1315_vm2, %v4689_v10, 0.0  ;;  %v1257_v15 = vadd.f32 %v4634_v20, %v1225_v60  ;;  %v4709_v20 = vunpack.c.l.bf16 %v3276_v62  ;;  %v827_v62 = vmul.f32 %v4701_v12, %v4297_v18 }
 0x124   : > { %1359 = vadd.xlane.f32.xlu0 %v1358_v5  ;;  %v694_v22 = vmul.f32 %v4304_v25, %v620_v7  ;;  %v762_v17 = vmul.f32 %v4306_v26, %v621_v34  ;;  %v659_v21 = vmul.f32 %v4302_v24, %v620_v7  ;;  %v695_v45 = vmul.f32 %v4304_v25, %v621_v34 }
 0x125   : > { %v4696_v50 = vadd.f32 %v4394_v53, %v1257_v15  ;;  %v622_v59 = vrot.slane %v4709_v20, 7  ;;  %v660_v41 = vmul.f32 %v4302_v24, %v621_v34  ;;  %v960_v15 = vmul.f32 %v4703_v2, %v4313_v29 }
 0x126   : > { %v726_v11 = vadd.f32 %v694_v22, %v4317_v31  ;;  %v727_v58 = vadd.f32 %v695_v45, %v659_v21  ;;  %v896_v10 = vmul.f32 %v4714_v9, %v4311_v28 }
 0x127   : > { %5837 = vst [vmem:[#allocation19_spill] sm:$0xff] %v4696_v50  ;;  %v1361_v63 = vsel %vm1315_vm2, %v4696_v50, 0.0  ;;  %v696_v56 = vmul.f32 %v4304_v25, %v622_v59  ;;  %v763_v19 = vmul.f32 %v4306_v26, %v622_v59  ;;  %v661_v45 = vmul.f32 %v4302_v24, %v622_v59 }
 0x128   : > { %1362 = vadd.xlane.f32.xlu1 %v1361_v63  ;;  %v792_v6 = vadd.f32 %v762_v17, %v726_v11  ;;  %v4732_v63 = vunpack.c.l.bf16 %v3277_v14  ;;  %v828_v11 = vmul.f32 %v4703_v2, %v4297_v18 }
 0x129   : > { %v728_v23 = vadd.f32 %v696_v56, %v660_v41  ;;  %v793_v7 = vadd.f32 %v763_v19, %v727_v58  ;;  %v697_v41 = vmul.f32 %v4304_v25, %v623_v51  ;;  %v894_v19 = vmul.f32 %v4703_v2, %v4311_v28 }
 0x12a   : > { %v857_v39 = vadd.f32 %v4309_v27, %v792_v6 }
 0x12b   : > { %v794_v22 = vadd.f32 %v764_v54, %v728_v23  ;;  %v858_v58 = vadd.f32 %v827_v62, %v793_v7  ;;  %v895_v23 = vmul.f32 %v4709_v20, %v4311_v28  ;;  %v1023_v62 = vrot.slane %v4703_v2, 1 }
 0x12c   : > { %v925_v5 = vadd.f32 %v893_v35, %v857_v39  ;;  %v624_v39 = vrot.slane %v4732_v63, 7 }
 0x12d   : > { %v859_v59 = vadd.f32 %v828_v11, %v794_v22 }
 0x167   : > { %v1318_v3 = vpop.xlane.xlu0 %1317 }
 0x168   : > { %v1413_v32 = vmul.f32 0.03125, %v1318_v3  ;;  %v990_v3 = vadd.f32 %v960_v15, %v925_v5  ;;  %v729_v5 = vadd.f32 %v697_v41, %v661_v45 }
 0x16a   : > { %v4728_v60 = vsub.f32 %v4403_v4, %v1413_v32  ;;  %v4740_v4 = vunpack.c.h.bf16 %v3277_v14  ;;  %v1022_v32 = vrot.slane %v4701_v12, 1 }
 0x16b   : > { %v1324_v34 = vpop.xlane.xlu1 %1323 }
 0x16c   : > { %5838 = vst [vmem:[#allocation20_spill] sm:$0xff] %v4728_v60  ;;  %v1477_v36 = vmul.f32 %v4728_v60, %v4728_v60  ;;  %v1415_v17 = vmul.f32 0.03125, %v1324_v34  ;;  %v1321_v6 = vpop.xlane.xlu0 %1320  ;;  %v625_v15 = vrot.slane %v4740_v4, 7  ;;  %v698_v34 = vmul.f32 %v4304_v25, %v624_v39 }
 0x16d   : > { %v1414_v56 = vmul.f32 0.03125, %v1321_v6  ;;  %v1128_v6 = vmul.f32 %v4335_v46, %v1022_v32 }
 0x16e   : > { %v1509_v21 = vsel %vm1315_vm2, %v1477_v36, 0.0  ;;  %v4747_v35 = vsub.f32 %v4427_v37, %v1415_v17  ;;  %v765_v37 = vmul.f32 %v4306_v26, %v624_v39  ;;  %v3278_v36 = vld [vmem:[%s4273_s18 + $0x58] sm:$0xff]   ;;  %v1091_v17 = vadd.f32 %v4352_v57, %v990_v3 }
 0x16f   : > { %1510 = vadd.xlane.f32.xlu0 %v1509_v21  ;;  %v4753_v14 = vsub.f32 %v4432_v49, %v1414_v56  ;;  %v662_v49 = vmul.f32 %v4302_v24, %v623_v51  ;;  %v926_v21 = vadd.f32 %v894_v19, %v858_v58  ;;  %v961_v56 = vmul.f32 %v4709_v20, %v4313_v29 }
 0x170   : > { %5839 = vst [vmem:[#allocation21_spill] sm:$0xff] %v4747_v35  ;;  %v1479_v54 = vmul.f32 %v4747_v35, %v4747_v35  ;;  %v4773_v8 = vunpack.c.l.bf16 %v3278_v36  ;;  %v927_v51 = vadd.f32 %v895_v23, %v859_v59  ;;  %v962_v35 = vmul.f32 %v4714_v9, %v4313_v29 }
 0x171   : > { %5840 = vst [vmem:[#allocation22_spill] sm:$0xff] %v4753_v14  ;;  %v1478_v7 = vmul.f32 %v4753_v14, %v4753_v14  ;;  %v766_v3 = vmul.f32 %v4306_v26, %v625_v15  ;;  %v730_v58 = vadd.f32 %v698_v34, %v662_v49  ;;  %v663_v19 = vmul.f32 %v4302_v24, %v624_v39 }
 0x172   : > { %v1327_v22 = vpop.xlane.xlu1 %1326  ;;  %v1515_v11 = vsel %vm1315_vm2, %v1479_v54, 0.0  ;;  %v795_v54 = vadd.f32 %v765_v37, %v729_v5  ;;  %v1061_v59 = vmul.f32 %v4332_v43, %v1022_v32  ;;  %v991_v37 = vadd.f32 %v961_v56, %v926_v21 }
 0x173   : > { %v1416_v45 = vmul.f32 0.03125, %v1327_v22  ;;  %1516 = vadd.xlane.f32.xlu0 %v1515_v11  ;;  %v1512_v41 = vsel %vm1315_vm2, %v1478_v7, 0.0  ;;  %v699_v7 = vmul.f32 %v4304_v25, %v625_v15  ;;  %v1160_v22 = vadd.f32 %v1128_v6, %v1091_v17 }
 0x174   : > { %1513 = vadd.xlane.f32.xlu1 %v1512_v41  ;;  %v1196_v11 = vmul.f32 %v4323_v38, %v1023_v62  ;;  %v1024_v41 = vrot.slane %v4709_v20, 1  ;;  %v626_v49 = vrot.slane %v4773_v8, 7  ;;  %v992_v34 = vadd.f32 %v962_v35, %v927_v51 }
 0x175   : > { %v4779_v14 = vsub.f32 %v4457_v16, %v1416_v45  ;;  %v829_v16 = vmul.f32 %v4709_v20, %v4297_v18  ;;  %v1062_v17 = vmul.f32 %v4332_v43, %v1023_v62  ;;  %v830_v6 = vmul.f32 %v4714_v9, %v4297_v18 }
 0x176   : > { %v796_v32 = vadd.f32 %v766_v3, %v730_v58  ;;  %v731_v60 = vadd.f32 %v699_v7, %v663_v19  ;;  %v767_v50 = vmul.f32 %v4306_v26, %v626_v49  ;;  %v1226_v56 = vadd.f32 %v1196_v11, %v1160_v22 }
 0x177   : > { %5841 = vst [vmem:[#allocation23_spill] sm:$0xff] %v4779_v14  ;;  %v1330_v23 = vpop.xlane.xlu0 %1329  ;;  %v1480_v5 = vmul.f32 %v4779_v14, %v4779_v14  ;;  %v4799_v14 = vunpack.c.h.bf16 %v3278_v36  ;;  %v1129_v35 = vmul.f32 %v4335_v46, %v1023_v62  ;;  %v1025_v51 = vrot.slane %v4714_v9, 1 }
 0x178   : > { %v1417_v39 = vmul.f32 0.03125, %v1330_v23  ;;  %v860_v23 = vadd.f32 %v829_v16, %v795_v54  ;;  %v1092_v58 = vadd.f32 %v1061_v59, %v991_v37  ;;  %v1093_v19 = vadd.f32 %v1062_v17, %v992_v34 }
 0x179   : > { %v1518_v45 = vsel %vm1315_vm2, %v1480_v5, 0.0  ;;  %v861_v7 = vadd.f32 %v830_v6, %v796_v32  ;;  %v897_v36 = vmul.f32 %v4732_v63, %v4311_v28  ;;  %v797_v22 = vadd.f32 %v767_v50, %v731_v60 }
 0x17a   : > { %v4797_v21 = vsub.f32 %v4480_v44, %v1417_v39  ;;  %1519 = vadd.xlane.f32.xlu1 %v1518_v45  ;;  %v1130_v44 = vmul.f32 %v4335_v46, %v1024_v41  ;;  %v831_v62 = vmul.f32 %v4732_v63, %v4297_v18  ;;  %v627_v5 = vrot.slane %v4799_v14, 7 }
 0x17b   : > { %v664_v16 = vmul.f32 %v4302_v24, %v625_v15  ;;  %v700_v59 = vmul.f32 %v4304_v25, %v626_v49  ;;  %v1258_v39 = vadd.f32 %v4701_v12, %v1226_v56  ;;  %v928_v34 = vadd.f32 %v896_v10, %v860_v23 }
 0x17c   : > { %5842 = vst [vmem:[#allocation24_spill] sm:$0xff] %v4797_v21  ;;  %v1481_v3 = vmul.f32 %v4797_v21, %v4797_v21  ;;  %v963_v50 = vmul.f32 %v4732_v63, %v4313_v29  ;;  %v1161_v60 = vadd.f32 %v1129_v35, %v1092_v58  ;;  %v1197_v17 = vmul.f32 %v4323_v38, %v1024_v41 }
 0x17d   : > { %v1198_v6 = vmul.f32 %v4323_v38, %v1025_v51  ;;  %v964_v45 = vmul.f32 %v4740_v4, %v4313_v29  ;;  %v929_v32 = vadd.f32 %v897_v36, %v861_v7  ;;  %v898_v12 = vmul.f32 %v4740_v4, %v4311_v28 }
 0x17e   : > { %v1333_v11 = vpop.xlane.xlu1 %1332  ;;  %v1521_v54 = vsel %vm1315_vm2, %v1481_v3, 0.0  ;;  %v862_v3 = vadd.f32 %v831_v62, %v797_v22  ;;  %v1162_v10 = vadd.f32 %v1130_v44, %v1093_v19  ;;  %v1063_v56 = vmul.f32 %v4332_v43, %v1024_v41 }
 0x17f   : > { %v1418_v37 = vmul.f32 0.03125, %v1333_v11  ;;  %1522 = vadd.xlane.f32.xlu0 %v1521_v54  ;;  %v732_v23 = vadd.f32 %v700_v59, %v664_v16  ;;  %v768_v35 = vmul.f32 %v4306_v26, %v627_v5  ;;  %v993_v11 = vadd.f32 %v963_v50, %v928_v34 }
 0x180   : > { %v665_v54 = vmul.f32 %v4302_v24, %v626_v49  ;;  %v4835_v7 = vadd.f32 %v4394_v53, %v1258_v39  ;;  %v1227_v36 = vadd.f32 %v1197_v17, %v1161_v60  ;;  %v1026_v22 = vrot.slane %v4732_v63, 1 }
 0x181   : > { %v4824_v15 = vsub.f32 %v4512_v61, %v1418_v37  ;;  %v701_v61 = vmul.f32 %v4304_v25, %v627_v5  ;;  %v1064_v41 = vmul.f32 %v4332_v43, %v1025_v51  ;;  %v994_v62 = vadd.f32 %v964_v45, %v929_v32 }
 0x182   : > { %5844 = vst [vmem:[#allocation26_spill] sm:$0xff] %v4835_v7  ;;  %v930_v16 = vadd.f32 %v898_v12, %v862_v3  ;;  %v965_v59 = vmul.f32 %v4773_v8, %v4313_v29  ;;  %v1131_v5 = vmul.f32 %v4335_v46, %v1025_v51  ;;  %v798_v37 = vadd.f32 %v768_v35, %v732_v23 }
 0x183   : > { %5843 = vst [vmem:[#allocation25_spill] sm:$0xff] %v4824_v15  ;;  %v1482_v58 = vmul.f32 %v4824_v15, %v4824_v15  ;;  %v832_v39 = vmul.f32 %v4740_v4, %v4297_v18  ;;  %v1228_v34 = vadd.f32 %v1198_v6, %v1162_v10  ;;  %v1094_v50 = vadd.f32 %v1063_v56, %v993_v11  ;;  %v3279_v15 = vld [vmem:[%s4273_s18 + $0x60] sm:$0xff]  }
 0x184   : > { %v1199_v60 = vmul.f32 %v4323_v38, %v1026_v22  ;;  %v733_v17 = vadd.f32 %v701_v61, %v665_v54  ;;  %v1259_v32 = vadd.f32 %v4703_v2, %v1227_v36  ;;  %v1027_v3 = vrot.slane %v4740_v4, 1 }
 0x185   : > { %v1336_v19 = vpop.xlane.xlu0 %1335  ;;  %v1524_v44 = vsel %vm1315_vm2, %v1482_v58, 0.0  ;;  %v1132_v12 = vmul.f32 %v4335_v46, %v1026_v22  ;;  %v1095_v23 = vadd.f32 %v1064_v41, %v994_v62  ;;  %v995_v35 = vadd.f32 %v965_v59, %v930_v16 }
 0x186   : > { %v1419_v49 = vmul.f32 0.03125, %v1336_v19  ;;  %1525 = vadd.xlane.f32.xlu1 %v1524_v44  ;;  %v1065_v58 = vmul.f32 %v4332_v43, %v1026_v22  ;;  %v899_v6 = vmul.f32 %v4773_v8, %v4311_v28  ;;  %v4858_v11 = vunpack.c.l.bf16 %v3279_v15 }
 0x187   : > { %v1260_v2 = vadd.f32 %v4709_v20, %v1228_v34  ;;  %v1163_v54 = vadd.f32 %v1131_v5, %v1094_v50  ;;  %v799_v61 = vadd.f32 %v4472_v42, %v733_v17  ;;  %v833_v36 = vmul.f32 %v4773_v8, %v4297_v18 }
 0x188   : > { %v4848_v45 = vsub.f32 %v4544_v52, %v1419_v49  ;;  %v863_v52 = vadd.f32 %v832_v39, %v798_v37  ;;  %v4869_v19 = vadd.f32 %v4394_v53, %v1259_v32  ;;  %v1200_v44 = vmul.f32 %v4323_v38, %v1027_v3 }
 0x189   : > { %v1339_v51 = vpop.xlane.xlu1 %1338  ;;  %v1164_v62 = vadd.f32 %v1132_v12, %v1095_v23  ;;  %v1096_v16 = vadd.f32 %v1065_v58, %v995_v35  ;;  %v1133_v20 = vmul.f32 %v4335_v46, %v1027_v3  ;;  %v966_v59 = vmul.f32 %v4799_v14, %v4313_v29 }
 0x18a   : > { %5845 = vst [vmem:[#allocation27_spill] sm:$0xff] %v4848_v45  ;;  %v1420_v10 = vmul.f32 0.03125, %v1339_v51  ;;  %v1483_v56 = vmul.f32 %v4848_v45, %v4848_v45  ;;  %5847 = vst [vmem:[#allocation29_spill] sm:$0xff] %v4869_v19  ;;  %v4877_v5 = vunpack.c.h.bf16 %v3279_v15  ;;  %v628_v37 = vrot.slane %v4858_v11, 7  ;;  %v4891_v15 = vld [vmem:[%s5777_s2] ss:$0 sm:$0xff] }
 0x18b   : > { %v1229_v53 = vadd.f32 %v1199_v60, %v1163_v54  ;;  %v1028_v39 = vrot.slane %v4773_v8, 1  ;;  %v864_v34 = vadd.f32 %v833_v36, %v799_v61  ;;  %v900_v50 = vmul.f32 %v4799_v14, %v4311_v28  ;;  %v3280_v54 = vld [vmem:[%s4273_s18 + $0x68] sm:$0xff]  }
 0x18c   : > { %v4865_v22 = vsub.f32 %v4562_v47, %v1420_v10  ;;  %v1527_v41 = vsel %vm1315_vm2, %v1483_v56, 0.0  ;;  %v931_v47 = vadd.f32 %v899_v6, %v863_v52  ;;  %v4886_v12 = vsel %vm1315_vm2, %v4835_v7, 0.0 }
 0x18d   : > { %1528 = vadd.xlane.f32.xlu0 %v1527_v41  ;;  %v4894_v60 = vadd.f32 %v4891_v15, %v1260_v2  ;;  %v1230_v23 = vadd.f32 %v1200_v44, %v1164_v62  ;;  %v1165_v35 = vadd.f32 %v1133_v20, %v1096_v16  ;;  %v1201_v58 = vmul.f32 %v4323_v38, %v1028_v39 }
 0x18e   : > { %5846 = vst [vmem:[#allocation28_spill] sm:$0xff] %v4865_v22  ;;  %v1484_v49 = vmul.f32 %v4865_v22, %v4865_v22  ;;  %v996_v6 = vadd.f32 %v966_v59, %v931_v47  ;;  %v1066_v10 = vmul.f32 %v4332_v43, %v1027_v3  ;;  %v4899_v56 = vrot.slane %v4877_v5, 7 }
 0x18f   : > { %5848 = vst [vmem:[#allocation30_spill] sm:$0xff] %v4894_v60  ;;  %v702_v52 = vmul.f32 %v4304_v25, %v628_v37  ;;  %v4908_v36 = vsel %vm1315_vm2, %v4869_v19, 0.0  ;;  %v1261_v41 = vadd.f32 %v4714_v9, %v1229_v53  ;;  %v932_v44 = vadd.f32 %v900_v50, %v864_v34 }
 0x190   : > { %v1342_v17 = vpop.xlane.xlu0 %1341  ;;  %v1530_v32 = vsel %vm1315_vm2, %v1484_v49, 0.0  ;;  %v4913_v3 = vsel %vm1315_vm2, %v4894_v60, 0.0  ;;  %v1029_v16 = vrot.slane %v4799_v14, 1  ;;  %v1134_v20 = vmul.f32 %v4335_v46, %v1028_v39  ;;  %v3282_v60 = vld [vmem:[%s4273_s18 + $0x78] sm:$0xff]  }
 0x191   : > { %v1421_v51 = vmul.f32 0.03125, %v1342_v17  ;;  %1531 = vadd.xlane.f32.xlu1 %v1530_v32  ;;  %v1262_v59 = vadd.f32 %v4732_v63, %v1230_v23  ;;  %v1231_v49 = vadd.f32 %v1201_v58, %v1165_v35  ;;  %v4920_v47 = vunpack.c.l.bf16 %v3280_v54 }
 0x192   : > { %v1097_v53 = vadd.f32 %v1066_v10, %v996_v6  ;;  %v734_v34 = vadd.f32 %v702_v52, %v4317_v31  ;;  %v769_v50 = vmul.f32 %v4306_v26, %v4899_v56  ;;  %v4930_v32 = vadd.f32 %v4891_v15, %v1261_v41 }
 0x193   : > { %v4904_v61 = vsub.f32 %v4588_v30, %v1421_v51  ;;  %v1345_v2 = vpop.xlane.xlu1 %1344  ;;  %v997_v51 = vadd.f32 %v4495_v0, %v932_v44  ;;  %v1067_v63 = vmul.f32 %v4332_v43, %v1028_v39  ;;  %v1202_v23 = vmul.f32 %v4323_v38, %v1029_v16 }
 0x194   : > { %v1422_v62 = vmul.f32 0.03125, %v1345_v2  ;;  %5851 = vst [vmem:[#allocation33_spill] sm:$0xff] %v4930_v32  ;;  %v1030_v31 = vrot.slane %v4858_v11, 1  ;;  %v4939_v35 = vrot.slane %v4877_v5, 1  ;;  %v4942_v58 = vadd.f32 %v4891_v15, %v1262_v59 }
 0x195   : > { %5849 = vst [vmem:[#allocation31_spill] sm:$0xff] %v4904_v61  ;;  %v1485_v30 = vmul.f32 %v4904_v61, %v4904_v61  ;;  %v1263_v6 = vadd.f32 %v4740_v4, %v1231_v49  ;;  %v1135_v10 = vmul.f32 %v4335_v46, %v1029_v16  ;;  %v901_v39 = vmul.f32 %v4858_v11, %v4311_v28 }
 0x196   : > { %v4923_v9 = vsub.f32 %v4601_v33, %v1422_v62  ;;  %v1166_v41 = vadd.f32 %v1134_v20, %v1097_v53  ;;  %v800_v44 = vadd.f32 %v769_v50, %v734_v34  ;;  %v630_v62 = vrot.slane %v4920_v47, 7 }
 0x197   : > { %v1533_v17 = vsel %vm1315_vm2, %v1485_v30, 0.0  ;;  %v3281_v30 = vld [vmem:[%s4273_s18 + $0x70] sm:$0xff]   ;;  %v1098_v19 = vadd.f32 %v1067_v63, %v997_v51  ;;  %v666_v59 = vmul.f32 %v4302_v24, %v628_v37  ;;  %v703_v4 = vmul.f32 %v4304_v25, %v4899_v56 }
 0x198   : > { %5850 = vst [vmem:[#allocation32_spill] sm:$0xff] %v4923_v9  ;;  %1534 = vadd.xlane.f32.xlu0 %v1533_v17  ;;  %v1486_v33 = vmul.f32 %v4923_v9, %v4923_v9  ;;  %v967_v16 = vmul.f32 %v4877_v5, %v4313_v29  ;;  %v4957_v49 = vmul.f32 %v4335_v46, %v1030_v31  ;;  %v4963_v53 = vunpack.c.h.bf16 %v3280_v54 }
 0x199   : > { %v4961_v20 = vmul.f32 %v4323_v38, %v4939_v35  ;;  %v4969_v37 = vadd.f32 %v4891_v15, %v1263_v6  ;;  %v770_v50 = vmul.f32 %v4306_v26, %v630_v62  ;;  %v4972_v51 = vunpack.c.l.bf16 %v3281_v30 }
 0x19a   : > { %v1348_v52 = vpop.xlane.xlu0 %1347  ;;  %v1536_v2 = vsel %vm1315_vm2, %v1486_v33, 0.0  ;;  %v1232_v63 = vadd.f32 %v1202_v23, %v1166_v41  ;;  %v865_v33 = vadd.f32 %v4309_v27, %v800_v44  ;;  %v902_v54 = vmul.f32 %v4877_v5, %v4311_v28 }
 0x19b   : > { %v1423_v17 = vmul.f32 0.03125, %v1348_v52  ;;  %1537 = vadd.xlane.f32.xlu1 %v1536_v2  ;;  %5853 = vst [vmem:[#allocation35_spill] sm:$0xff] %v4969_v37  ;;  %v834_v52 = vmul.f32 %v4858_v11, %v4297_v18  ;;  %v1167_v2 = vadd.f32 %v1135_v10, %v1098_v19  ;;  %v4983_v6 = vmul.f32 %v4920_v47, %v4313_v29 }
 0x19c   : > { %v4987_v23 = vrot.slane %v4920_v47, 1  ;;  %v631_v27 = vrot.slane %v4963_v53, 7  ;;  %v667_v41 = vmul.f32 %v4302_v24, %v4899_v56  ;;  %v704_v44 = vmul.f32 %v4304_v25, %v630_v62 }
 0x19d   : > { %v4966_v34 = vsub.f32 %v4626_v1, %v1423_v17  ;;  %v735_v17 = vadd.f32 %v703_v4, %v666_v59  ;;  %v632_v10 = vrot.slane %v4972_v51, 7  ;;  %v4995_v59 = vunpack.c.h.bf16 %v3281_v30 }
 0x19e   : > { %v1264_v4 = vadd.f32 %v4773_v8, %v1232_v63  ;;  %v4999_v61 = vmul.f32 %v4332_v43, %v1030_v31  ;;  %v5001_v22 = vunpack.c.l.bf16 %v3282_v60  ;;  %v5011_v30 = vmul.f32 %v4335_v46, %v4939_v35 }
 0x19f   : > { %5852 = vst [vmem:[#allocation34_spill] sm:$0xff] %v4966_v34  ;;  %v1487_v1 = vmul.f32 %v4966_v34, %v4966_v34  ;;  %v933_v34 = vadd.f32 %v901_v39, %v865_v33  ;;  %v771_v8 = vmul.f32 %v4306_v26, %v631_v27  ;;  %v668_v39 = vmul.f32 %v4302_v24, %v630_v62 }
 0x1a0   : > { %v1351_v7 = vpop.xlane.xlu1 %1350  ;;  %v705_v31 = vmul.f32 %v4304_v25, %v631_v27  ;;  %v669_v33 = vmul.f32 %v4302_v24, %v631_v27  ;;  %v5026_v62 = vunpack.c.h.bf16 %v3282_v60  ;;  %v772_v37 = vmul.f32 %v4306_v26, %v632_v10 }
 0x1a1   : > { %v1424_v9 = vmul.f32 0.03125, %v1351_v7  ;;  %v1539_v19 = vsel %vm1315_vm2, %v1487_v1, 0.0  ;;  %v5007_v7 = vadd.f32 %v4504_v13, %v1167_v2  ;;  %v801_v1 = vadd.f32 %v770_v50, %v735_v17 }
 0x1a2   : > { %1540 = vadd.xlane.f32.xlu0 %v1539_v19  ;;  %v736_v19 = vadd.f32 %v704_v44, %v667_v41  ;;  %v706_v50 = vmul.f32 %v4304_v25, %v632_v10  ;;  %v5023_v17 = vmul.f32 %v4323_v38, %v4987_v23  ;;  %v634_v41 = vrot.slane %v5001_v22, 7 }
 0x1a3   : > { %v5004_v56 = vsub.f32 %v4649_v48, %v1424_v9  ;;  %v633_v9 = vrot.slane %v4995_v59, 7  ;;  %v998_v45 = vadd.f32 %v967_v16, %v933_v34  ;;  %v866_v21 = vadd.f32 %v834_v52, %v801_v1 }
 0x1a4   : > { %v737_v13 = vadd.f32 %v705_v31, %v668_v39  ;;  %v738_v0 = vadd.f32 %v706_v50, %v669_v33  ;;  %v670_v60 = vmul.f32 %v4302_v24, %v632_v10  ;;  %v635_v34 = vrot.slane %v5026_v62, 7 }
 0x1a5   : > { %5854 = vst [vmem:[#allocation36_spill] sm:$0xff] %v5004_v56  ;;  %v1354_v63 = vpop.xlane.xlu0 %1353  ;;  %v1488_v48 = vmul.f32 %v5004_v56, %v5004_v56  ;;  %v835_v56 = vmul.f32 %v4877_v5, %v4297_v18  ;;  %v773_v32 = vmul.f32 %v4306_v26, %v633_v9  ;;  %v708_v52 = vmul.f32 %v4304_v25, %v634_v41 }
 0x1a6   : > { %v1425_v2 = vmul.f32 0.03125, %v1354_v63  ;;  %v802_v63 = vadd.f32 %v771_v8, %v736_v19  ;;  %v5044_v1 = vadd.f32 %v4891_v15, %v1264_v4  ;;  %v1099_v19 = vadd.f32 %v4352_v57, %v998_v45 }
 0x1a7   : > { %v1542_v44 = vsel %vm1315_vm2, %v1488_v48, 0.0  ;;  %v707_v48 = vmul.f32 %v4304_v25, %v633_v9  ;;  %v934_v8 = vadd.f32 %v902_v54, %v866_v21  ;;  %v903_v10 = vmul.f32 %v4920_v47, %v4311_v28 }
 0x1a8   : > { %v5032_v27 = vsub.f32 %v4667_v55, %v1425_v2  ;;  %1543 = vadd.xlane.f32.xlu1 %v1542_v44  ;;  %v671_v55 = vmul.f32 %v4302_v24, %v633_v9  ;;  %v867_v33 = vadd.f32 %v835_v56, %v802_v63  ;;  %v969_v50 = vmul.f32 %v4963_v53, %v4313_v29 }
 0x1a9   : > { %v836_v9 = vmul.f32 %v4920_v47, %v4297_v18  ;;  %v803_v4 = vadd.f32 %v772_v37, %v737_v13  ;;  %v804_v44 = vadd.f32 %v773_v32, %v738_v0  ;;  %v837_v57 = vmul.f32 %v4963_v53, %v4297_v18 }
 0x1aa   : > { %v1489_v16 = vmul.f32 %v5032_v27, %v5032_v27  ;;  %v5057_v21 = vrot.slane %v4963_v53, 1  ;;  %v739_v45 = vadd.f32 %v707_v48, %v670_v60  ;;  %v740_v54 = vadd.f32 %v708_v52, %v671_v55 }
 0x1ab   : > { %v1357_v39 = vpop.xlane.xlu1 %1356  ;;  %v775_v56 = vmul.f32 %v4306_v26, %v635_v34  ;;  %v709_v13 = vmul.f32 %v4304_v25, %v635_v34  ;;  %v1168_v0 = vadd.f32 %v4957_v49, %v1099_v19  ;;  %v999_v32 = vadd.f32 %v4983_v6, %v934_v8 }
 0x1ac   : > { %v1545_v31 = vsel %vm1315_vm2, %v1489_v16, 0.0  ;;  %v1426_v2 = vmul.f32 0.03125, %v1357_v39  ;;  %v774_v16 = vmul.f32 %v4306_v26, %v634_v41  ;;  %v672_v39 = vmul.f32 %v4302_v24, %v634_v41 }
 0x1ad   : > { %1546 = vadd.xlane.f32.xlu0 %v1545_v31  ;;  %v935_v37 = vadd.f32 %v903_v10, %v867_v33  ;;  %v904_v60 = vmul.f32 %v4963_v53, %v4311_v28  ;;  %v869_v52 = vadd.f32 %v837_v57, %v804_v44  ;;  %v905_v26 = vmul.f32 %v4972_v51, %v4311_v28  ;;  %v5855_v10 = vld [vmem:[#allocation18_spill] sm:$0xff] }
 0x1ae   : > { %v5061_v63 = vsub.f32 %v4681_v40, %v1426_v2  ;;  %v868_v40 = vadd.f32 %v836_v9, %v803_v4  ;;  %v1069_v25 = vmul.f32 %v4332_v43, %v4939_v35  ;;  %v806_v49 = vadd.f32 %v775_v56, %v740_v54 }
 0x1af   : > { %v839_v6 = vmul.f32 %v4995_v59, %v4297_v18  ;;  %v805_v34 = vadd.f32 %v774_v16, %v739_v45  ;;  %v838_v19 = vmul.f32 %v4972_v51, %v4297_v18  ;;  %v741_v8 = vadd.f32 %v709_v13, %v672_v39 }
 0x1b0   : > { %v1490_v55 = vmul.f32 %v5061_v63, %v5061_v63  ;;  %v1100_v33 = vadd.f32 %v4999_v61, %v999_v32  ;;  %v1000_v9 = vadd.f32 %v969_v50, %v935_v37  ;;  %v1138_v35 = vmul.f32 %v4335_v46, %v4987_v23 }
 0x1b1   : > { %v1360_v48 = vpop.xlane.xlu0 %1359  ;;  %v936_v2 = vadd.f32 %v904_v60, %v868_v40  ;;  %v970_v4 = vmul.f32 %v4972_v51, %v4313_v29  ;;  %v937_v44 = vadd.f32 %v905_v26, %v869_v52  ;;  %v971_v57 = vmul.f32 %v4995_v59, %v4313_v29  ;;  %v5856_v40 = vld [vmem:[#allocation19_spill] sm:$0xff] }
 0x1b2   : > { %v1427_v24 = vmul.f32 0.03125, %v1360_v48  ;;  %v1548_v41 = vsel %vm1315_vm2, %v1490_v55, 0.0  ;;  %v906_v56 = vmul.f32 %v4995_v59, %v4311_v28  ;;  %v871_v61 = vadd.f32 %v839_v6, %v806_v49 }
 0x1b3   : > { %1549 = vadd.xlane.f32.xlu1 %v1548_v41  ;;  %v907_v50 = vmul.f32 %v5001_v22, %v4311_v28  ;;  %v870_v39 = vadd.f32 %v838_v19, %v805_v34  ;;  %v807_v13 = vadd.f32 %v4472_v42, %v741_v8  ;;  %v840_v32 = vmul.f32 %v5001_v22, %v4297_v18 }
 0x1b4   : > { %v5082_v31 = vsub.f32 %v5855_v10, %v1427_v24  ;;  %v1101_v60 = vadd.f32 %v1069_v25, %v1000_v9  ;;  %v1034_v48 = vrot.slane %v4972_v51, 1  ;;  %v1070_v55 = vmul.f32 %v4332_v43, %v4987_v23 }
 0x1b5   : > { %v1363_v45 = vpop.xlane.xlu1 %1362  ;;  %v1001_v26 = vadd.f32 %v970_v4, %v936_v2  ;;  %v1035_v24 = vrot.slane %v4995_v59, 1  ;;  %v1071_v42 = vmul.f32 %v4332_v43, %v5057_v21  ;;  %v1002_v49 = vadd.f32 %v971_v57, %v937_v44 }
 0x1b6   : > { %v1491_v54 = vmul.f32 %v5082_v31, %v5082_v31  ;;  %v1428_v16 = vmul.f32 0.03125, %v1363_v45  ;;  %v972_v18 = vmul.f32 %v5001_v22, %v4313_v29  ;;  %v939_v25 = vadd.f32 %v907_v50, %v871_v61 }
 0x1b7   : > { %v973_v6 = vmul.f32 %v5026_v62, %v4313_v29  ;;  %v938_v41 = vadd.f32 %v906_v56, %v870_v39  ;;  %v872_v34 = vadd.f32 %v840_v32, %v807_v13  ;;  %v908_v19 = vmul.f32 %v5026_v62, %v4311_v28  ;;  %v3635_v56 = vld [vmem:[#allocation10] sm:$0xff]  }
 0x1b8   : > { %v1551_v37 = vsel %vm1315_vm2, %v1491_v54, 0.0  ;;  %v5105_v52 = vsub.f32 %v5856_v40, %v1428_v16  ;;  %v1234_v8 = vadd.f32 %v4961_v20, %v1168_v0  ;;  %v1169_v10 = vadd.f32 %v5011_v30, %v1100_v33  ;;  %v3634_v54 = vld [vmem:[#allocation9] sm:$0xff]   ;;  %3398 = vmatprep.subr.bf16.mxu1 %v3635_v56 }
 0x1b9   : > { %1552 = vadd.xlane.f32.xlu0 %v1551_v37  ;;  %v1170_v9 = vadd.f32 %v1138_v35, %v1101_v60  ;;  %v1205_v2 = vmul.f32 %v4323_v38, %v5057_v21  ;;  %v1102_v29 = vadd.f32 %v1070_v55, %v1001_v26  ;;  %v1139_v44 = vmul.f32 %v4335_v46, %v5057_v21  ;;  %v5857_v60 = vld [vmem:[#allocation33_spill] sm:$0xff]  ;;  %v5858_v55 = vld [vmem:[#allocation16_spill] sm:$0xff] }
 0x1ba   : > { %v1492_v23 = vmul.f32 %v5105_v52, %v5105_v52  ;;  %v1140_v57 = vmul.f32 %v4335_v46, %v1034_v48  ;;  %v1103_v28 = vadd.f32 %v1071_v42, %v1002_v49  ;;  %v1036_v20 = vrot.slane %v5001_v22, 1  ;;  %3362 = vmatprep.subr.bf16.mxu0 %v3634_v54  ;;  %3399 = vmatpush3.bf16.msra.mxu1 %v3635_v56 }
 0x1bb   : > { %v1004_v0 = vadd.f32 %v973_v6, %v939_v25  ;;  %v1073_v30 = vmul.f32 %v4332_v43, %v1035_v24  ;;  %v1265_v33 = vadd.f32 %v4799_v14, %v5007_v7  ;;  %v1003_v35 = vadd.f32 %v972_v18, %v938_v41  ;;  %3363 = vmatpush3.bf16.msra.mxu0 %v3634_v54  ;;  %v3636_v6 = vld [vmem:[#allocation9 + $0x8] sm:$0xff]  }
 0x1bc   : > { %v1554_v4 = vsel %vm1315_vm2, %v1492_v23, 0.0  ;;  %v1072_v45 = vmul.f32 %v4332_v43, %v1034_v48  ;;  %v1266_v21 = vadd.f32 %v4858_v11, %v1234_v8  ;;  %v1235_v61 = vadd.f32 %v5023_v17, %v1169_v10  ;;  %v3637_v23 = vld [vmem:[#allocation10 + $0x8] sm:$0xff]   ;;  %3364 = vmatprep.subr.bf16.mxu0 %v3636_v6 }
 0x1bd   : > { %1365 = vadd.xlane.f32.xlu0 %v4886_v12  ;;  %1555 = vadd.xlane.f32.xlu1 %v1554_v4  ;;  %v940_v12 = vadd.f32 %v908_v19, %v872_v34  ;;  %v1236_v50 = vadd.f32 %v1205_v2, %v1170_v9  ;;  %v1206_v16 = vmul.f32 %v4323_v38, %v1034_v48  ;;  %v1376_v39 = vsel %vm1315_vm2, %v4942_v58, 0.0  ;;  %v5859_v8 = vld [vmem:[#allocation35_spill] sm:$0xff] }
 0x1be   : > { %v1171_v13 = vadd.f32 %v1139_v44, %v1102_v29  ;;  %v1207_v14 = vmul.f32 %v4323_v38, %v1035_v24  ;;  %v1141_v7 = vmul.f32 %v4335_v46, %v1035_v24  ;;  %v1172_v32 = vadd.f32 %v1140_v57, %v1103_v28  ;;  %3400 = vmatprep.subr.bf16.mxu1 %v3637_v23 }
 0x1bf   : > { %v1037_v11 = vrot.slane %v5026_v62, 1  ;;  %v1105_v17 = vadd.f32 %v1073_v30, %v1004_v0  ;;  %v1142_v37 = vmul.f32 %v4335_v46, %v1036_v20  ;;  %v1104_v48 = vadd.f32 %v1072_v45, %v1003_v35  ;;  %3365 = vmatpush3.bf16.msra.mxu0 %v3636_v6  ;;  %3401 = vmatpush3.bf16.msra.mxu1 %v3637_v23  ;;  %v5213_v6 = vld [vmem:[%s5778_s3] ss:$0 sm:$0xff] }
 0x1c0   : > { %v1005_v40 = vadd.f32 %v5858_v55, %v940_v12  ;;  %v1074_v26 = vmul.f32 %v4332_v43, %v1036_v20  ;;  %v5150_v24 = vadd.f32 %v4891_v15, %v1265_v33  ;;  %v5153_v42 = vadd.f32 %v4891_v15, %v1266_v21  ;;  %v5861_v12 = vld [vmem:[#allocation17_spill] sm:$0xff] }
 0x1c1   : > { %1371 = vadd.xlane.f32.xlu0 %v4913_v3  ;;  %1368 = vadd.xlane.f32.xlu1 %v4908_v36  ;;  %v1373_v3 = vsel %vm1315_vm2, %v5857_v60, 0.0  ;;  %v1382_v36 = vsel %vm1315_vm2, %v5044_v1, 0.0  ;;  %v1267_v49 = vadd.f32 %v4877_v5, %v1235_v61  ;;  %v1268_v18 = vadd.f32 %v4920_v47, %v1236_v50 }
 0x1c2   : > { %v1237_v25 = vadd.f32 %v1206_v16, %v1171_v13  ;;  %v1238_v43 = vadd.f32 %v1207_v14, %v1172_v32  ;;  %v1208_v41 = vmul.f32 %v4323_v38, %v1036_v20  ;;  %v1174_v34 = vadd.f32 %v1142_v37, %v1105_v17 }
 0x1c3   : > { %v1209_v19 = vmul.f32 %v4323_v38, %v1037_v11  ;;  %v1379_v10 = vsel %vm1315_vm2, %v5859_v8, 0.0  ;;  %v1173_v9 = vadd.f32 %v1141_v7, %v1104_v48  ;;  %v1106_v2 = vadd.f32 %v1074_v26, %v1005_v40 }
 0x1c4   : > { %v1143_v4 = vmul.f32 %v4335_v46, %v1037_v11  ;;  %v1385_v5 = vsel %vm1315_vm2, %v5150_v24, 0.0  ;;  %v5860_v47 = vmov 0.0   ;;  %v1388_v38 = vsel %vm1315_vm2, %v5153_v42, 0.0 }
 0x1c5   : > { %1377 = vadd.xlane.f32.xlu0 %v1376_v39  ;;  %1374 = vadd.xlane.f32.xlu1 %v1373_v3  ;;  %v5168_v29 = vadd.f32 %v4891_v15, %v1268_v18  ;;  %v1270_v44 = vadd.f32 %v4972_v51, %v1238_v43  ;;  %v1240_v46 = vadd.f32 %v1209_v19, %v1174_v34  ;;  %v5862_v18 = vld [vmem:[#allocation20_spill] sm:$0xff]  ;;  %v5863_v34 = vld [vmem:[#allocation22_spill] sm:$0xff] }
 0x1c6   : > { %3446 = vmatprep.subr.bf16.mxu1 %v5860_v47  ;;  %3434 = vmatprep.subr.bf16.mxu0 %v5860_v47  ;;  %v5173_v57 = vadd.f32 %v4891_v15, %v1267_v49  ;;  %v1269_v28 = vadd.f32 %v4963_v53, %v1237_v25  ;;  %v1239_v20 = vadd.f32 %v1208_v41, %v1173_v9  ;;  %v5217_v9 = vld [vmem:[#allocation6] ss:$0 sm:$0xff] }
 0x1c7   : > { %v1175_v0 = vadd.f32 %v1143_v4, %v1106_v2  ;;  %v1394_v30 = vsel %vm1315_vm2, %v5168_v29, 0.0  ;;  %v5179_v33 = vadd.f32 %v4891_v15, %v1270_v44  ;;  %v1272_v51 = vadd.f32 %v5001_v22, %v1240_v46  ;;  %v5864_v2 = vld [vmem:[#allocation21_spill] sm:$0xff] }
 0x1c8   : > { %v1391_v35 = vsel %vm1315_vm2, %v5173_v57, 0.0  ;;  %v5185_v45 = vadd.f32 %v4891_v15, %v1269_v28  ;;  %v1271_v53 = vadd.f32 %v4995_v59, %v1239_v20 }
 0x1c9   : > { %1383 = vadd.xlane.f32.xlu0 %v1382_v36  ;;  %1380 = vadd.xlane.f32.xlu1 %v1379_v10  ;;  %v1241_v54 = vadd.f32 %v5861_v12, %v1175_v0  ;;  %v1400_v56 = vsel %vm1315_vm2, %v5179_v33, 0.0  ;;  %v5192_v21 = vadd.f32 %v4891_v15, %v1272_v51 }
 0x1ca   : > { %v1397_v22 = vsel %vm1315_vm2, %v5185_v45, 0.0  ;;  %v5197_v61 = vadd.f32 %v4891_v15, %v1271_v53 }
 0x1cb   : > { %v1273_v50 = vadd.f32 %v5026_v62, %v1241_v54  ;;  %v1406_v59 = vsel %vm1315_vm2, %v5192_v21, 0.0 }
 0x1cc   : > { %v1403_v16 = vsel %vm1315_vm2, %v5197_v61, 0.0 }
 0x1cd   : > { %1389 = vadd.xlane.f32.xlu0 %v1388_v38  ;;  %1386 = vadd.xlane.f32.xlu1 %v1385_v5  ;;  %v5205_v39 = vadd.f32 %v4891_v15, %v1273_v50 }
 0x1cf   : > { %v1409_v13 = vsel %vm1315_vm2, %v5205_v39, 0.0 }
 0x1d1   : > { %1395 = vadd.xlane.f32.xlu0 %v1394_v30  ;;  %1392 = vadd.xlane.f32.xlu1 %v1391_v35  ;;  %v5865_v30 = vld [vmem:[#allocation23_spill] sm:$0xff] }
 0x1d5   : > { %1401 = vadd.xlane.f32.xlu0 %v1400_v56  ;;  %1398 = vadd.xlane.f32.xlu1 %v1397_v22 }
 0x1d9   : > { %1407 = vadd.xlane.f32.xlu0 %v1406_v59  ;;  %1404 = vadd.xlane.f32.xlu1 %v1403_v16 }
 0x1dd   : > { %1410 = vadd.xlane.f32.xlu1 %v1409_v13 }
 0x1fc   : > { %v1511_v14 = vpop.xlane.xlu0 %1510 }
 0x1fd   : > { %v1605_v7 = vmul.f32 0.03125, %v1511_v14 }
 0x1ff   : > { %v1637_v62 = vadd.f32 1e-05, %v1605_v7  ;;  %v5866_v7 = vld [vmem:[#allocation24_spill] sm:$0xff] }
 0x200   : > { %v1517_v32 = vpop.xlane.xlu0 %1516 }
 0x201   : > { %3641 = vrsqrt.f32 %v1637_v62  ;;  %v1514_v11 = vpop.xlane.xlu1 %1513  ;;  %v1607_v17 = vmul.f32 0.03125, %v1517_v32 }
 0x202   : > { %v1606_v37 = vmul.f32 0.03125, %v1514_v11 }
 0x203   : > { %v1639_v3 = vadd.f32 1e-05, %v1607_v17 }
 0x204   : > { %v1638_v48 = vadd.f32 1e-05, %v1606_v37  ;;  %v5867_v37 = vld [vmem:[#allocation25_spill] sm:$0xff] }
 0x205   : > { %3643 = vrsqrt.f32 %v1639_v3 }
 0x206   : > { %3645 = vrsqrt.f32 %v1638_v48 }
 0x207   : > { %v1520_v15 = vpop.xlane.xlu1 %1519 }
 0x208   : > { %v1608_v55 = vmul.f32 0.03125, %v1520_v15 }
 0x20a   : > { %v1640_v26 = vadd.f32 1e-05, %v1608_v55 }
 0x20b   : > { %v3642_v40 = vpop.eup %3641 }
 0x20c   : > { %3647 = vrsqrt.f32 %v1640_v26  ;;  %v1523_v36 = vpop.xlane.xlu0 %1522  ;;  %v1701_v25 = vmul.f32 %v3642_v40, %v5862_v18 }
 0x20d   : > { %v1609_v49 = vmul.f32 0.03125, %v1523_v36 }
 0x20e   : > { %v1739_v10 = vmul.f32 %v5213_v6, %v1701_v25 }
 0x20f   : > { %v3644_v23 = vpop.eup %3643  ;;  %v1641_v43 = vadd.f32 1e-05, %v1609_v49 }
 0x210   : > { %v3646_v41 = vpop.eup %3645  ;;  %v1703_v4 = vmul.f32 %v3644_v23, %v5864_v2  ;;  %v1777_v46 = vadd.f32 %v5217_v9, %v1739_v10  ;;  %v5869_v2 = vld [vmem:[#allocation28_spill] sm:$0xff] }
 0x211   : > { %v1702_v19 = vmul.f32 %v3646_v41, %v5863_v34  ;;  %3649 = vrsqrt.f32 %v1641_v43  ;;  %v5868_v41 = vld [vmem:[#allocation27_spill] sm:$0xff] }
 0x212   : > { %v1741_v53 = vmul.f32 %v5213_v6, %v1703_v4 }
 0x213   : > { %v1526_v5 = vpop.xlane.xlu1 %1525  ;;  %v1740_v38 = vmul.f32 %v5213_v6, %v1702_v19 }
 0x214   : > { %v1610_v44 = vmul.f32 0.03125, %v1526_v5  ;;  %v1779_v22 = vadd.f32 %v5217_v9, %v1741_v53 }
 0x215   : > { %v1778_v28 = vadd.f32 %v5217_v9, %v1740_v38 }
 0x216   : > { %v3648_v20 = vpop.eup %3647  ;;  %v1642_v0 = vadd.f32 1e-05, %v1610_v44 }
 0x217   : > { %v1704_v51 = vmul.f32 %v3648_v20, %v5865_v30  ;;  %v1809_v35 = vpack.c.bf16 %v1778_v28, %v1777_v46 }
 0x218   : > { %3651 = vrsqrt.f32 %v1642_v0 }
 0x219   : > { %3366 = vmatprep.mubr.msk.bf16.mxu0 %vm1315_vm2, %v1809_v35  ;;  %3402 = vmatprep.mubr.msk.bf16.mxu1 %vm1315_vm2, %v1809_v35  ;;  %v1742_v12 = vmul.f32 %v5213_v6, %v1704_v51  ;;  %v5870_v35 = vld [vmem:[#allocation31_spill] sm:$0xff] }
 0x21a   : > { %v1529_v54 = vpop.xlane.xlu0 %1528 }
 0x21b   : > { %v1611_v56 = vmul.f32 0.03125, %v1529_v54  ;;  %v1780_v50 = vadd.f32 %v5217_v9, %v1742_v12  ;;  %v3650_v59 = vpop.eup %3649 }
 0x21c   : > { %v1705_v62 = vmul.f32 %v3650_v59, %v5866_v7 }
 0x21d   : > { %v1643_v16 = vadd.f32 1e-05, %v1611_v56  ;;  %v1810_v13 = vpack.c.bf16 %v1780_v50, %v1779_v22  ;;  %v5871_v22 = vld [vmem:[#allocation32_spill] sm:$0xff] }
 0x21e   : > { %v1532_v14 = vpop.xlane.xlu1 %1531  ;;  %v1743_v48 = vmul.f32 %v5213_v6, %v1705_v62 }
 0x21f   : > { %3653 = vrsqrt.f32 %v1643_v16  ;;  %v1612_v32 = vmul.f32 0.03125, %v1532_v14  ;;  %3367 = vmatmul.mubr.msk.bf16.vlgmr.msra.gmra.mrb[0].mxu0 %vm1315_vm2, %v1810_v13  ;;  %3403 = vmatmul.mubr.msk.bf16.vlgmr.msra.gmra.mrb[0].mxu1 %vm1315_vm2, %v1810_v13 }
 0x220   : > { %v1781_v26 = vadd.f32 %v5217_v9, %v1743_v48 }
 0x221   : > { %v1644_v11 = vadd.f32 1e-05, %v1612_v32 }
 0x222   : > { %v3652_v17 = vpop.eup %3651 }
 0x223   : > { %v1706_v3 = vmul.f32 %v3652_v17, %v5867_v37  ;;  %3655 = vrsqrt.f32 %v1644_v11 }
 0x225   : > { %v1535_v15 = vpop.xlane.xlu0 %1534  ;;  %v1744_v55 = vmul.f32 %v5213_v6, %v1706_v3  ;;  %v5872_v3 = vld [vmem:[#allocation34_spill] sm:$0xff] }
 0x226   : > { %v1613_v40 = vmul.f32 0.03125, %v1535_v15 }
 0x227   : > { %v1782_v36 = vadd.f32 %v5217_v9, %v1744_v55 }
 0x228   : > { %v1645_v49 = vadd.f32 1e-05, %v1613_v40  ;;  %v1538_v18 = vpop.xlane.xlu1 %1537 }
 0x229   : > { %v3654_v25 = vpop.eup %3653  ;;  %v1614_v23 = vmul.f32 0.03125, %v1538_v18  ;;  %v1811_v43 = vpack.c.bf16 %v1782_v36, %v1781_v26  ;;  %v5873_v36 = vld [vmem:[#allocation36_spill] sm:$0xff] }
 0x22a   : > { %v1707_v34 = vmul.f32 %v3654_v25, %v5868_v41  ;;  %3657 = vrsqrt.f32 %v1645_v49 }
 0x22b   : > { %v1646_v19 = vadd.f32 1e-05, %v1614_v23  ;;  %3370 = vmatprep.mubr.msk.bf16.mxu0 %vm1315_vm2, %v1811_v43  ;;  %3406 = vmatprep.mubr.msk.bf16.mxu1 %vm1315_vm2, %v1811_v43 }
 0x22c   : > { %v1745_v5 = vmul.f32 %v5213_v6, %v1707_v34 }
 0x22d   : > { %v3656_v10 = vpop.eup %3655  ;;  %3659 = vrsqrt.f32 %v1646_v19 }
 0x22e   : > { %v1708_v4 = vmul.f32 %v3656_v10, %v5869_v2  ;;  %v1783_v20 = vadd.f32 %v5217_v9, %v1745_v5 }
 0x22f   : > { %v1541_v38 = vpop.xlane.xlu0 %1540 }
 0x230   : > { %v1615_v44 = vmul.f32 0.03125, %v1541_v38  ;;  %v1746_v46 = vmul.f32 %v5213_v6, %v1708_v4 }
 0x232   : > { %v1647_v28 = vadd.f32 1e-05, %v1615_v44  ;;  %v1784_v0 = vadd.f32 %v5217_v9, %v1746_v46 }
 0x234   : > { %v3658_v30 = vpop.eup %3657  ;;  %3661 = vrsqrt.f32 %v1647_v28  ;;  %v1812_v51 = vpack.c.bf16 %v1784_v0, %v1783_v20  ;;  %v5874_v28 = vld [vmem:[#allocation26_spill] sm:$0xff] }
 0x235   : > { %v1709_v53 = vmul.f32 %v3658_v30, %v5870_v35  ;;  %v1544_v12 = vpop.xlane.xlu1 %1543 }
 0x236   : > { %v1616_v54 = vmul.f32 0.03125, %v1544_v12  ;;  %3371 = vmatmul.mubr.msk.bf16.gmra.mrb[4].mxu0 %vm1315_vm2, %v1812_v51  ;;  %3407 = vmatmul.mubr.msk.bf16.gmra.mrb[4].mxu1 %vm1315_vm2, %v1812_v51 }
 0x237   : > { %v3660_v56 = vpop.eup %3659  ;;  %v1747_v16 = vmul.f32 %v5213_v6, %v1709_v53 }
 0x238   : > { %v1710_v50 = vmul.f32 %v3660_v56, %v5871_v22  ;;  %v1648_v59 = vadd.f32 1e-05, %v1616_v54 }
 0x239   : > { %v1785_v62 = vadd.f32 %v5217_v9, %v1747_v16  ;;  %v5876_v16 = vld [vmem:[#allocation29_spill] sm:$0xff] }
 0x23a   : > { %3663 = vrsqrt.f32 %v1648_v59  ;;  %v1547_v13 = vpop.xlane.xlu0 %1546  ;;  %v1748_v14 = vmul.f32 %v5213_v6, %v1710_v50 }
 0x23b   : > { %v1617_v7 = vmul.f32 0.03125, %v1547_v13 }
 0x23c   : > { %v1786_v32 = vadd.f32 %v5217_v9, %v1748_v14 }
 0x23d   : > { %v1649_v11 = vadd.f32 1e-05, %v1617_v7 }
 0x23e   : > { %v3662_v17 = vpop.eup %3661  ;;  %v1813_v37 = vpack.c.bf16 %v1786_v32, %v1785_v62 }
 0x23f   : > { %3665 = vrsqrt.f32 %v1649_v11  ;;  %v1711_v48 = vmul.f32 %v3662_v17, %v5872_v3 }
 0x240   : > { %3374 = vmatprep.mubr.msk.bf16.mxu0 %vm1315_vm2, %v1813_v37  ;;  %3410 = vmatprep.mubr.msk.bf16.mxu1 %vm1315_vm2, %v1813_v37  ;;  %v1550_v15 = vpop.xlane.xlu1 %1549 }
 0x241   : > { %v1618_v55 = vmul.f32 0.03125, %v1550_v15  ;;  %v1749_v18 = vmul.f32 %v5213_v6, %v1711_v48 }
 0x243   : > { %v1650_v26 = vadd.f32 1e-05, %v1618_v55  ;;  %v1787_v34 = vadd.f32 %v5217_v9, %v1749_v18 }
 0x244   : > { %v3664_v40 = vpop.eup %3663 }
 0x245   : > { %v1712_v49 = vmul.f32 %v3664_v40, %v5873_v36  ;;  %3667 = vrsqrt.f32 %v1650_v26 }
 0x246   : > { %v1553_v25 = vpop.xlane.xlu0 %1552 }
 0x247   : > { %v1619_v23 = vmul.f32 0.03125, %v1553_v25  ;;  %v1750_v43 = vmul.f32 %v5213_v6, %v1712_v49 }
 0x249   : > { %v1651_v41 = vadd.f32 1e-05, %v1619_v23  ;;  %v1788_v19 = vadd.f32 %v5217_v9, %v1750_v43  ;;  %v3666_v10 = vpop.eup %3665 }
 0x24a   : > { %v1366_v2 = vpop.xlane.xlu0 %1365  ;;  %v1556_v4 = vpop.xlane.xlu1 %1555  ;;  %v1713_v46 = vmul.f32 %v3666_v10, %v5032_v27  ;;  %v5875_v27 = vld [vmem:[#allocation30_spill] sm:$0xff] }
 0x24b   : > { %3669 = vrsqrt.f32 %v1651_v41  ;;  %v1429_v5 = vmul.f32 0.03125, %v1366_v2  ;;  %v1814_v38 = vpack.c.bf16 %v1788_v19, %v1787_v34  ;;  %v1620_v44 = vmul.f32 0.03125, %v1556_v4 }
 0x24c   : > { %v1751_v59 = vmul.f32 %v5213_v6, %v1713_v46 }
 0x24d   : > { %v5264_v20 = vsub.f32 %v5874_v28, %v1429_v5  ;;  %3375 = vmatmul.mubr.msk.bf16.gmra.mrb[8].mxu0 %vm1315_vm2, %v1814_v38  ;;  %3411 = vmatmul.mubr.msk.bf16.gmra.mrb[8].mxu1 %vm1315_vm2, %v1814_v38  ;;  %v1652_v0 = vadd.f32 1e-05, %v1620_v44 }
 0x24e   : > { %v1372_v30 = vpop.xlane.xlu0 %1371  ;;  %v1369_v51 = vpop.xlane.xlu1 %1368  ;;  %v1789_v15 = vadd.f32 %v5217_v9, %v1751_v59 }
 0x24f   : > { %v1431_v35 = vmul.f32 0.03125, %v1372_v30  ;;  %v1493_v53 = vmul.f32 %v5264_v20, %v5264_v20  ;;  %v3668_v12 = vpop.eup %3667  ;;  %3671 = vrsqrt.f32 %v1652_v0  ;;  %v1430_v54 = vmul.f32 0.03125, %v1369_v51 }
 0x250   : > { %v1714_v56 = vmul.f32 %v3668_v12, %v5061_v63 }
 0x251   : > { %v5272_v22 = vsub.f32 %v5875_v27, %v1431_v35  ;;  %v1557_v50 = vsel %vm1315_vm2, %v1493_v53, 0.0  ;;  %v5277_v13 = vsub.f32 %v5876_v16, %v1430_v54 }
 0x252   : > { %1558 = vadd.xlane.f32.xlu0 %v1557_v50  ;;  %v1378_v14 = vpop.xlane.xlu0 %1377  ;;  %v1375_v7 = vpop.xlane.xlu1 %1374  ;;  %v1752_v11 = vmul.f32 %v5213_v6, %v1714_v56 }
 0x253   : > { %v1433_v62 = vmul.f32 0.03125, %v1378_v14  ;;  %v1495_v32 = vmul.f32 %v5272_v22, %v5272_v22  ;;  %v1432_v63 = vmul.f32 0.03125, %v1375_v7  ;;  %v1494_v17 = vmul.f32 %v5277_v13, %v5277_v13 }
 0x254   : > { %v1790_v55 = vadd.f32 %v5217_v9, %v1752_v11 }
 0x255   : > { %v3670_v37 = vpop.eup %3669  ;;  %v5285_v3 = vsub.f32 %v4942_v58, %v1433_v62  ;;  %v1563_v48 = vsel %vm1315_vm2, %v1495_v32, 0.0  ;;  %v5291_v40 = vsub.f32 %v5857_v60, %v1432_v63  ;;  %v1560_v26 = vsel %vm1315_vm2, %v1494_v17, 0.0 }
 0x256   : > { %1564 = vadd.xlane.f32.xlu0 %v1563_v48  ;;  %v1384_v36 = vpop.xlane.xlu0 %1383  ;;  %v1715_v49 = vmul.f32 %v3670_v37, %v5082_v31  ;;  %1561 = vadd.xlane.f32.xlu1 %v1560_v26  ;;  %v1381_v18 = vpop.xlane.xlu1 %1380  ;;  %v1815_v23 = vpack.c.bf16 %v1790_v55, %v1789_v15 }
 0x257   : > { %v1435_v25 = vmul.f32 0.03125, %v1384_v36  ;;  %v1497_v58 = vmul.f32 %v5285_v3, %v5285_v3  ;;  %v1434_v43 = vmul.f32 0.03125, %v1381_v18  ;;  %v1496_v41 = vmul.f32 %v5291_v40, %v5291_v40 }
 0x258   : > { %3378 = vmatprep.mubr.msk.bf16.mxu0 %vm1315_vm2, %v1815_v23  ;;  %3414 = vmatprep.mubr.msk.bf16.mxu1 %vm1315_vm2, %v1815_v23  ;;  %v1753_v44 = vmul.f32 %v5213_v6, %v1715_v49 }
 0x259   : > { %v5300_v60 = vsub.f32 %v5044_v1, %v1435_v25  ;;  %v1569_v34 = vsel %vm1315_vm2, %v1497_v58, 0.0  ;;  %v3672_v31 = vpop.eup %3671  ;;  %v5306_v19 = vsub.f32 %v5859_v8, %v1434_v43  ;;  %v1566_v10 = vsel %vm1315_vm2, %v1496_v41, 0.0 }
 0x25a   : > { %1570 = vadd.xlane.f32.xlu0 %v1569_v34  ;;  %v1390_v2 = vpop.xlane.xlu0 %1389  ;;  %v1716_v4 = vmul.f32 %v3672_v31, %v5105_v52  ;;  %1567 = vadd.xlane.f32.xlu1 %v1566_v10  ;;  %v1387_v5 = vpop.xlane.xlu1 %1386  ;;  %v1791_v54 = vadd.f32 %v5217_v9, %v1753_v44 }
 0x25b   : > { %v1437_v1 = vmul.f32 0.03125, %v1390_v2  ;;  %v1499_v38 = vmul.f32 %v5300_v60, %v5300_v60  ;;  %v1436_v46 = vmul.f32 0.03125, %v1387_v5  ;;  %v1498_v28 = vmul.f32 %v5306_v19, %v5306_v19 }
 0x25c   : > { %v1754_v30 = vmul.f32 %v5213_v6, %v1716_v4 }
 0x25d   : > { %v5316_v8 = vsub.f32 %v5153_v42, %v1437_v1  ;;  %v1575_v0 = vsel %vm1315_vm2, %v1499_v38, 0.0  ;;  %v5321_v52 = vsub.f32 %v5150_v24, %v1436_v46  ;;  %v1572_v51 = vsel %vm1315_vm2, %v1498_v28, 0.0 }
 0x25e   : > { %1576 = vadd.xlane.f32.xlu0 %v1575_v0  ;;  %v1396_v35 = vpop.xlane.xlu0 %1395  ;;  %1573 = vadd.xlane.f32.xlu1 %v1572_v51  ;;  %v1393_v53 = vpop.xlane.xlu1 %1392  ;;  %v1792_v56 = vadd.f32 %v5217_v9, %v1754_v30 }
 0x25f   : > { %v1439_v12 = vmul.f32 0.03125, %v1396_v35  ;;  %v1501_v42 = vmul.f32 %v5316_v8, %v5316_v8  ;;  %v1438_v27 = vmul.f32 0.03125, %v1393_v53  ;;  %v1500_v50 = vmul.f32 %v5321_v52, %v5321_v52 }
 0x260   : > { %v1816_v59 = vpack.c.bf16 %v1792_v56, %v1791_v54 }
 0x261   : > { %v5331_v24 = vsub.f32 %v5168_v29, %v1439_v12  ;;  %v1581_v16 = vsel %vm1315_vm2, %v1501_v42, 0.0  ;;  %v5335_v14 = vsub.f32 %v5173_v57, %v1438_v27  ;;  %v1578_v7 = vsel %vm1315_vm2, %v1500_v50, 0.0 }
 0x262   : > { %1582 = vadd.xlane.f32.xlu0 %v1581_v16  ;;  %v1402_v62 = vpop.xlane.xlu0 %1401  ;;  %1579 = vadd.xlane.f32.xlu1 %v1578_v7  ;;  %v1399_v32 = vpop.xlane.xlu1 %1398 }
 0x263   : > { %3379 = vmatmul.mubr.msk.bf16.gmra.mrb[12].mxu0 %vm1315_vm2, %v1816_v59  ;;  %v1441_v11 = vmul.f32 0.03125, %v1402_v62  ;;  %v1503_v63 = vmul.f32 %v5331_v24, %v5331_v24  ;;  %v1440_v29 = vmul.f32 0.03125, %v1399_v32  ;;  %3415 = vmatmul.mubr.msk.bf16.gmra.mrb[12].mxu1 %vm1315_vm2, %v1816_v59  ;;  %v1502_v17 = vmul.f32 %v5335_v14, %v5335_v14 }
 0x265   : > { %v5345_v57 = vsub.f32 %v5179_v33, %v1441_v11  ;;  %v1587_v37 = vsel %vm1315_vm2, %v1503_v63, 0.0  ;;  %v5349_v48 = vsub.f32 %v5185_v45, %v1440_v29  ;;  %v1584_v15 = vsel %vm1315_vm2, %v1502_v17, 0.0 }
 0x266   : > { %1588 = vadd.xlane.f32.xlu0 %v1587_v37  ;;  %v1408_v55 = vpop.xlane.xlu0 %1407  ;;  %1585 = vadd.xlane.f32.xlu1 %v1584_v15  ;;  %v1405_v26 = vpop.xlane.xlu1 %1404 }
 0x267   : > { %v1443_v36 = vmul.f32 0.03125, %v1408_v55  ;;  %v1505_v49 = vmul.f32 %v5345_v57, %v5345_v57  ;;  %v1442_v18 = vmul.f32 0.03125, %v1405_v26  ;;  %v1504_v33 = vmul.f32 %v5349_v48, %v5349_v48 }
 0x269   : > { %v5357_v25 = vsub.f32 %v5192_v21, %v1443_v36  ;;  %v1593_v45 = vsel %vm1315_vm2, %v1505_v49, 0.0  ;;  %v5361_v58 = vsub.f32 %v5197_v61, %v1442_v18  ;;  %v1590_v23 = vsel %vm1315_vm2, %v1504_v33, 0.0 }
 0x26a   : > { %1594 = vadd.xlane.f32.xlu0 %v1593_v45  ;;  %1591 = vadd.xlane.f32.xlu1 %v1590_v23  ;;  %v1411_v43 = vpop.xlane.xlu1 %1410 }
 0x26b   : > { %v1507_v41 = vmul.f32 %v5357_v25, %v5357_v25  ;;  %v1444_v34 = vmul.f32 0.03125, %v1411_v43  ;;  %v1506_v31 = vmul.f32 %v5361_v58, %v5361_v58 }
 0x26d   : > { %v1599_v21 = vsel %vm1315_vm2, %v1507_v41, 0.0  ;;  %v5370_v10 = vsub.f32 %v5205_v39, %v1444_v34  ;;  %v1596_v61 = vsel %vm1315_vm2, %v1506_v31, 0.0 }
 0x26e   : > { %1600 = vadd.xlane.f32.xlu0 %v1599_v21  ;;  %1597 = vadd.xlane.f32.xlu1 %v1596_v61 }
 0x26f   : > { %v1508_v2 = vmul.f32 %v5370_v10, %v5370_v10 }
 0x271   : > { %v1602_v4 = vsel %vm1315_vm2, %v1508_v2, 0.0 }
 0x272   : > { %1603 = vadd.xlane.f32.xlu1 %v1602_v4 }
 0x2df   : > { %v1559_v5 = vpop.xlane.xlu0 %1558 }
 0x2e0   : > { %v1621_v1 = vmul.f32 0.03125, %v1559_v5 }
 0x2e2   : > { %v1653_v38 = vadd.f32 1e-05, %v1621_v1 }
 0x2e3   : > { %v1565_v44 = vpop.xlane.xlu0 %1564  ;;  %v1562_v46 = vpop.xlane.xlu1 %1561 }
 0x2e4   : > { %3673 = vrsqrt.f32 %v1653_v38  ;;  %v1623_v28 = vmul.f32 0.03125, %v1565_v44  ;;  %v1622_v0 = vmul.f32 0.03125, %v1562_v46 }
 0x2e6   : > { %v1655_v39 = vadd.f32 1e-05, %v1623_v28  ;;  %v1654_v30 = vadd.f32 1e-05, %v1622_v0 }
 0x2e7   : > { %v1571_v51 = vpop.xlane.xlu0 %1570  ;;  %v1568_v35 = vpop.xlane.xlu1 %1567 }
 0x2e8   : > { %3675 = vrsqrt.f32 %v1655_v39  ;;  %v1625_v53 = vmul.f32 0.03125, %v1571_v51  ;;  %v1624_v12 = vmul.f32 0.03125, %v1568_v35 }
 0x2e9   : > { %3677 = vrsqrt.f32 %v1654_v30 }
 0x2ea   : > { %v1657_v54 = vadd.f32 1e-05, %v1625_v53  ;;  %v1656_v56 = vadd.f32 1e-05, %v1624_v12 }
 0x2eb   : > { %v1577_v42 = vpop.xlane.xlu0 %1576  ;;  %v1574_v27 = vpop.xlane.xlu1 %1573 }
 0x2ec   : > { %3679 = vrsqrt.f32 %v1657_v54  ;;  %v1627_v50 = vmul.f32 0.03125, %v1577_v42  ;;  %v1626_v59 = vmul.f32 0.03125, %v1574_v27 }
 0x2ed   : > { %3681 = vrsqrt.f32 %v1656_v56 }
 0x2ee   : > { %v3674_v16 = vpop.eup %3673  ;;  %v1659_v7 = vadd.f32 1e-05, %v1627_v50  ;;  %v1658_v32 = vadd.f32 1e-05, %v1626_v59 }
 0x2ef   : > { %v1717_v62 = vmul.f32 %v3674_v16, %v5264_v20  ;;  %v1583_v11 = vpop.xlane.xlu0 %1582  ;;  %v1580_v63 = vpop.xlane.xlu1 %1579 }
 0x2f0   : > { %3683 = vrsqrt.f32 %v1659_v7  ;;  %v1629_v29 = vmul.f32 0.03125, %v1583_v11  ;;  %v1628_v17 = vmul.f32 0.03125, %v1580_v63 }
 0x2f1   : > { %3685 = vrsqrt.f32 %v1658_v32  ;;  %v1755_v20 = vmul.f32 %v5213_v6, %v1717_v62 }
 0x2f2   : > { %v3676_v37 = vpop.eup %3675  ;;  %v1661_v15 = vadd.f32 1e-05, %v1629_v29  ;;  %v5377_v55 = vpop.f32.mrb[0].mxu0  ;;  %v1660_v18 = vadd.f32 1e-05, %v1628_v17 }
 0x2f3   : > { %v5379_v26 = vpop.f32.mrb[0].mxu1  ;;  %v3678_v36 = vpop.eup %3677  ;;  %v1719_v49 = vmul.f32 %v3676_v37, %v5272_v22  ;;  %v1793_v30 = vadd.f32 %v5217_v9, %v1755_v20 }
 0x2f4   : > { %v1589_v33 = vpop.xlane.xlu0 %1588  ;;  %v1923_v45 = vpop.f32.mrb[1].mxu0  ;;  %v1718_v23 = vmul.f32 %v3678_v36, %v5277_v13  ;;  %3687 = vrsqrt.f32 %v1661_v15 }
 0x2f5   : > { %v1586_v43 = vpop.xlane.xlu1 %1585  ;;  %v1631_v41 = vmul.f32 0.03125, %v1589_v33  ;;  %v2116_v34 = vpop.f32.mrb[1].mxu1  ;;  %3689 = vrsqrt.f32 %v1660_v18  ;;  %v1757_v21 = vmul.f32 %v5213_v6, %v1719_v49 }
 0x2f6   : > { %v1630_v31 = vmul.f32 0.03125, %v1586_v43  ;;  %v5385_v61 = vpop.f32.mrb[2].mxu0  ;;  %v5387_v2 = vpop.f32.mrb[2].mxu1  ;;  %v1756_v5 = vmul.f32 %v5213_v6, %v1718_v23 }
 0x2f7   : > { %v3680_v22 = vpop.eup %3679  ;;  %v1663_v4 = vadd.f32 1e-05, %v1631_v41  ;;  %v2051_v1 = vpack.c.bf16 %v5385_v61, %v5377_v55  ;;  %v2244_v13 = vpack.c.bf16 %v5387_v2, %v5379_v26  ;;  %v1926_v38 = vpop.f32.mrb[3].mxu0  ;;  %v1795_v42 = vadd.f32 %v5217_v9, %v1757_v21 }
 0x2f8   : > { %v2119_v44 = vpop.f32.mrb[3].mxu1  ;;  %v3682_v46 = vpop.eup %3681  ;;  %v1721_v28 = vmul.f32 %v3680_v22, %v5285_v3  ;;  %v1662_v0 = vadd.f32 1e-05, %v1630_v31  ;;  %v2050_v51 = vpack.c.bf16 %v1926_v38, %v1923_v45  ;;  %v1794_v54 = vadd.f32 %v5217_v9, %v1756_v5 }
 0x2f9   : > { %v1595_v39 = vpop.xlane.xlu0 %1594  ;;  %v1720_v35 = vmul.f32 %v3682_v46, %v5291_v40  ;;  %3691 = vrsqrt.f32 %v1663_v4  ;;  %v1592_v53 = vpop.xlane.xlu1 %1591  ;;  %v2243_v63 = vpack.c.bf16 %v2119_v44, %v2116_v34 }
 0x2fa   : > { %v1633_v12 = vmul.f32 0.03125, %v1595_v39  ;;  %3693 = vrsqrt.f32 %v1662_v0  ;;  %v1632_v56 = vmul.f32 0.03125, %v1592_v53  ;;  %v3684_v27 = vpop.eup %3683  ;;  %v1817_v59 = vpack.c.bf16 %v1794_v54, %v1793_v30 }
 0x2fb   : > { %v1758_v3 = vmul.f32 %v5213_v6, %v1720_v35  ;;  %v2272_v16 = vsel %vm1315_vm2, %v2050_v51, 0  ;;  %v3686_v7 = vpop.eup %3685  ;;  %v1723_v62 = vmul.f32 %v3684_v27, %v5300_v60  ;;  %v1759_v11 = vmul.f32 %v5213_v6, %v1721_v28  ;;  %3447 = vmatpush3.bf16.msra.mxu1 %v2243_v63 }
 0x2fc   : > { %v1665_v50 = vadd.f32 1e-05, %v1633_v12  ;;  %v1664_v40 = vadd.f32 1e-05, %v1632_v56  ;;  %3435 = vmatpush3.bf16.xpose.msra.mxu0 %v2272_v16  ;;  %v1722_v29 = vmul.f32 %v3686_v7, %v5306_v19  ;;  %3382 = vmatprep.mubr.msk.bf16.mxu0 %vm1315_vm2, %v1817_v59 }
 0x2fd   : > { %v1601_v32 = vpop.xlane.xlu0 %1600  ;;  %v1598_v17 = vpop.xlane.xlu1 %1597  ;;  %3418 = vmatprep.mubr.msk.bf16.mxu1 %vm1315_vm2, %v1817_v59  ;;  %v1796_v15 = vadd.f32 %v5217_v9, %v1758_v3  ;;  %3436 = vmatprep.subr.bf16.mxu0 %v5860_v47  ;;  %v1797_v20 = vadd.f32 %v5217_v9, %v1759_v11  ;;  %v1761_v45 = vmul.f32 %v5213_v6, %v1723_v62 }
 0x2fe   : > { %3695 = vrsqrt.f32 %v1665_v50  ;;  %v1635_v37 = vmul.f32 0.03125, %v1601_v32  ;;  %v1634_v26 = vmul.f32 0.03125, %v1598_v17  ;;  %v3688_v60 = vpop.eup %3687  ;;  %v1760_v18 = vmul.f32 %v5213_v6, %v1722_v29  ;;  %3448 = vmatprep.subr.bf16.mxu1 %v5860_v47 }
 0x2ff   : > { %3697 = vrsqrt.f32 %v1664_v40  ;;  %v1818_v49 = vpack.c.bf16 %v1796_v15, %v1795_v42  ;;  %v3690_v19 = vpop.eup %3689  ;;  %v1725_v43 = vmul.f32 %v3688_v60, %v5316_v8  ;;  %3449 = vmatpush3.bf16.msra.mxu1 %v2244_v13  ;;  %v2275_v8 = vsel %vm1315_vm2, %v2051_v1, 0 }
 0x300   : > { %v1667_v36 = vadd.f32 1e-05, %v1635_v37  ;;  %v1666_v33 = vadd.f32 1e-05, %v1634_v26  ;;  %v1724_v23 = vmul.f32 %v3690_v19, %v5321_v52  ;;  %v1798_v34 = vadd.f32 %v5217_v9, %v1760_v18  ;;  %3450 = vmatprep.subr.bf16.mxu1 %v5860_v47 }
 0x301   : > { %v1604_v41 = vpop.xlane.xlu1 %1603  ;;  %3383 = vmatmul.mubr.msk.bf16.gmra.mrb[16].mxu0 %vm1315_vm2, %v1818_v49  ;;  %3419 = vmatmul.mubr.msk.bf16.gmra.mrb[16].mxu1 %vm1315_vm2, %v1818_v49  ;;  %v1799_v38 = vadd.f32 %v5217_v9, %v1761_v45  ;;  %v1763_v55 = vmul.f32 %v5213_v6, %v1725_v43 }
 0x302   : > { %3699 = vrsqrt.f32 %v1667_v36  ;;  %v1636_v31 = vmul.f32 0.03125, %v1604_v41  ;;  %v1819_v2 = vpack.c.bf16 %v1798_v34, %v1797_v20  ;;  %v1762_v22 = vmul.f32 %v5213_v6, %v1724_v23 }
 0x303   : > { %3701 = vrsqrt.f32 %v1666_v33  ;;  %v3692_v21 = vpop.eup %3691  ;;  %v1801_v39 = vadd.f32 %v5217_v9, %v1763_v55 }
 0x304   : > { %v3694_v52 = vpop.eup %3693  ;;  %v1727_v4 = vmul.f32 %v3692_v21, %v5331_v24  ;;  %v1668_v5 = vadd.f32 1e-05, %v1636_v31  ;;  %3437 = vmatpush3.bf16.xpose.msra.mxu0 %v2275_v8  ;;  %3386 = vmatprep.mubr.msk.bf16.mxu0 %vm1315_vm2, %v1819_v2  ;;  %v1800_v44 = vadd.f32 %v5217_v9, %v1762_v22 }
 0x305   : > { %v1726_v13 = vmul.f32 %v3694_v52, %v5335_v14  ;;  %3422 = vmatprep.mubr.msk.bf16.mxu1 %vm1315_vm2, %v1819_v2  ;;  %3438 = vmatprep.subr.bf16.mxu0 %v5860_v47 }
 0x306   : > { %3703 = vrsqrt.f32 %v1668_v5  ;;  %v1820_v1 = vpack.c.bf16 %v1800_v44, %v1799_v38  ;;  %v1765_v14 = vmul.f32 %v5213_v6, %v1727_v4 }
 0x307   : > { %v1764_v24 = vmul.f32 %v5213_v6, %v1726_v13 }
 0x308   : > { %v3696_v61 = vpop.eup %3695 }
 0x309   : > { %v3698_v46 = vpop.eup %3697  ;;  %v1729_v28 = vmul.f32 %v3696_v61, %v5345_v57  ;;  %3387 = vmatmul.mubr.msk.bf16.gmra.mrb[20].mxu0 %vm1315_vm2, %v1820_v1  ;;  %3423 = vmatmul.mubr.msk.bf16.gmra.mrb[20].mxu1 %vm1315_vm2, %v1820_v1  ;;  %v1802_v30 = vadd.f32 %v5217_v9, %v1764_v24  ;;  %v3372_v51 = vpop.f32.mrb[4].mxu0 }
 0x30a   : > { %v1728_v0 = vmul.f32 %v3698_v46, %v5349_v48  ;;  %v3408_v35 = vpop.f32.mrb[4].mxu1  ;;  %v1939_v56 = vpop.f32.mrb[5].mxu0  ;;  %v1803_v48 = vadd.f32 %v5217_v9, %v1765_v14 }
 0x30b   : > { %v1821_v12 = vpack.c.bf16 %v1802_v30, %v1801_v39  ;;  %v2132_v57 = vpop.f32.mrb[5].mxu1  ;;  %v1767_v50 = vmul.f32 %v5213_v6, %v1729_v28  ;;  %v3373_v59 = vpop.f32.mrb[6].mxu0 }
 0x30c   : > { %v3700_v53 = vpop.eup %3699  ;;  %v1766_v54 = vmul.f32 %v5213_v6, %v1728_v0  ;;  %v3409_v3 = vpop.f32.mrb[6].mxu1  ;;  %v2053_v62 = vpack.c.bf16 %v3373_v59, %v3372_v51 }
 0x30d   : > { %v3702_v42 = vpop.eup %3701  ;;  %v1731_v27 = vmul.f32 %v3700_v53, %v5357_v25  ;;  %3390 = vmatprep.mubr.msk.bf16.mxu0 %vm1315_vm2, %v1821_v12  ;;  %3426 = vmatprep.mubr.msk.bf16.mxu1 %vm1315_vm2, %v1821_v12  ;;  %v1942_v40 = vpop.f32.mrb[7].mxu0  ;;  %v2246_v11 = vpack.c.bf16 %v3409_v3, %v3408_v35  ;;  %v1805_v15 = vadd.f32 %v5217_v9, %v1767_v50 }
 0x30e   : > { %v1730_v16 = vmul.f32 %v3702_v42, %v5361_v58  ;;  %v1804_v7 = vadd.f32 %v5217_v9, %v1766_v54  ;;  %v2135_v32 = vpop.f32.mrb[7].mxu1  ;;  %v2052_v63 = vpack.c.bf16 %v1942_v40, %v1939_v56 }
 0x30f   : > { %v2245_v25 = vpack.c.bf16 %v2135_v32, %v2132_v57  ;;  %v1769_v60 = vmul.f32 %v5213_v6, %v1731_v27 }
 0x310   : > { %v1822_v29 = vpack.c.bf16 %v1804_v7, %v1803_v48  ;;  %v1768_v17 = vmul.f32 %v5213_v6, %v1730_v16  ;;  %v3704_v37 = vpop.eup %3703  ;;  %v2278_v36 = vsel %vm1315_vm2, %v2052_v63, 0 }
 0x311   : > { %3451 = vmatpush3.bf16.msra.mxu1 %v2245_v25  ;;  %v1732_v58 = vmul.f32 %v3704_v37, %v5370_v10  ;;  %3439 = vmatpush3.bf16.xpose.msra.mxu0 %v2278_v36  ;;  %v1807_v10 = vadd.f32 %v5217_v9, %v1769_v60 }
 0x312   : > { %3391 = vmatmul.mubr.msk.bf16.gmra.mrb[24].mxu0 %vm1315_vm2, %v1822_v29  ;;  %3427 = vmatmul.mubr.msk.bf16.gmra.mrb[24].mxu1 %vm1315_vm2, %v1822_v29  ;;  %v1806_v26 = vadd.f32 %v5217_v9, %v1768_v17 }
 0x313   : > { %3452 = vmatprep.subr.bf16.mxu1 %v5860_v47  ;;  %v1770_v18 = vmul.f32 %v5213_v6, %v1732_v58  ;;  %3440 = vmatprep.subr.bf16.mxu0 %v5860_v47  ;;  %v2281_v6 = vsel %vm1315_vm2, %v2053_v62, 0 }
 0x314   : > { %v1823_v49 = vpack.c.bf16 %v1806_v26, %v1805_v15 }
 0x315   : > { %3453 = vmatpush3.bf16.msra.mxu1 %v2246_v11  ;;  %v1808_v19 = vadd.f32 %v5217_v9, %v1770_v18  ;;  %v5471_v9 = vld [vmem:[#allocation7] sm:$0x3f]  }
 0x316   : > { %3394 = vmatprep.mubr.msk.bf16.mxu0 %vm1315_vm2, %v1823_v49  ;;  %3430 = vmatprep.mubr.msk.bf16.mxu1 %vm1315_vm2, %v1823_v49 }
 0x317   : > { %3470 = vmatprep.subr.bf16.mxu1 %v5860_v47  ;;  %v1824_v33 = vpack.c.bf16 %v1808_v19, %v1807_v10 }
 0x319   : > { %3441 = vmatpush3.bf16.xpose.msra.mxu0 %v2281_v6 }
 0x31a   : > { %3395 = vmatmul.mubr.msk.bf16.gmra.mrb[28].mxu0 %vm1315_vm2, %v1824_v33  ;;  %3431 = vmatmul.mubr.msk.bf16.gmra.mrb[28].mxu1 %vm1315_vm2, %v1824_v33 }
 0x31b   : > { %3442 = vmatprep.mubr.msk.bf16.mxu0 %vm3971_vm3, %v5860_v47  ;;  %3458 = vmatprep.subr.bf16.mxu0 %v5860_v47 }
 0x31c   : > { %3454 = vmatprep.mubr.msk.bf16.mxu1 %vm3971_vm3, %v5860_v47 }
 0x320   : > { %v3376_v20 = vpop.f32.mrb[8].mxu0  ;;  %v5473_v45 = vpop.f32.mrb[8].mxu1 }
 0x321   : > { %v1955_v23 = vpop.f32.mrb[9].mxu0  ;;  %v5477_v43 = vpop.f32.mrb[9].mxu1 }
 0x322   : > { %3443 = vmatmul.mubr.msk.bf16.vlgmr.msra.gmra.mrb[32].mxu0 %vm1315_vm2, %v5471_v9  ;;  %v3377_v41 = vpop.f32.mrb[10].mxu0  ;;  %v5481_v34 = vpop.f32.mrb[10].mxu1 }
 0x323   : > { %3466 = vmatprep.mubr.msk.bf16.mxu0 %vm3971_vm3, %v5860_v47  ;;  %v2055_v31 = vpack.c.bf16 %v3377_v41, %v3376_v20  ;;  %v2248_v21 = vpack.c.bf16 %v5481_v34, %v5473_v45  ;;  %v1958_v2 = vpop.f32.mrb[11].mxu0  ;;  %v5485_v22 = vpop.f32.mrb[11].mxu1 }
 0x324   : > { %v2054_v8 = vpack.c.bf16 %v1958_v2, %v1955_v23  ;;  %v2247_v52 = vpack.c.bf16 %v5485_v22, %v5477_v43 }
 0x325   : > { %v2424_v5 = vsel %vm1315_vm2, %v2055_v31, 0 }
 0x326   : > { %v2421_v4 = vsel %vm1315_vm2, %v2054_v8, 0 }
 0x327   : > { %3459 = vmatpush3.bf16.xpose.msra.mxu0 %v2421_v4 }
 0x328   : > { %3460 = vmatprep.subr.bf16.mxu0 %v5860_v47 }
 0x32f   : > { %3461 = vmatpush3.bf16.xpose.msra.mxu0 %v2424_v5 }
 0x330   : > { %3462 = vmatprep.subr.bf16.mxu0 %v5860_v47 }
 0x336   : > { %v3380_v38 = vpop.f32.mrb[12].mxu0  ;;  %v5493_v13 = vpop.f32.mrb[12].mxu1 }
 0x337   : > { %v1971_v44 = vpop.f32.mrb[13].mxu0  ;;  %v5495_v55 = vpop.f32.mrb[13].mxu1 }
 0x338   : > { %v3381_v61 = vpop.f32.mrb[14].mxu0  ;;  %v5497_v24 = vpop.f32.mrb[14].mxu1 }
 0x339   : > { %v2057_v1 = vpack.c.bf16 %v3381_v61, %v3380_v38  ;;  %v1974_v46 = vpop.f32.mrb[15].mxu0  ;;  %v2250_v28 = vpack.c.bf16 %v5497_v24, %v5493_v13  ;;  %v5501_v0 = vpop.f32.mrb[15].mxu1 }
 0x33a   : > { %v2056_v14 = vpack.c.bf16 %v1974_v46, %v1971_v44  ;;  %v2249_v39 = vpack.c.bf16 %v5501_v0, %v5495_v55 }
 0x33b   : > { %v2430_v51 = vsel %vm1315_vm2, %v2057_v1, 0 }
 0x33c   : > { %v2427_v30 = vsel %vm1315_vm2, %v2056_v14, 0 }
 0x33d   : > { %3463 = vmatpush3.bf16.xpose.msra.mxu0 %v2427_v30 }
 0x33e   : > { %3464 = vmatprep.subr.bf16.mxu0 %v5860_v47 }
 0x345   : > { %3465 = vmatpush3.bf16.xpose.msra.mxu0 %v2430_v51 }
 0x346   : > { %3494 = vmatprep.subr.bf16.mxu0 %v5860_v47 }
 0x34c   : > { %3467 = vmatmul.mubr.msk.bf16.vlgmr.msra.gmra.mrb[36].mxu0 %vm1315_vm2, %v5471_v9 }
 0x34d   : > { %3502 = vmatprep.mubr.msk.bf16.mxu0 %vm3971_vm3, %v5860_v47 }
 0x3d4   : > { %v5513_v35 = vpop.f32.mrb[16].mxu0  ;;  %v3420_v53 = vpop.f32.mrb[16].mxu1 }
 0x3d5   : > { %v5515_v12 = vpop.f32.mrb[17].mxu0  ;;  %v2180_v54 = vpop.f32.mrb[17].mxu1 }
 0x3d6   : > { %v5517_v56 = vpop.f32.mrb[18].mxu0  ;;  %v3421_v57 = vpop.f32.mrb[18].mxu1 }
 0x3d7   : > { %v2059_v42 = vpack.c.bf16 %v5517_v56, %v5513_v35  ;;  %v2252_v27 = vpack.c.bf16 %v3421_v57, %v3420_v53  ;;  %v5521_v48 = vpop.f32.mrb[19].mxu0  ;;  %v2183_v50 = vpop.f32.mrb[19].mxu1 }
 0x3d8   : > { %v2058_v59 = vpack.c.bf16 %v5521_v48, %v5515_v12  ;;  %v2251_v3 = vpack.c.bf16 %v2183_v50, %v2180_v54  ;;  %v5667_v12 = vld [vmem:[%s5781_s6 + $0x8] sm:$0xf] }
 0x3d9   : > { %v2570_v13 = vsel %vm1315_vm2, %v2059_v42, 0 }
 0x3da   : > { %3495 = vmatpush3.bf16.msra.mxu0 %v2251_v3  ;;  %v2567_v55 = vsel %vm1315_vm2, %v2058_v59, 0 }
 0x3db   : > { %3496 = vmatprep.subr.bf16.mxu0 %v5860_v47 }
 0x3dc   : > { %v5526_v16 = vpop.f32.mrb[20].mxu0  ;;  %v3424_v7 = vpop.f32.mrb[20].mxu1 }
 0x3dd   : > { %v5528_v62 = vpop.f32.mrb[21].mxu0  ;;  %v2196_v40 = vpop.f32.mrb[21].mxu1 }
 0x3de   : > { %v5530_v32 = vpop.f32.mrb[22].mxu0  ;;  %v3425_v11 = vpop.f32.mrb[22].mxu1  ;;  %3497 = vmatpush3.bf16.msra.mxu0 %v2252_v27 }
 0x3df   : > { %v2061_v63 = vpack.c.bf16 %v5530_v32, %v5526_v16  ;;  %v2254_v25 = vpack.c.bf16 %v3425_v11, %v3424_v7  ;;  %v5534_v29 = vpop.f32.mrb[23].mxu0  ;;  %v2199_v17 = vpop.f32.mrb[23].mxu1  ;;  %3498 = vmatprep.subr.bf16.mxu0 %v5860_v47 }
 0x3e0   : > { %v2060_v37 = vpack.c.bf16 %v5534_v29, %v5528_v62  ;;  %v2253_v15 = vpack.c.bf16 %v2199_v17, %v2196_v40 }
 0x3e2   : > { %3499 = vmatpush3.bf16.msra.mxu0 %v2253_v15  ;;  %v2573_v24 = vsel %vm1315_vm2, %v2060_v37, 0 }
 0x3e3   : > { %3500 = vmatprep.subr.bf16.mxu0 %v5860_v47 }
 0x3e5   : > { %v5540_v58 = vpop.f32.mrb[24].mxu0  ;;  %v5542_v26 = vpop.f32.mrb[24].mxu1 }
 0x3e6   : > { %v5544_v60 = vpop.f32.mrb[25].mxu0  ;;  %v5546_v36 = vpop.f32.mrb[25].mxu1  ;;  %3501 = vmatpush3.bf16.msra.mxu0 %v2254_v25 }
 0x3e7   : > { %v5548_v49 = vpop.f32.mrb[26].mxu0  ;;  %v5550_v18 = vpop.f32.mrb[26].mxu1  ;;  %3506 = vmatprep.subr.bf16.mxu0 %v5860_v47 }
 0x3e8   : > { %v2256_v19 = vpack.c.bf16 %v5550_v18, %v5542_v26  ;;  %v5556_v33 = vpop.f32.mrb[27].mxu0  ;;  %v5558_v6 = vpop.f32.mrb[27].mxu1 }
 0x3e9   : > { %v2255_v23 = vpack.c.bf16 %v5558_v6, %v5546_v36 }
 0x3ed   : > { %v5565_v41 = vpop.f32.mrb[28].mxu0  ;;  %v5567_v31 = vpop.f32.mrb[28].mxu1 }
 0x3ee   : > { %v5569_v2 = vpop.f32.mrb[29].mxu0  ;;  %v5571_v8 = vpop.f32.mrb[29].mxu1 }
 0x3ef   : > { %v5573_v4 = vpop.f32.mrb[30].mxu0  ;;  %v5575_v5 = vpop.f32.mrb[30].mxu1 }
 0x3f0   : > { %v5581_v61 = vpop.f32.mrb[31].mxu0  ;;  %v5583_v1 = vpop.f32.mrb[31].mxu1  ;;  %v5877_v0 = vpack.c.bf16 %v5575_v5, %v5567_v31 }
 0x3f1   : > { %v2257_v14 = vpack.c.bf16 %v5583_v1, %v5571_v8 }
 0x3f5   : > { %v2317_v30 = vpop.f32.mrb[32].mxu0 }
 0x3f6   : > { %v3444_v51 = vpop.f32.mrb[33].mxu0  ;;  %v2325_v53 = vsel %vm2324_vm4, %v2317_v30, -inf }
 0x3f7   : > { %2326 = vmax.xlane.f32.xlu0 %v2325_v53  ;;  %v2320_v54 = vpop.f32.mrb[34].mxu0 }
 0x3f8   : > { %v2329_v57 = vsel %vm2328_vm5, %v2320_v54, -inf  ;;  %v3445_v27 = vpop.f32.mrb[35].mxu0 }
 0x3f9   : > { %2330 = vmax.xlane.f32.xlu1 %v2329_v57 }
 0x41f   : > { %v2466_v50 = vpop.f32.mrb[36].mxu0 }
 0x420   : > { %v3468_v3 = vpop.f32.mrb[37].mxu0  ;;  %v2473_v7 = vsel %vm2324_vm4, %v2466_v50, -inf }
 0x421   : > { %2474 = vmax.xlane.f32.xlu0 %v2473_v7  ;;  %v2469_v40 = vpop.f32.mrb[38].mxu0 }
 0x422   : > { %v2476_v11 = vsel %vm2328_vm5, %v2469_v40, -inf  ;;  %v3469_v25 = vpop.f32.mrb[39].mxu0 }
 0x423   : > { %2477 = vmax.xlane.f32.xlu1 %v2476_v11 }
 0x484   : > { %v2327_v17 = vpop.xlane.xlu0 %2326 }
 0x485   : > { %v2332_v15 = vsub.f32 %v2317_v30, %v2327_v17 }
 0x486   : > { %v2331_v51 = vpop.xlane.xlu1 %2330 }
 0x487   : > { %v2334_v38 = vmul.f32 1.442695, %v2332_v15  ;;  %v2333_v53 = vsub.f32 %v2320_v54, %v2331_v51 }
 0x489   : > { %3705 = vpow2.f32 %v2334_v38  ;;  %v2336_v46 = vmul.f32 1.442695, %v2333_v53 }
 0x48b   : > { %3707 = vpow2.f32 %v2336_v46 }
 0x493   : > { %v3706_v27 = vpop.eup %3705 }
 0x494   : > { %v2338_v57 = vsel %vm2324_vm4, %v3706_v27, 0.0 }
 0x495   : > { %v3708_v3 = vpop.eup %3707  ;;  %2339 = vadd.xlane.f32.xlu0 %v2338_v57 }
 0x496   : > { %v2341_v7 = vsel %vm2328_vm5, %v3708_v3, 0.0 }
 0x497   : > { %2342 = vadd.xlane.f32.xlu1 %v2341_v7 }
 0x4ae   : > { %v2475_v10 = vpop.xlane.xlu0 %2474 }
 0x4af   : > { %v2479_v20 = vsub.f32 %v2466_v50, %v2475_v10 }
 0x4b0   : > { %v2478_v25 = vpop.xlane.xlu1 %2477 }
 0x4b1   : > { %v2481_v11 = vmul.f32 1.442695, %v2479_v20  ;;  %v2480_v44 = vsub.f32 %v2469_v40, %v2478_v25 }
 0x4b3   : > { %3709 = vpow2.f32 %v2481_v11  ;;  %v2483_v30 = vmul.f32 1.442695, %v2480_v44 }
 0x4b5   : > { %3711 = vpow2.f32 %v2483_v30 }
 0x4bd   : > { %v3710_v54 = vpop.eup %3709 }
 0x4be   : > { %v2485_v38 = vsel %vm2324_vm4, %v3710_v54, 0.0 }
 0x4bf   : > { %v3712_v46 = vpop.eup %3711  ;;  %2486 = vadd.xlane.f32.xlu0 %v2485_v38 }
 0x4c0   : > { %v2488_v17 = vsel %vm2328_vm5, %v3712_v46, 0.0 }
 0x4c1   : > { %2489 = vadd.xlane.f32.xlu1 %v2488_v17 }
 0x522   : > { %v2340_v15 = vpop.xlane.xlu0 %2339 }
 0x523   : > { %3713 = vrcp.f32 %v2340_v15 }
 0x524   : > { %v2343_v51 = vpop.xlane.xlu1 %2342 }
 0x525   : > { %3715 = vrcp.f32 %v2343_v51 }
 0x52d   : > { %v3714_v53 = vpop.eup %3713 }
 0x52e   : > { %v2345_v50 = vmul.f32 %v3714_v53, %v3706_v27 }
 0x52f   : > { %v3716_v10 = vpop.eup %3715 }
 0x530   : > { %v2347_v20 = vmul.f32 %v3716_v10, %v3708_v3 }
 0x532   : > { %v2348_v40 = vpack.c.bf16 %v2347_v20, %v2345_v50 }
 0x534   : > { %3455 = vmatmul.mubr.msk.bf16.vlgmr.msra.gmra.mrb[32].mxu1 %vm2324_vm4, %v2348_v40 }
 0x535   : > { %3471 = vmatpush3.bf16.msra.mxu1 %v2247_v52  ;;  %3478 = vmatprep.mubr.msk.bf16.mxu1 %vm3971_vm3, %v5860_v47 }
 0x536   : > { %3472 = vmatprep.subr.bf16.mxu1 %v5860_v47 }
 0x539   : > { %3473 = vmatpush3.bf16.msra.mxu1 %v2248_v21 }
 0x53a   : > { %3474 = vmatprep.subr.bf16.mxu1 %v5860_v47 }
 0x53d   : > { %3475 = vmatpush3.bf16.msra.mxu1 %v2249_v39  ;;  %v5662_v39 = vld [vmem:[%s5781_s6] sm:$0xff] }
 0x53e   : > { %3476 = vmatprep.subr.bf16.mxu1 %v5860_v47 }
 0x541   : > { %3477 = vmatpush3.bf16.msra.mxu1 %v2250_v28  ;;  %v2576_v28 = vsel %vm1315_vm2, %v2061_v63, 0 }
 0x542   : > { %3482 = vmatprep.subr.bf16.mxu1 %v5860_v47 }
 0x54c   : > { %v2487_v43 = vpop.xlane.xlu0 %2486 }
 0x54d   : > { %3717 = vrcp.f32 %v2487_v43 }
 0x54e   : > { %v2490_v22 = vpop.xlane.xlu1 %2489 }
 0x54f   : > { %3719 = vrcp.f32 %v2490_v22 }
 0x557   : > { %v3718_v45 = vpop.eup %3717 }
 0x558   : > { %v2492_v21 = vmul.f32 %v3718_v45, %v3710_v54 }
 0x559   : > { %v3720_v34 = vpop.eup %3719 }
 0x55a   : > { %v2494_v52 = vmul.f32 %v3720_v34, %v3712_v46 }
 0x55c   : > { %v2495_v44 = vpack.c.bf16 %v2494_v52, %v2492_v21 }
 0x55e   : > { %3479 = vmatmul.mubr.msk.bf16.vlgmr.msra.gmra.mrb[36].mxu1 %vm2324_vm4, %v2495_v44 }
 0x55f   : > { %3483 = vmatpush3.bf16.xpose.msra.mxu1 %v2567_v55  ;;  %3490 = vmatprep.mubr.msk.bf16.mxu1 %vm3971_vm3, %v5860_v47 }
 0x560   : > { %3484 = vmatprep.subr.bf16.mxu1 %v5860_v47 }
 0x567   : > { %3485 = vmatpush3.bf16.xpose.msra.mxu1 %v2570_v13 }
 0x568   : > { %3486 = vmatprep.subr.bf16.mxu1 %v5860_v47 }
 0x56f   : > { %3487 = vmatpush3.bf16.xpose.msra.mxu1 %v2573_v24 }
 0x570   : > { %3488 = vmatprep.subr.bf16.mxu1 %v5860_v47 }
 0x577   : > { %3489 = vmatpush3.bf16.xpose.msra.mxu1 %v2576_v28 }
 0x578   : > { %3518 = vmatprep.subr.bf16.mxu1 %v5860_v47 }
 0x57e   : > { %3491 = vmatmul.mubr.msk.bf16.vlgmr.msra.gmra.mrb[40].mxu1 %vm1315_vm2, %v5471_v9 }
 0x57f   : > { %3519 = vmatpush3.bf16.msra.mxu1 %v2255_v23  ;;  %3526 = vmatprep.mubr.msk.bf16.mxu1 %vm3971_vm3, %v5860_v47 }
 0x580   : > { %3520 = vmatprep.subr.bf16.mxu1 %v5860_v47 }
 0x583   : > { %3521 = vmatpush3.bf16.msra.mxu1 %v2256_v19 }
 0x584   : > { %3522 = vmatprep.subr.bf16.mxu1 %v5860_v47 }
 0x587   : > { %3523 = vmatpush3.bf16.msra.mxu1 %v2257_v14 }
 0x588   : > { %3524 = vmatprep.subr.bf16.mxu1 %v5860_v47 }
 0x58b   : > { %3525 = vmatpush3.bf16.msra.mxu1 %v5877_v0 }
 0x58c   : > { %3530 = vmatprep.subr.bf16.mxu1 %v5860_v47 }
 0x607   : > { %v2386_v35 = vpop.f32.mrb[32].mxu1 }
 0x608   : > { %v2393_v56 = vmul.f32 %v2386_v35, %v5662_v39  ;;  %v3456_v42 = vpop.f32.mrb[33].mxu1 }
 0x609   : > { %v2389_v48 = vpop.f32.mrb[34].mxu1 }
 0x60a   : > { %v2396_v59 = vsel %vm2395_vm6, %v2393_v56, 0.0  ;;  %v2404_v16 = vrot.slane %v2393_v56, 4  ;;  %v2394_v62 = vmul.f32 %v2389_v48, %v5667_v12  ;;  %v3457_v32 = vpop.f32.mrb[35].mxu1 }
 0x60b   : > { %v2397_v63 = vrot.slane %v2396_v59, 4 }
 0x60c   : > { %v2406_v29 = vsel %vm2395_vm6, %v2404_v16, 0.0  ;;  %v2413_v37 = vsel %vm2395_vm6, %v2394_v62, 0.0 }
 0x60d   : > { %v2398_v26 = vadd.f32 %v2397_v63, %v2396_v59  ;;  %v2407_v36 = vrot.slane %v2406_v29, 4  ;;  %v2414_v18 = vrot.slane %v2413_v37, 4 }
 0x60f   : > { %v2399_v19 = vrot.slane %v2398_v26, 2  ;;  %v2408_v6 = vadd.f32 %v2407_v36, %v2406_v29  ;;  %v2415_v23 = vadd.f32 %v2414_v18, %v2413_v37 }
 0x611   : > { %v2400_v31 = vadd.f32 %v2399_v19, %v2398_v26  ;;  %v2409_v8 = vrot.slane %v2408_v6, 2  ;;  %v2416_v5 = vrot.slane %v2415_v23, 2 }
 0x613   : > { %v2401_v1 = vrot.slane %v2400_v31, 1  ;;  %v2410_v14 = vadd.f32 %v2409_v8, %v2408_v6  ;;  %v2417_v27 = vadd.f32 %v2416_v5, %v2415_v23 }
 0x615   : > { %v2411_v57 = vrot.slane %v2410_v14, 1  ;;  %v2418_v3 = vrot.slane %v2417_v27, 1  ;;  %v2402_v7 = vadd.f32 %v2401_v1, %v2400_v31 }
 0x617   : > { %v2412_v25 = vadd.f32 %v2411_v57, %v2410_v14  ;;  %v2419_v11 = vadd.f32 %v2418_v3, %v2417_v27 }
 0x619   : > { %v2859_v30 = vsel %vm2858_vm7, %v2402_v7, %v2412_v25 }
 0x61a   : > { %v2861_v54 = vsel %vm2860_vm8, %v2859_v30, %v2419_v11 }
 0x631   : > { %v2533_v38 = vpop.f32.mrb[36].mxu1 }
 0x632   : > { %v2540_v46 = vmul.f32 %v2533_v38, %v5662_v39  ;;  %v3480_v17 = vpop.f32.mrb[37].mxu1 }
 0x633   : > { %v2536_v15 = vpop.f32.mrb[38].mxu1  ;;  %v5878_v17 = vpack.c.bf16 %v5556_v33, %v5544_v60  ;;  %v5880_v60 = vpack.c.bf16 %v5581_v61, %v5569_v2 }
 0x634   : > { %v2542_v51 = vsel %vm2395_vm6, %v2540_v46, 0.0  ;;  %v2550_v53 = vrot.slane %v2540_v46, 4  ;;  %v2541_v10 = vmul.f32 %v2536_v15, %v5667_v12  ;;  %v3481_v50 = vpop.f32.mrb[39].mxu1 }
 0x635   : > { %v2543_v20 = vrot.slane %v2542_v51, 4  ;;  %v2713_v15 = vsel %vm1315_vm2, %v5878_v17, 0  ;;  %v2719_v33 = vsel %vm1315_vm2, %v5880_v60, 0 }
 0x636   : > { %v2552_v40 = vsel %vm2395_vm6, %v2550_v53, 0.0  ;;  %v2559_v43 = vsel %vm2395_vm6, %v2541_v10, 0.0  ;;  %v5881_v10 = vpack.c.bf16 %v5573_v4, %v5565_v41 }
 0x637   : > { %v2544_v22 = vadd.f32 %v2543_v20, %v2542_v51  ;;  %v2553_v45 = vrot.slane %v2552_v40, 4  ;;  %v2560_v34 = vrot.slane %v2559_v43, 4  ;;  %v5879_v51 = vpack.c.bf16 %v5548_v49, %v5540_v58 }
 0x638   : > { %v2722_v50 = vsel %vm1315_vm2, %v5881_v10, 0 }
 0x639   : > { %v2545_v21 = vrot.slane %v2544_v22, 2  ;;  %v2554_v52 = vadd.f32 %v2553_v45, %v2552_v40  ;;  %v2561_v44 = vadd.f32 %v2560_v34, %v2559_v43  ;;  %v2716_v53 = vsel %vm1315_vm2, %v5879_v51, 0 }
 0x63b   : > { %v2546_v55 = vadd.f32 %v2545_v21, %v2544_v22  ;;  %v2555_v13 = vrot.slane %v2554_v52, 2  ;;  %v2562_v24 = vrot.slane %v2561_v44, 2 }
 0x63d   : > { %v2547_v28 = vrot.slane %v2546_v55, 1  ;;  %v2556_v0 = vadd.f32 %v2555_v13, %v2554_v52  ;;  %v2563_v35 = vadd.f32 %v2562_v24, %v2561_v44 }
 0x63f   : > { %v2548_v56 = vadd.f32 %v2547_v28, %v2546_v55  ;;  %v2557_v42 = vrot.slane %v2556_v0, 1  ;;  %v2564_v48 = vrot.slane %v2563_v35, 1 }
 0x641   : > { %v2558_v59 = vadd.f32 %v2557_v42, %v2556_v0  ;;  %v2863_v16 = vsel %vm2862_vm9, %v2861_v54, %v2548_v56  ;;  %v2565_v62 = vadd.f32 %v2564_v48, %v2563_v35 }
 0x643   : > { %v2865_v32 = vsel %vm2864_vm10, %v2863_v16, %v2558_v59 }
 0x644   : > { %v5682_v63 = vsel %vm2866_vm11, %v2865_v32, %v2565_v62 }
 0x651   : > { %v2612_v29 = vpop.f32.mrb[40].mxu1 }
 0x652   : > { %v3492_v37 = vpop.f32.mrb[41].mxu1  ;;  %v2619_v26 = vsel %vm2324_vm4, %v2612_v29, -inf }
 0x653   : > { %2620 = vmax.xlane.f32.xlu0 %v2619_v26  ;;  %v2615_v36 = vpop.f32.mrb[42].mxu1 }
 0x654   : > { %v2622_v18 = vsel %vm2328_vm5, %v2615_v36, -inf  ;;  %v3493_v19 = vpop.f32.mrb[43].mxu1 }
 0x655   : > { %2623 = vmax.xlane.f32.xlu1 %v2622_v18 }
 0x6e0   : > { %v2621_v6 = vpop.xlane.xlu0 %2620 }
 0x6e1   : > { %v2625_v23 = vsub.f32 %v2612_v29, %v2621_v6 }
 0x6e2   : > { %v2624_v31 = vpop.xlane.xlu1 %2623 }
 0x6e3   : > { %v2627_v8 = vmul.f32 1.442695, %v2625_v23  ;;  %v2626_v5 = vsub.f32 %v2615_v36, %v2624_v31 }
 0x6e5   : > { %3721 = vpow2.f32 %v2627_v8  ;;  %v2629_v1 = vmul.f32 1.442695, %v2626_v5 }
 0x6e7   : > { %3723 = vpow2.f32 %v2629_v1 }
 0x6ef   : > { %v3722_v14 = vpop.eup %3721 }
 0x6f0   : > { %v2631_v27 = vsel %vm2324_vm4, %v3722_v14, 0.0 }
 0x6f1   : > { %v3724_v57 = vpop.eup %3723  ;;  %2632 = vadd.xlane.f32.xlu0 %v2631_v27 }
 0x6f2   : > { %v2634_v3 = vsel %vm2328_vm5, %v3724_v57, 0.0 }
 0x6f3   : > { %2635 = vadd.xlane.f32.xlu1 %v2634_v3  ;;  %v3639_v3 = vld [vmem:[%s5882_s24] sm:$0xff]  }
 0x77e   : > { %v2633_v7 = vpop.xlane.xlu0 %2632 }
 0x77f   : > { %3725 = vrcp.f32 %v2633_v7  ;;  %v3640_v7 = vld [vmem:[%s5882_s24 + $0x8] sm:$0xff]  }
 0x780   : > { %v2636_v25 = vpop.xlane.xlu1 %2635 }
 0x781   : > { %3727 = vrcp.f32 %v2636_v25 }
 0x789   : > { %v3726_v11 = vpop.eup %3725 }
 0x78a   : > { %v2638_v54 = vmul.f32 %v3726_v11, %v3722_v14 }
 0x78b   : > { %v3728_v30 = vpop.eup %3727 }
 0x78c   : > { %v2640_v38 = vmul.f32 %v3728_v30, %v3724_v57 }
 0x78e   : > { %v2641_v46 = vpack.c.bf16 %v2640_v38, %v2638_v54 }
 0x790   : > { %3503 = vmatmul.mubr.msk.bf16.vlgmr.msra.gmra.mrb[40].mxu0 %vm2324_vm4, %v2641_v46 }
 0x791   : > { %3507 = vmatpush3.bf16.xpose.msra.mxu0 %v2713_v15  ;;  %3514 = vmatprep.mubr.msk.bf16.mxu0 %vm3971_vm3, %v5860_v47 }
 0x792   : > { %3508 = vmatprep.subr.bf16.mxu0 %v5860_v47 }
 0x799   : > { %3509 = vmatpush3.bf16.xpose.msra.mxu0 %v2716_v53 }
 0x79a   : > { %3510 = vmatprep.subr.bf16.mxu0 %v5860_v47 }
 0x7a1   : > { %3511 = vmatpush3.bf16.xpose.msra.mxu0 %v2719_v33 }
 0x7a2   : > { %3512 = vmatprep.subr.bf16.mxu0 %v5860_v47 }
 0x7a9   : > { %3513 = vmatpush3.bf16.xpose.msra.mxu0 %v2722_v50 }
 0x7b0   : > { %3515 = vmatmul.mubr.msk.bf16.vlgmr.msra.gmra.mrb[44].mxu0 %vm1315_vm2, %v5471_v9 }
 0x863   : > { %v2679_v58 = vpop.f32.mrb[40].mxu0 }
 0x864   : > { %v2686_v49 = vmul.f32 %v2679_v58, %v5662_v39  ;;  %v3504_v20 = vpop.f32.mrb[41].mxu0 }
 0x865   : > { %v2682_v40 = vpop.f32.mrb[42].mxu0 }
 0x866   : > { %v2688_v2 = vsel %vm2395_vm6, %v2686_v49, 0.0  ;;  %v2696_v61 = vrot.slane %v2686_v49, 4  ;;  %v3505_v43 = vpop.f32.mrb[43].mxu0  ;;  %v2687_v25 = vmul.f32 %v2682_v40, %v5667_v12 }
 0x867   : > { %v2689_v22 = vrot.slane %v2688_v2, 4 }
 0x868   : > { %v2698_v45 = vsel %vm2395_vm6, %v2696_v61, 0.0  ;;  %v2705_v11 = vsel %vm2395_vm6, %v2687_v25, 0.0 }
 0x869   : > { %v2690_v34 = vadd.f32 %v2689_v22, %v2688_v2  ;;  %v2699_v41 = vrot.slane %v2698_v45, 4  ;;  %v2706_v30 = vrot.slane %v2705_v11, 4 }
 0x86b   : > { %v2691_v4 = vrot.slane %v2690_v34, 2  ;;  %v2700_v21 = vadd.f32 %v2699_v41, %v2698_v45  ;;  %v2707_v54 = vadd.f32 %v2706_v30, %v2705_v11  ;;  %v3194_v30 = vld [vmem:[%s5885_s11] ss:$0 sm:$0xff] }
 0x86d   : > { %v2692_v52 = vadd.f32 %v2691_v4, %v2690_v34  ;;  %v2701_v44 = vrot.slane %v2700_v21, 2  ;;  %v2708_v15 = vrot.slane %v2707_v54, 2 }
 0x86f   : > { %v2693_v55 = vrot.slane %v2692_v52, 1  ;;  %v2702_v9 = vadd.f32 %v2701_v44, %v2700_v21  ;;  %v2709_v49 = vadd.f32 %v2708_v15, %v2707_v54 }
 0x871   : > { %v2694_v13 = vadd.f32 %v2693_v55, %v2692_v52  ;;  %v2703_v24 = vrot.slane %v2702_v9, 1  ;;  %v2710_v22 = vrot.slane %v2709_v49, 1 }
 0x873   : > { %v2704_v28 = vadd.f32 %v2703_v24, %v2702_v9  ;;  %v2869_v0 = vsel %vm2868_vm12, %v5682_v63, %v2694_v13  ;;  %v2711_v52 = vadd.f32 %v2710_v22, %v2709_v49 }
 0x875   : > { %v5716_v35 = vsel %vm2870_vm13, %v2869_v0, %v2704_v28 }
 0x883   : > { %v2758_v56 = vpop.f32.mrb[44].mxu0 }
 0x884   : > { %v3516_v42 = vpop.f32.mrb[45].mxu0  ;;  %v2765_v48 = vsel %vm2324_vm4, %v2758_v56, -inf }
 0x885   : > { %2766 = vmax.xlane.f32.xlu0 %v2765_v48  ;;  %v2761_v59 = vpop.f32.mrb[46].mxu0  ;;  %v3190_v48 = vld [vmem:[%s5883_s15] ss:$0 sm:$0xff] }
 0x886   : > { %v2768_v16 = vsel %vm2328_vm5, %v2761_v59, -inf  ;;  %v3517_v62 = vpop.f32.mrb[47].mxu0 }
 0x887   : > { %2769 = vmax.xlane.f32.xlu1 %v2768_v16 }
 0x912   : > { %v2767_v32 = vpop.xlane.xlu0 %2766 }
 0x913   : > { %v2771_v29 = vsub.f32 %v2758_v56, %v2767_v32 }
 0x914   : > { %v2770_v37 = vpop.xlane.xlu1 %2769 }
 0x915   : > { %v2773_v26 = vmul.f32 1.442695, %v2771_v29  ;;  %v2772_v36 = vsub.f32 %v2761_v59, %v2770_v37 }
 0x917   : > { %3729 = vpow2.f32 %v2773_v26  ;;  %v2775_v18 = vmul.f32 1.442695, %v2772_v36 }
 0x919   : > { %3731 = vpow2.f32 %v2775_v18 }
 0x921   : > { %v3730_v63 = vpop.eup %3729 }
 0x922   : > { %v2777_v19 = vsel %vm2324_vm4, %v3730_v63, 0.0 }
 0x923   : > { %v3732_v6 = vpop.eup %3731  ;;  %2778 = vadd.xlane.f32.xlu0 %v2777_v19 }
 0x924   : > { %v2780_v23 = vsel %vm2328_vm5, %v3732_v6, 0.0 }
 0x925   : > { %2781 = vadd.xlane.f32.xlu1 %v2780_v23 }
 0x9b0   : > { %v2779_v31 = vpop.xlane.xlu0 %2778 }
 0x9b1   : > { %3733 = vrcp.f32 %v2779_v31 }
 0x9b2   : > { %v2782_v8 = vpop.xlane.xlu1 %2781 }
 0x9b3   : > { %3735 = vrcp.f32 %v2782_v8 }
 0x9bb   : > { %v3734_v5 = vpop.eup %3733 }
 0x9bc   : > { %v2784_v14 = vmul.f32 %v3734_v5, %v3730_v63 }
 0x9bd   : > { %v3736_v1 = vpop.eup %3735 }
 0x9be   : > { %v2786_v27 = vmul.f32 %v3736_v1, %v3732_v6 }
 0x9c0   : > { %v2787_v57 = vpack.c.bf16 %v2786_v27, %v2784_v14 }
 0x9c2   : > { %3527 = vmatmul.mubr.msk.bf16.vlgmr.msra.gmra.mrb[44].mxu1 %vm2324_vm4, %v2787_v57 }
 0x9c3   : > { %3534 = vmatprep.mubr.msk.bf16.mxu1 %vm3971_vm3, %v5860_v47  ;;  %3531 = vmatpush3.bf16.msra.mxu1 %v3639_v3 }
 0x9c4   : > { %3532 = vmatprep.subr.bf16.mxu1 %v5860_v47 }
 0x9c7   : > { %3533 = vmatpush3.bf16.msra.mxu1 %v3640_v7 }
 0xa95   : > { %v2825_v38 = vpop.f32.mrb[44].mxu1 }
 0xa96   : > { %v2832_v46 = vmul.f32 %v2825_v38, %v5662_v39  ;;  %v3528_v17 = vpop.f32.mrb[45].mxu1 }
 0xa97   : > { %v2828_v51 = vpop.f32.mrb[46].mxu1 }
 0xa98   : > { %v2834_v53 = vsel %vm2395_vm6, %v2832_v46, 0.0  ;;  %v2842_v60 = vrot.slane %v2832_v46, 4  ;;  %v2833_v33 = vmul.f32 %v2828_v51, %v5667_v12  ;;  %v3529_v10 = vpop.f32.mrb[47].mxu1  ;;  %v3195_v46 = vld [vmem:[%s5886_s10] ss:$0 sm:$0xff] }
 0xa99   : > { %v2835_v47 = vrot.slane %v2834_v53, 4 }
 0xa9a   : > { %v2844_v50 = vsel %vm2395_vm6, %v2842_v60, 0.0  ;;  %v2851_v58 = vsel %vm2395_vm6, %v2833_v33, 0.0 }
 0xa9b   : > { %v2836_v20 = vadd.f32 %v2835_v47, %v2834_v53  ;;  %v2845_v40 = vrot.slane %v2844_v50, 4  ;;  %v2852_v2 = vrot.slane %v2851_v58, 4 }
 0xa9d   : > { %v2837_v61 = vrot.slane %v2836_v20, 2  ;;  %v2846_v39 = vadd.f32 %v2845_v40, %v2844_v50  ;;  %v2853_v43 = vadd.f32 %v2852_v2, %v2851_v58 }
 0xa9f   : > { %v2838_v45 = vadd.f32 %v2837_v61, %v2836_v20  ;;  %v2847_v34 = vrot.slane %v2846_v39, 2  ;;  %v2854_v41 = vrot.slane %v2853_v43, 2 }
 0xaa1   : > { %v2839_v4 = vrot.slane %v2838_v45, 1  ;;  %v2848_v21 = vadd.f32 %v2847_v34, %v2846_v39  ;;  %v2855_v12 = vadd.f32 %v2854_v41, %v2853_v43 }
 0xaa3   : > { %v2840_v44 = vadd.f32 %v2839_v4, %v2838_v45  ;;  %v2849_v55 = vrot.slane %v2848_v21, 1  ;;  %v2856_v9 = vrot.slane %v2855_v12, 1 }
 0xaa5   : > { %v2850_v13 = vadd.f32 %v2849_v55, %v2848_v21  ;;  %v2872_v24 = vsel %vm2858_vm7, %v2711_v52, %v2840_v44  ;;  %v2857_v28 = vadd.f32 %v2856_v9, %v2855_v12 }
 0xaa7   : > { %v2873_v0 = vsel %vm2860_vm8, %v2872_v24, %v2850_v13 }
 0xaa8   : > { %v2874_v56 = vsel %vm2862_vm9, %v2873_v0, %v2857_v28 }
 0xaa9   : > { %v2875_v42 = vpack.c.bf16 %v2874_v56, %v5716_v35 }
 0xaab   : > { %3535 = vmatmul.mubr.msk.bf16.vlgmr.msra.gmra.mrb[48].mxu1 %vm1315_vm2, %v2875_v42 }
 0xb7e   : > { %v2936_v59 = vpop.f32.mrb[48].mxu1 }
 0xb7f   : > { %v2937_v16 = vadd.f32 %v3190_v48, %v2936_v59  ;;  %v3536_v62 = vpop.f32.mrb[49].mxu1 }
 0xb80   : > { %v2939_v32 = vpop.f32.mrb[50].mxu1 }
 0xb81   : > { %v2940_v29 = vadd.f32 %v3190_v48, %v2939_v32  ;;  %v3537_v37 = vpop.f32.mrb[51].mxu1  ;;  %v2945_v26 = vsel %vm1315_vm2, %v2937_v16, 0.0 }
 0xb82   : > { %2946 = vadd.xlane.f32.xlu0 %v2945_v26 }
 0xb83   : > { %v2948_v36 = vsel %vm2395_vm6, %v2940_v29, 0.0 }
 0xb84   : > { %2949 = vadd.xlane.f32.xlu1 %v2948_v36 }
 0xc0f   : > { %v2947_v18 = vpop.xlane.xlu0 %2946 }
 0xc10   : > { %v2951_v35 = vmul.f32 0.03125, %v2947_v18 }
 0xc11   : > { %v2950_v63 = vpop.xlane.xlu1 %2949 }
 0xc12   : > { %v2953_v19 = vsub.f32 %v2937_v16, %v2951_v35  ;;  %v2952_v6 = vmul.f32 0.03125, %v2950_v63 }
 0xc14   : > { %v2954_v23 = vsub.f32 %v2940_v29, %v2952_v6  ;;  %v2955_v31 = vmul.f32 %v2953_v19, %v2953_v19 }
 0xc16   : > { %v2957_v8 = vsel %vm1315_vm2, %v2955_v31, 0.0  ;;  %v2956_v5 = vmul.f32 %v2954_v23, %v2954_v23  ;;  %vm3000_vm2 = vcmask 257025  }
 0xc17   : > { %2958 = vadd.xlane.f32.xlu0 %v2957_v8 }
 0xc18   : > { %v2960_v1 = vsel %vm2395_vm6, %v2956_v5, 0.0 }
 0xc19   : > { %2961 = vadd.xlane.f32.xlu1 %v2960_v1 }
 0xca4   : > { %v2959_v14 = vpop.xlane.xlu0 %2958 }
 0xca5   : > { %v2963_v27 = vmul.f32 0.03125, %v2959_v14 }
 0xca6   : > { %v2962_v57 = vpop.xlane.xlu1 %2961 }
 0xca7   : > { %v2965_v3 = vadd.f32 1e-05, %v2963_v27  ;;  %v2964_v7 = vmul.f32 0.03125, %v2962_v57 }
 0xca9   : > { %3737 = vrsqrt.f32 %v2965_v3  ;;  %v2966_v25 = vadd.f32 1e-05, %v2964_v7 }
 0xcab   : > { %3739 = vrsqrt.f32 %v2966_v25 }
 0xcb3   : > { %v3738_v11 = vpop.eup %3737 }
 0xcb4   : > { %v2969_v54 = vmul.f32 %v3738_v11, %v2953_v19 }
 0xcb5   : > { %v3740_v38 = vpop.eup %3739 }
 0xcb6   : > { %v2977_v17 = vmul.f32 %v3194_v30, %v2969_v54  ;;  %v2970_v15 = vmul.f32 %v3740_v38, %v2954_v23 }
 0xcb8   : > { %v2985_v51 = vadd.f32 %v3195_v46, %v2977_v17  ;;  %v2978_v53 = vmul.f32 %v3194_v30, %v2970_v15 }
 0xcba   : > { %v2987_v60 = vadd.f32 %v2985_v51, %v2937_v16  ;;  %v2986_v33 = vadd.f32 %v3195_v46, %v2978_v53 }
 0xcbc   : > { %2990 = vst.msk [vmem:[%s533_s17] sm:$0x7] %vm2989_vm14, %v2987_v60  ;;  %v2988_v10 = vadd.f32 %v2986_v33, %v2940_v29 }
 0xcbd   : > { %3196 = vst.msk [vmem:[%s533_s17 + $0x1] sm:$0x38] %vm2992_vm15, %v2987_v60 }
 0xcbe   : > { %3197 = vst.msk [vmem:[%s533_s17 + $0x2] sm:$0xc0] %vm2995_vm0, %v2987_v60 }
 0xcbf   : > { %3198 = vst.msk [vmem:[%s533_s17 + $0xa] sm:$0x1] %vm2997_vm1, %v2988_v10 }
 0xcc0   : > { %3199 = vst.msk [vmem:[%s533_s17 + $0xb] sm:$0xe] %vm3000_vm2, %v2988_v10 }
 0xcc1 PF: > { %p26_p5 = scmp.ge.s32.totalorder %s4206_s19, 4   ;;  %s5888_s25 = smov %s3950_s26 }
 0xcc2   : > { %s5889_s26 = smov %s3954_s27  ;;  %s5890_s27 = smov %s4217_s23 }
 0xcc3   : > { %s5891_s28 = smov %s4206_s19  ;;  %28 = sbr.rel (!%p26_p5) target bundleno = 12 (0xc), region = 135 }
 0xcca   :  { %3024 = vsyncpa [#allocation3], 1 }
 0xccb   :  { %3026 = vsyncpa [#allocation3 + $0x1], 1 }
 0xccc   :  { %3027 = vsyncpa [#allocation5], 1 }
 0xccd   :  { %3028 = vsyncpa [#allocation8], 1 }
 0xcce   :  { %3029 = vsyncpa [#allocation11], 1 }

// kernel: tpu_custom_call.1
= control target key start
LH: loop header
LB: loop body
LE: loop exit
PB: predicated region body
PF: predicated region fallthrough
CT: control target
= control target key end

     0   :  { %s5775_s0 = inlined_call_operand.hbm [shape: bf16[8,8,8,32], index: 0, kind: input, shape index: {}]   ;;  %s5776_s1 = inlined_call_operand.hbm [shape: f32[9,32], index: 1, kind: input, shape index: {}]   ;;  %s5777_s2 = inlined_call_operand.vmem [shape: f32[1,32], index: 2, kind: input, shape index: {}]   ;;  %s5778_s3 = inlined_call_operand.vmem [shape: f32[1,32], index: 3, kind: input, shape index: {}]   ;;  %s5779_s4 = inlined_call_operand.hbm [shape: f32[1,32], index: 4, kind: input, shape index: {}]   ;;  %s5780_s5 = inlined_call_operand.hbm [shape: bf16[12,32], index: 5, kind: input, shape index: {}]   ;;  %s5781_s6 = inlined_call_operand.vmem [shape: f32[12,32], index: 6, kind: input, shape index: {}]   ;;  %s5782_s7 = inlined_call_operand.hbm [shape: bf16[32,32], index: 7, kind: input, shape index: {}]   ;;  %s5783_s8 = inlined_call_operand.hbm [shape: bf16[32,32], index: 8, kind: input, shape index: {}]   ;;  %s5784_s9 = inlined_call_operand.vmem [shape: bf16[32,32], index: 9, kind: input, shape index: {}]   ;;  %s5785_s10 = inlined_call_operand.vmem [shape: f32[1,32], index: 10, kind: input, shape index: {}]   ;;  %s5786_s11 = inlined_call_operand.vmem [shape: f32[1,32], index: 11, kind: input, shape index: {}]   ;;  %s5787_s12 = inlined_call_operand.vmem [shape: f32[1,32], index: 12, kind: input, shape index: {}]   ;;  %s5788_s13 = inlined_call_operand.vmem [shape: f32[8,3,32], index: 13, kind: output, shape index: {}]  }
   0x1   :  { %5819 = sst [smem:[#allocation37_spill]] %s5784_s9 }
   0x2   :  { %5820 = sst [smem:[#allocation38_spill]] %s5785_s10 }
   0x3   :  { %5821 = sst [smem:[#allocation39_spill]] %s5786_s11 }
   0x4   :  { %5822 = sst [smem:[#allocation40_spill]] %s5787_s12 }
   0x5   :  { %5823 = sst [smem:[#allocation41_spill]] %s5788_s13 }
   0x6   :  { %18 = vsyncpa [#allocation3], 0 }
   0x7   :  { %20 = vsyncpa [#allocation3 + $0x1], 0 }
   0x8   :  { %21 = vsyncpa [#allocation5], 0 }
   0x9   :  { %22 = vsyncpa [#allocation8], 0 }
   0xa   :  { %23 = vsyncpa [#allocation11], 0  ;;  %s4042_s25 = smov 0   ;;  %s4044_s26 = smov 0  }
   0xb   :  { %s4046_s27 = smov 0   ;;  %s4048_s28 = smov 0  }
   0xc LB: > { %s3960_s29 = smov [#allocation4]   ;;  %s5789_s14 = sadd.s32 4294967295, %s3958_s28   ;;  %s3958_s28 = sphi %s4048_s28, %s5891_s28   ;;  %s3954_s27 = sphi %s4046_s27, %s5890_s27   ;;  %s3950_s26 = sphi %s4044_s26, %s5889_s26   ;;  %s3946_s25 = sphi %s4042_s25, %s5888_s25  }
   0xd   : > { %s350_s30 = sshll.u32 %s3960_s29, 4  ;;  %p3119_p0 = scmp.ge.s32.totalorder %s3958_s28, 1  ;;  %s4071_s30 = int_to_ptr.vmem [resolvable:$true] %s350_s30 }
   0xe   : > { %p4066_p1 = scmp.eq.s32.totalorder %s5789_s14, 0  ;;  %p338_p2 = scmp.lt.s32.totalorder %s3958_s28, 3 }
   0xf   : > { %s3961_s17 = smov [#allocation7]   ;;  %s3962_s20 = smov [#allocation6]  }
  0x10   : > { %s5824_s15 = scalar_select %p4066_p1, 1, 0 }
  0x11   : > { %p4073_p3 = pnand %p3119_p0, %p338_p2  ;;  %s380_s18 = sshll.u32 %s3961_s17, 4  ;;  %s4085_s18 = int_to_ptr.vmem [resolvable:$true] %s380_s18 }
  0x12   : > { %s4087_s21 = sshll.u32 %s3962_s20, 4  ;;  %s3742_s24 = scalar_lea.hbm %s5776_s1, 256  ;;  %s371_s21 = int_to_ptr.vmem [resolvable:$true] %s4087_s21 }
  0x13   : > { %s5825_s16 = scalar_select %p4073_p3, 1, 0 }
  0x14   : > { %p3560_p4 = pneg %p4073_p3  ;;  %p3743_p6 = scmp.ne.s32.totalorder %s5776_s1, %s3742_s24 }
  0x15   : > { %p3749_p10 = scmp.lt.u32.totalorder %s3742_s24, %s5776_s1 }
  0x16   : > { %p4081_p5 = pnand %p3560_p4, %p4066_p1 }
  0x18   : > { %p4097_p7 = pneg %p4081_p5 }
  0x1a   : > { %p3745_p8 = pnand %p4097_p7, %p3743_p6 }
  0x1c   : > { %p3746_p9 = pneg %p3745_p8 }
  0x1e   : > { %p3751_p11 = pnand %p3749_p10, %p3746_p9 }
  0x20   : > { %3754 = shalt.err (!%p3751_p11)
}
  0x21   : > { %s3755_s14 = scalar_lea.vmem %s4071_s30, 256  ;;  %p3763_p2 = scmp.lt.s32.totalorder %s4071_s30, %s4071_s30 }
  0x22   : > { %p3756_p12 = scmp.ne.s32.totalorder %s4071_s30, %s3755_s14  ;;  %p3764_p4 = scmp.lt.s32.totalorder %s3755_s14, %s3755_s14 }
  0x24   : > { %p3758_p13 = pnand %p3756_p12, %p4097_p7  ;;  %p3765_p6 = por %p3764_p4, %p3763_p2 }
  0x26   : > { %p3759_p0 = pneg %p3758_p13 }
  0x28   : > { %p3766_p8 = pnand %p3765_p6, %p3759_p0 }
  0x2a   : > { %3769 = shalt.err (!%p3766_p8)
}
  0x2b   : > { %s3963_s22 = smov 128   ;;  %s3964_s13 = smov 8  }
  0x2c   : > { %3563 = dma.hbm_to_vmem [thread:$0]  (!%p4081_p5), %s5776_s1, 256, %s4071_s30, [#allocation5], %s3963_s22, %s3963_s22, %s3964_s13  }
  0x2d   : > { %s3770_s12 = scalar_lea.hbm %s5780_s5, 128 }
  0x2e   : > { %p3771_p9 = scmp.ne.s32.totalorder %s5780_s5, %s3770_s12  ;;  %p3777_p12 = scmp.lt.u32.totalorder %s3770_s12, %s5780_s5 }
  0x30   : > { %p3773_p10 = pnand %p3771_p9, %p4097_p7 }
  0x32   : > { %p3774_p11 = pneg %p3773_p10 }
  0x34   : > { %p3779_p13 = pnand %p3777_p12, %p3774_p11 }
  0x36   : > { %3782 = shalt.err (!%p3779_p13)
}
  0x37   : > { %s3783_s30 = scalar_lea.vmem %s4085_s18, 128  ;;  %p3791_p6 = scmp.lt.s32.totalorder %s4085_s18, %s4085_s18 }
  0x38   : > { %p3784_p0 = scmp.ne.s32.totalorder %s4085_s18, %s3783_s30  ;;  %p3792_p8 = scmp.lt.s32.totalorder %s3783_s30, %s3783_s30 }
  0x3a   : > { %p3786_p2 = pnand %p3784_p0, %p4097_p7  ;;  %p3793_p9 = por %p3792_p8, %p3791_p6 }
  0x3c   : > { %p3787_p4 = pneg %p3786_p2 }
  0x3e   : > { %p3794_p10 = pnand %p3793_p9, %p3787_p4 }
  0x40   : > { %3797 = shalt.err (!%p3794_p10)
}
  0x41   : > { %s5794_s10 = smov 64   ;;  %s3966_s9 = smov 4  }
  0x42   : > { %3569 = dma.hbm_to_vmem [thread:$0]  (!%p4081_p5), %s5780_s5, 128, %s4085_s18, [#allocation8], %s5794_s10, %s5794_s10, %s3966_s9  }
  0x43   : > { %s3798_s23 = scalar_lea.hbm %s5779_s4, 16 }
  0x44   : > { %p3799_p11 = scmp.ne.s32.totalorder %s5779_s4, %s3798_s23  ;;  %p3805_p0 = scmp.lt.u32.totalorder %s3798_s23, %s5779_s4 }
  0x46   : > { %p3801_p12 = pnand %p3799_p11, %p4097_p7 }
  0x48   : > { %p3802_p13 = pneg %p3801_p12 }
  0x4a   : > { %p3807_p2 = pnand %p3805_p0, %p3802_p13 }
  0x4c   : > { %3810 = shalt.err (!%p3807_p2)
}
  0x4d   : > { %s3811_s30 = scalar_lea.vmem %s371_s21, 16  ;;  %s3818_s18 = scalar_lea.vmem %s371_s21, 32 }
  0x4e   : > { %p3812_p4 = scmp.ne.s32.totalorder %s371_s21, %s3811_s30  ;;  %p3819_p9 = scmp.lt.s32.totalorder %s371_s21, %s371_s21 }
  0x4f   : > { %p3820_p10 = scmp.lt.s32.totalorder %s3818_s18, %s3811_s30 }
  0x50   : > { %p3814_p6 = pnand %p3812_p4, %p4097_p7 }
  0x51   : > { %p3821_p3 = por %p3820_p10, %p3819_p9 }
  0x52   : > { %p3815_p8 = pneg %p3814_p6 }
  0x54   : > { %p3822_p1 = pnand %p3821_p3, %p3815_p8 }
  0x56   : > { %3825 = shalt.err (!%p3822_p1)
}
  0x57   : > { %3566 = dma.hbm_to_vmem [thread:$0]  (!%p4081_p5), %s5779_s4, 16, %s371_s21, [#allocation5]  }
  0x58   : > { %s3967_s22 = smov [#allocation9]   ;;  %s3968_s23 = smov [#allocation10]  }
  0x59   : > { %s396_s13 = sshll.u32 %s3967_s22, 4  ;;  %s409_s24 = sshll.u32 %s3968_s23, 4  ;;  %s397_s13 = int_to_ptr.vmem [resolvable:$true] %s396_s13  ;;  %s410_s24 = int_to_ptr.vmem [resolvable:$true] %s409_s24 }
  0x5a   : > { %s3826_s14 = scalar_lea.hbm %s5782_s7, 256 }
  0x5b   : > { %p3827_p1 = scmp.ne.s32.totalorder %s5782_s7, %s3826_s14  ;;  %p3833_p12 = scmp.lt.u32.totalorder %s3826_s14, %s5782_s7 }
  0x5d   : > { %p3829_p3 = pnand %p3827_p1, %p4097_p7 }
  0x5f   : > { %p3830_p11 = pneg %p3829_p3 }
  0x61   : > { %p3835_p13 = pnand %p3833_p12, %p3830_p11 }
  0x63   : > { %3838 = shalt.err (!%p3835_p13)
}
  0x64   : > { %s3839_s21 = scalar_lea.vmem %s397_s13, 256  ;;  %p3847_p6 = scmp.lt.s32.totalorder %s397_s13, %s397_s13 }
  0x65   : > { %p3840_p0 = scmp.ne.s32.totalorder %s397_s13, %s3839_s21  ;;  %p3848_p8 = scmp.lt.s32.totalorder %s3839_s21, %s3839_s21 }
  0x67   : > { %p3842_p2 = pnand %p3840_p0, %p4097_p7  ;;  %p3849_p9 = por %p3848_p8, %p3847_p6 }
  0x69   : > { %p3843_p4 = pneg %p3842_p2 }
  0x6b   : > { %p3850_p10 = pnand %p3849_p9, %p3843_p4 }
  0x6d   : > { %3853 = shalt.err (!%p3850_p10)
}
  0x6e   : > { %s5828_s12 = smov 64   ;;  %s3854_s20 = scalar_lea.hbm %s5783_s8, 256 }
  0x6f   : > { %3572 = dma.hbm_to_vmem [thread:$0]  (!%p4081_p5), %s5782_s7, 256, %s397_s13, [#allocation8], %s5828_s12, %s5828_s12, %s3966_s9  }
  0x70   : > { %p3855_p1 = scmp.ne.s32.totalorder %s5783_s8, %s3854_s20  ;;  %p3861_p12 = scmp.lt.u32.totalorder %s3854_s20, %s5783_s8 }
  0x72   : > { %p3857_p3 = pnand %p3855_p1, %p4097_p7 }
  0x74   : > { %p3858_p11 = pneg %p3857_p3 }
  0x76   : > { %p3863_p13 = pnand %p3861_p12, %p3858_p11 }
  0x78   : > { %3866 = shalt.err (!%p3863_p13)
}
  0x79   : > { %s3867_s21 = scalar_lea.vmem %s410_s24, 256  ;;  %p3875_p6 = scmp.lt.s32.totalorder %s410_s24, %s410_s24 }
  0x7a   : > { %p3868_p0 = scmp.ne.s32.totalorder %s410_s24, %s3867_s21  ;;  %p3876_p8 = scmp.lt.s32.totalorder %s3867_s21, %s3867_s21 }
  0x7c   : > { %p3870_p2 = pnand %p3868_p0, %p4097_p7  ;;  %p3877_p9 = por %p3876_p8, %p3875_p6 }
  0x7e   : > { %p3871_p4 = pneg %p3870_p2 }
  0x80   : > { %p3878_p10 = pnand %p3877_p9, %p3871_p4 }
  0x82   : > { %3881 = shalt.err (!%p3878_p10)
}
  0x83   : > { %3575 = dma.hbm_to_vmem [thread:$0]  (!%p4081_p5), %s5783_s8, 256, %s410_s24, [#allocation11], %s5828_s12, %s5828_s12, %s3966_s9  }
  0x84   : > { %s4206_s19 = sadd.s32 1, %s3958_s28   ;;  %s36_s22 = sadd.s32 1, %s3954_s27 }
  0x85   : > { %s33_s17 = ssub.s32 %s3958_s28, %s4206_s19  ;;  %p43_p1 = scmp.ne.s32.totalorder %s3954_s27, %s3950_s26 }
  0x86   : > { %p34_p7 = scmp.eq.s32.totalorder %s33_s17, 0  ;;  %p44_p3 = scmp.eq.s32.totalorder %s3958_s28, 0 }
  0x87   : > { %p49_p11 = scmp.ne.s32.totalorder %s3950_s26, %s3946_s25  ;;  %p5829_p13 = scmp.ne.s32.totalorder %s5824_s15, 0 }
  0x88   : > { %s4217_s23 = scalar_select %p34_p7, %s3954_s27, %s36_s22  }
  0x89   : > { %p45_p12 = por %p44_p3, %p43_p1  ;;  %p4221_p0 = por %p5829_p13, %p49_p11 }
  0x8a   : > { %p3585_p2 = scmp.lt.s32.totalorder %s3958_s28, 2  ;;  %s435_s20 = sand.u32 1, %s3954_s27  }
  0x8b   : > { %s3126_s24 = sshll.u32 %s435_s20, 7  ;;  %s3203_s14 = sshll.u32 %s3958_s28, 11 }
  0x8c   : > { %s4231_s11 = scalar_lea.hbm %s5775_s0, %s3203_s14  ;;  %s439_s25 = scalar_lea.vmem [#allocation2], %s3126_s24 }
  0x8d   : > { %s447_s21 = sshll.u32 %s439_s25, 4  ;;  %p4235_p5 = pnand %p3585_p2, %p45_p12  ;;  %s4233_s21 = int_to_ptr.vmem [resolvable:$true] %s447_s21 }
  0x8e   : > { %s4239_s10 = scalar_lea.sflag [#allocation3], %s435_s20  ;;  %s3882_s17 = scalar_lea.hbm %s4231_s11, 2048 }
  0x8f   : > { %p3883_p4 = scmp.ne.s32.totalorder %s4231_s11, %s3882_s17  ;;  %p3884_p6 = pneg %p4235_p5 }
  0x90   : > { %s3887_s14 = scalar_lea.hbm %s5775_s0, 4096  ;;  %p3888_p10 = scmp.lt.u32.totalorder %s4231_s11, %s5775_s0 }
  0x91   : > { %p3885_p8 = pnand %p3884_p6, %p3883_p4  ;;  %p3889_p7 = scmp.lt.u32.totalorder %s3887_s14, %s3882_s17 }
  0x92   : > { %p3891_p3 = scmp.lt.u32.totalorder %s3882_s17, %s4231_s11 }
  0x93   : > { %p3886_p9 = pneg %p3885_p8  ;;  %p3890_p1 = por %p3889_p7, %p3888_p10 }
  0x95   : > { %p3892_p11 = por %p3891_p3, %p3890_p1 }
  0x97   : > { %p3893_p12 = pnand %p3892_p11, %p3886_p9 }
  0x99   : > { %3896 = shalt.err (!%p3893_p12)
}
  0x9a   : > { %s3897_s20 = scalar_lea.vmem %s4233_s21, 2048  ;;  %s3969_s25 = smov [#allocation2]  }
  0x9b   : > { %p3898_p13 = scmp.ne.s32.totalorder %s4233_s21, %s3897_s20  ;;  %s3902_s22 = sshll.u32 %s3969_s25, 4  ;;  %s3903_s22 = int_to_ptr.vmem [resolvable:$false] %s3902_s22 }
  0x9c   : > { %s3904_s24 = scalar_lea.vmem %s3903_s22, 4096  ;;  %p3905_p8 = scmp.lt.s32.totalorder %s4233_s21, %s3903_s22 }
  0x9d   : > { %p3900_p2 = pnand %p3898_p13, %p3884_p6  ;;  %p3906_p10 = scmp.lt.s32.totalorder %s3904_s24, %s3897_s20 }
  0x9f   : > { %p3901_p4 = pneg %p3900_p2  ;;  %p3907_p7 = por %p3906_p10, %p3905_p8 }
  0xa1   : > { %p3908_p1 = pnand %p3907_p7, %p3901_p4 }
  0xa3   : > { %3911 = shalt.err (!%p3908_p1)
}
  0xa4   : > { %3579 = dma.hbm_to_vmem [thread:$0]  (!%p4235_p5), %s4231_s11, 2048, %s4233_s21, %s4239_s10, %s5828_s12, %s5828_s12, %s3966_s9  }
  0xa5   : > { %p5832_p6 = scmp.ne.s32.totalorder %s5825_s16, 0 }
  0xa7   : > { %459 = sbr.rel (%p5832_p6) target bundleno = 3265 (0xcc1), region = 72 }
  0xae   : > { %s461_s17 = sand.u32 1, %s3950_s26  }
  0xaf   : > { %s3131_s14 = sshll.u32 %s461_s17, 7  ;;  %s462_s30 = scalar_lea.sflag [#allocation3], %s461_s17 }
  0xb0   : > { %s4273_s18 = scalar_lea.vmem [#allocation2], %s3131_s14 }
  0xb1   : > { %3929 = dma.done.wait (%p4221_p0), %s462_s30, 2048  }
  0xb2   : > { %3931 = vsyncadd (%p4221_p0), %s462_s30, 4294965248  ;;  %p5833_p9 = scmp.ne.s32.totalorder %s5824_s15, 0 }
  0xb4   : > { %3933 = dma.done.wait (%p5833_p9), [#allocation5], 272  }
  0xb5   : > { %3935 = vsyncadd (%p5833_p9), [#allocation5], 4294967024 }
  0xb6   : > { %3937 = dma.done.wait (%p5833_p9), [#allocation8], 384  }
  0xb7   : > { %3939 = vsyncadd (%p5833_p9), [#allocation8], 4294966912 }
  0xb8   : > { %3941 = dma.done.wait (%p5833_p9), [#allocation11], 256  }
  0xb9   : > { %3943 = vsyncadd (%p5833_p9), [#allocation11], 4294967040  ;;  %v602_v0 = vlaneseq  ;;  %v3205_v6 = vld [vmem:[%s4273_s18] sm:$0xff]   ;;  %v5796_v8 = vmov 0.0   ;;  %v3141_v21 = vld [vmem:[#allocation4 + $0x8] ss:$0 sm:$0xff] }
  0xba   : > { %v600_v7 = vld [vmem:[#allocation4] sm:$0xff]  ;;  %v4293_v13 = vunpack.c.l.bf16 %v3205_v6  ;;  %v4295_v14 = vunpack.c.h.bf16 %v3205_v6  ;;  %v3268_v30 = vld [vmem:[%s4273_s18 + $0x8] sm:$0xff]   ;;  %vm1315_vm2 = vcmask 261120   ;;  %vm3971_vm3 = vmmov 0   ;;  %s5882_s24 = sld [smem:[#allocation37_spill]]  ;;  %s5883_s15 = sld [smem:[#allocation38_spill]] }
  0xbb   : > { %v603_v1 = vshrl.u32 %v602_v0, 7  ;;  %v4326_v40 = vunpack.c.l.bf16 %v3268_v30  ;;  %v4328_v41 = vunpack.c.h.bf16 %v3268_v30  ;;  %vm2324_vm4 = vcmask 523264   ;;  %s5884_s16 = sadd.s32 4294967295, %s3958_s28   ;;  %s5885_s11 = sld [smem:[#allocation39_spill]] }
  0xbc   : > { %v604_v22 = vrot.slane %v4293_v13, 7  ;;  %v605_v23 = vrot.slane %v4295_v14, 7  ;;  %v1006_v33 = vrot.slane %v4293_v13, 1  ;;  %v1007_v34 = vrot.slane %v4295_v14, 1  ;;  %s3137_s9 = sshll.u32 %s5884_s16, 2  ;;  %s5886_s10 = sld [smem:[#allocation40_spill]] }
  0xbd   : > { %vm636_vm0 = vcmp.ge.s32.totalorder %v603_v1, 1  ;;  %v641_v2 = vsub.s32 0, %v603_v1  ;;  %v675_v3 = vsub.s32 3, %v603_v1  ;;  %v744_v4 = vsub.s32 6, %v603_v1  ;;  %p530_p0 = scmp.lt.s32.totalorder %s3137_s9, 7  ;;  %s5887_s22 = sld [smem:[#allocation41_spill]] }
  0xbe   : > { %v810_v5 = vsub.s32 1, %v603_v1  ;;  %vm1038_vm1 = vcmp.le.s32.totalorder %v603_v1, 6  ;;  %v3139_v9 = vsel %vm636_vm0, 1.0, %v5796_v8  ;;  %v875_v10 = vsub.s32 4, %v603_v1 }
  0xbf   : > { %v943_v11 = vsub.s32 7, %v603_v1  ;;  %v1043_v12 = vsub.s32 2, %v603_v1  ;;  %v642_v15 = vrot.slane %v600_v7, %v641_v2  ;;  %v676_v16 = vrot.slane %v600_v7, %v675_v3  ;;  %s5893_s9 = smov (!%p530_p0, %s3137_s9), 7 }
  0xc0   : > { %v745_v17 = vrot.slane %v600_v7, %v744_v4  ;;  %v4297_v18 = vrot.slane %v600_v7, %v810_v5  ;;  %v3140_v19 = vsel %vm1038_vm1, 1.0, %v5796_v8  ;;  %v1109_v20 = vsub.s32 5, %v603_v1  ;;  %v3269_v1 = vld [vmem:[%s4273_s18 + $0x10] sm:$0xff]   ;;  %s3138_s20 = sshll.u32 %s5893_s9, 2 }
  0xc1   : > { %v4302_v24 = vmul.f32 %v3139_v9, %v642_v15  ;;  %v4304_v25 = vmul.f32 %v3139_v9, %v676_v16  ;;  %v4311_v28 = vrot.slane %v600_v7, %v875_v10  ;;  %v4313_v29 = vrot.slane %v600_v7, %v943_v11 }
  0xc2   : > { %v4306_v26 = vmul.f32 %v3139_v9, %v745_v17  ;;  %v4309_v27 = vmul.f32 0.0, %v4297_v18  ;;  %v1044_v36 = vrot.slane %v600_v7, %v1043_v12  ;;  %v1110_v37 = vrot.slane %v600_v7, %v1109_v20 }
  0xc3   : > { %v4317_v31 = vmul.f32 0.0, %v4302_v24  ;;  %v678_v32 = vmul.f32 %v4304_v25, %v604_v22  ;;  %v4323_v38 = vmul.f32 %v3141_v21, %v3140_v19  ;;  %v877_v42 = vmul.f32 %v4293_v13, %v4311_v28  ;;  %s533_s17 = scalar_lea.vmem %s5887_s22, %s3138_s20 }
  0xc4   : > { %v747_v35 = vmul.f32 %v4306_v26, %v605_v23  ;;  %v4332_v43 = vmul.f32 %v3140_v19, %v1044_v36  ;;  %v646_v44 = vmul.f32 %v4302_v24, %v605_v23  ;;  %v4335_v46 = vmul.f32 %v3140_v19, %v1110_v37 }
  0xc5   : > { %v710_v39 = vadd.f32 %v678_v32, %v4317_v31  ;;  %v606_v47 = vrot.slane %v4326_v40, 7  ;;  %v607_v48 = vrot.slane %v4328_v41, 7  ;;  %v945_v49 = vmul.f32 %v4295_v14, %v4313_v29 }
  0xc6   : > { %v1181_v50 = vmul.f32 %v4323_v38, %v1007_v34  ;;  %v814_v51 = vmul.f32 %v4295_v14, %v4297_v18  ;;  %v1008_v52 = vrot.slane %v4326_v40, 1  ;;  %v4349_v56 = vrot.slane %v4328_v41, 1 }
  0xc7   : > { %v776_v45 = vadd.f32 %v747_v35, %v710_v39  ;;  %v680_v54 = vmul.f32 %v4304_v25, %v606_v47  ;;  %v749_v55 = vmul.f32 %v4306_v26, %v607_v48  ;;  %v4352_v57 = vmul.f32 0.0, %v4332_v43 }
  0xc8   : > { %v879_v58 = vmul.f32 %v4326_v40, %v4311_v28  ;;  %v645_v59 = vmul.f32 %v4302_v24, %v604_v22  ;;  %v679_v60 = vmul.f32 %v4304_v25, %v605_v23  ;;  %v1112_v62 = vmul.f32 %v4335_v46, %v1006_v33 }
  0xc9   : > { %v841_v53 = vadd.f32 %v4309_v27, %v776_v45  ;;  %v712_v63 = vadd.f32 %v680_v54, %v646_v44  ;;  %v748_v0 = vmul.f32 %v4306_v26, %v606_v47  ;;  %v947_v2 = vmul.f32 %v4328_v41, %v4313_v29 }
  0xca   : > { %v1048_v3 = vmul.f32 %v4332_v43, %v1007_v34  ;;  %v711_v4 = vadd.f32 %v679_v60, %v645_v59  ;;  %v813_v5 = vmul.f32 %v4293_v13, %v4297_v18  ;;  %v1114_v9 = vmul.f32 %v4335_v46, %v1008_v52 }
  0xcb   : > { %v909_v61 = vadd.f32 %v877_v42, %v841_v53  ;;  %v778_v7 = vadd.f32 %v749_v55, %v712_v63  ;;  %v1183_v10 = vmul.f32 %v4323_v38, %v4349_v56  ;;  %v878_v12 = vmul.f32 %v4295_v14, %v4311_v28  ;;  %v4394_v53 = vld [vmem:[%s5777_s2] ss:$0 sm:$0xff] }
  0xcc   : > { %v777_v11 = vadd.f32 %v748_v0, %v711_v4  ;;  %v4371_v15 = vunpack.c.l.bf16 %v3269_v1  ;;  %v647_v16 = vmul.f32 %v4302_v24, %v606_v47  ;;  %v946_v20 = vmul.f32 %v4326_v40, %v4313_v29 }
  0xcd   : > { %v974_v6 = vadd.f32 %v945_v49, %v909_v61  ;;  %v843_v19 = vadd.f32 %v814_v51, %v778_v7  ;;  %v681_v21 = vmul.f32 %v4304_v25, %v607_v48  ;;  %v1047_v23 = vmul.f32 %v4332_v43, %v1006_v33 }
  0xce   : > { %v842_v22 = vadd.f32 %v813_v5, %v777_v11  ;;  %v1113_v30 = vmul.f32 %v4335_v46, %v1007_v34  ;;  %v608_v32 = vrot.slane %v4371_v15, 7  ;;  %v1182_v37 = vmul.f32 %v4323_v38, %v1008_v52 }
  0xcf   : > { %v1075_v17 = vadd.f32 %v4352_v57, %v974_v6  ;;  %v911_v36 = vadd.f32 %v879_v58, %v843_v19  ;;  %v713_v39 = vadd.f32 %v681_v21, %v647_v16  ;;  %v815_v45 = vmul.f32 %v4326_v40, %v4297_v18 }
  0xd0   : > { %v910_v42 = vadd.f32 %v878_v12, %v842_v22  ;;  %v750_v44 = vmul.f32 %v4306_v26, %v608_v32  ;;  %v880_v47 = vmul.f32 %v4328_v41, %v4311_v28  ;;  %v948_v34 = vmul.f32 %v4371_v15, %v4313_v29 }
  0xd1   : > { %v1144_v35 = vadd.f32 %v1112_v62, %v1075_v17  ;;  %v976_v33 = vadd.f32 %v947_v2, %v911_v36  ;;  %v4389_v51 = vunpack.c.h.bf16 %v3269_v1  ;;  %v648_v58 = vmul.f32 %v4302_v24, %v607_v48 }
  0xd2   : > { %v975_v54 = vadd.f32 %v946_v20, %v910_v42  ;;  %v779_v55 = vadd.f32 %v750_v44, %v713_v39  ;;  %v682_v59 = vmul.f32 %v4304_v25, %v608_v32  ;;  %v1010_v61 = vrot.slane %v4371_v15, 1 }
  0xd3   : > { %v1210_v49 = vadd.f32 %v1181_v50, %v1144_v35  ;;  %v1077_v60 = vadd.f32 %v1048_v3, %v976_v33  ;;  %v609_v62 = vrot.slane %v4389_v51, 7  ;;  %v1049_v1 = vmul.f32 %v4332_v43, %v1008_v52 }
  0xd4   : > { %v1076_v63 = vadd.f32 %v1047_v23, %v975_v54  ;;  %v844_v0 = vadd.f32 %v815_v45, %v779_v55  ;;  %v714_v2 = vadd.f32 %v682_v59, %v648_v58  ;;  %v816_v6 = vmul.f32 %v4328_v41, %v4297_v18 }
  0xd5   : > { %v1242_v50 = vadd.f32 %v4293_v13, %v1210_v49  ;;  %v1146_v5 = vadd.f32 %v1114_v9, %v1077_v60  ;;  %v751_v48 = vmul.f32 %v4306_v26, %v609_v62  ;;  %v3270_v13 = vld [vmem:[%s4273_s18 + $0x18] sm:$0xff]   ;;  %v1115_v11 = vmul.f32 %v4335_v46, %v4349_v56 }
  0xd6   : > { %v1145_v3 = vadd.f32 %v1113_v30, %v1076_v63  ;;  %v912_v7 = vadd.f32 %v880_v47, %v844_v0  ;;  %v881_v12 = vmul.f32 %v4371_v15, %v4311_v28  ;;  %v949_v9 = vmul.f32 %v4389_v51, %v4313_v29 }
  0xd7   : > { %v4403_v4 = vadd.f32 %v4394_v53, %v1242_v50  ;;  %v1212_v16 = vadd.f32 %v1183_v10, %v1146_v5  ;;  %v780_v17 = vadd.f32 %v751_v48, %v714_v2  ;;  %v1011_v21 = vrot.slane %v4389_v51, 1 }
  0xd8   : > { %v1211_v19 = vadd.f32 %v1182_v37, %v1145_v3  ;;  %v977_v20 = vadd.f32 %v948_v34, %v912_v7  ;;  %v4418_v22 = vunpack.c.l.bf16 %v3270_v13  ;;  %v649_v35 = vmul.f32 %v4302_v24, %v608_v32 }
  0xd9   : > { %v1316_v52 = vsel %vm1315_vm2, %v4403_v4, 0.0  ;;  %v1244_v23 = vadd.f32 %v4326_v40, %v1212_v16  ;;  %v845_v30 = vadd.f32 %v816_v6, %v780_v17  ;;  %v683_v36 = vmul.f32 %v4304_v25, %v609_v62 }
  0xda   : > { %1317 = vadd.xlane.f32.xlu0 %v1316_v52  ;;  %v1243_v10 = vadd.f32 %v4295_v14, %v1211_v19  ;;  %v1078_v39 = vadd.f32 %v1049_v1, %v977_v20  ;;  %v1184_v42 = vmul.f32 %v4323_v38, %v1010_v61  ;;  %v610_v44 = vrot.slane %v4418_v22, 7 }
  0xdb   : > { %v4427_v37 = vadd.f32 %v4394_v53, %v1244_v23  ;;  %v913_v45 = vadd.f32 %v881_v12, %v845_v30  ;;  %v1050_v47 = vmul.f32 %v4332_v43, %v4349_v56  ;;  %v715_v40 = vadd.f32 %v683_v36, %v649_v35 }
  0xdc   : > { %v4432_v49 = vadd.f32 %v4394_v53, %v1243_v10  ;;  %v1147_v32 = vadd.f32 %v1115_v11, %v1078_v39  ;;  %v752_v33 = vmul.f32 %v4306_v26, %v610_v44  ;;  %v817_v14 = vmul.f32 %v4371_v15, %v4297_v18 }
  0xdd   : > { %v1322_v34 = vsel %vm1315_vm2, %v4427_v37, 0.0  ;;  %v978_v54 = vadd.f32 %v949_v9, %v913_v45  ;;  %v1116_v55 = vmul.f32 %v4335_v46, %v1010_v61  ;;  %v1185_v58 = vmul.f32 %v4323_v38, %v1011_v21  ;;  %v3271_v45 = vld [vmem:[%s4273_s18 + $0x20] sm:$0xff]  }
  0xde   : > { %1323 = vadd.xlane.f32.xlu1 %v1322_v34  ;;  %v1319_v56 = vsel %vm1315_vm2, %v4432_v49, 0.0  ;;  %v1213_v59 = vadd.f32 %v1184_v42, %v1147_v32  ;;  %v781_v50 = vadd.f32 %v752_v33, %v715_v40  ;;  %v882_v60 = vmul.f32 %v4389_v51, %v4311_v28 }
  0xdf   : > { %1320 = vadd.xlane.f32.xlu0 %v1319_v56  ;;  %v1079_v63 = vadd.f32 %v1050_v47, %v978_v54  ;;  %v950_v0 = vmul.f32 %v4418_v22, %v4313_v29  ;;  %v4447_v1 = vunpack.c.h.bf16 %v3270_v13  ;;  %v650_v2 = vmul.f32 %v4302_v24, %v609_v62 }
  0xe0   : > { %v1245_v5 = vadd.f32 %v4328_v41, %v1213_v59  ;;  %v846_v48 = vadd.f32 %v817_v14, %v781_v50  ;;  %v1012_v6 = vrot.slane %v4418_v22, 1  ;;  %v684_v3 = vmul.f32 %v4304_v25, %v610_v44 }
  0xe1   : > { %v1148_v7 = vadd.f32 %v1116_v55, %v1079_v63  ;;  %v1051_v11 = vmul.f32 %v4332_v43, %v1010_v61  ;;  %v1117_v12 = vmul.f32 %v4335_v46, %v1011_v21  ;;  %v611_v52 = vrot.slane %v4447_v1, 7 }
  0xe2   : > { %v4457_v16 = vadd.f32 %v4394_v53, %v1245_v5  ;;  %v914_v13 = vadd.f32 %v882_v60, %v846_v48  ;;  %v1186_v62 = vmul.f32 %v4323_v38, %v1012_v6  ;;  %v716_v41 = vadd.f32 %v684_v3, %v650_v2  ;;  %v3272_v48 = vld [vmem:[%s4273_s18 + $0x28] sm:$0xff]  }
  0xe3   : > { %v1214_v17 = vadd.f32 %v1185_v58, %v1148_v7  ;;  %v753_v9 = vmul.f32 %v4306_v26, %v611_v52  ;;  %v818_v19 = vmul.f32 %v4389_v51, %v4297_v18  ;;  %v883_v61 = vmul.f32 %v4418_v22, %v4311_v28 }
  0xe4   : > { %v1325_v20 = vsel %vm1315_vm2, %v4457_v16, 0.0  ;;  %v979_v23 = vadd.f32 %v950_v0, %v914_v13  ;;  %v1013_v30 = vrot.slane %v4447_v1, 1  ;;  %v651_v35 = vmul.f32 %v4302_v24, %v610_v44 }
  0xe5   : > { %1326 = vadd.xlane.f32.xlu1 %v1325_v20  ;;  %v1246_v36 = vadd.f32 %v4371_v15, %v1214_v17  ;;  %v782_v10 = vadd.f32 %v753_v9, %v716_v41  ;;  %v685_v39 = vmul.f32 %v4304_v25, %v611_v52  ;;  %v4472_v42 = vmul.f32 0.0, %v4306_v26 }
  0xe6   : > { %v1080_v47 = vadd.f32 %v1051_v11, %v979_v23  ;;  %v951_v40 = vmul.f32 %v4447_v1, %v4313_v29  ;;  %v1052_v32 = vmul.f32 %v4332_v43, %v1011_v21  ;;  %v1118_v33 = vmul.f32 %v4335_v46, %v1012_v6 }
  0xe7   : > { %v4480_v44 = vadd.f32 %v4394_v53, %v1246_v36  ;;  %v847_v14 = vadd.f32 %v818_v19, %v782_v10  ;;  %v717_v15 = vadd.f32 %v685_v39, %v651_v35  ;;  %v819_v34 = vmul.f32 %v4418_v22, %v4297_v18 }
  0xe8   : > { %v1149_v54 = vadd.f32 %v1117_v12, %v1080_v47  ;;  %v1187_v55 = vmul.f32 %v4323_v38, %v1013_v30  ;;  %v884_v58 = vmul.f32 %v4447_v1, %v4311_v28  ;;  %v4487_v56 = vunpack.c.l.bf16 %v3271_v45 }
  0xe9   : > { %v1328_v21 = vsel %vm1315_vm2, %v4480_v44, 0.0  ;;  %v915_v59 = vadd.f32 %v883_v61, %v847_v14  ;;  %v783_v50 = vadd.f32 %v4472_v42, %v717_v15  ;;  %v4492_v60 = vunpack.c.h.bf16 %v3271_v45 }
  0xea   : > { %1329 = vadd.xlane.f32.xlu0 %v1328_v21  ;;  %v1215_v63 = vadd.f32 %v1186_v62, %v1149_v54  ;;  %v4495_v0 = vmul.f32 0.0, %v4313_v29  ;;  %v1053_v2 = vmul.f32 %v4332_v43, %v1012_v6  ;;  %v612_v5 = vrot.slane %v4487_v56, 7 }
  0xeb   : > { %v980_v3 = vadd.f32 %v951_v40, %v915_v59  ;;  %v848_v7 = vadd.f32 %v819_v34, %v783_v50  ;;  %v1119_v11 = vmul.f32 %v4335_v46, %v1013_v30  ;;  %v613_v12 = vrot.slane %v4492_v60, 7 }
  0xec   : > { %5834 = vst [vmem:[#allocation16_spill] sm:$0xff] %v4495_v0  ;;  %v1247_v52 = vadd.f32 %v4389_v51, %v1215_v63  ;;  %v4504_v13 = vmul.f32 0.0, %v4323_v38  ;;  %v686_v62 = vmul.f32 %v4304_v25, %v612_v5  ;;  %v1014_v41 = vrot.slane %v4487_v56, 1 }
  0xed   : > { %v1081_v17 = vadd.f32 %v1052_v32, %v980_v3  ;;  %v916_v6 = vadd.f32 %v884_v58, %v848_v7  ;;  %v755_v9 = vmul.f32 %v4306_v26, %v613_v12  ;;  %v4509_v19 = vunpack.c.l.bf16 %v3272_v48 }
  0xee   : > { %5835 = vst [vmem:[#allocation17_spill] sm:$0xff] %v4504_v13  ;;  %v4512_v61 = vadd.f32 %v4394_v53, %v1247_v52  ;;  %v718_v20 = vadd.f32 %v686_v62, %v4317_v31  ;;  %v4516_v51 = vrot.slane %v4492_v60, 1  ;;  %v652_v23 = vmul.f32 %v4302_v24, %v612_v5 }
  0xef   : > { %v1150_v30 = vadd.f32 %v1118_v33, %v1081_v17  ;;  %v981_v35 = vadd.f32 %v4495_v0, %v916_v6  ;;  %v614_v36 = vrot.slane %v4509_v19, 7  ;;  %v687_v10 = vmul.f32 %v4304_v25, %v613_v12 }
  0xf0   : > { %v1331_v39 = vsel %vm1315_vm2, %v4512_v61, 0.0  ;;  %v784_v45 = vadd.f32 %v755_v9, %v718_v20  ;;  %v885_v47 = vmul.f32 %v4487_v56, %v4311_v28  ;;  %v820_v40 = vmul.f32 %v4487_v56, %v4297_v18 }
  0xf1   : > { %1332 = vadd.xlane.f32.xlu1 %v1331_v39  ;;  %v1216_v32 = vadd.f32 %v1187_v55, %v1150_v30  ;;  %v1082_v14 = vadd.f32 %v1053_v2, %v981_v35  ;;  %v719_v33 = vadd.f32 %v687_v10, %v652_v23  ;;  %v756_v15 = vmul.f32 %v4306_v26, %v614_v36  ;;  %v3273_v35 = vld [vmem:[%s4273_s18 + $0x30] sm:$0xff]  }
  0xf2   : > { %v849_v34 = vadd.f32 %v4309_v27, %v784_v45  ;;  %v953_v54 = vmul.f32 %v4492_v60, %v4313_v29  ;;  %v1120_v58 = vmul.f32 %v4335_v46, %v1014_v41  ;;  %v1189_v21 = vmul.f32 %v4323_v38, %v4516_v51 }
  0xf3   : > { %v1248_v59 = vadd.f32 %v4418_v22, %v1216_v32  ;;  %v1151_v50 = vadd.f32 %v1119_v11, %v1082_v14  ;;  %v785_v63 = vadd.f32 %v756_v15, %v719_v33  ;;  %v886_v55 = vmul.f32 %v4492_v60, %v4311_v28 }
  0xf4   : > { %v917_v2 = vadd.f32 %v885_v47, %v849_v34  ;;  %v954_v5 = vmul.f32 %v4509_v19, %v4313_v29  ;;  %v4540_v3 = vunpack.c.h.bf16 %v3272_v48  ;;  %v653_v7 = vmul.f32 %v4302_v24, %v613_v12 }
  0xf5   : > { %v4544_v52 = vadd.f32 %v4394_v53, %v1248_v59  ;;  %v1217_v62 = vadd.f32 %v4504_v13, %v1151_v50  ;;  %v850_v22 = vadd.f32 %v820_v40, %v785_v63  ;;  %v688_v11 = vmul.f32 %v4304_v25, %v614_v36 }
  0xf6   : > { %v982_v17 = vadd.f32 %v953_v54, %v917_v2  ;;  %v1016_v6 = vrot.slane %v4509_v19, 1  ;;  %v1054_v9 = vmul.f32 %v4332_v43, %v1014_v41  ;;  %v615_v20 = vrot.slane %v4540_v3, 7 }
  0xf7   : > { %v1334_v48 = vsel %vm1315_vm2, %v4544_v52, 0.0  ;;  %v1249_v12 = vadd.f32 %v4447_v1, %v1217_v62  ;;  %v918_v23 = vadd.f32 %v886_v55, %v850_v22  ;;  %v720_v30 = vadd.f32 %v688_v11, %v653_v7 }
  0xf8   : > { %1335 = vadd.xlane.f32.xlu0 %v1334_v48  ;;  %v1083_v10 = vadd.f32 %v4352_v57, %v982_v17  ;;  %v1121_v39 = vmul.f32 %v4335_v46, %v4516_v51  ;;  %v757_v45 = vmul.f32 %v4306_v26, %v615_v20  ;;  %v821_v41 = vmul.f32 %v4492_v60, %v4297_v18 }
  0xf9   : > { %v4562_v47 = vadd.f32 %v4394_v53, %v1249_v12  ;;  %v983_v40 = vadd.f32 %v954_v5, %v918_v23  ;;  %v1190_v1 = vmul.f32 %v4323_v38, %v1016_v6  ;;  %v887_v32 = vmul.f32 %v4509_v19, %v4311_v28 }
  0xfa   : > { %v1152_v14 = vadd.f32 %v1120_v58, %v1083_v10  ;;  %v786_v33 = vadd.f32 %v757_v45, %v720_v30  ;;  %v1017_v15 = vrot.slane %v4540_v3, 1  ;;  %v4568_v34 = vunpack.c.l.bf16 %v3273_v35 }
  0xfb   : > { %v1337_v54 = vsel %vm1315_vm2, %v4562_v47, 0.0  ;;  %v1084_v59 = vadd.f32 %v1054_v9, %v983_v40  ;;  %v654_v50 = vmul.f32 %v4302_v24, %v614_v36  ;;  %v689_v63 = vmul.f32 %v4304_v25, %v615_v20 }
  0xfc   : > { %1338 = vadd.xlane.f32.xlu1 %v1337_v54  ;;  %v1218_v55 = vadd.f32 %v1189_v21, %v1152_v14  ;;  %v851_v2 = vadd.f32 %v821_v41, %v786_v33  ;;  %v955_v5 = vmul.f32 %v4540_v3, %v4313_v29  ;;  %v616_v58 = vrot.slane %v4568_v34, 7 }
  0xfd   : > { %v1153_v7 = vadd.f32 %v1121_v39, %v1084_v59  ;;  %v1055_v62 = vmul.f32 %v4332_v43, %v4516_v51  ;;  %v721_v22 = vadd.f32 %v689_v63, %v654_v50  ;;  %v822_v9 = vmul.f32 %v4509_v19, %v4297_v18  ;;  %v3274_v59 = vld [vmem:[%s4273_s18 + $0x38] sm:$0xff]  }
  0xfe   : > { %v1250_v11 = vadd.f32 %v4487_v56, %v1218_v55  ;;  %v919_v17 = vadd.f32 %v887_v32, %v851_v2  ;;  %v758_v36 = vmul.f32 %v4306_v26, %v616_v58  ;;  %v1122_v48 = vmul.f32 %v4335_v46, %v1016_v6 }
  0xff   : > { %v1219_v21 = vadd.f32 %v1190_v1, %v1153_v7  ;;  %v1191_v12 = vmul.f32 %v4323_v38, %v1017_v15  ;;  %v4585_v23 = vunpack.c.h.bf16 %v3273_v35  ;;  %v888_v56 = vmul.f32 %v4540_v3, %v4311_v28 }
 0x100   : > { %v4588_v30 = vadd.f32 %v4394_v53, %v1250_v11  ;;  %v984_v51 = vadd.f32 %v955_v5, %v919_v17  ;;  %v787_v10 = vadd.f32 %v758_v36, %v721_v22  ;;  %v655_v41 = vmul.f32 %v4302_v24, %v615_v20 }
 0x101   : > { %v1251_v39 = vadd.f32 %v4492_v60, %v1219_v21  ;;  %v617_v45 = vrot.slane %v4585_v23, 7  ;;  %v690_v40 = vmul.f32 %v4304_v25, %v616_v58  ;;  %v956_v14 = vmul.f32 %v4568_v34, %v4313_v29 }
 0x102   : > { %v1340_v35 = vsel %vm1315_vm2, %v4588_v30, 0.0  ;;  %v1085_v1 = vadd.f32 %v1055_v62, %v984_v51  ;;  %v852_v32 = vadd.f32 %v822_v9, %v787_v10  ;;  %v823_v20 = vmul.f32 %v4540_v3, %v4297_v18 }
 0x103   : > { %1341 = vadd.xlane.f32.xlu0 %v1340_v35  ;;  %v4601_v33 = vadd.f32 %v4394_v53, %v1251_v39  ;;  %v722_v54 = vadd.f32 %v690_v40, %v655_v41  ;;  %v759_v60 = vmul.f32 %v4306_v26, %v617_v45  ;;  %v1056_v55 = vmul.f32 %v4332_v43, %v1016_v6 }
 0x104   : > { %v1154_v50 = vadd.f32 %v1122_v48, %v1085_v1  ;;  %v920_v63 = vadd.f32 %v888_v56, %v852_v32  ;;  %v1018_v5 = vrot.slane %v4568_v34, 1  ;;  %v889_v62 = vmul.f32 %v4568_v34, %v4311_v28 }
 0x105   : > { %v1343_v2 = vsel %vm1315_vm2, %v4601_v33, 0.0  ;;  %v788_v7 = vadd.f32 %v759_v60, %v722_v54  ;;  %v1123_v17 = vmul.f32 %v4335_v46, %v1017_v15  ;;  %v4614_v36 = vunpack.c.l.bf16 %v3274_v59 }
 0x106   : > { %1344 = vadd.xlane.f32.xlu1 %v1343_v2  ;;  %v1220_v22 = vadd.f32 %v1191_v12, %v1154_v50  ;;  %v985_v11 = vadd.f32 %v956_v14, %v920_v63  ;;  %v957_v6 = vmul.f32 %v4585_v23, %v4313_v29  ;;  %v656_v21 = vmul.f32 %v4302_v24, %v616_v58 }
 0x107   : > { %v853_v9 = vadd.f32 %v823_v20, %v788_v7  ;;  %v691_v48 = vmul.f32 %v4304_v25, %v617_v45  ;;  %v1192_v56 = vmul.f32 %v4323_v38, %v1018_v5  ;;  %v618_v12 = vrot.slane %v4614_v36, 7 }
 0x108   : > { %v1252_v51 = vadd.f32 %v4509_v19, %v1220_v22  ;;  %v1086_v10 = vadd.f32 %v1056_v55, %v985_v11  ;;  %v1019_v41 = vrot.slane %v4585_v23, 1  ;;  %v1057_v40 = vmul.f32 %v4332_v43, %v1017_v15 }
 0x109   : > { %v921_v39 = vadd.f32 %v889_v62, %v853_v9  ;;  %v723_v35 = vadd.f32 %v691_v48, %v656_v21  ;;  %v760_v58 = vmul.f32 %v4306_v26, %v618_v12  ;;  %v824_v19 = vmul.f32 %v4568_v34, %v4297_v18 }
 0x10a   : > { %v4626_v1 = vadd.f32 %v4394_v53, %v1252_v51  ;;  %v1155_v32 = vadd.f32 %v1123_v17, %v1086_v10  ;;  %v1124_v54 = vmul.f32 %v4335_v46, %v1018_v5  ;;  %v890_v60 = vmul.f32 %v4585_v23, %v4311_v28 }
 0x10b   : > { %v986_v14 = vadd.f32 %v957_v6, %v921_v39  ;;  %v4634_v20 = vunpack.c.h.bf16 %v3274_v59  ;;  %v789_v63 = vadd.f32 %v760_v58, %v723_v35  ;;  %v657_v55 = vmul.f32 %v4302_v24, %v617_v45 }
 0x10c   : > { %v1346_v15 = vsel %vm1315_vm2, %v4626_v1, 0.0  ;;  %v1221_v50 = vadd.f32 %v1192_v56, %v1155_v32  ;;  %v1193_v7 = vmul.f32 %v4323_v38, %v1019_v41  ;;  %v692_v22 = vmul.f32 %v4304_v25, %v618_v12 }
 0x10d   : > { %1347 = vadd.xlane.f32.xlu0 %v1346_v15  ;;  %v1087_v2 = vadd.f32 %v1057_v40, %v986_v14  ;;  %v619_v62 = vrot.slane %v4634_v20, 7  ;;  %v854_v17 = vadd.f32 %v824_v19, %v789_v63  ;;  %v958_v59 = vmul.f32 %v4614_v36, %v4313_v29 }
 0x10e   : > { %v1253_v11 = vadd.f32 %v4540_v3, %v1221_v50  ;;  %v724_v6 = vadd.f32 %v692_v22, %v657_v55  ;;  %v825_v45 = vmul.f32 %v4585_v23, %v4297_v18  ;;  %v1020_v10 = vrot.slane %v4614_v36, 1 }
 0x10f   : > { %v1156_v9 = vadd.f32 %v1124_v54, %v1087_v2  ;;  %v761_v21 = vmul.f32 %v4306_v26, %v619_v62  ;;  %v922_v51 = vadd.f32 %v890_v60, %v854_v17  ;;  %v1058_v56 = vmul.f32 %v4332_v43, %v1018_v5 }
 0x110   : > { %v4649_v48 = vadd.f32 %v4394_v53, %v1253_v11  ;;  %v891_v40 = vmul.f32 %v4614_v36, %v4311_v28  ;;  %v658_v35 = vmul.f32 %v4302_v24, %v618_v12  ;;  %v1125_v19 = vmul.f32 %v4335_v46, %v1019_v41 }
 0x111   : > { %v1222_v3 = vadd.f32 %v1193_v7, %v1156_v9  ;;  %v790_v39 = vadd.f32 %v761_v21, %v724_v6  ;;  %v987_v58 = vadd.f32 %v958_v59, %v922_v51  ;;  %v693_v14 = vmul.f32 %v4304_v25, %v619_v62 }
 0x112   : > { %v1349_v32 = vsel %vm1315_vm2, %v4649_v48, 0.0  ;;  %v959_v5 = vmul.f32 %v4634_v20, %v4313_v29  ;;  %v1194_v50 = vmul.f32 %v4323_v38, %v1020_v10  ;;  %v826_v12 = vmul.f32 %v4614_v36, %v4297_v18 }
 0x113   : > { %1350 = vadd.xlane.f32.xlu1 %v1349_v32  ;;  %v1254_v54 = vadd.f32 %v4568_v34, %v1222_v3  ;;  %v855_v60 = vadd.f32 %v825_v45, %v790_v39  ;;  %v1088_v15 = vadd.f32 %v1058_v56, %v987_v58  ;;  %v725_v63 = vadd.f32 %v693_v14, %v658_v35 }
 0x114   : > { %v1021_v7 = vrot.slane %v4634_v20, 1  ;;  %v1059_v62 = vmul.f32 %v4332_v43, %v1019_v41  ;;  %v892_v11 = vmul.f32 %v4634_v20, %v4311_v28  ;;  %v1126_v9 = vmul.f32 %v4335_v46, %v1020_v10 }
 0x115   : > { %v4667_v55 = vadd.f32 %v4394_v53, %v1254_v54  ;;  %v923_v2 = vadd.f32 %v891_v40, %v855_v60  ;;  %v1157_v34 = vadd.f32 %v1125_v19, %v1088_v15  ;;  %v791_v22 = vadd.f32 %v4472_v42, %v725_v63 }
 0x116   : > { %v1195_v51 = vmul.f32 %v4323_v38, %v1021_v7  ;;  %v1060_v3 = vmul.f32 %v4332_v43, %v1020_v10  ;;  %v1127_v32 = vmul.f32 %v4335_v46, %v1021_v7  ;;  %vm2328_vm5 = vcmask 519168  }
 0x117   : > { %v1352_v17 = vsel %vm1315_vm2, %v4667_v55, 0.0  ;;  %v988_v59 = vadd.f32 %v959_v5, %v923_v2  ;;  %v1223_v6 = vadd.f32 %v1194_v50, %v1157_v34  ;;  %v856_v21 = vadd.f32 %v826_v12, %v791_v22 }
 0x118   : > { %1353 = vadd.xlane.f32.xlu0 %v1352_v17  ;;  %vm2395_vm6 = vcmask 257024   ;;  %vm2858_vm7 = vcmask 1040384   ;;  %vm2860_vm8 = vcmask 1041408   ;;  %vm2862_vm9 = vcmask 1042432  }
 0x119   : > { %v1089_v45 = vadd.f32 %v1059_v62, %v988_v59  ;;  %v1255_v41 = vadd.f32 %v4585_v23, %v1223_v6  ;;  %v924_v56 = vadd.f32 %v892_v11, %v856_v21  ;;  %v3276_v62 = vld [vmem:[%s4273_s18 + $0x48] sm:$0xff]   ;;  %vm2864_vm10 = vcmask 1043456  }
 0x11a   : > { %vm2866_vm11 = vcmask 1044480   ;;  %vm2868_vm12 = vcmask 1045504   ;;  %vm2870_vm13 = vcmask 1046528   ;;  %vm2989_vm14 = vcmask 256000  }
 0x11b   : > { %v1158_v39 = vadd.f32 %v1126_v9, %v1089_v45  ;;  %v4681_v40 = vadd.f32 %v4394_v53, %v1255_v41  ;;  %v989_v35 = vadd.f32 %v4495_v0, %v924_v56  ;;  %v4714_v9 = vunpack.c.h.bf16 %v3276_v62 }
 0x11c   : > { %vm2992_vm15 = vcmask 259075   ;;  %vm2995_vm0 = vcmask 261126   ;;  %vm2997_vm1 = vcmask 253952  }
 0x11d   : > { %v1224_v58 = vadd.f32 %v1195_v51, %v1158_v39  ;;  %v1355_v19 = vsel %vm1315_vm2, %v4681_v40, 0.0  ;;  %v1090_v14 = vadd.f32 %v1060_v3, %v989_v35  ;;  %v623_v51 = vrot.slane %v4714_v9, 7 }
 0x11e   : > { %1356 = vadd.xlane.f32.xlu1 %v1355_v19 }
 0x11f   : > { %v1256_v23 = vadd.f32 %v4614_v36, %v1224_v58  ;;  %v1159_v54 = vadd.f32 %v1127_v32, %v1090_v14  ;;  %v3275_v36 = vld [vmem:[%s4273_s18 + $0x40] sm:$0xff]   ;;  %v3277_v14 = vld [vmem:[%s4273_s18 + $0x50] sm:$0xff]  }
 0x120   : > { %v4701_v12 = vunpack.c.l.bf16 %v3275_v36  ;;  %v4703_v2 = vunpack.c.h.bf16 %v3275_v36 }
 0x121   : > { %v4689_v10 = vadd.f32 %v4394_v53, %v1256_v23  ;;  %v1225_v60 = vadd.f32 %v4504_v13, %v1159_v54  ;;  %v764_v54 = vmul.f32 %v4306_v26, %v623_v51 }
 0x122   : > { %v620_v7 = vrot.slane %v4701_v12, 7  ;;  %v621_v34 = vrot.slane %v4703_v2, 7  ;;  %v893_v35 = vmul.f32 %v4701_v12, %v4311_v28 }
 0x123   : > { %5836 = vst [vmem:[#allocation18_spill] sm:$0xff] %v4689_v10  ;;  %v1358_v5 = vsel %vm1315_vm2, %v4689_v10, 0.0  ;;  %v1257_v15 = vadd.f32 %v4634_v20, %v1225_v60  ;;  %v4709_v20 = vunpack.c.l.bf16 %v3276_v62  ;;  %v827_v62 = vmul.f32 %v4701_v12, %v4297_v18 }
 0x124   : > { %1359 = vadd.xlane.f32.xlu0 %v1358_v5  ;;  %v694_v22 = vmul.f32 %v4304_v25, %v620_v7  ;;  %v762_v17 = vmul.f32 %v4306_v26, %v621_v34  ;;  %v659_v21 = vmul.f32 %v4302_v24, %v620_v7  ;;  %v695_v45 = vmul.f32 %v4304_v25, %v621_v34 }
 0x125   : > { %v4696_v50 = vadd.f32 %v4394_v53, %v1257_v15  ;;  %v622_v59 = vrot.slane %v4709_v20, 7  ;;  %v660_v41 = vmul.f32 %v4302_v24, %v621_v34  ;;  %v960_v15 = vmul.f32 %v4703_v2, %v4313_v29 }
 0x126   : > { %v726_v11 = vadd.f32 %v694_v22, %v4317_v31  ;;  %v727_v58 = vadd.f32 %v695_v45, %v659_v21  ;;  %v896_v10 = vmul.f32 %v4714_v9, %v4311_v28 }
 0x127   : > { %5837 = vst [vmem:[#allocation19_spill] sm:$0xff] %v4696_v50  ;;  %v1361_v63 = vsel %vm1315_vm2, %v4696_v50, 0.0  ;;  %v696_v56 = vmul.f32 %v4304_v25, %v622_v59  ;;  %v763_v19 = vmul.f32 %v4306_v26, %v622_v59  ;;  %v661_v45 = vmul.f32 %v4302_v24, %v622_v59 }
 0x128   : > { %1362 = vadd.xlane.f32.xlu1 %v1361_v63  ;;  %v792_v6 = vadd.f32 %v762_v17, %v726_v11  ;;  %v4732_v63 = vunpack.c.l.bf16 %v3277_v14  ;;  %v828_v11 = vmul.f32 %v4703_v2, %v4297_v18 }
 0x129   : > { %v728_v23 = vadd.f32 %v696_v56, %v660_v41  ;;  %v793_v7 = vadd.f32 %v763_v19, %v727_v58  ;;  %v697_v41 = vmul.f32 %v4304_v25, %v623_v51  ;;  %v894_v19 = vmul.f32 %v4703_v2, %v4311_v28 }
 0x12a   : > { %v857_v39 = vadd.f32 %v4309_v27, %v792_v6 }
 0x12b   : > { %v794_v22 = vadd.f32 %v764_v54, %v728_v23  ;;  %v858_v58 = vadd.f32 %v827_v62, %v793_v7  ;;  %v895_v23 = vmul.f32 %v4709_v20, %v4311_v28  ;;  %v1023_v62 = vrot.slane %v4703_v2, 1 }
 0x12c   : > { %v925_v5 = vadd.f32 %v893_v35, %v857_v39  ;;  %v624_v39 = vrot.slane %v4732_v63, 7 }
 0x12d   : > { %v859_v59 = vadd.f32 %v828_v11, %v794_v22 }
 0x167   : > { %v1318_v3 = vpop.xlane.xlu0 %1317 }
 0x168   : > { %v1413_v32 = vmul.f32 0.03125, %v1318_v3  ;;  %v990_v3 = vadd.f32 %v960_v15, %v925_v5  ;;  %v729_v5 = vadd.f32 %v697_v41, %v661_v45 }
 0x16a   : > { %v4728_v60 = vsub.f32 %v4403_v4, %v1413_v32  ;;  %v4740_v4 = vunpack.c.h.bf16 %v3277_v14  ;;  %v1022_v32 = vrot.slane %v4701_v12, 1 }
 0x16b   : > { %v1324_v34 = vpop.xlane.xlu1 %1323 }
 0x16c   : > { %5838 = vst [vmem:[#allocation20_spill] sm:$0xff] %v4728_v60  ;;  %v1477_v36 = vmul.f32 %v4728_v60, %v4728_v60  ;;  %v1415_v17 = vmul.f32 0.03125, %v1324_v34  ;;  %v1321_v6 = vpop.xlane.xlu0 %1320  ;;  %v625_v15 = vrot.slane %v4740_v4, 7  ;;  %v698_v34 = vmul.f32 %v4304_v25, %v624_v39 }
 0x16d   : > { %v1414_v56 = vmul.f32 0.03125, %v1321_v6  ;;  %v1128_v6 = vmul.f32 %v4335_v46, %v1022_v32 }
 0x16e   : > { %v1509_v21 = vsel %vm1315_vm2, %v1477_v36, 0.0  ;;  %v4747_v35 = vsub.f32 %v4427_v37, %v1415_v17  ;;  %v765_v37 = vmul.f32 %v4306_v26, %v624_v39  ;;  %v3278_v36 = vld [vmem:[%s4273_s18 + $0x58] sm:$0xff]   ;;  %v1091_v17 = vadd.f32 %v4352_v57, %v990_v3 }
 0x16f   : > { %1510 = vadd.xlane.f32.xlu0 %v1509_v21  ;;  %v4753_v14 = vsub.f32 %v4432_v49, %v1414_v56  ;;  %v662_v49 = vmul.f32 %v4302_v24, %v623_v51  ;;  %v926_v21 = vadd.f32 %v894_v19, %v858_v58  ;;  %v961_v56 = vmul.f32 %v4709_v20, %v4313_v29 }
 0x170   : > { %5839 = vst [vmem:[#allocation21_spill] sm:$0xff] %v4747_v35  ;;  %v1479_v54 = vmul.f32 %v4747_v35, %v4747_v35  ;;  %v4773_v8 = vunpack.c.l.bf16 %v3278_v36  ;;  %v927_v51 = vadd.f32 %v895_v23, %v859_v59  ;;  %v962_v35 = vmul.f32 %v4714_v9, %v4313_v29 }
 0x171   : > { %5840 = vst [vmem:[#allocation22_spill] sm:$0xff] %v4753_v14  ;;  %v1478_v7 = vmul.f32 %v4753_v14, %v4753_v14  ;;  %v766_v3 = vmul.f32 %v4306_v26, %v625_v15  ;;  %v730_v58 = vadd.f32 %v698_v34, %v662_v49  ;;  %v663_v19 = vmul.f32 %v4302_v24, %v624_v39 }
 0x172   : > { %v1327_v22 = vpop.xlane.xlu1 %1326  ;;  %v1515_v11 = vsel %vm1315_vm2, %v1479_v54, 0.0  ;;  %v795_v54 = vadd.f32 %v765_v37, %v729_v5  ;;  %v1061_v59 = vmul.f32 %v4332_v43, %v1022_v32  ;;  %v991_v37 = vadd.f32 %v961_v56, %v926_v21 }
 0x173   : > { %v1416_v45 = vmul.f32 0.03125, %v1327_v22  ;;  %1516 = vadd.xlane.f32.xlu0 %v1515_v11  ;;  %v1512_v41 = vsel %vm1315_vm2, %v1478_v7, 0.0  ;;  %v699_v7 = vmul.f32 %v4304_v25, %v625_v15  ;;  %v1160_v22 = vadd.f32 %v1128_v6, %v1091_v17 }
 0x174   : > { %1513 = vadd.xlane.f32.xlu1 %v1512_v41  ;;  %v1196_v11 = vmul.f32 %v4323_v38, %v1023_v62  ;;  %v1024_v41 = vrot.slane %v4709_v20, 1  ;;  %v626_v49 = vrot.slane %v4773_v8, 7  ;;  %v992_v34 = vadd.f32 %v962_v35, %v927_v51 }
 0x175   : > { %v4779_v14 = vsub.f32 %v4457_v16, %v1416_v45  ;;  %v829_v16 = vmul.f32 %v4709_v20, %v4297_v18  ;;  %v1062_v17 = vmul.f32 %v4332_v43, %v1023_v62  ;;  %v830_v6 = vmul.f32 %v4714_v9, %v4297_v18 }
 0x176   : > { %v796_v32 = vadd.f32 %v766_v3, %v730_v58  ;;  %v731_v60 = vadd.f32 %v699_v7, %v663_v19  ;;  %v767_v50 = vmul.f32 %v4306_v26, %v626_v49  ;;  %v1226_v56 = vadd.f32 %v1196_v11, %v1160_v22 }
 0x177   : > { %5841 = vst [vmem:[#allocation23_spill] sm:$0xff] %v4779_v14  ;;  %v1330_v23 = vpop.xlane.xlu0 %1329  ;;  %v1480_v5 = vmul.f32 %v4779_v14, %v4779_v14  ;;  %v4799_v14 = vunpack.c.h.bf16 %v3278_v36  ;;  %v1129_v35 = vmul.f32 %v4335_v46, %v1023_v62  ;;  %v1025_v51 = vrot.slane %v4714_v9, 1 }
 0x178   : > { %v1417_v39 = vmul.f32 0.03125, %v1330_v23  ;;  %v860_v23 = vadd.f32 %v829_v16, %v795_v54  ;;  %v1092_v58 = vadd.f32 %v1061_v59, %v991_v37  ;;  %v1093_v19 = vadd.f32 %v1062_v17, %v992_v34 }
 0x179   : > { %v1518_v45 = vsel %vm1315_vm2, %v1480_v5, 0.0  ;;  %v861_v7 = vadd.f32 %v830_v6, %v796_v32  ;;  %v897_v36 = vmul.f32 %v4732_v63, %v4311_v28  ;;  %v797_v22 = vadd.f32 %v767_v50, %v731_v60 }
 0x17a   : > { %v4797_v21 = vsub.f32 %v4480_v44, %v1417_v39  ;;  %1519 = vadd.xlane.f32.xlu1 %v1518_v45  ;;  %v1130_v44 = vmul.f32 %v4335_v46, %v1024_v41  ;;  %v831_v62 = vmul.f32 %v4732_v63, %v4297_v18  ;;  %v627_v5 = vrot.slane %v4799_v14, 7 }
 0x17b   : > { %v664_v16 = vmul.f32 %v4302_v24, %v625_v15  ;;  %v700_v59 = vmul.f32 %v4304_v25, %v626_v49  ;;  %v1258_v39 = vadd.f32 %v4701_v12, %v1226_v56  ;;  %v928_v34 = vadd.f32 %v896_v10, %v860_v23 }
 0x17c   : > { %5842 = vst [vmem:[#allocation24_spill] sm:$0xff] %v4797_v21  ;;  %v1481_v3 = vmul.f32 %v4797_v21, %v4797_v21  ;;  %v963_v50 = vmul.f32 %v4732_v63, %v4313_v29  ;;  %v1161_v60 = vadd.f32 %v1129_v35, %v1092_v58  ;;  %v1197_v17 = vmul.f32 %v4323_v38, %v1024_v41 }
 0x17d   : > { %v1198_v6 = vmul.f32 %v4323_v38, %v1025_v51  ;;  %v964_v45 = vmul.f32 %v4740_v4, %v4313_v29  ;;  %v929_v32 = vadd.f32 %v897_v36, %v861_v7  ;;  %v898_v12 = vmul.f32 %v4740_v4, %v4311_v28 }
 0x17e   : > { %v1333_v11 = vpop.xlane.xlu1 %1332  ;;  %v1521_v54 = vsel %vm1315_vm2, %v1481_v3, 0.0  ;;  %v862_v3 = vadd.f32 %v831_v62, %v797_v22  ;;  %v1162_v10 = vadd.f32 %v1130_v44, %v1093_v19  ;;  %v1063_v56 = vmul.f32 %v4332_v43, %v1024_v41 }
 0x17f   : > { %v1418_v37 = vmul.f32 0.03125, %v1333_v11  ;;  %1522 = vadd.xlane.f32.xlu0 %v1521_v54  ;;  %v732_v23 = vadd.f32 %v700_v59, %v664_v16  ;;  %v768_v35 = vmul.f32 %v4306_v26, %v627_v5  ;;  %v993_v11 = vadd.f32 %v963_v50, %v928_v34 }
 0x180   : > { %v665_v54 = vmul.f32 %v4302_v24, %v626_v49  ;;  %v4835_v7 = vadd.f32 %v4394_v53, %v1258_v39  ;;  %v1227_v36 = vadd.f32 %v1197_v17, %v1161_v60  ;;  %v1026_v22 = vrot.slane %v4732_v63, 1 }
 0x181   : > { %v4824_v15 = vsub.f32 %v4512_v61, %v1418_v37  ;;  %v701_v61 = vmul.f32 %v4304_v25, %v627_v5  ;;  %v1064_v41 = vmul.f32 %v4332_v43, %v1025_v51  ;;  %v994_v62 = vadd.f32 %v964_v45, %v929_v32 }
 0x182   : > { %5844 = vst [vmem:[#allocation26_spill] sm:$0xff] %v4835_v7  ;;  %v930_v16 = vadd.f32 %v898_v12, %v862_v3  ;;  %v965_v59 = vmul.f32 %v4773_v8, %v4313_v29  ;;  %v1131_v5 = vmul.f32 %v4335_v46, %v1025_v51  ;;  %v798_v37 = vadd.f32 %v768_v35, %v732_v23 }
 0x183   : > { %5843 = vst [vmem:[#allocation25_spill] sm:$0xff] %v4824_v15  ;;  %v1482_v58 = vmul.f32 %v4824_v15, %v4824_v15  ;;  %v832_v39 = vmul.f32 %v4740_v4, %v4297_v18  ;;  %v1228_v34 = vadd.f32 %v1198_v6, %v1162_v10  ;;  %v1094_v50 = vadd.f32 %v1063_v56, %v993_v11  ;;  %v3279_v15 = vld [vmem:[%s4273_s18 + $0x60] sm:$0xff]  }
 0x184   : > { %v1199_v60 = vmul.f32 %v4323_v38, %v1026_v22  ;;  %v733_v17 = vadd.f32 %v701_v61, %v665_v54  ;;  %v1259_v32 = vadd.f32 %v4703_v2, %v1227_v36  ;;  %v1027_v3 = vrot.slane %v4740_v4, 1 }
 0x185   : > { %v1336_v19 = vpop.xlane.xlu0 %1335  ;;  %v1524_v44 = vsel %vm1315_vm2, %v1482_v58, 0.0  ;;  %v1132_v12 = vmul.f32 %v4335_v46, %v1026_v22  ;;  %v1095_v23 = vadd.f32 %v1064_v41, %v994_v62  ;;  %v995_v35 = vadd.f32 %v965_v59, %v930_v16 }
 0x186   : > { %v1419_v49 = vmul.f32 0.03125, %v1336_v19  ;;  %1525 = vadd.xlane.f32.xlu1 %v1524_v44  ;;  %v1065_v58 = vmul.f32 %v4332_v43, %v1026_v22  ;;  %v899_v6 = vmul.f32 %v4773_v8, %v4311_v28  ;;  %v4858_v11 = vunpack.c.l.bf16 %v3279_v15 }
 0x187   : > { %v1260_v2 = vadd.f32 %v4709_v20, %v1228_v34  ;;  %v1163_v54 = vadd.f32 %v1131_v5, %v1094_v50  ;;  %v799_v61 = vadd.f32 %v4472_v42, %v733_v17  ;;  %v833_v36 = vmul.f32 %v4773_v8, %v4297_v18 }
 0x188   : > { %v4848_v45 = vsub.f32 %v4544_v52, %v1419_v49  ;;  %v863_v52 = vadd.f32 %v832_v39, %v798_v37  ;;  %v4869_v19 = vadd.f32 %v4394_v53, %v1259_v32  ;;  %v1200_v44 = vmul.f32 %v4323_v38, %v1027_v3 }
 0x189   : > { %v1339_v51 = vpop.xlane.xlu1 %1338  ;;  %v1164_v62 = vadd.f32 %v1132_v12, %v1095_v23  ;;  %v1096_v16 = vadd.f32 %v1065_v58, %v995_v35  ;;  %v1133_v20 = vmul.f32 %v4335_v46, %v1027_v3  ;;  %v966_v59 = vmul.f32 %v4799_v14, %v4313_v29 }
 0x18a   : > { %5845 = vst [vmem:[#allocation27_spill] sm:$0xff] %v4848_v45  ;;  %v1420_v10 = vmul.f32 0.03125, %v1339_v51  ;;  %v1483_v56 = vmul.f32 %v4848_v45, %v4848_v45  ;;  %5847 = vst [vmem:[#allocation29_spill] sm:$0xff] %v4869_v19  ;;  %v4877_v5 = vunpack.c.h.bf16 %v3279_v15  ;;  %v628_v37 = vrot.slane %v4858_v11, 7  ;;  %v4891_v15 = vld [vmem:[%s5777_s2] ss:$0 sm:$0xff] }
 0x18b   : > { %v1229_v53 = vadd.f32 %v1199_v60, %v1163_v54  ;;  %v1028_v39 = vrot.slane %v4773_v8, 1  ;;  %v864_v34 = vadd.f32 %v833_v36, %v799_v61  ;;  %v900_v50 = vmul.f32 %v4799_v14, %v4311_v28  ;;  %v3280_v54 = vld [vmem:[%s4273_s18 + $0x68] sm:$0xff]  }
 0x18c   : > { %v4865_v22 = vsub.f32 %v4562_v47, %v1420_v10  ;;  %v1527_v41 = vsel %vm1315_vm2, %v1483_v56, 0.0  ;;  %v931_v47 = vadd.f32 %v899_v6, %v863_v52  ;;  %v4886_v12 = vsel %vm1315_vm2, %v4835_v7, 0.0 }
 0x18d   : > { %1528 = vadd.xlane.f32.xlu0 %v1527_v41  ;;  %v4894_v60 = vadd.f32 %v4891_v15, %v1260_v2  ;;  %v1230_v23 = vadd.f32 %v1200_v44, %v1164_v62  ;;  %v1165_v35 = vadd.f32 %v1133_v20, %v1096_v16  ;;  %v1201_v58 = vmul.f32 %v4323_v38, %v1028_v39 }
 0x18e   : > { %5846 = vst [vmem:[#allocation28_spill] sm:$0xff] %v4865_v22  ;;  %v1484_v49 = vmul.f32 %v4865_v22, %v4865_v22  ;;  %v996_v6 = vadd.f32 %v966_v59, %v931_v47  ;;  %v1066_v10 = vmul.f32 %v4332_v43, %v1027_v3  ;;  %v4899_v56 = vrot.slane %v4877_v5, 7 }
 0x18f   : > { %5848 = vst [vmem:[#allocation30_spill] sm:$0xff] %v4894_v60  ;;  %v702_v52 = vmul.f32 %v4304_v25, %v628_v37  ;;  %v4908_v36 = vsel %vm1315_vm2, %v4869_v19, 0.0  ;;  %v1261_v41 = vadd.f32 %v4714_v9, %v1229_v53  ;;  %v932_v44 = vadd.f32 %v900_v50, %v864_v34 }
 0x190   : > { %v1342_v17 = vpop.xlane.xlu0 %1341  ;;  %v1530_v32 = vsel %vm1315_vm2, %v1484_v49, 0.0  ;;  %v4913_v3 = vsel %vm1315_vm2, %v4894_v60, 0.0  ;;  %v1029_v16 = vrot.slane %v4799_v14, 1  ;;  %v1134_v20 = vmul.f32 %v4335_v46, %v1028_v39  ;;  %v3282_v60 = vld [vmem:[%s4273_s18 + $0x78] sm:$0xff]  }
 0x191   : > { %v1421_v51 = vmul.f32 0.03125, %v1342_v17  ;;  %1531 = vadd.xlane.f32.xlu1 %v1530_v32  ;;  %v1262_v59 = vadd.f32 %v4732_v63, %v1230_v23  ;;  %v1231_v49 = vadd.f32 %v1201_v58, %v1165_v35  ;;  %v4920_v47 = vunpack.c.l.bf16 %v3280_v54 }
 0x192   : > { %v1097_v53 = vadd.f32 %v1066_v10, %v996_v6  ;;  %v734_v34 = vadd.f32 %v702_v52, %v4317_v31  ;;  %v769_v50 = vmul.f32 %v4306_v26, %v4899_v56  ;;  %v4930_v32 = vadd.f32 %v4891_v15, %v1261_v41 }
 0x193   : > { %v4904_v61 = vsub.f32 %v4588_v30, %v1421_v51  ;;  %v1345_v2 = vpop.xlane.xlu1 %1344  ;;  %v997_v51 = vadd.f32 %v4495_v0, %v932_v44  ;;  %v1067_v63 = vmul.f32 %v4332_v43, %v1028_v39  ;;  %v1202_v23 = vmul.f32 %v4323_v38, %v1029_v16 }
 0x194   : > { %v1422_v62 = vmul.f32 0.03125, %v1345_v2  ;;  %5851 = vst [vmem:[#allocation33_spill] sm:$0xff] %v4930_v32  ;;  %v1030_v31 = vrot.slane %v4858_v11, 1  ;;  %v4939_v35 = vrot.slane %v4877_v5, 1  ;;  %v4942_v58 = vadd.f32 %v4891_v15, %v1262_v59 }
 0x195   : > { %5849 = vst [vmem:[#allocation31_spill] sm:$0xff] %v4904_v61  ;;  %v1485_v30 = vmul.f32 %v4904_v61, %v4904_v61  ;;  %v1263_v6 = vadd.f32 %v4740_v4, %v1231_v49  ;;  %v1135_v10 = vmul.f32 %v4335_v46, %v1029_v16  ;;  %v901_v39 = vmul.f32 %v4858_v11, %v4311_v28 }
 0x196   : > { %v4923_v9 = vsub.f32 %v4601_v33, %v1422_v62  ;;  %v1166_v41 = vadd.f32 %v1134_v20, %v1097_v53  ;;  %v800_v44 = vadd.f32 %v769_v50, %v734_v34  ;;  %v630_v62 = vrot.slane %v4920_v47, 7 }
 0x197   : > { %v1533_v17 = vsel %vm1315_vm2, %v1485_v30, 0.0  ;;  %v3281_v30 = vld [vmem:[%s4273_s18 + $0x70] sm:$0xff]   ;;  %v1098_v19 = vadd.f32 %v1067_v63, %v997_v51  ;;  %v666_v59 = vmul.f32 %v4302_v24, %v628_v37  ;;  %v703_v4 = vmul.f32 %v4304_v25, %v4899_v56 }
 0x198   : > { %5850 = vst [vmem:[#allocation32_spill] sm:$0xff] %v4923_v9  ;;  %1534 = vadd.xlane.f32.xlu0 %v1533_v17  ;;  %v1486_v33 = vmul.f32 %v4923_v9, %v4923_v9  ;;  %v967_v16 = vmul.f32 %v4877_v5, %v4313_v29  ;;  %v4957_v49 = vmul.f32 %v4335_v46, %v1030_v31  ;;  %v4963_v53 = vunpack.c.h.bf16 %v3280_v54 }
 0x199   : > { %v4961_v20 = vmul.f32 %v4323_v38, %v4939_v35  ;;  %v4969_v37 = vadd.f32 %v4891_v15, %v1263_v6  ;;  %v770_v50 = vmul.f32 %v4306_v26, %v630_v62  ;;  %v4972_v51 = vunpack.c.l.bf16 %v3281_v30 }
 0x19a   : > { %v1348_v52 = vpop.xlane.xlu0 %1347  ;;  %v1536_v2 = vsel %vm1315_vm2, %v1486_v33, 0.0  ;;  %v1232_v63 = vadd.f32 %v1202_v23, %v1166_v41  ;;  %v865_v33 = vadd.f32 %v4309_v27, %v800_v44  ;;  %v902_v54 = vmul.f32 %v4877_v5, %v4311_v28 }
 0x19b   : > { %v1423_v17 = vmul.f32 0.03125, %v1348_v52  ;;  %1537 = vadd.xlane.f32.xlu1 %v1536_v2  ;;  %5853 = vst [vmem:[#allocation35_spill] sm:$0xff] %v4969_v37  ;;  %v834_v52 = vmul.f32 %v4858_v11, %v4297_v18  ;;  %v1167_v2 = vadd.f32 %v1135_v10, %v1098_v19  ;;  %v4983_v6 = vmul.f32 %v4920_v47, %v4313_v29 }
 0x19c   : > { %v4987_v23 = vrot.slane %v4920_v47, 1  ;;  %v631_v27 = vrot.slane %v4963_v53, 7  ;;  %v667_v41 = vmul.f32 %v4302_v24, %v4899_v56  ;;  %v704_v44 = vmul.f32 %v4304_v25, %v630_v62 }
 0x19d   : > { %v4966_v34 = vsub.f32 %v4626_v1, %v1423_v17  ;;  %v735_v17 = vadd.f32 %v703_v4, %v666_v59  ;;  %v632_v10 = vrot.slane %v4972_v51, 7  ;;  %v4995_v59 = vunpack.c.h.bf16 %v3281_v30 }
 0x19e   : > { %v1264_v4 = vadd.f32 %v4773_v8, %v1232_v63  ;;  %v4999_v61 = vmul.f32 %v4332_v43, %v1030_v31  ;;  %v5001_v22 = vunpack.c.l.bf16 %v3282_v60  ;;  %v5011_v30 = vmul.f32 %v4335_v46, %v4939_v35 }
 0x19f   : > { %5852 = vst [vmem:[#allocation34_spill] sm:$0xff] %v4966_v34  ;;  %v1487_v1 = vmul.f32 %v4966_v34, %v4966_v34  ;;  %v933_v34 = vadd.f32 %v901_v39, %v865_v33  ;;  %v771_v8 = vmul.f32 %v4306_v26, %v631_v27  ;;  %v668_v39 = vmul.f32 %v4302_v24, %v630_v62 }
 0x1a0   : > { %v1351_v7 = vpop.xlane.xlu1 %1350  ;;  %v705_v31 = vmul.f32 %v4304_v25, %v631_v27  ;;  %v669_v33 = vmul.f32 %v4302_v24, %v631_v27  ;;  %v5026_v62 = vunpack.c.h.bf16 %v3282_v60  ;;  %v772_v37 = vmul.f32 %v4306_v26, %v632_v10 }
 0x1a1   : > { %v1424_v9 = vmul.f32 0.03125, %v1351_v7  ;;  %v1539_v19 = vsel %vm1315_vm2, %v1487_v1, 0.0  ;;  %v5007_v7 = vadd.f32 %v4504_v13, %v1167_v2  ;;  %v801_v1 = vadd.f32 %v770_v50, %v735_v17 }
 0x1a2   : > { %1540 = vadd.xlane.f32.xlu0 %v1539_v19  ;;  %v736_v19 = vadd.f32 %v704_v44, %v667_v41  ;;  %v706_v50 = vmul.f32 %v4304_v25, %v632_v10  ;;  %v5023_v17 = vmul.f32 %v4323_v38, %v4987_v23  ;;  %v634_v41 = vrot.slane %v5001_v22, 7 }
 0x1a3   : > { %v5004_v56 = vsub.f32 %v4649_v48, %v1424_v9  ;;  %v633_v9 = vrot.slane %v4995_v59, 7  ;;  %v998_v45 = vadd.f32 %v967_v16, %v933_v34  ;;  %v866_v21 = vadd.f32 %v834_v52, %v801_v1 }
 0x1a4   : > { %v737_v13 = vadd.f32 %v705_v31, %v668_v39  ;;  %v738_v0 = vadd.f32 %v706_v50, %v669_v33  ;;  %v670_v60 = vmul.f32 %v4302_v24, %v632_v10  ;;  %v635_v34 = vrot.slane %v5026_v62, 7 }
 0x1a5   : > { %5854 = vst [vmem:[#allocation36_spill] sm:$0xff] %v5004_v56  ;;  %v1354_v63 = vpop.xlane.xlu0 %1353  ;;  %v1488_v48 = vmul.f32 %v5004_v56, %v5004_v56  ;;  %v835_v56 = vmul.f32 %v4877_v5, %v4297_v18  ;;  %v773_v32 = vmul.f32 %v4306_v26, %v633_v9  ;;  %v708_v52 = vmul.f32 %v4304_v25, %v634_v41 }
 0x1a6   : > { %v1425_v2 = vmul.f32 0.03125, %v1354_v63  ;;  %v802_v63 = vadd.f32 %v771_v8, %v736_v19  ;;  %v5044_v1 = vadd.f32 %v4891_v15, %v1264_v4  ;;  %v1099_v19 = vadd.f32 %v4352_v57, %v998_v45 }
 0x1a7   : > { %v1542_v44 = vsel %vm1315_vm2, %v1488_v48, 0.0  ;;  %v707_v48 = vmul.f32 %v4304_v25, %v633_v9  ;;  %v934_v8 = vadd.f32 %v902_v54, %v866_v21  ;;  %v903_v10 = vmul.f32 %v4920_v47, %v4311_v28 }
 0x1a8   : > { %v5032_v27 = vsub.f32 %v4667_v55, %v1425_v2  ;;  %1543 = vadd.xlane.f32.xlu1 %v1542_v44  ;;  %v671_v55 = vmul.f32 %v4302_v24, %v633_v9  ;;  %v867_v33 = vadd.f32 %v835_v56, %v802_v63  ;;  %v969_v50 = vmul.f32 %v4963_v53, %v4313_v29 }
 0x1a9   : > { %v836_v9 = vmul.f32 %v4920_v47, %v4297_v18  ;;  %v803_v4 = vadd.f32 %v772_v37, %v737_v13  ;;  %v804_v44 = vadd.f32 %v773_v32, %v738_v0  ;;  %v837_v57 = vmul.f32 %v4963_v53, %v4297_v18 }
 0x1aa   : > { %v1489_v16 = vmul.f32 %v5032_v27, %v5032_v27  ;;  %v5057_v21 = vrot.slane %v4963_v53, 1  ;;  %v739_v45 = vadd.f32 %v707_v48, %v670_v60  ;;  %v740_v54 = vadd.f32 %v708_v52, %v671_v55 }
 0x1ab   : > { %v1357_v39 = vpop.xlane.xlu1 %1356  ;;  %v775_v56 = vmul.f32 %v4306_v26, %v635_v34  ;;  %v709_v13 = vmul.f32 %v4304_v25, %v635_v34  ;;  %v1168_v0 = vadd.f32 %v4957_v49, %v1099_v19  ;;  %v999_v32 = vadd.f32 %v4983_v6, %v934_v8 }
 0x1ac   : > { %v1545_v31 = vsel %vm1315_vm2, %v1489_v16, 0.0  ;;  %v1426_v2 = vmul.f32 0.03125, %v1357_v39  ;;  %v774_v16 = vmul.f32 %v4306_v26, %v634_v41  ;;  %v672_v39 = vmul.f32 %v4302_v24, %v634_v41 }
 0x1ad   : > { %1546 = vadd.xlane.f32.xlu0 %v1545_v31  ;;  %v935_v37 = vadd.f32 %v903_v10, %v867_v33  ;;  %v904_v60 = vmul.f32 %v4963_v53, %v4311_v28  ;;  %v869_v52 = vadd.f32 %v837_v57, %v804_v44  ;;  %v905_v26 = vmul.f32 %v4972_v51, %v4311_v28  ;;  %v5855_v10 = vld [vmem:[#allocation18_spill] sm:$0xff] }
 0x1ae   : > { %v5061_v63 = vsub.f32 %v4681_v40, %v1426_v2  ;;  %v868_v40 = vadd.f32 %v836_v9, %v803_v4  ;;  %v1069_v25 = vmul.f32 %v4332_v43, %v4939_v35  ;;  %v806_v49 = vadd.f32 %v775_v56, %v740_v54 }
 0x1af   : > { %v839_v6 = vmul.f32 %v4995_v59, %v4297_v18  ;;  %v805_v34 = vadd.f32 %v774_v16, %v739_v45  ;;  %v838_v19 = vmul.f32 %v4972_v51, %v4297_v18  ;;  %v741_v8 = vadd.f32 %v709_v13, %v672_v39 }
 0x1b0   : > { %v1490_v55 = vmul.f32 %v5061_v63, %v5061_v63  ;;  %v1100_v33 = vadd.f32 %v4999_v61, %v999_v32  ;;  %v1000_v9 = vadd.f32 %v969_v50, %v935_v37  ;;  %v1138_v35 = vmul.f32 %v4335_v46, %v4987_v23 }
 0x1b1   : > { %v1360_v48 = vpop.xlane.xlu0 %1359  ;;  %v936_v2 = vadd.f32 %v904_v60, %v868_v40  ;;  %v970_v4 = vmul.f32 %v4972_v51, %v4313_v29  ;;  %v937_v44 = vadd.f32 %v905_v26, %v869_v52  ;;  %v971_v57 = vmul.f32 %v4995_v59, %v4313_v29  ;;  %v5856_v40 = vld [vmem:[#allocation19_spill] sm:$0xff] }
 0x1b2   : > { %v1427_v24 = vmul.f32 0.03125, %v1360_v48  ;;  %v1548_v41 = vsel %vm1315_vm2, %v1490_v55, 0.0  ;;  %v906_v56 = vmul.f32 %v4995_v59, %v4311_v28  ;;  %v871_v61 = vadd.f32 %v839_v6, %v806_v49 }
 0x1b3   : > { %1549 = vadd.xlane.f32.xlu1 %v1548_v41  ;;  %v907_v50 = vmul.f32 %v5001_v22, %v4311_v28  ;;  %v870_v39 = vadd.f32 %v838_v19, %v805_v34  ;;  %v807_v13 = vadd.f32 %v4472_v42, %v741_v8  ;;  %v840_v32 = vmul.f32 %v5001_v22, %v4297_v18 }
 0x1b4   : > { %v5082_v31 = vsub.f32 %v5855_v10, %v1427_v24  ;;  %v1101_v60 = vadd.f32 %v1069_v25, %v1000_v9  ;;  %v1034_v48 = vrot.slane %v4972_v51, 1  ;;  %v1070_v55 = vmul.f32 %v4332_v43, %v4987_v23 }
 0x1b5   : > { %v1363_v45 = vpop.xlane.xlu1 %1362  ;;  %v1001_v26 = vadd.f32 %v970_v4, %v936_v2  ;;  %v1035_v24 = vrot.slane %v4995_v59, 1  ;;  %v1071_v42 = vmul.f32 %v4332_v43, %v5057_v21  ;;  %v1002_v49 = vadd.f32 %v971_v57, %v937_v44 }
 0x1b6   : > { %v1491_v54 = vmul.f32 %v5082_v31, %v5082_v31  ;;  %v1428_v16 = vmul.f32 0.03125, %v1363_v45  ;;  %v972_v18 = vmul.f32 %v5001_v22, %v4313_v29  ;;  %v939_v25 = vadd.f32 %v907_v50, %v871_v61 }
 0x1b7   : > { %v973_v6 = vmul.f32 %v5026_v62, %v4313_v29  ;;  %v938_v41 = vadd.f32 %v906_v56, %v870_v39  ;;  %v872_v34 = vadd.f32 %v840_v32, %v807_v13  ;;  %v908_v19 = vmul.f32 %v5026_v62, %v4311_v28  ;;  %v3635_v56 = vld [vmem:[#allocation10] sm:$0xff]  }
 0x1b8   : > { %v1551_v37 = vsel %vm1315_vm2, %v1491_v54, 0.0  ;;  %v5105_v52 = vsub.f32 %v5856_v40, %v1428_v16  ;;  %v1234_v8 = vadd.f32 %v4961_v20, %v1168_v0  ;;  %v1169_v10 = vadd.f32 %v5011_v30, %v1100_v33  ;;  %v3634_v54 = vld [vmem:[#allocation9] sm:$0xff]   ;;  %3398 = vmatprep.subr.bf16.mxu1 %v3635_v56 }
 0x1b9   : > { %1552 = vadd.xlane.f32.xlu0 %v1551_v37  ;;  %v1170_v9 = vadd.f32 %v1138_v35, %v1101_v60  ;;  %v1205_v2 = vmul.f32 %v4323_v38, %v5057_v21  ;;  %v1102_v29 = vadd.f32 %v1070_v55, %v1001_v26  ;;  %v1139_v44 = vmul.f32 %v4335_v46, %v5057_v21  ;;  %v5857_v60 = vld [vmem:[#allocation33_spill] sm:$0xff]  ;;  %v5858_v55 = vld [vmem:[#allocation16_spill] sm:$0xff] }
 0x1ba   : > { %v1492_v23 = vmul.f32 %v5105_v52, %v5105_v52  ;;  %v1140_v57 = vmul.f32 %v4335_v46, %v1034_v48  ;;  %v1103_v28 = vadd.f32 %v1071_v42, %v1002_v49  ;;  %v1036_v20 = vrot.slane %v5001_v22, 1  ;;  %3362 = vmatprep.subr.bf16.mxu0 %v3634_v54  ;;  %3399 = vmatpush3.bf16.msra.mxu1 %v3635_v56 }
 0x1bb   : > { %v1004_v0 = vadd.f32 %v973_v6, %v939_v25  ;;  %v1073_v30 = vmul.f32 %v4332_v43, %v1035_v24  ;;  %v1265_v33 = vadd.f32 %v4799_v14, %v5007_v7  ;;  %v1003_v35 = vadd.f32 %v972_v18, %v938_v41  ;;  %3363 = vmatpush3.bf16.msra.mxu0 %v3634_v54  ;;  %v3636_v6 = vld [vmem:[#allocation9 + $0x8] sm:$0xff]  }
 0x1bc   : > { %v1554_v4 = vsel %vm1315_vm2, %v1492_v23, 0.0  ;;  %v1072_v45 = vmul.f32 %v4332_v43, %v1034_v48  ;;  %v1266_v21 = vadd.f32 %v4858_v11, %v1234_v8  ;;  %v1235_v61 = vadd.f32 %v5023_v17, %v1169_v10  ;;  %v3637_v23 = vld [vmem:[#allocation10 + $0x8] sm:$0xff]   ;;  %3364 = vmatprep.subr.bf16.mxu0 %v3636_v6 }
 0x1bd   : > { %1365 = vadd.xlane.f32.xlu0 %v4886_v12  ;;  %1555 = vadd.xlane.f32.xlu1 %v1554_v4  ;;  %v940_v12 = vadd.f32 %v908_v19, %v872_v34  ;;  %v1236_v50 = vadd.f32 %v1205_v2, %v1170_v9  ;;  %v1206_v16 = vmul.f32 %v4323_v38, %v1034_v48  ;;  %v1376_v39 = vsel %vm1315_vm2, %v4942_v58, 0.0  ;;  %v5859_v8 = vld [vmem:[#allocation35_spill] sm:$0xff] }
 0x1be   : > { %v1171_v13 = vadd.f32 %v1139_v44, %v1102_v29  ;;  %v1207_v14 = vmul.f32 %v4323_v38, %v1035_v24  ;;  %v1141_v7 = vmul.f32 %v4335_v46, %v1035_v24  ;;  %v1172_v32 = vadd.f32 %v1140_v57, %v1103_v28  ;;  %3400 = vmatprep.subr.bf16.mxu1 %v3637_v23 }
 0x1bf   : > { %v1037_v11 = vrot.slane %v5026_v62, 1  ;;  %v1105_v17 = vadd.f32 %v1073_v30, %v1004_v0  ;;  %v1142_v37 = vmul.f32 %v4335_v46, %v1036_v20  ;;  %v1104_v48 = vadd.f32 %v1072_v45, %v1003_v35  ;;  %3365 = vmatpush3.bf16.msra.mxu0 %v3636_v6  ;;  %3401 = vmatpush3.bf16.msra.mxu1 %v3637_v23  ;;  %v5213_v6 = vld [vmem:[%s5778_s3] ss:$0 sm:$0xff] }
 0x1c0   : > { %v1005_v40 = vadd.f32 %v5858_v55, %v940_v12  ;;  %v1074_v26 = vmul.f32 %v4332_v43, %v1036_v20  ;;  %v5150_v24 = vadd.f32 %v4891_v15, %v1265_v33  ;;  %v5153_v42 = vadd.f32 %v4891_v15, %v1266_v21  ;;  %v5861_v12 = vld [vmem:[#allocation17_spill] sm:$0xff] }
 0x1c1   : > { %1371 = vadd.xlane.f32.xlu0 %v4913_v3  ;;  %1368 = vadd.xlane.f32.xlu1 %v4908_v36  ;;  %v1373_v3 = vsel %vm1315_vm2, %v5857_v60, 0.0  ;;  %v1382_v36 = vsel %vm1315_vm2, %v5044_v1, 0.0  ;;  %v1267_v49 = vadd.f32 %v4877_v5, %v1235_v61  ;;  %v1268_v18 = vadd.f32 %v4920_v47, %v1236_v50 }
 0x1c2   : > { %v1237_v25 = vadd.f32 %v1206_v16, %v1171_v13  ;;  %v1238_v43 = vadd.f32 %v1207_v14, %v1172_v32  ;;  %v1208_v41 = vmul.f32 %v4323_v38, %v1036_v20  ;;  %v1174_v34 = vadd.f32 %v1142_v37, %v1105_v17 }
 0x1c3   : > { %v1209_v19 = vmul.f32 %v4323_v38, %v1037_v11  ;;  %v1379_v10 = vsel %vm1315_vm2, %v5859_v8, 0.0  ;;  %v1173_v9 = vadd.f32 %v1141_v7, %v1104_v48  ;;  %v1106_v2 = vadd.f32 %v1074_v26, %v1005_v40 }
 0x1c4   : > { %v1143_v4 = vmul.f32 %v4335_v46, %v1037_v11  ;;  %v1385_v5 = vsel %vm1315_vm2, %v5150_v24, 0.0  ;;  %v5860_v47 = vmov 0.0   ;;  %v1388_v38 = vsel %vm1315_vm2, %v5153_v42, 0.0 }
 0x1c5   : > { %1377 = vadd.xlane.f32.xlu0 %v1376_v39  ;;  %1374 = vadd.xlane.f32.xlu1 %v1373_v3  ;;  %v5168_v29 = vadd.f32 %v4891_v15, %v1268_v18  ;;  %v1270_v44 = vadd.f32 %v4972_v51, %v1238_v43  ;;  %v1240_v46 = vadd.f32 %v1209_v19, %v1174_v34  ;;  %v5862_v18 = vld [vmem:[#allocation20_spill] sm:$0xff]  ;;  %v5863_v34 = vld [vmem:[#allocation22_spill] sm:$0xff] }
 0x1c6   : > { %3446 = vmatprep.subr.bf16.mxu1 %v5860_v47  ;;  %3434 = vmatprep.subr.bf16.mxu0 %v5860_v47  ;;  %v5173_v57 = vadd.f32 %v4891_v15, %v1267_v49  ;;  %v1269_v28 = vadd.f32 %v4963_v53, %v1237_v25  ;;  %v1239_v20 = vadd.f32 %v1208_v41, %v1173_v9  ;;  %v5217_v9 = vld [vmem:[#allocation6] ss:$0 sm:$0xff] }
 0x1c7   : > { %v1175_v0 = vadd.f32 %v1143_v4, %v1106_v2  ;;  %v1394_v30 = vsel %vm1315_vm2, %v5168_v29, 0.0  ;;  %v5179_v33 = vadd.f32 %v4891_v15, %v1270_v44  ;;  %v1272_v51 = vadd.f32 %v5001_v22, %v1240_v46  ;;  %v5864_v2 = vld [vmem:[#allocation21_spill] sm:$0xff] }
 0x1c8   : > { %v1391_v35 = vsel %vm1315_vm2, %v5173_v57, 0.0  ;;  %v5185_v45 = vadd.f32 %v4891_v15, %v1269_v28  ;;  %v1271_v53 = vadd.f32 %v4995_v59, %v1239_v20 }
 0x1c9   : > { %1383 = vadd.xlane.f32.xlu0 %v1382_v36  ;;  %1380 = vadd.xlane.f32.xlu1 %v1379_v10  ;;  %v1241_v54 = vadd.f32 %v5861_v12, %v1175_v0  ;;  %v1400_v56 = vsel %vm1315_vm2, %v5179_v33, 0.0  ;;  %v5192_v21 = vadd.f32 %v4891_v15, %v1272_v51 }
 0x1ca   : > { %v1397_v22 = vsel %vm1315_vm2, %v5185_v45, 0.0  ;;  %v5197_v61 = vadd.f32 %v4891_v15, %v1271_v53 }
 0x1cb   : > { %v1273_v50 = vadd.f32 %v5026_v62, %v1241_v54  ;;  %v1406_v59 = vsel %vm1315_vm2, %v5192_v21, 0.0 }
 0x1cc   : > { %v1403_v16 = vsel %vm1315_vm2, %v5197_v61, 0.0 }
 0x1cd   : > { %1389 = vadd.xlane.f32.xlu0 %v1388_v38  ;;  %1386 = vadd.xlane.f32.xlu1 %v1385_v5  ;;  %v5205_v39 = vadd.f32 %v4891_v15, %v1273_v50 }
 0x1cf   : > { %v1409_v13 = vsel %vm1315_vm2, %v5205_v39, 0.0 }
 0x1d1   : > { %1395 = vadd.xlane.f32.xlu0 %v1394_v30  ;;  %1392 = vadd.xlane.f32.xlu1 %v1391_v35  ;;  %v5865_v30 = vld [vmem:[#allocation23_spill] sm:$0xff] }
 0x1d5   : > { %1401 = vadd.xlane.f32.xlu0 %v1400_v56  ;;  %1398 = vadd.xlane.f32.xlu1 %v1397_v22 }
 0x1d9   : > { %1407 = vadd.xlane.f32.xlu0 %v1406_v59  ;;  %1404 = vadd.xlane.f32.xlu1 %v1403_v16 }
 0x1dd   : > { %1410 = vadd.xlane.f32.xlu1 %v1409_v13 }
 0x1fc   : > { %v1511_v14 = vpop.xlane.xlu0 %1510 }
 0x1fd   : > { %v1605_v7 = vmul.f32 0.03125, %v1511_v14 }
 0x1ff   : > { %v1637_v62 = vadd.f32 1e-05, %v1605_v7  ;;  %v5866_v7 = vld [vmem:[#allocation24_spill] sm:$0xff] }
 0x200   : > { %v1517_v32 = vpop.xlane.xlu0 %1516 }
 0x201   : > { %3641 = vrsqrt.f32 %v1637_v62  ;;  %v1514_v11 = vpop.xlane.xlu1 %1513  ;;  %v1607_v17 = vmul.f32 0.03125, %v1517_v32 }
 0x202   : > { %v1606_v37 = vmul.f32 0.03125, %v1514_v11 }
 0x203   : > { %v1639_v3 = vadd.f32 1e-05, %v1607_v17 }
 0x204   : > { %v1638_v48 = vadd.f32 1e-05, %v1606_v37  ;;  %v5867_v37 = vld [vmem:[#allocation25_spill] sm:$0xff] }
 0x205   : > { %3643 = vrsqrt.f32 %v1639_v3 }
 0x206   : > { %3645 = vrsqrt.f32 %v1638_v48 }
 0x207   : > { %v1520_v15 = vpop.xlane.xlu1 %1519 }
 0x208   : > { %v1608_v55 = vmul.f32 0.03125, %v1520_v15 }
 0x20a   : > { %v1640_v26 = vadd.f32 1e-05, %v1608_v55 }
 0x20b   : > { %v3642_v40 = vpop.eup %3641 }
 0x20c   : > { %3647 = vrsqrt.f32 %v1640_v26  ;;  %v1523_v36 = vpop.xlane.xlu0 %1522  ;;  %v1701_v25 = vmul.f32 %v3642_v40, %v5862_v18 }
 0x20d   : > { %v1609_v49 = vmul.f32 0.03125, %v1523_v36 }
 0x20e   : > { %v1739_v10 = vmul.f32 %v5213_v6, %v1701_v25 }
 0x20f   : > { %v3644_v23 = vpop.eup %3643  ;;  %v1641_v43 = vadd.f32 1e-05, %v1609_v49 }
 0x210   : > { %v3646_v41 = vpop.eup %3645  ;;  %v1703_v4 = vmul.f32 %v3644_v23, %v5864_v2  ;;  %v1777_v46 = vadd.f32 %v5217_v9, %v1739_v10  ;;  %v5869_v2 = vld [vmem:[#allocation28_spill] sm:$0xff] }
 0x211   : > { %v1702_v19 = vmul.f32 %v3646_v41, %v5863_v34  ;;  %3649 = vrsqrt.f32 %v1641_v43  ;;  %v5868_v41 = vld [vmem:[#allocation27_spill] sm:$0xff] }
 0x212   : > { %v1741_v53 = vmul.f32 %v5213_v6, %v1703_v4 }
 0x213   : > { %v1526_v5 = vpop.xlane.xlu1 %1525  ;;  %v1740_v38 = vmul.f32 %v5213_v6, %v1702_v19 }
 0x214   : > { %v1610_v44 = vmul.f32 0.03125, %v1526_v5  ;;  %v1779_v22 = vadd.f32 %v5217_v9, %v1741_v53 }
 0x215   : > { %v1778_v28 = vadd.f32 %v5217_v9, %v1740_v38 }
 0x216   : > { %v3648_v20 = vpop.eup %3647  ;;  %v1642_v0 = vadd.f32 1e-05, %v1610_v44 }
 0x217   : > { %v1704_v51 = vmul.f32 %v3648_v20, %v5865_v30  ;;  %v1809_v35 = vpack.c.bf16 %v1778_v28, %v1777_v46 }
 0x218   : > { %3651 = vrsqrt.f32 %v1642_v0 }
 0x219   : > { %3366 = vmatprep.mubr.msk.bf16.mxu0 %vm1315_vm2, %v1809_v35  ;;  %3402 = vmatprep.mubr.msk.bf16.mxu1 %vm1315_vm2, %v1809_v35  ;;  %v1742_v12 = vmul.f32 %v5213_v6, %v1704_v51  ;;  %v5870_v35 = vld [vmem:[#allocation31_spill] sm:$0xff] }
 0x21a   : > { %v1529_v54 = vpop.xlane.xlu0 %1528 }
 0x21b   : > { %v1611_v56 = vmul.f32 0.03125, %v1529_v54  ;;  %v1780_v50 = vadd.f32 %v5217_v9, %v1742_v12  ;;  %v3650_v59 = vpop.eup %3649 }
 0x21c   : > { %v1705_v62 = vmul.f32 %v3650_v59, %v5866_v7 }
 0x21d   : > { %v1643_v16 = vadd.f32 1e-05, %v1611_v56  ;;  %v1810_v13 = vpack.c.bf16 %v1780_v50, %v1779_v22  ;;  %v5871_v22 = vld [vmem:[#allocation32_spill] sm:$0xff] }
 0x21e   : > { %v1532_v14 = vpop.xlane.xlu1 %1531  ;;  %v1743_v48 = vmul.f32 %v5213_v6, %v1705_v62 }
 0x21f   : > { %3653 = vrsqrt.f32 %v1643_v16  ;;  %v1612_v32 = vmul.f32 0.03125, %v1532_v14  ;;  %3367 = vmatmul.mubr.msk.bf16.vlgmr.msra.gmra.mrb[0].mxu0 %vm1315_vm2, %v1810_v13  ;;  %3403 = vmatmul.mubr.msk.bf16.vlgmr.msra.gmra.mrb[0].mxu1 %vm1315_vm2, %v1810_v13 }
 0x220   : > { %v1781_v26 = vadd.f32 %v5217_v9, %v1743_v48 }
 0x221   : > { %v1644_v11 = vadd.f32 1e-05, %v1612_v32 }
 0x222   : > { %v3652_v17 = vpop.eup %3651 }
 0x223   : > { %v1706_v3 = vmul.f32 %v3652_v17, %v5867_v37  ;;  %3655 = vrsqrt.f32 %v1644_v11 }
 0x225   : > { %v1535_v15 = vpop.xlane.xlu0 %1534  ;;  %v1744_v55 = vmul.f32 %v5213_v6, %v1706_v3  ;;  %v5872_v3 = vld [vmem:[#allocation34_spill] sm:$0xff] }
 0x226   : > { %v1613_v40 = vmul.f32 0.03125, %v1535_v15 }
 0x227   : > { %v1782_v36 = vadd.f32 %v5217_v9, %v1744_v55 }
 0x228   : > { %v1645_v49 = vadd.f32 1e-05, %v1613_v40  ;;  %v1538_v18 = vpop.xlane.xlu1 %1537 }
 0x229   : > { %v3654_v25 = vpop.eup %3653  ;;  %v1614_v23 = vmul.f32 0.03125, %v1538_v18  ;;  %v1811_v43 = vpack.c.bf16 %v1782_v36, %v1781_v26  ;;  %v5873_v36 = vld [vmem:[#allocation36_spill] sm:$0xff] }
 0x22a   : > { %v1707_v34 = vmul.f32 %v3654_v25, %v5868_v41  ;;  %3657 = vrsqrt.f32 %v1645_v49 }
 0x22b   : > { %v1646_v19 = vadd.f32 1e-05, %v1614_v23  ;;  %3370 = vmatprep.mubr.msk.bf16.mxu0 %vm1315_vm2, %v1811_v43  ;;  %3406 = vmatprep.mubr.msk.bf16.mxu1 %vm1315_vm2, %v1811_v43 }
 0x22c   : > { %v1745_v5 = vmul.f32 %v5213_v6, %v1707_v34 }
 0x22d   : > { %v3656_v10 = vpop.eup %3655  ;;  %3659 = vrsqrt.f32 %v1646_v19 }
 0x22e   : > { %v1708_v4 = vmul.f32 %v3656_v10, %v5869_v2  ;;  %v1783_v20 = vadd.f32 %v5217_v9, %v1745_v5 }
 0x22f   : > { %v1541_v38 = vpop.xlane.xlu0 %1540 }
 0x230   : > { %v1615_v44 = vmul.f32 0.03125, %v1541_v38  ;;  %v1746_v46 = vmul.f32 %v5213_v6, %v1708_v4 }
 0x232   : > { %v1647_v28 = vadd.f32 1e-05, %v1615_v44  ;;  %v1784_v0 = vadd.f32 %v5217_v9, %v1746_v46 }
 0x234   : > { %v3658_v30 = vpop.eup %3657  ;;  %3661 = vrsqrt.f32 %v1647_v28  ;;  %v1812_v51 = vpack.c.bf16 %v1784_v0, %v1783_v20  ;;  %v5874_v28 = vld [vmem:[#allocation26_spill] sm:$0xff] }
 0x235   : > { %v1709_v53 = vmul.f32 %v3658_v30, %v5870_v35  ;;  %v1544_v12 = vpop.xlane.xlu1 %1543 }
 0x236   : > { %v1616_v54 = vmul.f32 0.03125, %v1544_v12  ;;  %3371 = vmatmul.mubr.msk.bf16.gmra.mrb[4].mxu0 %vm1315_vm2, %v1812_v51  ;;  %3407 = vmatmul.mubr.msk.bf16.gmra.mrb[4].mxu1 %vm1315_vm2, %v1812_v51 }
 0x237   : > { %v3660_v56 = vpop.eup %3659  ;;  %v1747_v16 = vmul.f32 %v5213_v6, %v1709_v53 }
 0x238   : > { %v1710_v50 = vmul.f32 %v3660_v56, %v5871_v22  ;;  %v1648_v59 = vadd.f32 1e-05, %v1616_v54 }
 0x239   : > { %v1785_v62 = vadd.f32 %v5217_v9, %v1747_v16  ;;  %v5876_v16 = vld [vmem:[#allocation29_spill] sm:$0xff] }
 0x23a   : > { %3663 = vrsqrt.f32 %v1648_v59  ;;  %v1547_v13 = vpop.xlane.xlu0 %1546  ;;  %v1748_v14 = vmul.f32 %v5213_v6, %v1710_v50 }
 0x23b   : > { %v1617_v7 = vmul.f32 0.03125, %v1547_v13 }
 0x23c   : > { %v1786_v32 = vadd.f32 %v5217_v9, %v1748_v14 }
 0x23d   : > { %v1649_v11 = vadd.f32 1e-05, %v1617_v7 }
 0x23e   : > { %v3662_v17 = vpop.eup %3661  ;;  %v1813_v37 = vpack.c.bf16 %v1786_v32, %v1785_v62 }
 0x23f   : > { %3665 = vrsqrt.f32 %v1649_v11  ;;  %v1711_v48 = vmul.f32 %v3662_v17, %v5872_v3 }
 0x240   : > { %3374 = vmatprep.mubr.msk.bf16.mxu0 %vm1315_vm2, %v1813_v37  ;;  %3410 = vmatprep.mubr.msk.bf16.mxu1 %vm1315_vm2, %v1813_v37  ;;  %v1550_v15 = vpop.xlane.xlu1 %1549 }
 0x241   : > { %v1618_v55 = vmul.f32 0.03125, %v1550_v15  ;;  %v1749_v18 = vmul.f32 %v5213_v6, %v1711_v48 }
 0x243   : > { %v1650_v26 = vadd.f32 1e-05, %v1618_v55  ;;  %v1787_v34 = vadd.f32 %v5217_v9, %v1749_v18 }
 0x244   : > { %v3664_v40 = vpop.eup %3663 }
 0x245   : > { %v1712_v49 = vmul.f32 %v3664_v40, %v5873_v36  ;;  %3667 = vrsqrt.f32 %v1650_v26 }
 0x246   : > { %v1553_v25 = vpop.xlane.xlu0 %1552 }
 0x247   : > { %v1619_v23 = vmul.f32 0.03125, %v1553_v25  ;;  %v1750_v43 = vmul.f32 %v5213_v6, %v1712_v49 }
 0x249   : > { %v1651_v41 = vadd.f32 1e-05, %v1619_v23  ;;  %v1788_v19 = vadd.f32 %v5217_v9, %v1750_v43  ;;  %v3666_v10 = vpop.eup %3665 }
 0x24a   : > { %v1366_v2 = vpop.xlane.xlu0 %1365  ;;  %v1556_v4 = vpop.xlane.xlu1 %1555  ;;  %v1713_v46 = vmul.f32 %v3666_v10, %v5032_v27  ;;  %v5875_v27 = vld [vmem:[#allocation30_spill] sm:$0xff] }
 0x24b   : > { %3669 = vrsqrt.f32 %v1651_v41  ;;  %v1429_v5 = vmul.f32 0.03125, %v1366_v2  ;;  %v1814_v38 = vpack.c.bf16 %v1788_v19, %v1787_v34  ;;  %v1620_v44 = vmul.f32 0.03125, %v1556_v4 }
 0x24c   : > { %v1751_v59 = vmul.f32 %v5213_v6, %v1713_v46 }
 0x24d   : > { %v5264_v20 = vsub.f32 %v5874_v28, %v1429_v5  ;;  %3375 = vmatmul.mubr.msk.bf16.gmra.mrb[8].mxu0 %vm1315_vm2, %v1814_v38  ;;  %3411 = vmatmul.mubr.msk.bf16.gmra.mrb[8].mxu1 %vm1315_vm2, %v1814_v38  ;;  %v1652_v0 = vadd.f32 1e-05, %v1620_v44 }
 0x24e   : > { %v1372_v30 = vpop.xlane.xlu0 %1371  ;;  %v1369_v51 = vpop.xlane.xlu1 %1368  ;;  %v1789_v15 = vadd.f32 %v5217_v9, %v1751_v59 }
 0x24f   : > { %v1431_v35 = vmul.f32 0.03125, %v1372_v30  ;;  %v1493_v53 = vmul.f32 %v5264_v20, %v5264_v20  ;;  %v3668_v12 = vpop.eup %3667  ;;  %3671 = vrsqrt.f32 %v1652_v0  ;;  %v1430_v54 = vmul.f32 0.03125, %v1369_v51 }
 0x250   : > { %v1714_v56 = vmul.f32 %v3668_v12, %v5061_v63 }
 0x251   : > { %v5272_v22 = vsub.f32 %v5875_v27, %v1431_v35  ;;  %v1557_v50 = vsel %vm1315_vm2, %v1493_v53, 0.0  ;;  %v5277_v13 = vsub.f32 %v5876_v16, %v1430_v54 }
 0x252   : > { %1558 = vadd.xlane.f32.xlu0 %v1557_v50  ;;  %v1378_v14 = vpop.xlane.xlu0 %1377  ;;  %v1375_v7 = vpop.xlane.xlu1 %1374  ;;  %v1752_v11 = vmul.f32 %v5213_v6, %v1714_v56 }
 0x253   : > { %v1433_v62 = vmul.f32 0.03125, %v1378_v14  ;;  %v1495_v32 = vmul.f32 %v5272_v22, %v5272_v22  ;;  %v1432_v63 = vmul.f32 0.03125, %v1375_v7  ;;  %v1494_v17 = vmul.f32 %v5277_v13, %v5277_v13 }
 0x254   : > { %v1790_v55 = vadd.f32 %v5217_v9, %v1752_v11 }
 0x255   : > { %v3670_v37 = vpop.eup %3669  ;;  %v5285_v3 = vsub.f32 %v4942_v58, %v1433_v62  ;;  %v1563_v48 = vsel %vm1315_vm2, %v1495_v32, 0.0  ;;  %v5291_v40 = vsub.f32 %v5857_v60, %v1432_v63  ;;  %v1560_v26 = vsel %vm1315_vm2, %v1494_v17, 0.0 }
 0x256   : > { %1564 = vadd.xlane.f32.xlu0 %v1563_v48  ;;  %v1384_v36 = vpop.xlane.xlu0 %1383  ;;  %v1715_v49 = vmul.f32 %v3670_v37, %v5082_v31  ;;  %1561 = vadd.xlane.f32.xlu1 %v1560_v26  ;;  %v1381_v18 = vpop.xlane.xlu1 %1380  ;;  %v1815_v23 = vpack.c.bf16 %v1790_v55, %v1789_v15 }
 0x257   : > { %v1435_v25 = vmul.f32 0.03125, %v1384_v36  ;;  %v1497_v58 = vmul.f32 %v5285_v3, %v5285_v3  ;;  %v1434_v43 = vmul.f32 0.03125, %v1381_v18  ;;  %v1496_v41 = vmul.f32 %v5291_v40, %v5291_v40 }
 0x258   : > { %3378 = vmatprep.mubr.msk.bf16.mxu0 %vm1315_vm2, %v1815_v23  ;;  %3414 = vmatprep.mubr.msk.bf16.mxu1 %vm1315_vm2, %v1815_v23  ;;  %v1753_v44 = vmul.f32 %v5213_v6, %v1715_v49 }
 0x259   : > { %v5300_v60 = vsub.f32 %v5044_v1, %v1435_v25  ;;  %v1569_v34 = vsel %vm1315_vm2, %v1497_v58, 0.0  ;;  %v3672_v31 = vpop.eup %3671  ;;  %v5306_v19 = vsub.f32 %v5859_v8, %v1434_v43  ;;  %v1566_v10 = vsel %vm1315_vm2, %v1496_v41, 0.0 }
 0x25a   : > { %1570 = vadd.xlane.f32.xlu0 %v1569_v34  ;;  %v1390_v2 = vpop.xlane.xlu0 %1389  ;;  %v1716_v4 = vmul.f32 %v3672_v31, %v5105_v52  ;;  %1567 = vadd.xlane.f32.xlu1 %v1566_v10  ;;  %v1387_v5 = vpop.xlane.xlu1 %1386  ;;  %v1791_v54 = vadd.f32 %v5217_v9, %v1753_v44 }
 0x25b   : > { %v1437_v1 = vmul.f32 0.03125, %v1390_v2  ;;  %v1499_v38 = vmul.f32 %v5300_v60, %v5300_v60  ;;  %v1436_v46 = vmul.f32 0.03125, %v1387_v5  ;;  %v1498_v28 = vmul.f32 %v5306_v19, %v5306_v19 }
 0x25c   : > { %v1754_v30 = vmul.f32 %v5213_v6, %v1716_v4 }
 0x25d   : > { %v5316_v8 = vsub.f32 %v5153_v42, %v1437_v1  ;;  %v1575_v0 = vsel %vm1315_vm2, %v1499_v38, 0.0  ;;  %v5321_v52 = vsub.f32 %v5150_v24, %v1436_v46  ;;  %v1572_v51 = vsel %vm1315_vm2, %v1498_v28, 0.0 }
 0x25e   : > { %1576 = vadd.xlane.f32.xlu0 %v1575_v0  ;;  %v1396_v35 = vpop.xlane.xlu0 %1395  ;;  %1573 = vadd.xlane.f32.xlu1 %v1572_v51  ;;  %v1393_v53 = vpop.xlane.xlu1 %1392  ;;  %v1792_v56 = vadd.f32 %v5217_v9, %v1754_v30 }
 0x25f   : > { %v1439_v12 = vmul.f32 0.03125, %v1396_v35  ;;  %v1501_v42 = vmul.f32 %v5316_v8, %v5316_v8  ;;  %v1438_v27 = vmul.f32 0.03125, %v1393_v53  ;;  %v1500_v50 = vmul.f32 %v5321_v52, %v5321_v52 }
 0x260   : > { %v1816_v59 = vpack.c.bf16 %v1792_v56, %v1791_v54 }
 0x261   : > { %v5331_v24 = vsub.f32 %v5168_v29, %v1439_v12  ;;  %v1581_v16 = vsel %vm1315_vm2, %v1501_v42, 0.0  ;;  %v5335_v14 = vsub.f32 %v5173_v57, %v1438_v27  ;;  %v1578_v7 = vsel %vm1315_vm2, %v1500_v50, 0.0 }
 0x262   : > { %1582 = vadd.xlane.f32.xlu0 %v1581_v16  ;;  %v1402_v62 = vpop.xlane.xlu0 %1401  ;;  %1579 = vadd.xlane.f32.xlu1 %v1578_v7  ;;  %v1399_v32 = vpop.xlane.xlu1 %1398 }
 0x263   : > { %3379 = vmatmul.mubr.msk.bf16.gmra.mrb[12].mxu0 %vm1315_vm2, %v1816_v59  ;;  %v1441_v11 = vmul.f32 0.03125, %v1402_v62  ;;  %v1503_v63 = vmul.f32 %v5331_v24, %v5331_v24  ;;  %v1440_v29 = vmul.f32 0.03125, %v1399_v32  ;;  %3415 = vmatmul.mubr.msk.bf16.gmra.mrb[12].mxu1 %vm1315_vm2, %v1816_v59  ;;  %v1502_v17 = vmul.f32 %v5335_v14, %v5335_v14 }
 0x265   : > { %v5345_v57 = vsub.f32 %v5179_v33, %v1441_v11  ;;  %v1587_v37 = vsel %vm1315_vm2, %v1503_v63, 0.0  ;;  %v5349_v48 = vsub.f32 %v5185_v45, %v1440_v29  ;;  %v1584_v15 = vsel %vm1315_vm2, %v1502_v17, 0.0 }
 0x266   : > { %1588 = vadd.xlane.f32.xlu0 %v1587_v37  ;;  %v1408_v55 = vpop.xlane.xlu0 %1407  ;;  %1585 = vadd.xlane.f32.xlu1 %v1584_v15  ;;  %v1405_v26 = vpop.xlane.xlu1 %1404 }
 0x267   : > { %v1443_v36 = vmul.f32 0.03125, %v1408_v55  ;;  %v1505_v49 = vmul.f32 %v5345_v57, %v5345_v57  ;;  %v1442_v18 = vmul.f32 0.03125, %v1405_v26  ;;  %v1504_v33 = vmul.f32 %v5349_v48, %v5349_v48 }
 0x269   : > { %v5357_v25 = vsub.f32 %v5192_v21, %v1443_v36  ;;  %v1593_v45 = vsel %vm1315_vm2, %v1505_v49, 0.0  ;;  %v5361_v58 = vsub.f32 %v5197_v61, %v1442_v18  ;;  %v1590_v23 = vsel %vm1315_vm2, %v1504_v33, 0.0 }
 0x26a   : > { %1594 = vadd.xlane.f32.xlu0 %v1593_v45  ;;  %1591 = vadd.xlane.f32.xlu1 %v1590_v23  ;;  %v1411_v43 = vpop.xlane.xlu1 %1410 }
 0x26b   : > { %v1507_v41 = vmul.f32 %v5357_v25, %v5357_v25  ;;  %v1444_v34 = vmul.f32 0.03125, %v1411_v43  ;;  %v1506_v31 = vmul.f32 %v5361_v58, %v5361_v58 }
 0x26d   : > { %v1599_v21 = vsel %vm1315_vm2, %v1507_v41, 0.0  ;;  %v5370_v10 = vsub.f32 %v5205_v39, %v1444_v34  ;;  %v1596_v61 = vsel %vm1315_vm2, %v1506_v31, 0.0 }
 0x26e   : > { %1600 = vadd.xlane.f32.xlu0 %v1599_v21  ;;  %1597 = vadd.xlane.f32.xlu1 %v1596_v61 }
 0x26f   : > { %v1508_v2 = vmul.f32 %v5370_v10, %v5370_v10 }
 0x271   : > { %v1602_v4 = vsel %vm1315_vm2, %v1508_v2, 0.0 }
 0x272   : > { %1603 = vadd.xlane.f32.xlu1 %v1602_v4 }
 0x2df   : > { %v1559_v5 = vpop.xlane.xlu0 %1558 }
 0x2e0   : > { %v1621_v1 = vmul.f32 0.03125, %v1559_v5 }
 0x2e2   : > { %v1653_v38 = vadd.f32 1e-05, %v1621_v1 }
 0x2e3   : > { %v1565_v44 = vpop.xlane.xlu0 %1564  ;;  %v1562_v46 = vpop.xlane.xlu1 %1561 }
 0x2e4   : > { %3673 = vrsqrt.f32 %v1653_v38  ;;  %v1623_v28 = vmul.f32 0.03125, %v1565_v44  ;;  %v1622_v0 = vmul.f32 0.03125, %v1562_v46 }
 0x2e6   : > { %v1655_v39 = vadd.f32 1e-05, %v1623_v28  ;;  %v1654_v30 = vadd.f32 1e-05, %v1622_v0 }
 0x2e7   : > { %v1571_v51 = vpop.xlane.xlu0 %1570  ;;  %v1568_v35 = vpop.xlane.xlu1 %1567 }
 0x2e8   : > { %3675 = vrsqrt.f32 %v1655_v39  ;;  %v1625_v53 = vmul.f32 0.03125, %v1571_v51  ;;  %v1624_v12 = vmul.f32 0.03125, %v1568_v35 }
 0x2e9   : > { %3677 = vrsqrt.f32 %v1654_v30 }
 0x2ea   : > { %v1657_v54 = vadd.f32 1e-05, %v1625_v53  ;;  %v1656_v56 = vadd.f32 1e-05, %v1624_v12 }
 0x2eb   : > { %v1577_v42 = vpop.xlane.xlu0 %1576  ;;  %v1574_v27 = vpop.xlane.xlu1 %1573 }
 0x2ec   : > { %3679 = vrsqrt.f32 %v1657_v54  ;;  %v1627_v50 = vmul.f32 0.03125, %v1577_v42  ;;  %v1626_v59 = vmul.f32 0.03125, %v1574_v27 }
 0x2ed   : > { %3681 = vrsqrt.f32 %v1656_v56 }
 0x2ee   : > { %v3674_v16 = vpop.eup %3673  ;;  %v1659_v7 = vadd.f32 1e-05, %v1627_v50  ;;  %v1658_v32 = vadd.f32 1e-05, %v1626_v59 }
 0x2ef   : > { %v1717_v62 = vmul.f32 %v3674_v16, %v5264_v20  ;;  %v1583_v11 = vpop.xlane.xlu0 %1582  ;;  %v1580_v63 = vpop.xlane.xlu1 %1579 }
 0x2f0   : > { %3683 = vrsqrt.f32 %v1659_v7  ;;  %v1629_v29 = vmul.f32 0.03125, %v1583_v11  ;;  %v1628_v17 = vmul.f32 0.03125, %v1580_v63 }
 0x2f1   : > { %3685 = vrsqrt.f32 %v1658_v32  ;;  %v1755_v20 = vmul.f32 %v5213_v6, %v1717_v62 }
 0x2f2   : > { %v3676_v37 = vpop.eup %3675  ;;  %v1661_v15 = vadd.f32 1e-05, %v1629_v29  ;;  %v5377_v55 = vpop.f32.mrb[0].mxu0  ;;  %v1660_v18 = vadd.f32 1e-05, %v1628_v17 }
 0x2f3   : > { %v5379_v26 = vpop.f32.mrb[0].mxu1  ;;  %v3678_v36 = vpop.eup %3677  ;;  %v1719_v49 = vmul.f32 %v3676_v37, %v5272_v22  ;;  %v1793_v30 = vadd.f32 %v5217_v9, %v1755_v20 }
 0x2f4   : > { %v1589_v33 = vpop.xlane.xlu0 %1588  ;;  %v1923_v45 = vpop.f32.mrb[1].mxu0  ;;  %v1718_v23 = vmul.f32 %v3678_v36, %v5277_v13  ;;  %3687 = vrsqrt.f32 %v1661_v15 }
 0x2f5   : > { %v1586_v43 = vpop.xlane.xlu1 %1585  ;;  %v1631_v41 = vmul.f32 0.03125, %v1589_v33  ;;  %v2116_v34 = vpop.f32.mrb[1].mxu1  ;;  %3689 = vrsqrt.f32 %v1660_v18  ;;  %v1757_v21 = vmul.f32 %v5213_v6, %v1719_v49 }
 0x2f6   : > { %v1630_v31 = vmul.f32 0.03125, %v1586_v43  ;;  %v5385_v61 = vpop.f32.mrb[2].mxu0  ;;  %v5387_v2 = vpop.f32.mrb[2].mxu1  ;;  %v1756_v5 = vmul.f32 %v5213_v6, %v1718_v23 }
 0x2f7   : > { %v3680_v22 = vpop.eup %3679  ;;  %v1663_v4 = vadd.f32 1e-05, %v1631_v41  ;;  %v2051_v1 = vpack.c.bf16 %v5385_v61, %v5377_v55  ;;  %v2244_v13 = vpack.c.bf16 %v5387_v2, %v5379_v26  ;;  %v1926_v38 = vpop.f32.mrb[3].mxu0  ;;  %v1795_v42 = vadd.f32 %v5217_v9, %v1757_v21 }
 0x2f8   : > { %v2119_v44 = vpop.f32.mrb[3].mxu1  ;;  %v3682_v46 = vpop.eup %3681  ;;  %v1721_v28 = vmul.f32 %v3680_v22, %v5285_v3  ;;  %v1662_v0 = vadd.f32 1e-05, %v1630_v31  ;;  %v2050_v51 = vpack.c.bf16 %v1926_v38, %v1923_v45  ;;  %v1794_v54 = vadd.f32 %v5217_v9, %v1756_v5 }
 0x2f9   : > { %v1595_v39 = vpop.xlane.xlu0 %1594  ;;  %v1720_v35 = vmul.f32 %v3682_v46, %v5291_v40  ;;  %3691 = vrsqrt.f32 %v1663_v4  ;;  %v1592_v53 = vpop.xlane.xlu1 %1591  ;;  %v2243_v63 = vpack.c.bf16 %v2119_v44, %v2116_v34 }
 0x2fa   : > { %v1633_v12 = vmul.f32 0.03125, %v1595_v39  ;;  %3693 = vrsqrt.f32 %v1662_v0  ;;  %v1632_v56 = vmul.f32 0.03125, %v1592_v53  ;;  %v3684_v27 = vpop.eup %3683  ;;  %v1817_v59 = vpack.c.bf16 %v1794_v54, %v1793_v30 }
 0x2fb   : > { %v1758_v3 = vmul.f32 %v5213_v6, %v1720_v35  ;;  %v2272_v16 = vsel %vm1315_vm2, %v2050_v51, 0  ;;  %v3686_v7 = vpop.eup %3685  ;;  %v1723_v62 = vmul.f32 %v3684_v27, %v5300_v60  ;;  %v1759_v11 = vmul.f32 %v5213_v6, %v1721_v28  ;;  %3447 = vmatpush3.bf16.msra.mxu1 %v2243_v63 }
 0x2fc   : > { %v1665_v50 = vadd.f32 1e-05, %v1633_v12  ;;  %v1664_v40 = vadd.f32 1e-05, %v1632_v56  ;;  %3435 = vmatpush3.bf16.xpose.msra.mxu0 %v2272_v16  ;;  %v1722_v29 = vmul.f32 %v3686_v7, %v5306_v19  ;;  %3382 = vmatprep.mubr.msk.bf16.mxu0 %vm1315_vm2, %v1817_v59 }
 0x2fd   : > { %v1601_v32 = vpop.xlane.xlu0 %1600  ;;  %v1598_v17 = vpop.xlane.xlu1 %1597  ;;  %3418 = vmatprep.mubr.msk.bf16.mxu1 %vm1315_vm2, %v1817_v59  ;;  %v1796_v15 = vadd.f32 %v5217_v9, %v1758_v3  ;;  %3436 = vmatprep.subr.bf16.mxu0 %v5860_v47  ;;  %v1797_v20 = vadd.f32 %v5217_v9, %v1759_v11  ;;  %v1761_v45 = vmul.f32 %v5213_v6, %v1723_v62 }
 0x2fe   : > { %3695 = vrsqrt.f32 %v1665_v50  ;;  %v1635_v37 = vmul.f32 0.03125, %v1601_v32  ;;  %v1634_v26 = vmul.f32 0.03125, %v1598_v17  ;;  %v3688_v60 = vpop.eup %3687  ;;  %v1760_v18 = vmul.f32 %v5213_v6, %v1722_v29  ;;  %3448 = vmatprep.subr.bf16.mxu1 %v5860_v47 }
 0x2ff   : > { %3697 = vrsqrt.f32 %v1664_v40  ;;  %v1818_v49 = vpack.c.bf16 %v1796_v15, %v1795_v42  ;;  %v3690_v19 = vpop.eup %3689  ;;  %v1725_v43 = vmul.f32 %v3688_v60, %v5316_v8  ;;  %3449 = vmatpush3.bf16.msra.mxu1 %v2244_v13  ;;  %v2275_v8 = vsel %vm1315_vm2, %v2051_v1, 0 }
 0x300   : > { %v1667_v36 = vadd.f32 1e-05, %v1635_v37  ;;  %v1666_v33 = vadd.f32 1e-05, %v1634_v26  ;;  %v1724_v23 = vmul.f32 %v3690_v19, %v5321_v52  ;;  %v1798_v34 = vadd.f32 %v5217_v9, %v1760_v18  ;;  %3450 = vmatprep.subr.bf16.mxu1 %v5860_v47 }
 0x301   : > { %v1604_v41 = vpop.xlane.xlu1 %1603  ;;  %3383 = vmatmul.mubr.msk.bf16.gmra.mrb[16].mxu0 %vm1315_vm2, %v1818_v49  ;;  %3419 = vmatmul.mubr.msk.bf16.gmra.mrb[16].mxu1 %vm1315_vm2, %v1818_v49  ;;  %v1799_v38 = vadd.f32 %v5217_v9, %v1761_v45  ;;  %v1763_v55 = vmul.f32 %v5213_v6, %v1725_v43 }
 0x302   : > { %3699 = vrsqrt.f32 %v1667_v36  ;;  %v1636_v31 = vmul.f32 0.03125, %v1604_v41  ;;  %v1819_v2 = vpack.c.bf16 %v1798_v34, %v1797_v20  ;;  %v1762_v22 = vmul.f32 %v5213_v6, %v1724_v23 }
 0x303   : > { %3701 = vrsqrt.f32 %v1666_v33  ;;  %v3692_v21 = vpop.eup %3691  ;;  %v1801_v39 = vadd.f32 %v5217_v9, %v1763_v55 }
 0x304   : > { %v3694_v52 = vpop.eup %3693  ;;  %v1727_v4 = vmul.f32 %v3692_v21, %v5331_v24  ;;  %v1668_v5 = vadd.f32 1e-05, %v1636_v31  ;;  %3437 = vmatpush3.bf16.xpose.msra.mxu0 %v2275_v8  ;;  %3386 = vmatprep.mubr.msk.bf16.mxu0 %vm1315_vm2, %v1819_v2  ;;  %v1800_v44 = vadd.f32 %v5217_v9, %v1762_v22 }
 0x305   : > { %v1726_v13 = vmul.f32 %v3694_v52, %v5335_v14  ;;  %3422 = vmatprep.mubr.msk.bf16.mxu1 %vm1315_vm2, %v1819_v2  ;;  %3438 = vmatprep.subr.bf16.mxu0 %v5860_v47 }
 0x306   : > { %3703 = vrsqrt.f32 %v1668_v5  ;;  %v1820_v1 = vpack.c.bf16 %v1800_v44, %v1799_v38  ;;  %v1765_v14 = vmul.f32 %v5213_v6, %v1727_v4 }
 0x307   : > { %v1764_v24 = vmul.f32 %v5213_v6, %v1726_v13 }
 0x308   : > { %v3696_v61 = vpop.eup %3695 }
 0x309   : > { %v3698_v46 = vpop.eup %3697  ;;  %v1729_v28 = vmul.f32 %v3696_v61, %v5345_v57  ;;  %3387 = vmatmul.mubr.msk.bf16.gmra.mrb[20].mxu0 %vm1315_vm2, %v1820_v1  ;;  %3423 = vmatmul.mubr.msk.bf16.gmra.mrb[20].mxu1 %vm1315_vm2, %v1820_v1  ;;  %v1802_v30 = vadd.f32 %v5217_v9, %v1764_v24  ;;  %v3372_v51 = vpop.f32.mrb[4].mxu0 }
 0x30a   : > { %v1728_v0 = vmul.f32 %v3698_v46, %v5349_v48  ;;  %v3408_v35 = vpop.f32.mrb[4].mxu1  ;;  %v1939_v56 = vpop.f32.mrb[5].mxu0  ;;  %v1803_v48 = vadd.f32 %v5217_v9, %v1765_v14 }
 0x30b   : > { %v1821_v12 = vpack.c.bf16 %v1802_v30, %v1801_v39  ;;  %v2132_v57 = vpop.f32.mrb[5].mxu1  ;;  %v1767_v50 = vmul.f32 %v5213_v6, %v1729_v28  ;;  %v3373_v59 = vpop.f32.mrb[6].mxu0 }
 0x30c   : > { %v3700_v53 = vpop.eup %3699  ;;  %v1766_v54 = vmul.f32 %v5213_v6, %v1728_v0  ;;  %v3409_v3 = vpop.f32.mrb[6].mxu1  ;;  %v2053_v62 = vpack.c.bf16 %v3373_v59, %v3372_v51 }
 0x30d   : > { %v3702_v42 = vpop.eup %3701  ;;  %v1731_v27 = vmul.f32 %v3700_v53, %v5357_v25  ;;  %3390 = vmatprep.mubr.msk.bf16.mxu0 %vm1315_vm2, %v1821_v12  ;;  %3426 = vmatprep.mubr.msk.bf16.mxu1 %vm1315_vm2, %v1821_v12  ;;  %v1942_v40 = vpop.f32.mrb[7].mxu0  ;;  %v2246_v11 = vpack.c.bf16 %v3409_v3, %v3408_v35  ;;  %v1805_v15 = vadd.f32 %v5217_v9, %v1767_v50 }
 0x30e   : > { %v1730_v16 = vmul.f32 %v3702_v42, %v5361_v58  ;;  %v1804_v7 = vadd.f32 %v5217_v9, %v1766_v54  ;;  %v2135_v32 = vpop.f32.mrb[7].mxu1  ;;  %v2052_v63 = vpack.c.bf16 %v1942_v40, %v1939_v56 }
 0x30f   : > { %v2245_v25 = vpack.c.bf16 %v2135_v32, %v2132_v57  ;;  %v1769_v60 = vmul.f32 %v5213_v6, %v1731_v27 }
 0x310   : > { %v1822_v29 = vpack.c.bf16 %v1804_v7, %v1803_v48  ;;  %v1768_v17 = vmul.f32 %v5213_v6, %v1730_v16  ;;  %v3704_v37 = vpop.eup %3703  ;;  %v2278_v36 = vsel %vm1315_vm2, %v2052_v63, 0 }
 0x311   : > { %3451 = vmatpush3.bf16.msra.mxu1 %v2245_v25  ;;  %v1732_v58 = vmul.f32 %v3704_v37, %v5370_v10  ;;  %3439 = vmatpush3.bf16.xpose.msra.mxu0 %v2278_v36  ;;  %v1807_v10 = vadd.f32 %v5217_v9, %v1769_v60 }
 0x312   : > { %3391 = vmatmul.mubr.msk.bf16.gmra.mrb[24].mxu0 %vm1315_vm2, %v1822_v29  ;;  %3427 = vmatmul.mubr.msk.bf16.gmra.mrb[24].mxu1 %vm1315_vm2, %v1822_v29  ;;  %v1806_v26 = vadd.f32 %v5217_v9, %v1768_v17 }
 0x313   : > { %3452 = vmatprep.subr.bf16.mxu1 %v5860_v47  ;;  %v1770_v18 = vmul.f32 %v5213_v6, %v1732_v58  ;;  %3440 = vmatprep.subr.bf16.mxu0 %v5860_v47  ;;  %v2281_v6 = vsel %vm1315_vm2, %v2053_v62, 0 }
 0x314   : > { %v1823_v49 = vpack.c.bf16 %v1806_v26, %v1805_v15 }
 0x315   : > { %3453 = vmatpush3.bf16.msra.mxu1 %v2246_v11  ;;  %v1808_v19 = vadd.f32 %v5217_v9, %v1770_v18  ;;  %v5471_v9 = vld [vmem:[#allocation7] sm:$0x3f]  }
 0x316   : > { %3394 = vmatprep.mubr.msk.bf16.mxu0 %vm1315_vm2, %v1823_v49  ;;  %3430 = vmatprep.mubr.msk.bf16.mxu1 %vm1315_vm2, %v1823_v49 }
 0x317   : > { %3470 = vmatprep.subr.bf16.mxu1 %v5860_v47  ;;  %v1824_v33 = vpack.c.bf16 %v1808_v19, %v1807_v10 }
 0x319   : > { %3441 = vmatpush3.bf16.xpose.msra.mxu0 %v2281_v6 }
 0x31a   : > { %3395 = vmatmul.mubr.msk.bf16.gmra.mrb[28].mxu0 %vm1315_vm2, %v1824_v33  ;;  %3431 = vmatmul.mubr.msk.bf16.gmra.mrb[28].mxu1 %vm1315_vm2, %v1824_v33 }
 0x31b   : > { %3442 = vmatprep.mubr.msk.bf16.mxu0 %vm3971_vm3, %v5860_v47  ;;  %3458 = vmatprep.subr.bf16.mxu0 %v5860_v47 }
 0x31c   : > { %3454 = vmatprep.mubr.msk.bf16.mxu1 %vm3971_vm3, %v5860_v47 }
 0x320   : > { %v3376_v20 = vpop.f32.mrb[8].mxu0  ;;  %v5473_v45 = vpop.f32.mrb[8].mxu1 }
 0x321   : > { %v1955_v23 = vpop.f32.mrb[9].mxu0  ;;  %v5477_v43 = vpop.f32.mrb[9].mxu1 }
 0x322   : > { %3443 = vmatmul.mubr.msk.bf16.vlgmr.msra.gmra.mrb[32].mxu0 %vm1315_vm2, %v5471_v9  ;;  %v3377_v41 = vpop.f32.mrb[10].mxu0  ;;  %v5481_v34 = vpop.f32.mrb[10].mxu1 }
 0x323   : > { %3466 = vmatprep.mubr.msk.bf16.mxu0 %vm3971_vm3, %v5860_v47  ;;  %v2055_v31 = vpack.c.bf16 %v3377_v41, %v3376_v20  ;;  %v2248_v21 = vpack.c.bf16 %v5481_v34, %v5473_v45  ;;  %v1958_v2 = vpop.f32.mrb[11].mxu0  ;;  %v5485_v22 = vpop.f32.mrb[11].mxu1 }
 0x324   : > { %v2054_v8 = vpack.c.bf16 %v1958_v2, %v1955_v23  ;;  %v2247_v52 = vpack.c.bf16 %v5485_v22, %v5477_v43 }
 0x325   : > { %v2424_v5 = vsel %vm1315_vm2, %v2055_v31, 0 }
 0x326   : > { %v2421_v4 = vsel %vm1315_vm2, %v2054_v8, 0 }
 0x327   : > { %3459 = vmatpush3.bf16.xpose.msra.mxu0 %v2421_v4 }
 0x328   : > { %3460 = vmatprep.subr.bf16.mxu0 %v5860_v47 }
 0x32f   : > { %3461 = vmatpush3.bf16.xpose.msra.mxu0 %v2424_v5 }
 0x330   : > { %3462 = vmatprep.subr.bf16.mxu0 %v5860_v47 }
 0x336   : > { %v3380_v38 = vpop.f32.mrb[12].mxu0  ;;  %v5493_v13 = vpop.f32.mrb[12].mxu1 }
 0x337   : > { %v1971_v44 = vpop.f32.mrb[13].mxu0  ;;  %v5495_v55 = vpop.f32.mrb[13].mxu1 }
 0x338   : > { %v3381_v61 = vpop.f32.mrb[14].mxu0  ;;  %v5497_v24 = vpop.f32.mrb[14].mxu1 }
 0x339   : > { %v2057_v1 = vpack.c.bf16 %v3381_v61, %v3380_v38  ;;  %v1974_v46 = vpop.f32.mrb[15].mxu0  ;;  %v2250_v28 = vpack.c.bf16 %v5497_v24, %v5493_v13  ;;  %v5501_v0 = vpop.f32.mrb[15].mxu1 }
 0x33a   : > { %v2056_v14 = vpack.c.bf16 %v1974_v46, %v1971_v44  ;;  %v2249_v39 = vpack.c.bf16 %v5501_v0, %v5495_v55 }
 0x33b   : > { %v2430_v51 = vsel %vm1315_vm2, %v2057_v1, 0 }
 0x33c   : > { %v2427_v30 = vsel %vm1315_vm2, %v2056_v14, 0 }
 0x33d   : > { %3463 = vmatpush3.bf16.xpose.msra.mxu0 %v2427_v30 }
 0x33e   : > { %3464 = vmatprep.subr.bf16.mxu0 %v5860_v47 }
 0x345   : > { %3465 = vmatpush3.bf16.xpose.msra.mxu0 %v2430_v51 }
 0x346   : > { %3494 = vmatprep.subr.bf16.mxu0 %v5860_v47 }
 0x34c   : > { %3467 = vmatmul.mubr.msk.bf16.vlgmr.msra.gmra.mrb[36].mxu0 %vm1315_vm2, %v5471_v9 }
 0x34d   : > { %3502 = vmatprep.mubr.msk.bf16.mxu0 %vm3971_vm3, %v5860_v47 }
 0x3d4   : > { %v5513_v35 = vpop.f32.mrb[16].mxu0  ;;  %v3420_v53 = vpop.f32.mrb[16].mxu1 }
 0x3d5   : > { %v5515_v12 = vpop.f32.mrb[17].mxu0  ;;  %v2180_v54 = vpop.f32.mrb[17].mxu1 }
 0x3d6   : > { %v5517_v56 = vpop.f32.mrb[18].mxu0  ;;  %v3421_v57 = vpop.f32.mrb[18].mxu1 }
 0x3d7   : > { %v2059_v42 = vpack.c.bf16 %v5517_v56, %v5513_v35  ;;  %v2252_v27 = vpack.c.bf16 %v3421_v57, %v3420_v53  ;;  %v5521_v48 = vpop.f32.mrb[19].mxu0  ;;  %v2183_v50 = vpop.f32.mrb[19].mxu1 }
 0x3d8   : > { %v2058_v59 = vpack.c.bf16 %v5521_v48, %v5515_v12  ;;  %v2251_v3 = vpack.c.bf16 %v2183_v50, %v2180_v54  ;;  %v5667_v12 = vld [vmem:[%s5781_s6 + $0x8] sm:$0xf] }
 0x3d9   : > { %v2570_v13 = vsel %vm1315_vm2, %v2059_v42, 0 }
 0x3da   : > { %3495 = vmatpush3.bf16.msra.mxu0 %v2251_v3  ;;  %v2567_v55 = vsel %vm1315_vm2, %v2058_v59, 0 }
 0x3db   : > { %3496 = vmatprep.subr.bf16.mxu0 %v5860_v47 }
 0x3dc   : > { %v5526_v16 = vpop.f32.mrb[20].mxu0  ;;  %v3424_v7 = vpop.f32.mrb[20].mxu1 }
 0x3dd   : > { %v5528_v62 = vpop.f32.mrb[21].mxu0  ;;  %v2196_v40 = vpop.f32.mrb[21].mxu1 }
 0x3de   : > { %v5530_v32 = vpop.f32.mrb[22].mxu0  ;;  %v3425_v11 = vpop.f32.mrb[22].mxu1  ;;  %3497 = vmatpush3.bf16.msra.mxu0 %v2252_v27 }
 0x3df   : > { %v2061_v63 = vpack.c.bf16 %v5530_v32, %v5526_v16  ;;  %v2254_v25 = vpack.c.bf16 %v3425_v11, %v3424_v7  ;;  %v5534_v29 = vpop.f32.mrb[23].mxu0  ;;  %v2199_v17 = vpop.f32.mrb[23].mxu1  ;;  %3498 = vmatprep.subr.bf16.mxu0 %v5860_v47 }
 0x3e0   : > { %v2060_v37 = vpack.c.bf16 %v5534_v29, %v5528_v62  ;;  %v2253_v15 = vpack.c.bf16 %v2199_v17, %v2196_v40 }
 0x3e2   : > { %3499 = vmatpush3.bf16.msra.mxu0 %v2253_v15  ;;  %v2573_v24 = vsel %vm1315_vm2, %v2060_v37, 0 }
 0x3e3   : > { %3500 = vmatprep.subr.bf16.mxu0 %v5860_v47 }
 0x3e5   : > { %v5540_v58 = vpop.f32.mrb[24].mxu0  ;;  %v5542_v26 = vpop.f32.mrb[24].mxu1 }
 0x3e6   : > { %v5544_v60 = vpop.f32.mrb[25].mxu0  ;;  %v5546_v36 = vpop.f32.mrb[25].mxu1  ;;  %3501 = vmatpush3.bf16.msra.mxu0 %v2254_v25 }
 0x3e7   : > { %v5548_v49 = vpop.f32.mrb[26].mxu0  ;;  %v5550_v18 = vpop.f32.mrb[26].mxu1  ;;  %3506 = vmatprep.subr.bf16.mxu0 %v5860_v47 }
 0x3e8   : > { %v2256_v19 = vpack.c.bf16 %v5550_v18, %v5542_v26  ;;  %v5556_v33 = vpop.f32.mrb[27].mxu0  ;;  %v5558_v6 = vpop.f32.mrb[27].mxu1 }
 0x3e9   : > { %v2255_v23 = vpack.c.bf16 %v5558_v6, %v5546_v36 }
 0x3ed   : > { %v5565_v41 = vpop.f32.mrb[28].mxu0  ;;  %v5567_v31 = vpop.f32.mrb[28].mxu1 }
 0x3ee   : > { %v5569_v2 = vpop.f32.mrb[29].mxu0  ;;  %v5571_v8 = vpop.f32.mrb[29].mxu1 }
 0x3ef   : > { %v5573_v4 = vpop.f32.mrb[30].mxu0  ;;  %v5575_v5 = vpop.f32.mrb[30].mxu1 }
 0x3f0   : > { %v5581_v61 = vpop.f32.mrb[31].mxu0  ;;  %v5583_v1 = vpop.f32.mrb[31].mxu1  ;;  %v5877_v0 = vpack.c.bf16 %v5575_v5, %v5567_v31 }
 0x3f1   : > { %v2257_v14 = vpack.c.bf16 %v5583_v1, %v5571_v8 }
 0x3f5   : > { %v2317_v30 = vpop.f32.mrb[32].mxu0 }
 0x3f6   : > { %v3444_v51 = vpop.f32.mrb[33].mxu0  ;;  %v2325_v53 = vsel %vm2324_vm4, %v2317_v30, -inf }
 0x3f7   : > { %2326 = vmax.xlane.f32.xlu0 %v2325_v53  ;;  %v2320_v54 = vpop.f32.mrb[34].mxu0 }
 0x3f8   : > { %v2329_v57 = vsel %vm2328_vm5, %v2320_v54, -inf  ;;  %v3445_v27 = vpop.f32.mrb[35].mxu0 }
 0x3f9   : > { %2330 = vmax.xlane.f32.xlu1 %v2329_v57 }
 0x41f   : > { %v2466_v50 = vpop.f32.mrb[36].mxu0 }
 0x420   : > { %v3468_v3 = vpop.f32.mrb[37].mxu0  ;;  %v2473_v7 = vsel %vm2324_vm4, %v2466_v50, -inf }
 0x421   : > { %2474 = vmax.xlane.f32.xlu0 %v2473_v7  ;;  %v2469_v40 = vpop.f32.mrb[38].mxu0 }
 0x422   : > { %v2476_v11 = vsel %vm2328_vm5, %v2469_v40, -inf  ;;  %v3469_v25 = vpop.f32.mrb[39].mxu0 }
 0x423   : > { %2477 = vmax.xlane.f32.xlu1 %v2476_v11 }
 0x484   : > { %v2327_v17 = vpop.xlane.xlu0 %2326 }
 0x485   : > { %v2332_v15 = vsub.f32 %v2317_v30, %v2327_v17 }
 0x486   : > { %v2331_v51 = vpop.xlane.xlu1 %2330 }
 0x487   : > { %v2334_v38 = vmul.f32 1.442695, %v2332_v15  ;;  %v2333_v53 = vsub.f32 %v2320_v54, %v2331_v51 }
 0x489   : > { %3705 = vpow2.f32 %v2334_v38  ;;  %v2336_v46 = vmul.f32 1.442695, %v2333_v53 }
 0x48b   : > { %3707 = vpow2.f32 %v2336_v46 }
 0x493   : > { %v3706_v27 = vpop.eup %3705 }
 0x494   : > { %v2338_v57 = vsel %vm2324_vm4, %v3706_v27, 0.0 }
 0x495   : > { %v3708_v3 = vpop.eup %3707  ;;  %2339 = vadd.xlane.f32.xlu0 %v2338_v57 }
 0x496   : > { %v2341_v7 = vsel %vm2328_vm5, %v3708_v3, 0.0 }
 0x497   : > { %2342 = vadd.xlane.f32.xlu1 %v2341_v7 }
 0x4ae   : > { %v2475_v10 = vpop.xlane.xlu0 %2474 }
 0x4af   : > { %v2479_v20 = vsub.f32 %v2466_v50, %v2475_v10 }
 0x4b0   : > { %v2478_v25 = vpop.xlane.xlu1 %2477 }
 0x4b1   : > { %v2481_v11 = vmul.f32 1.442695, %v2479_v20  ;;  %v2480_v44 = vsub.f32 %v2469_v40, %v2478_v25 }
 0x4b3   : > { %3709 = vpow2.f32 %v2481_v11  ;;  %v2483_v30 = vmul.f32 1.442695, %v2480_v44 }
 0x4b5   : > { %3711 = vpow2.f32 %v2483_v30 }
 0x4bd   : > { %v3710_v54 = vpop.eup %3709 }
 0x4be   : > { %v2485_v38 = vsel %vm2324_vm4, %v3710_v54, 0.0 }
 0x4bf   : > { %v3712_v46 = vpop.eup %3711  ;;  %2486 = vadd.xlane.f32.xlu0 %v2485_v38 }
 0x4c0   : > { %v2488_v17 = vsel %vm2328_vm5, %v3712_v46, 0.0 }
 0x4c1   : > { %2489 = vadd.xlane.f32.xlu1 %v2488_v17 }
 0x522   : > { %v2340_v15 = vpop.xlane.xlu0 %2339 }
 0x523   : > { %3713 = vrcp.f32 %v2340_v15 }
 0x524   : > { %v2343_v51 = vpop.xlane.xlu1 %2342 }
 0x525   : > { %3715 = vrcp.f32 %v2343_v51 }
 0x52d   : > { %v3714_v53 = vpop.eup %3713 }
 0x52e   : > { %v2345_v50 = vmul.f32 %v3714_v53, %v3706_v27 }
 0x52f   : > { %v3716_v10 = vpop.eup %3715 }
 0x530   : > { %v2347_v20 = vmul.f32 %v3716_v10, %v3708_v3 }
 0x532   : > { %v2348_v40 = vpack.c.bf16 %v2347_v20, %v2345_v50 }
 0x534   : > { %3455 = vmatmul.mubr.msk.bf16.vlgmr.msra.gmra.mrb[32].mxu1 %vm2324_vm4, %v2348_v40 }
 0x535   : > { %3471 = vmatpush3.bf16.msra.mxu1 %v2247_v52  ;;  %3478 = vmatprep.mubr.msk.bf16.mxu1 %vm3971_vm3, %v5860_v47 }
 0x536   : > { %3472 = vmatprep.subr.bf16.mxu1 %v5860_v47 }
 0x539   : > { %3473 = vmatpush3.bf16.msra.mxu1 %v2248_v21 }
 0x53a   : > { %3474 = vmatprep.subr.bf16.mxu1 %v5860_v47 }
 0x53d   : > { %3475 = vmatpush3.bf16.msra.mxu1 %v2249_v39  ;;  %v5662_v39 = vld [vmem:[%s5781_s6] sm:$0xff] }
 0x53e   : > { %3476 = vmatprep.subr.bf16.mxu1 %v5860_v47 }
 0x541   : > { %3477 = vmatpush3.bf16.msra.mxu1 %v2250_v28  ;;  %v2576_v28 = vsel %vm1315_vm2, %v2061_v63, 0 }
 0x542   : > { %3482 = vmatprep.subr.bf16.mxu1 %v5860_v47 }
 0x54c   : > { %v2487_v43 = vpop.xlane.xlu0 %2486 }
 0x54d   : > { %3717 = vrcp.f32 %v2487_v43 }
 0x54e   : > { %v2490_v22 = vpop.xlane.xlu1 %2489 }
 0x54f   : > { %3719 = vrcp.f32 %v2490_v22 }
 0x557   : > { %v3718_v45 = vpop.eup %3717 }
 0x558   : > { %v2492_v21 = vmul.f32 %v3718_v45, %v3710_v54 }
 0x559   : > { %v3720_v34 = vpop.eup %3719 }
 0x55a   : > { %v2494_v52 = vmul.f32 %v3720_v34, %v3712_v46 }
 0x55c   : > { %v2495_v44 = vpack.c.bf16 %v2494_v52, %v2492_v21 }
 0x55e   : > { %3479 = vmatmul.mubr.msk.bf16.vlgmr.msra.gmra.mrb[36].mxu1 %vm2324_vm4, %v2495_v44 }
 0x55f   : > { %3483 = vmatpush3.bf16.xpose.msra.mxu1 %v2567_v55  ;;  %3490 = vmatprep.mubr.msk.bf16.mxu1 %vm3971_vm3, %v5860_v47 }
 0x560   : > { %3484 = vmatprep.subr.bf16.mxu1 %v5860_v47 }
 0x567   : > { %3485 = vmatpush3.bf16.xpose.msra.mxu1 %v2570_v13 }
 0x568   : > { %3486 = vmatprep.subr.bf16.mxu1 %v5860_v47 }
 0x56f   : > { %3487 = vmatpush3.bf16.xpose.msra.mxu1 %v2573_v24 }
 0x570   : > { %3488 = vmatprep.subr.bf16.mxu1 %v5860_v47 }
 0x577   : > { %3489 = vmatpush3.bf16.xpose.msra.mxu1 %v2576_v28 }
 0x578   : > { %3518 = vmatprep.subr.bf16.mxu1 %v5860_v47 }
 0x57e   : > { %3491 = vmatmul.mubr.msk.bf16.vlgmr.msra.gmra.mrb[40].mxu1 %vm1315_vm2, %v5471_v9 }
 0x57f   : > { %3519 = vmatpush3.bf16.msra.mxu1 %v2255_v23  ;;  %3526 = vmatprep.mubr.msk.bf16.mxu1 %vm3971_vm3, %v5860_v47 }
 0x580   : > { %3520 = vmatprep.subr.bf16.mxu1 %v5860_v47 }
 0x583   : > { %3521 = vmatpush3.bf16.msra.mxu1 %v2256_v19 }
 0x584   : > { %3522 = vmatprep.subr.bf16.mxu1 %v5860_v47 }
 0x587   : > { %3523 = vmatpush3.bf16.msra.mxu1 %v2257_v14 }
 0x588   : > { %3524 = vmatprep.subr.bf16.mxu1 %v5860_v47 }
 0x58b   : > { %3525 = vmatpush3.bf16.msra.mxu1 %v5877_v0 }
 0x58c   : > { %3530 = vmatprep.subr.bf16.mxu1 %v5860_v47 }
 0x607   : > { %v2386_v35 = vpop.f32.mrb[32].mxu1 }
 0x608   : > { %v2393_v56 = vmul.f32 %v2386_v35, %v5662_v39  ;;  %v3456_v42 = vpop.f32.mrb[33].mxu1 }
 0x609   : > { %v2389_v48 = vpop.f32.mrb[34].mxu1 }
 0x60a   : > { %v2396_v59 = vsel %vm2395_vm6, %v2393_v56, 0.0  ;;  %v2404_v16 = vrot.slane %v2393_v56, 4  ;;  %v2394_v62 = vmul.f32 %v2389_v48, %v5667_v12  ;;  %v3457_v32 = vpop.f32.mrb[35].mxu1 }
 0x60b   : > { %v2397_v63 = vrot.slane %v2396_v59, 4 }
 0x60c   : > { %v2406_v29 = vsel %vm2395_vm6, %v2404_v16, 0.0  ;;  %v2413_v37 = vsel %vm2395_vm6, %v2394_v62, 0.0 }
 0x60d   : > { %v2398_v26 = vadd.f32 %v2397_v63, %v2396_v59  ;;  %v2407_v36 = vrot.slane %v2406_v29, 4  ;;  %v2414_v18 = vrot.slane %v2413_v37, 4 }
 0x60f   : > { %v2399_v19 = vrot.slane %v2398_v26, 2  ;;  %v2408_v6 = vadd.f32 %v2407_v36, %v2406_v29  ;;  %v2415_v23 = vadd.f32 %v2414_v18, %v2413_v37 }
 0x611   : > { %v2400_v31 = vadd.f32 %v2399_v19, %v2398_v26  ;;  %v2409_v8 = vrot.slane %v2408_v6, 2  ;;  %v2416_v5 = vrot.slane %v2415_v23, 2 }
 0x613   : > { %v2401_v1 = vrot.slane %v2400_v31, 1  ;;  %v2410_v14 = vadd.f32 %v2409_v8, %v2408_v6  ;;  %v2417_v27 = vadd.f32 %v2416_v5, %v2415_v23 }
 0x615   : > { %v2411_v57 = vrot.slane %v2410_v14, 1  ;;  %v2418_v3 = vrot.slane %v2417_v27, 1  ;;  %v2402_v7 = vadd.f32 %v2401_v1, %v2400_v31 }
 0x617   : > { %v2412_v25 = vadd.f32 %v2411_v57, %v2410_v14  ;;  %v2419_v11 = vadd.f32 %v2418_v3, %v2417_v27 }
 0x619   : > { %v2859_v30 = vsel %vm2858_vm7, %v2402_v7, %v2412_v25 }
 0x61a   : > { %v2861_v54 = vsel %vm2860_vm8, %v2859_v30, %v2419_v11 }
 0x631   : > { %v2533_v38 = vpop.f32.mrb[36].mxu1 }
 0x632   : > { %v2540_v46 = vmul.f32 %v2533_v38, %v5662_v39  ;;  %v3480_v17 = vpop.f32.mrb[37].mxu1 }
 0x633   : > { %v2536_v15 = vpop.f32.mrb[38].mxu1  ;;  %v5878_v17 = vpack.c.bf16 %v5556_v33, %v5544_v60  ;;  %v5880_v60 = vpack.c.bf16 %v5581_v61, %v5569_v2 }
 0x634   : > { %v2542_v51 = vsel %vm2395_vm6, %v2540_v46, 0.0  ;;  %v2550_v53 = vrot.slane %v2540_v46, 4  ;;  %v2541_v10 = vmul.f32 %v2536_v15, %v5667_v12  ;;  %v3481_v50 = vpop.f32.mrb[39].mxu1 }
 0x635   : > { %v2543_v20 = vrot.slane %v2542_v51, 4  ;;  %v2713_v15 = vsel %vm1315_vm2, %v5878_v17, 0  ;;  %v2719_v33 = vsel %vm1315_vm2, %v5880_v60, 0 }
 0x636   : > { %v2552_v40 = vsel %vm2395_vm6, %v2550_v53, 0.0  ;;  %v2559_v43 = vsel %vm2395_vm6, %v2541_v10, 0.0  ;;  %v5881_v10 = vpack.c.bf16 %v5573_v4, %v5565_v41 }
 0x637   : > { %v2544_v22 = vadd.f32 %v2543_v20, %v2542_v51  ;;  %v2553_v45 = vrot.slane %v2552_v40, 4  ;;  %v2560_v34 = vrot.slane %v2559_v43, 4  ;;  %v5879_v51 = vpack.c.bf16 %v5548_v49, %v5540_v58 }
 0x638   : > { %v2722_v50 = vsel %vm1315_vm2, %v5881_v10, 0 }
 0x639   : > { %v2545_v21 = vrot.slane %v2544_v22, 2  ;;  %v2554_v52 = vadd.f32 %v2553_v45, %v2552_v40  ;;  %v2561_v44 = vadd.f32 %v2560_v34, %v2559_v43  ;;  %v2716_v53 = vsel %vm1315_vm2, %v5879_v51, 0 }
 0x63b   : > { %v2546_v55 = vadd.f32 %v2545_v21, %v2544_v22  ;;  %v2555_v13 = vrot.slane %v2554_v52, 2  ;;  %v2562_v24 = vrot.slane %v2561_v44, 2 }
 0x63d   : > { %v2547_v28 = vrot.slane %v2546_v55, 1  ;;  %v2556_v0 = vadd.f32 %v2555_v13, %v2554_v52  ;;  %v2563_v35 = vadd.f32 %v2562_v24, %v2561_v44 }
 0x63f   : > { %v2548_v56 = vadd.f32 %v2547_v28, %v2546_v55  ;;  %v2557_v42 = vrot.slane %v2556_v0, 1  ;;  %v2564_v48 = vrot.slane %v2563_v35, 1 }
 0x641   : > { %v2558_v59 = vadd.f32 %v2557_v42, %v2556_v0  ;;  %v2863_v16 = vsel %vm2862_vm9, %v2861_v54, %v2548_v56  ;;  %v2565_v62 = vadd.f32 %v2564_v48, %v2563_v35 }
 0x643   : > { %v2865_v32 = vsel %vm2864_vm10, %v2863_v16, %v2558_v59 }
 0x644   : > { %v5682_v63 = vsel %vm2866_vm11, %v2865_v32, %v2565_v62 }
 0x651   : > { %v2612_v29 = vpop.f32.mrb[40].mxu1 }
 0x652   : > { %v3492_v37 = vpop.f32.mrb[41].mxu1  ;;  %v2619_v26 = vsel %vm2324_vm4, %v2612_v29, -inf }
 0x653   : > { %2620 = vmax.xlane.f32.xlu0 %v2619_v26  ;;  %v2615_v36 = vpop.f32.mrb[42].mxu1 }
 0x654   : > { %v2622_v18 = vsel %vm2328_vm5, %v2615_v36, -inf  ;;  %v3493_v19 = vpop.f32.mrb[43].mxu1 }
 0x655   : > { %2623 = vmax.xlane.f32.xlu1 %v2622_v18 }
 0x6e0   : > { %v2621_v6 = vpop.xlane.xlu0 %2620 }
 0x6e1   : > { %v2625_v23 = vsub.f32 %v2612_v29, %v2621_v6 }
 0x6e2   : > { %v2624_v31 = vpop.xlane.xlu1 %2623 }
 0x6e3   : > { %v2627_v8 = vmul.f32 1.442695, %v2625_v23  ;;  %v2626_v5 = vsub.f32 %v2615_v36, %v2624_v31 }
 0x6e5   : > { %3721 = vpow2.f32 %v2627_v8  ;;  %v2629_v1 = vmul.f32 1.442695, %v2626_v5 }
 0x6e7   : > { %3723 = vpow2.f32 %v2629_v1 }
 0x6ef   : > { %v3722_v14 = vpop.eup %3721 }
 0x6f0   : > { %v2631_v27 = vsel %vm2324_vm4, %v3722_v14, 0.0 }
 0x6f1   : > { %v3724_v57 = vpop.eup %3723  ;;  %2632 = vadd.xlane.f32.xlu0 %v2631_v27 }
 0x6f2   : > { %v2634_v3 = vsel %vm2328_vm5, %v3724_v57, 0.0 }
 0x6f3   : > { %2635 = vadd.xlane.f32.xlu1 %v2634_v3  ;;  %v3639_v3 = vld [vmem:[%s5882_s24] sm:$0xff]  }
 0x77e   : > { %v2633_v7 = vpop.xlane.xlu0 %2632 }
 0x77f   : > { %3725 = vrcp.f32 %v2633_v7  ;;  %v3640_v7 = vld [vmem:[%s5882_s24 + $0x8] sm:$0xff]  }
 0x780   : > { %v2636_v25 = vpop.xlane.xlu1 %2635 }
 0x781   : > { %3727 = vrcp.f32 %v2636_v25 }
 0x789   : > { %v3726_v11 = vpop.eup %3725 }
 0x78a   : > { %v2638_v54 = vmul.f32 %v3726_v11, %v3722_v14 }
 0x78b   : > { %v3728_v30 = vpop.eup %3727 }
 0x78c   : > { %v2640_v38 = vmul.f32 %v3728_v30, %v3724_v57 }
 0x78e   : > { %v2641_v46 = vpack.c.bf16 %v2640_v38, %v2638_v54 }
 0x790   : > { %3503 = vmatmul.mubr.msk.bf16.vlgmr.msra.gmra.mrb[40].mxu0 %vm2324_vm4, %v2641_v46 }
 0x791   : > { %3507 = vmatpush3.bf16.xpose.msra.mxu0 %v2713_v15  ;;  %3514 = vmatprep.mubr.msk.bf16.mxu0 %vm3971_vm3, %v5860_v47 }
 0x792   : > { %3508 = vmatprep.subr.bf16.mxu0 %v5860_v47 }
 0x799   : > { %3509 = vmatpush3.bf16.xpose.msra.mxu0 %v2716_v53 }
 0x79a   : > { %3510 = vmatprep.subr.bf16.mxu0 %v5860_v47 }
 0x7a1   : > { %3511 = vmatpush3.bf16.xpose.msra.mxu0 %v2719_v33 }
 0x7a2   : > { %3512 = vmatprep.subr.bf16.mxu0 %v5860_v47 }
 0x7a9   : > { %3513 = vmatpush3.bf16.xpose.msra.mxu0 %v2722_v50 }
 0x7b0   : > { %3515 = vmatmul.mubr.msk.bf16.vlgmr.msra.gmra.mrb[44].mxu0 %vm1315_vm2, %v5471_v9 }
 0x863   : > { %v2679_v58 = vpop.f32.mrb[40].mxu0 }
 0x864   : > { %v2686_v49 = vmul.f32 %v2679_v58, %v5662_v39  ;;  %v3504_v20 = vpop.f32.mrb[41].mxu0 }
 0x865   : > { %v2682_v40 = vpop.f32.mrb[42].mxu0 }
 0x866   : > { %v2688_v2 = vsel %vm2395_vm6, %v2686_v49, 0.0  ;;  %v2696_v61 = vrot.slane %v2686_v49, 4  ;;  %v3505_v43 = vpop.f32.mrb[43].mxu0  ;;  %v2687_v25 = vmul.f32 %v2682_v40, %v5667_v12 }
 0x867   : > { %v2689_v22 = vrot.slane %v2688_v2, 4 }
 0x868   : > { %v2698_v45 = vsel %vm2395_vm6, %v2696_v61, 0.0  ;;  %v2705_v11 = vsel %vm2395_vm6, %v2687_v25, 0.0 }
 0x869   : > { %v2690_v34 = vadd.f32 %v2689_v22, %v2688_v2  ;;  %v2699_v41 = vrot.slane %v2698_v45, 4  ;;  %v2706_v30 = vrot.slane %v2705_v11, 4 }
 0x86b   : > { %v2691_v4 = vrot.slane %v2690_v34, 2  ;;  %v2700_v21 = vadd.f32 %v2699_v41, %v2698_v45  ;;  %v2707_v54 = vadd.f32 %v2706_v30, %v2705_v11  ;;  %v3194_v30 = vld [vmem:[%s5885_s11] ss:$0 sm:$0xff] }
 0x86d   : > { %v2692_v52 = vadd.f32 %v2691_v4, %v2690_v34  ;;  %v2701_v44 = vrot.slane %v2700_v21, 2  ;;  %v2708_v15 = vrot.slane %v2707_v54, 2 }
 0x86f   : > { %v2693_v55 = vrot.slane %v2692_v52, 1  ;;  %v2702_v9 = vadd.f32 %v2701_v44, %v2700_v21  ;;  %v2709_v49 = vadd.f32 %v2708_v15, %v2707_v54 }
 0x871   : > { %v2694_v13 = vadd.f32 %v2693_v55, %v2692_v52  ;;  %v2703_v24 = vrot.slane %v2702_v9, 1  ;;  %v2710_v22 = vrot.slane %v2709_v49, 1 }
 0x873   : > { %v2704_v28 = vadd.f32 %v2703_v24, %v2702_v9  ;;  %v2869_v0 = vsel %vm2868_vm12, %v5682_v63, %v2694_v13  ;;  %v2711_v52 = vadd.f32 %v2710_v22, %v2709_v49 }
 0x875   : > { %v5716_v35 = vsel %vm2870_vm13, %v2869_v0, %v2704_v28 }
 0x883   : > { %v2758_v56 = vpop.f32.mrb[44].mxu0 }
 0x884   : > { %v3516_v42 = vpop.f32.mrb[45].mxu0  ;;  %v2765_v48 = vsel %vm2324_vm4, %v2758_v56, -inf }
 0x885   : > { %2766 = vmax.xlane.f32.xlu0 %v2765_v48  ;;  %v2761_v59 = vpop.f32.mrb[46].mxu0  ;;  %v3190_v48 = vld [vmem:[%s5883_s15] ss:$0 sm:$0xff] }
 0x886   : > { %v2768_v16 = vsel %vm2328_vm5, %v2761_v59, -inf  ;;  %v3517_v62 = vpop.f32.mrb[47].mxu0 }
 0x887   : > { %2769 = vmax.xlane.f32.xlu1 %v2768_v16 }
 0x912   : > { %v2767_v32 = vpop.xlane.xlu0 %2766 }
 0x913   : > { %v2771_v29 = vsub.f32 %v2758_v56, %v2767_v32 }
 0x914   : > { %v2770_v37 = vpop.xlane.xlu1 %2769 }
 0x915   : > { %v2773_v26 = vmul.f32 1.442695, %v2771_v29  ;;  %v2772_v36 = vsub.f32 %v2761_v59, %v2770_v37 }
 0x917   : > { %3729 = vpow2.f32 %v2773_v26  ;;  %v2775_v18 = vmul.f32 1.442695, %v2772_v36 }
 0x919   : > { %3731 = vpow2.f32 %v2775_v18 }
 0x921   : > { %v3730_v63 = vpop.eup %3729 }
 0x922   : > { %v2777_v19 = vsel %vm2324_vm4, %v3730_v63, 0.0 }
 0x923   : > { %v3732_v6 = vpop.eup %3731  ;;  %2778 = vadd.xlane.f32.xlu0 %v2777_v19 }
 0x924   : > { %v2780_v23 = vsel %vm2328_vm5, %v3732_v6, 0.0 }
 0x925   : > { %2781 = vadd.xlane.f32.xlu1 %v2780_v23 }
 0x9b0   : > { %v2779_v31 = vpop.xlane.xlu0 %2778 }
 0x9b1   : > { %3733 = vrcp.f32 %v2779_v31 }
 0x9b2   : > { %v2782_v8 = vpop.xlane.xlu1 %2781 }
 0x9b3   : > { %3735 = vrcp.f32 %v2782_v8 }
 0x9bb   : > { %v3734_v5 = vpop.eup %3733 }
 0x9bc   : > { %v2784_v14 = vmul.f32 %v3734_v5, %v3730_v63 }
 0x9bd   : > { %v3736_v1 = vpop.eup %3735 }
 0x9be   : > { %v2786_v27 = vmul.f32 %v3736_v1, %v3732_v6 }
 0x9c0   : > { %v2787_v57 = vpack.c.bf16 %v2786_v27, %v2784_v14 }
 0x9c2   : > { %3527 = vmatmul.mubr.msk.bf16.vlgmr.msra.gmra.mrb[44].mxu1 %vm2324_vm4, %v2787_v57 }
 0x9c3   : > { %3534 = vmatprep.mubr.msk.bf16.mxu1 %vm3971_vm3, %v5860_v47  ;;  %3531 = vmatpush3.bf16.msra.mxu1 %v3639_v3 }
 0x9c4   : > { %3532 = vmatprep.subr.bf16.mxu1 %v5860_v47 }
 0x9c7   : > { %3533 = vmatpush3.bf16.msra.mxu1 %v3640_v7 }
 0xa95   : > { %v2825_v38 = vpop.f32.mrb[44].mxu1 }
 0xa96   : > { %v2832_v46 = vmul.f32 %v2825_v38, %v5662_v39  ;;  %v3528_v17 = vpop.f32.mrb[45].mxu1 }
 0xa97   : > { %v2828_v51 = vpop.f32.mrb[46].mxu1 }
 0xa98   : > { %v2834_v53 = vsel %vm2395_vm6, %v2832_v46, 0.0  ;;  %v2842_v60 = vrot.slane %v2832_v46, 4  ;;  %v2833_v33 = vmul.f32 %v2828_v51, %v5667_v12  ;;  %v3529_v10 = vpop.f32.mrb[47].mxu1  ;;  %v3195_v46 = vld [vmem:[%s5886_s10] ss:$0 sm:$0xff] }
 0xa99   : > { %v2835_v47 = vrot.slane %v2834_v53, 4 }
 0xa9a   : > { %v2844_v50 = vsel %vm2395_vm6, %v2842_v60, 0.0  ;;  %v2851_v58 = vsel %vm2395_vm6, %v2833_v33, 0.0 }
 0xa9b   : > { %v2836_v20 = vadd.f32 %v2835_v47, %v2834_v53  ;;  %v2845_v40 = vrot.slane %v2844_v50, 4  ;;  %v2852_v2 = vrot.slane %v2851_v58, 4 }
 0xa9d   : > { %v2837_v61 = vrot.slane %v2836_v20, 2  ;;  %v2846_v39 = vadd.f32 %v2845_v40, %v2844_v50  ;;  %v2853_v43 = vadd.f32 %v2852_v2, %v2851_v58 }
 0xa9f   : > { %v2838_v45 = vadd.f32 %v2837_v61, %v2836_v20  ;;  %v2847_v34 = vrot.slane %v2846_v39, 2  ;;  %v2854_v41 = vrot.slane %v2853_v43, 2 }
 0xaa1   : > { %v2839_v4 = vrot.slane %v2838_v45, 1  ;;  %v2848_v21 = vadd.f32 %v2847_v34, %v2846_v39  ;;  %v2855_v12 = vadd.f32 %v2854_v41, %v2853_v43 }
 0xaa3   : > { %v2840_v44 = vadd.f32 %v2839_v4, %v2838_v45  ;;  %v2849_v55 = vrot.slane %v2848_v21, 1  ;;  %v2856_v9 = vrot.slane %v2855_v12, 1 }
 0xaa5   : > { %v2850_v13 = vadd.f32 %v2849_v55, %v2848_v21  ;;  %v2872_v24 = vsel %vm2858_vm7, %v2711_v52, %v2840_v44  ;;  %v2857_v28 = vadd.f32 %v2856_v9, %v2855_v12 }
 0xaa7   : > { %v2873_v0 = vsel %vm2860_vm8, %v2872_v24, %v2850_v13 }
 0xaa8   : > { %v2874_v56 = vsel %vm2862_vm9, %v2873_v0, %v2857_v28 }
 0xaa9   : > { %v2875_v42 = vpack.c.bf16 %v2874_v56, %v5716_v35 }
 0xaab   : > { %3535 = vmatmul.mubr.msk.bf16.vlgmr.msra.gmra.mrb[48].mxu1 %vm1315_vm2, %v2875_v42 }
 0xb7e   : > { %v2936_v59 = vpop.f32.mrb[48].mxu1 }
 0xb7f   : > { %v2937_v16 = vadd.f32 %v3190_v48, %v2936_v59  ;;  %v3536_v62 = vpop.f32.mrb[49].mxu1 }
 0xb80   : > { %v2939_v32 = vpop.f32.mrb[50].mxu1 }
 0xb81   : > { %v2940_v29 = vadd.f32 %v3190_v48, %v2939_v32  ;;  %v3537_v37 = vpop.f32.mrb[51].mxu1  ;;  %v2945_v26 = vsel %vm1315_vm2, %v2937_v16, 0.0 }
 0xb82   : > { %2946 = vadd.xlane.f32.xlu0 %v2945_v26 }
 0xb83   : > { %v2948_v36 = vsel %vm2395_vm6, %v2940_v29, 0.0 }
 0xb84   : > { %2949 = vadd.xlane.f32.xlu1 %v2948_v36 }
 0xc0f   : > { %v2947_v18 = vpop.xlane.xlu0 %2946 }
 0xc10   : > { %v2951_v35 = vmul.f32 0.03125, %v2947_v18 }
 0xc11   : > { %v2950_v63 = vpop.xlane.xlu1 %2949 }
 0xc12   : > { %v2953_v19 = vsub.f32 %v2937_v16, %v2951_v35  ;;  %v2952_v6 = vmul.f32 0.03125, %v2950_v63 }
 0xc14   : > { %v2954_v23 = vsub.f32 %v2940_v29, %v2952_v6  ;;  %v2955_v31 = vmul.f32 %v2953_v19, %v2953_v19 }
 0xc16   : > { %v2957_v8 = vsel %vm1315_vm2, %v2955_v31, 0.0  ;;  %v2956_v5 = vmul.f32 %v2954_v23, %v2954_v23  ;;  %vm3000_vm2 = vcmask 257025  }
 0xc17   : > { %2958 = vadd.xlane.f32.xlu0 %v2957_v8 }
 0xc18   : > { %v2960_v1 = vsel %vm2395_vm6, %v2956_v5, 0.0 }
 0xc19   : > { %2961 = vadd.xlane.f32.xlu1 %v2960_v1 }
 0xca4   : > { %v2959_v14 = vpop.xlane.xlu0 %2958 }
 0xca5   : > { %v2963_v27 = vmul.f32 0.03125, %v2959_v14 }
 0xca6   : > { %v2962_v57 = vpop.xlane.xlu1 %2961 }
 0xca7   : > { %v2965_v3 = vadd.f32 1e-05, %v2963_v27  ;;  %v2964_v7 = vmul.f32 0.03125, %v2962_v57 }
 0xca9   : > { %3737 = vrsqrt.f32 %v2965_v3  ;;  %v2966_v25 = vadd.f32 1e-05, %v2964_v7 }
 0xcab   : > { %3739 = vrsqrt.f32 %v2966_v25 }
 0xcb3   : > { %v3738_v11 = vpop.eup %3737 }
 0xcb4   : > { %v2969_v54 = vmul.f32 %v3738_v11, %v2953_v19 }
 0xcb5   : > { %v3740_v38 = vpop.eup %3739 }
 0xcb6   : > { %v2977_v17 = vmul.f32 %v3194_v30, %v2969_v54  ;;  %v2970_v15 = vmul.f32 %v3740_v38, %v2954_v23 }
 0xcb8   : > { %v2985_v51 = vadd.f32 %v3195_v46, %v2977_v17  ;;  %v2978_v53 = vmul.f32 %v3194_v30, %v2970_v15 }
 0xcba   : > { %v2987_v60 = vadd.f32 %v2985_v51, %v2937_v16  ;;  %v2986_v33 = vadd.f32 %v3195_v46, %v2978_v53 }
 0xcbc   : > { %2990 = vst.msk [vmem:[%s533_s17] sm:$0x7] %vm2989_vm14, %v2987_v60  ;;  %v2988_v10 = vadd.f32 %v2986_v33, %v2940_v29 }
 0xcbd   : > { %3196 = vst.msk [vmem:[%s533_s17 + $0x1] sm:$0x38] %vm2992_vm15, %v2987_v60 }
 0xcbe   : > { %3197 = vst.msk [vmem:[%s533_s17 + $0x2] sm:$0xc0] %vm2995_vm0, %v2987_v60 }
 0xcbf   : > { %3198 = vst.msk [vmem:[%s533_s17 + $0xa] sm:$0x1] %vm2997_vm1, %v2988_v10 }
 0xcc0   : > { %3199 = vst.msk [vmem:[%s533_s17 + $0xb] sm:$0xe] %vm3000_vm2, %v2988_v10 }
 0xcc1 PF: > { %p26_p5 = scmp.ge.s32.totalorder %s4206_s19, 4   ;;  %s5888_s25 = smov %s3950_s26 }
 0xcc2   : > { %s5889_s26 = smov %s3954_s27  ;;  %s5890_s27 = smov %s4217_s23 }
 0xcc3   : > { %s5891_s28 = smov %s4206_s19  ;;  %28 = sbr.rel (!%p26_p5) target bundleno = 12 (0xc), region = 135 }
 0xcca   :  { %3024 = vsyncpa [#allocation3], 1 }
 0xccb   :  { %3026 = vsyncpa [#allocation3 + $0x1], 1 }
 0xccc   :  { %3027 = vsyncpa [#allocation5], 1 }
 0xccd   :  { %3028 = vsyncpa [#allocation8], 1 }
 0xcce   :  { %3029 = vsyncpa [#allocation11], 1 }

</bundles_post_ra>
